<compile_context>
chip_gen: v7x
topology: tpu7x:2x2x1
jax: 0.10.0
libtpu: 0.0.40
codegen_flags: <defaults>
</compile_context>

<pallas_src>
import functools

import jax
import jax.numpy as jnp
from jax.experimental import pallas as pl
from jax.experimental.pallas import tpu as pltpu


# ----------------------------------------------------------------------------
# Fused AMTEN kernel (one batch element per grid step)
# ----------------------------------------------------------------------------
def _amten_kernel(x_ref, ml_ref, mr_ref,
                  w1_ref, b1_ref, w21_ref, b21_ref, w22_ref, b22_ref,
                  w31_ref, b31_ref, w32_ref, b32_ref,
                  o_ref, pad_a, pad_b, *, H, W):
    # x_ref  : (3, H*W)       VMEM  one batch element, spatial flattened
    # ml/mr  : (1, H*W)       VMEM  left/right boundary-column masks
    # w*_ref : (cout, cin*9)  VMEM  packed conv weights, row layout [ci][kh][kw]
    # b*_ref : (cout, 1)      VMEM  biases
    # o_ref  : (15, H*W)      VMEM  fused xcat_2 output
    # pad_a/pad_b : (6, LP)   VMEM  zero-padded flat activation planes
    HW = H * W
    f32 = jnp.float32

    # Halos must be zero at EVERY grid step (batch axis may be sharded across
    # TensorCores, so no program_id==0 init trick).
    pad_a[...] = jnp.zeros_like(pad_a)
    pad_b[...] = jnp.zeros_like(pad_b)

    mask_l = ml_ref[...]            # kills kw == 0 taps at column 0
    mask_r = mr_ref[...]            # kills kw == 2 taps at column W-1

    interior = pl.ds(1 + W, HW)     # real-pixel span of a flat padded plane

    def conv3x3(src, c0, cin, w_ref, b_ref, cout):
        """3x3/s1/p1 conv of padded planes src[c0:c0+cin] -> (cout, HW) f32."""
        acc = jnp.zeros((cout, HW), f32)
        for ci in range(cin):
            for kh in range(3):
                for kw in range(3):
                    s = kh * W + kw                                   # static
                    tap = src[c0 + ci:c0 + ci + 1, s:s + HW]          # (1, HW)
                    if kw == 0:
                        tap = tap * mask_l
                    elif kw == 2:
                        tap = tap * mask_r
                    t = (ci * 3 + kh) * 3 + kw
                    # one FMA vectorized over all output channels (sublanes)
                    acc = acc + w_ref[:, t:t + 1] * tap               # (cout, HW)
        return acc + b_ref[...]

    # ---- conv1 + residual:  x1 = conv1(x) - x ------------------------------
    pad_a[0:3, interior] = x_ref[...]
    x1 = conv3x3(pad_a, 0, 3, w1_ref, b1_ref, 3) - x_ref[...]
    o_ref[6:9, :] = x1.astype(o_ref.dtype)          # xcat_2[:, 6:9]   = x1
    o_ref[12:15, :] = x1.astype(o_ref.dtype)        # xcat_2[:, 12:15] = x1
    pad_b[3:6, interior] = x1                       # xcat_1 channels 3..5

    # ---- conv2_1 ------------------------------------------------------------
    t2 = conv3x3(pad_b, 3, 3, w21_ref, b21_ref, 3)
    pad_a[0:3, interior] = t2                       # x no longer needed

    # ---- conv2_2 ------------------------------------------------------------
    x2 = conv3x3(pad_a, 0, 3, w22_ref, b22_ref, 3)
    o_ref[9:12, :] = x2.astype(o_ref.dtype)         # xcat_2[:, 9:12] = x2
    pad_b[0:3, interior] = x2                       # xcat_1 channels 0..2

    # ---- conv3_1 on xcat_1 = [x2, x1] ---------------------------------------
    u = conv3x3(pad_b, 0, 6, w31_ref, b31_ref, 6)
    pad_a[0:6, interior] = u

    # ---- conv3_2 ------------------------------------------------------------
    x3 = conv3x3(pad_a, 0, 6, w32_ref, b32_ref, 6)
    o_ref[0:6, :] = x3.astype(o_ref.dtype)          # xcat_2[:, 0:6] = x3


# ----------------------------------------------------------------------------
# Wrapper: one pallas_call for the whole network
# ----------------------------------------------------------------------------
def amten_forward(x, params):
    """x: (N, 3, H, W) f32 -> xcat_2: (N, 15, H, W) f32."""
    N, C, H, W = x.shape
    assert C == 3
    HW = H * W
    LP = pl.cdiv((H + 2) * W + 2, 128) * 128        # flat padded plane length

    x_flat = x.astype(jnp.float32).reshape(N, C, HW)

    # Boundary-column masks (constant, folded by XLA).
    col = jnp.arange(HW, dtype=jnp.int32) % W
    mask_l = (col != 0).astype(jnp.float32).reshape(1, HW)
    mask_r = (col != W - 1).astype(jnp.float32).reshape(1, HW)

    args = [x_flat, mask_l, mask_r]
    in_specs = [
        pl.BlockSpec((None, C, HW), lambda n: (n, 0, 0)),
        pl.BlockSpec((1, HW), lambda n: (0, 0)),
        pl.BlockSpec((1, HW), lambda n: (0, 0)),
    ]
    for name in ("c1", "c21", "c22", "c31", "c32"):
        w = params[f"{name}_w"].astype(jnp.float32)
        b = params[f"{name}_b"].astype(jnp.float32)
        cout = w.shape[0]
        w_packed = w.reshape(cout, -1)              # (cout, cin*9)
        b_col = b.reshape(cout, 1)
        args += [w_packed, b_col]
        in_specs += [
            pl.BlockSpec(w_packed.shape, lambda n: (0, 0)),
            pl.BlockSpec(b_col.shape, lambda n: (0, 0)),
        ]

    kernel = functools.partial(_amten_kernel, H=H, W=W)

    out_flat = pl.pallas_call(
        kernel,
        out_shape=jax.ShapeDtypeStruct((N, 15, HW), jnp.float32),
        grid=(N,),
        in_specs=in_specs,
        out_specs=pl.BlockSpec((None, 15, HW), lambda n: (n, 0, 0)),
        scratch_shapes=[
            pltpu.VMEM((6, LP), jnp.float32),
            pltpu.VMEM((6, LP), jnp.float32),
        ],
        compiler_params=pltpu.CompilerParams(
            dimension_semantics=("parallel",)),
    )(*args)
    return out_flat.reshape(N, 15, H, W)


# ----------------------------------------------------------------------------
# Deterministic parameter init (PyTorch Conv2d default-ish uniform bounds)
# ----------------------------------------------------------------------------
def init_params(key):
    shapes = {
        "c1":  (3, 3),
        "c21": (3, 3),
        "c22": (3, 3),
        "c31": (6, 6),
        "c32": (6, 6),
    }
    params = {}
    for name, (cout, cin) in shapes.items():
        key, kw, kb = jax.random.split(key, 3)
        bound = 1.0 / jnp.sqrt(cin * 9.0)
        params[f"{name}_w"] = jax.random.uniform(
            kw, (cout, cin, 3, 3), jnp.float32, -bound, bound)
        params[f"{name}_b"] = jax.random.uniform(
            kb, (cout,), jnp.float32, -bound, bound)
    return params


# ----------------------------------------------------------------------------
# Pure-JAX reference (for correctness check)
# ----------------------------------------------------------------------------
def _conv_ref(x, w, b):
    y = jax.lax.conv_general_dilated(
        x, w, window_strides=(1, 1), padding=((1, 1), (1, 1)),
        dimension_numbers=("NCHW", "OIHW", "NCHW"))
    return y + b[None, :, None, None]


def amten_ref(x, p):
    x1 = _conv_ref(x, p["c1_w"], p["c1_b"]) - x
    x2 = _conv_ref(x1, p["c21_w"], p["c21_b"])
    x2 = _conv_ref(x2, p["c22_w"], p["c22_b"])
    xcat_1 = jnp.concatenate([x2, x1], axis=1)
    x3 = _conv_ref(xcat_1, p["c31_w"], p["c31_b"])
    x3 = _conv_ref(x3, p["c32_w"], p["c32_b"])
    return jnp.concatenate([x3, x1, xcat_1], axis=1)


if __name__ == "__main__":
    key = jax.random.PRNGKey(0)
    key, kx = jax.random.split(key)
    x = jax.random.normal(kx, (2, 3, 16, 16), dtype=jnp.float32)
    params = init_params(key)

    out = jax.jit(amten_forward)(x, params)
    out = jax.block_until_ready(out)

    assert out.shape == (2, 15, 16, 16), out.shape
    ref = amten_ref(x, params)
    err = float(jnp.max(jnp.abs(out - ref)))
    assert err < 1e-3, err
    print("KERNEL_OK")
</pallas_src>

<mosaic_0001>
module attributes {stable_mosaic.version = 11 : i64} {
  func.func @_amten_kernel(%arg0: i32, %arg1: memref<1x3x256xf32, #tpu.memory_space<vmem>>, %arg2: memref<1x256xf32, #tpu.memory_space<vmem>>, %arg3: memref<1x256xf32, #tpu.memory_space<vmem>>, %arg4: memref<3x27xf32, #tpu.memory_space<vmem>>, %arg5: memref<3x1xf32, #tpu.memory_space<vmem>>, %arg6: memref<3x27xf32, #tpu.memory_space<vmem>>, %arg7: memref<3x1xf32, #tpu.memory_space<vmem>>, %arg8: memref<3x27xf32, #tpu.memory_space<vmem>>, %arg9: memref<3x1xf32, #tpu.memory_space<vmem>>, %arg10: memref<6x54xf32, #tpu.memory_space<vmem>>, %arg11: memref<6x1xf32, #tpu.memory_space<vmem>>, %arg12: memref<6x54xf32, #tpu.memory_space<vmem>>, %arg13: memref<6x1xf32, #tpu.memory_space<vmem>>, %arg14: memref<1x15x256xf32, #tpu.memory_space<vmem>>, %arg15: memref<6x384xf32, #tpu.memory_space<vmem>>, %arg16: memref<6x384xf32, #tpu.memory_space<vmem>>) attributes {dimension_semantics = [#tpu.dimension_semantics<parallel>], iteration_bounds = array<i64: 2>, scalar_prefetch = 0 : i64, scratch_operands = 2 : i64, tpu.core_type = #tpu.core_type<tc>, window_params = [{transform_indices = @transform_0, window_bounds = array<i64: 1, 3, 256>}, {pipeline_mode = #tpu.pipeline_mode<synchronous>, transform_indices = @transform_1, window_bounds = array<i64: 1, 256>}, {pipeline_mode = #tpu.pipeline_mode<synchronous>, transform_indices = @transform_2, window_bounds = array<i64: 1, 256>}, {pipeline_mode = #tpu.pipeline_mode<synchronous>, transform_indices = @transform_3, window_bounds = array<i64: 3, 27>}, {pipeline_mode = #tpu.pipeline_mode<synchronous>, transform_indices = @transform_4, window_bounds = array<i64: 3, 1>}, {pipeline_mode = #tpu.pipeline_mode<synchronous>, transform_indices = @transform_5, window_bounds = array<i64: 3, 27>}, {pipeline_mode = #tpu.pipeline_mode<synchronous>, transform_indices = @transform_6, window_bounds = array<i64: 3, 1>}, {pipeline_mode = #tpu.pipeline_mode<synchronous>, transform_indices = @transform_7, window_bounds = array<i64: 3, 27>}, {pipeline_mode = #tpu.pipeline_mode<synchronous>, transform_indices = @transform_8, window_bounds = array<i64: 3, 1>}, {pipeline_mode = #tpu.pipeline_mode<synchronous>, transform_indices = @transform_9, window_bounds = array<i64: 6, 54>}, {pipeline_mode = #tpu.pipeline_mode<synchronous>, transform_indices = @transform_10, window_bounds = array<i64: 6, 1>}, {pipeline_mode = #tpu.pipeline_mode<synchronous>, transform_indices = @transform_11, window_bounds = array<i64: 6, 54>}, {pipeline_mode = #tpu.pipeline_mode<synchronous>, transform_indices = @transform_12, window_bounds = array<i64: 6, 1>}, {transform_indices = @transform_13, window_bounds = array<i64: 1, 15, 256>}]} {
    %cst = arith.constant 0.000000e+00 : f32
    %0 = vector.broadcast %cst : f32 to vector<6x384xf32>
    %c0 = arith.constant 0 : index
    %c0_0 = arith.constant 0 : index
    %1 = vector.load %arg15[%c0, %c0_0] : memref<6x384xf32, #tpu.memory_space<vmem>>, vector<6x384xf32>
    tpu.vector_store %arg15[%c0, %c0_0], %0 {strides = array<i32>} : memref<6x384xf32, #tpu.memory_space<vmem>>, vector<6x384xf32>,
    %cst_1 = arith.constant 0.000000e+00 : f32
    %2 = vector.broadcast %cst_1 : f32 to vector<6x384xf32>
    %c0_2 = arith.constant 0 : index
    %c0_3 = arith.constant 0 : index
    %3 = vector.load %arg16[%c0_2, %c0_3] : memref<6x384xf32, #tpu.memory_space<vmem>>, vector<6x384xf32>
    tpu.vector_store %arg16[%c0_2, %c0_3], %2 {strides = array<i32>} : memref<6x384xf32, #tpu.memory_space<vmem>>, vector<6x384xf32>,
    %c0_4 = arith.constant 0 : index
    %c0_5 = arith.constant 0 : index
    %4 = vector.load %arg2[%c0_4, %c0_5] : memref<1x256xf32, #tpu.memory_space<vmem>>, vector<1x256xf32>
    %c0_6 = arith.constant 0 : index
    %c0_7 = arith.constant 0 : index
    %5 = vector.load %arg3[%c0_6, %c0_7] : memref<1x256xf32, #tpu.memory_space<vmem>>, vector<1x256xf32>
    %c0_8 = arith.constant 0 : index
    %c0_9 = arith.constant 0 : index
    %c0_10 = arith.constant 0 : index
    %6 = vector.load %arg1[%c0_8, %c0_9, %c0_10] : memref<1x3x256xf32, #tpu.memory_space<vmem>>, vector<1x3x256xf32>
    %7 = vector.shape_cast %6 : vector<1x3x256xf32> to vector<3x256xf32>
    %c0_11 = arith.constant 0 : index
    %c17 = arith.constant 17 : index
    %8 = vector.load %arg15[%c0_11, %c17] : memref<6x384xf32, #tpu.memory_space<vmem>>, vector<3x256xf32>
    tpu.vector_store %arg15[%c0_11, %c17], %7 {strides = array<i32>} : memref<6x384xf32, #tpu.memory_space<vmem>>, vector<3x256xf32>,
    %cst_12 = arith.constant 0.000000e+00 : f32
    %9 = vector.broadcast %cst_12 : f32 to vector<3x256xf32>
    %c0_13 = arith.constant 0 : index
    %c0_14 = arith.constant 0 : index
    %10 = vector.load %arg15[%c0_13, %c0_14] : memref<6x384xf32, #tpu.memory_space<vmem>>, vector<1x256xf32>
    %11 = arith.mulf %10, %4 : vector<1x256xf32>
    %c0_15 = arith.constant 0 : index
    %c0_16 = arith.constant 0 : index
    %12 = vector.load %arg4[%c0_15, %c0_16] : memref<3x27xf32, #tpu.memory_space<vmem>>, vector<3x1xf32>
    %13 = vector.broadcast %12 : vector<3x1xf32> to vector<3x256xf32>
    %14 = vector.broadcast %11 : vector<1x256xf32> to vector<3x256xf32>
    %15 = arith.mulf %13, %14 : vector<3x256xf32>
    %16 = arith.addf %9, %15 : vector<3x256xf32>
    %c0_17 = arith.constant 0 : index
    %c1 = arith.constant 1 : index
    %17 = vector.load %arg15[%c0_17, %c1] : memref<6x384xf32, #tpu.memory_space<vmem>>, vector<1x256xf32>
    %c0_18 = arith.constant 0 : index
    %c1_19 = arith.constant 1 : index
    %18 = vector.load %arg4[%c0_18, %c1_19] : memref<3x27xf32, #tpu.memory_space<vmem>>, vector<3x1xf32>
    %19 = vector.broadcast %18 : vector<3x1xf32> to vector<3x256xf32>
    %20 = vector.broadcast %17 : vector<1x256xf32> to vector<3x256xf32>
    %21 = arith.mulf %19, %20 : vector<3x256xf32>
    %22 = arith.addf %16, %21 : vector<3x256xf32>
    %c0_20 = arith.constant 0 : index
    %c2 = arith.constant 2 : index
    %23 = vector.load %arg15[%c0_20, %c2] : memref<6x384xf32, #tpu.memory_space<vmem>>, vector<1x256xf32>
    %24 = arith.mulf %23, %5 : vector<1x256xf32>
    %c0_21 = arith.constant 0 : index
    %c2_22 = arith.constant 2 : index
    %25 = vector.load %arg4[%c0_21, %c2_22] : memref<3x27xf32, #tpu.memory_space<vmem>>, vector<3x1xf32>
    %26 = vector.broadcast %25 : vector<3x1xf32> to vector<3x256xf32>
    %27 = vector.broadcast %24 : vector<1x256xf32> to vector<3x256xf32>
    %28 = arith.mulf %26, %27 : vector<3x256xf32>
    %29 = arith.addf %22, %28 : vector<3x256xf32>
    %c0_23 = arith.constant 0 : index
    %c16 = arith.constant 16 : index
    %30 = vector.load %arg15[%c0_23, %c16] : memref<6x384xf32, #tpu.memory_space<vmem>>, vector<1x256xf32>
    %31 = arith.mulf %30, %4 : vector<1x256xf32>
    %c0_24 = arith.constant 0 : index
    %c3 = arith.constant 3 : index
    %32 = vector.load %arg4[%c0_24, %c3] : memref<3x27xf32, #tpu.memory_space<vmem>>, vector<3x1xf32>
    %33 = vector.broadcast %32 : vector<3x1xf32> to vector<3x256xf32>
    %34 = vector.broadcast %31 : vector<1x256xf32> to vector<3x256xf32>
    %35 = arith.mulf %33, %34 : vector<3x256xf32>
    %36 = arith.addf %29, %35 : vector<3x256xf32>
    %c0_25 = arith.constant 0 : index
    %c17_26 = arith.constant 17 : index
    %37 = vector.load %arg15[%c0_25, %c17_26] : memref<6x384xf32, #tpu.memory_space<vmem>>, vector<1x256xf32>
    %c0_27 = arith.constant 0 : index
    %c4 = arith.constant 4 : index
    %38 = vector.load %arg4[%c0_27, %c4] : memref<3x27xf32, #tpu.memory_space<vmem>>, vector<3x1xf32>
    %39 = vector.broadcast %38 : vector<3x1xf32> to vector<3x256xf32>
    %40 = vector.broadcast %37 : vector<1x256xf32> to vector<3x256xf32>
    %41 = arith.mulf %39, %40 : vector<3x256xf32>
    %42 = arith.addf %36, %41 : vector<3x256xf32>
    %c0_28 = arith.constant 0 : index
    %c18 = arith.constant 18 : index
    %43 = vector.load %arg15[%c0_28, %c18] : memref<6x384xf32, #tpu.memory_space<vmem>>, vector<1x256xf32>
    %44 = arith.mulf %43, %5 : vector<1x256xf32>
    %c0_29 = arith.constant 0 : index
    %c5 = arith.constant 5 : index
    %45 = vector.load %arg4[%c0_29, %c5] : memref<3x27xf32, #tpu.memory_space<vmem>>, vector<3x1xf32>
    %46 = vector.broadcast %45 : vector<3x1xf32> to vector<3x256xf32>
    %47 = vector.broadcast %44 : vector<1x256xf32> to vector<3x256xf32>
    %48 = arith.mulf %46, %47 : vector<3x256xf32>
    %49 = arith.addf %42, %48 : vector<3x256xf32>
    %c0_30 = arith.constant 0 : index
    %c32 = arith.constant 32 : index
    %50 = vector.load %arg15[%c0_30, %c32] : memref<6x384xf32, #tpu.memory_space<vmem>>, vector<1x256xf32>
    %51 = arith.mulf %50, %4 : vector<1x256xf32>
    %c0_31 = arith.constant 0 : index
    %c6 = arith.constant 6 : index
    %52 = vector.load %arg4[%c0_31, %c6] : memref<3x27xf32, #tpu.memory_space<vmem>>, vector<3x1xf32>
    %53 = vector.broadcast %52 : vector<3x1xf32> to vector<3x256xf32>
    %54 = vector.broadcast %51 : vector<1x256xf32> to vector<3x256xf32>
    %55 = arith.mulf %53, %54 : vector<3x256xf32>
    %56 = arith.addf %49, %55 : vector<3x256xf32>
    %c0_32 = arith.constant 0 : index
    %c33 = arith.constant 33 : index
    %57 = vector.load %arg15[%c0_32, %c33] : memref<6x384xf32, #tpu.memory_space<vmem>>, vector<1x256xf32>
    %c0_33 = arith.constant 0 : index
    %c7 = arith.constant 7 : index
    %58 = vector.load %arg4[%c0_33, %c7] : memref<3x27xf32, #tpu.memory_space<vmem>>, vector<3x1xf32>
    %59 = vector.broadcast %58 : vector<3x1xf32> to vector<3x256xf32>
    %60 = vector.broadcast %57 : vector<1x256xf32> to vector<3x256xf32>
    %61 = arith.mulf %59, %60 : vector<3x256xf32>
    %62 = arith.addf %56, %61 : vector<3x256xf32>
    %c0_34 = arith.constant 0 : index
    %c34 = arith.constant 34 : index
    %63 = vector.load %arg15[%c0_34, %c34] : memref<6x384xf32, #tpu.memory_space<vmem>>, vector<1x256xf32>
    %64 = arith.mulf %63, %5 : vector<1x256xf32>
    %c0_35 = arith.constant 0 : index
    %c8 = arith.constant 8 : index
    %65 = vector.load %arg4[%c0_35, %c8] : memref<3x27xf32, #tpu.memory_space<vmem>>, vector<3x1xf32>
    %66 = vector.broadcast %65 : vector<3x1xf32> to vector<3x256xf32>
    %67 = vector.broadcast %64 : vector<1x256xf32> to vector<3x256xf32>
    %68 = arith.mulf %66, %67 : vector<3x256xf32>
    %69 = arith.addf %62, %68 : vector<3x256xf32>
    %c1_36 = arith.constant 1 : index
    %c0_37 = arith.constant 0 : index
    %70 = vector.load %arg15[%c1_36, %c0_37] : memref<6x384xf32, #tpu.memory_space<vmem>>, vector<1x256xf32>
    %71 = arith.mulf %70, %4 : vector<1x256xf32>
    %c0_38 = arith.constant 0 : index
    %c9 = arith.constant 9 : index
    %72 = vector.load %arg4[%c0_38, %c9] : memref<3x27xf32, #tpu.memory_space<vmem>>, vector<3x1xf32>
    %73 = vector.broadcast %72 : vector<3x1xf32> to vector<3x256xf32>
    %74 = vector.broadcast %71 : vector<1x256xf32> to vector<3x256xf32>
    %75 = arith.mulf %73, %74 : vector<3x256xf32>
    %76 = arith.addf %69, %75 : vector<3x256xf32>
    %c1_39 = arith.constant 1 : index
    %c1_40 = arith.constant 1 : index
    %77 = vector.load %arg15[%c1_39, %c1_40] : memref<6x384xf32, #tpu.memory_space<vmem>>, vector<1x256xf32>
    %c0_41 = arith.constant 0 : index
    %c10 = arith.constant 10 : index
    %78 = vector.load %arg4[%c0_41, %c10] : memref<3x27xf32, #tpu.memory_space<vmem>>, vector<3x1xf32>
    %79 = vector.broadcast %78 : vector<3x1xf32> to vector<3x256xf32>
    %80 = vector.broadcast %77 : vector<1x256xf32> to vector<3x256xf32>
    %81 = arith.mulf %79, %80 : vector<3x256xf32>
    %82 = arith.addf %76, %81 : vector<3x256xf32>
    %c1_42 = arith.constant 1 : index
    %c2_43 = arith.constant 2 : index
    %83 = vector.load %arg15[%c1_42, %c2_43] : memref<6x384xf32, #tpu.memory_space<vmem>>, vector<1x256xf32>
    %84 = arith.mulf %83, %5 : vector<1x256xf32>
    %c0_44 = arith.constant 0 : index
    %c11 = arith.constant 11 : index
    %85 = vector.load %arg4[%c0_44, %c11] : memref<3x27xf32, #tpu.memory_space<vmem>>, vector<3x1xf32>
    %86 = vector.broadcast %85 : vector<3x1xf32> to vector<3x256xf32>
    %87 = vector.broadcast %84 : vector<1x256xf32> to vector<3x256xf32>
    %88 = arith.mulf %86, %87 : vector<3x256xf32>
    %89 = arith.addf %82, %88 : vector<3x256xf32>
    %c1_45 = arith.constant 1 : index
    %c16_46 = arith.constant 16 : index
    %90 = vector.load %arg15[%c1_45, %c16_46] : memref<6x384xf32, #tpu.memory_space<vmem>>, vector<1x256xf32>
    %91 = arith.mulf %90, %4 : vector<1x256xf32>
    %c0_47 = arith.constant 0 : index
    %c12 = arith.constant 12 : index
    %92 = vector.load %arg4[%c0_47, %c12] : memref<3x27xf32, #tpu.memory_space<vmem>>, vector<3x1xf32>
    %93 = vector.broadcast %92 : vector<3x1xf32> to vector<3x256xf32>
    %94 = vector.broadcast %91 : vector<1x256xf32> to vector<3x256xf32>
    %95 = arith.mulf %93, %94 : vector<3x256xf32>
    %96 = arith.addf %89, %95 : vector<3x256xf32>
    %c1_48 = arith.constant 1 : index
    %c17_49 = arith.constant 17 : index
    %97 = vector.load %arg15[%c1_48, %c17_49] : memref<6x384xf32, #tpu.memory_space<vmem>>, vector<1x256xf32>
    %c0_50 = arith.constant 0 : index
    %c13 = arith.constant 13 : index
    %98 = vector.load %arg4[%c0_50, %c13] : memref<3x27xf32, #tpu.memory_space<vmem>>, vector<3x1xf32>
    %99 = vector.broadcast %98 : vector<3x1xf32> to vector<3x256xf32>
    %100 = vector.broadcast %97 : vector<1x256xf32> to vector<3x256xf32>
    %101 = arith.mulf %99, %100 : vector<3x256xf32>
    %102 = arith.addf %96, %101 : vector<3x256xf32>
    %c1_51 = arith.constant 1 : index
    %c18_52 = arith.constant 18 : index
    %103 = vector.load %arg15[%c1_51, %c18_52] : memref<6x384xf32, #tpu.memory_space<vmem>>, vector<1x256xf32>
    %104 = arith.mulf %103, %5 : vector<1x256xf32>
    %c0_53 = arith.constant 0 : index
    %c14 = arith.constant 14 : index
    %105 = vector.load %arg4[%c0_53, %c14] : memref<3x27xf32, #tpu.memory_space<vmem>>, vector<3x1xf32>
    %106 = vector.broadcast %105 : vector<3x1xf32> to vector<3x256xf32>
    %107 = vector.broadcast %104 : vector<1x256xf32> to vector<3x256xf32>
    %108 = arith.mulf %106, %107 : vector<3x256xf32>
    %109 = arith.addf %102, %108 : vector<3x256xf32>
    %c1_54 = arith.constant 1 : index
    %c32_55 = arith.constant 32 : index
    %110 = vector.load %arg15[%c1_54, %c32_55] : memref<6x384xf32, #tpu.memory_space<vmem>>, vector<1x256xf32>
    %111 = arith.mulf %110, %4 : vector<1x256xf32>
    %c0_56 = arith.constant 0 : index
    %c15 = arith.constant 15 : index
    %112 = vector.load %arg4[%c0_56, %c15] : memref<3x27xf32, #tpu.memory_space<vmem>>, vector<3x1xf32>
    %113 = vector.broadcast %112 : vector<3x1xf32> to vector<3x256xf32>
    %114 = vector.broadcast %111 : vector<1x256xf32> to vector<3x256xf32>
    %115 = arith.mulf %113, %114 : vector<3x256xf32>
    %116 = arith.addf %109, %115 : vector<3x256xf32>
    %c1_57 = arith.constant 1 : index
    %c33_58 = arith.constant 33 : index
    %117 = vector.load %arg15[%c1_57, %c33_58] : memref<6x384xf32, #tpu.memory_space<vmem>>, vector<1x256xf32>
    %c0_59 = arith.constant 0 : index
    %c16_60 = arith.constant 16 : index
    %118 = vector.load %arg4[%c0_59, %c16_60] : memref<3x27xf32, #tpu.memory_space<vmem>>, vector<3x1xf32>
    %119 = vector.broadcast %118 : vector<3x1xf32> to vector<3x256xf32>
    %120 = vector.broadcast %117 : vector<1x256xf32> to vector<3x256xf32>
    %121 = arith.mulf %119, %120 : vector<3x256xf32>
    %122 = arith.addf %116, %121 : vector<3x256xf32>
    %c1_61 = arith.constant 1 : index
    %c34_62 = arith.constant 34 : index
    %123 = vector.load %arg15[%c1_61, %c34_62] : memref<6x384xf32, #tpu.memory_space<vmem>>, vector<1x256xf32>
    %124 = arith.mulf %123, %5 : vector<1x256xf32>
    %c0_63 = arith.constant 0 : index
    %c17_64 = arith.constant 17 : index
    %125 = vector.load %arg4[%c0_63, %c17_64] : memref<3x27xf32, #tpu.memory_space<vmem>>, vector<3x1xf32>
    %126 = vector.broadcast %125 : vector<3x1xf32> to vector<3x256xf32>
    %127 = vector.broadcast %124 : vector<1x256xf32> to vector<3x256xf32>
    %128 = arith.mulf %126, %127 : vector<3x256xf32>
    %129 = arith.addf %122, %128 : vector<3x256xf32>
    %c2_65 = arith.constant 2 : index
    %c0_66 = arith.constant 0 : index
    %130 = vector.load %arg15[%c2_65, %c0_66] : memref<6x384xf32, #tpu.memory_space<vmem>>, vector<1x256xf32>
    %131 = arith.mulf %130, %4 : vector<1x256xf32>
    %c0_67 = arith.constant 0 : index
    %c18_68 = arith.constant 18 : index
    %132 = vector.load %arg4[%c0_67, %c18_68] : memref<3x27xf32, #tpu.memory_space<vmem>>, vector<3x1xf32>
    %133 = vector.broadcast %132 : vector<3x1xf32> to vector<3x256xf32>
    %134 = vector.broadcast %131 : vector<1x256xf32> to vector<3x256xf32>
    %135 = arith.mulf %133, %134 : vector<3x256xf32>
    %136 = arith.addf %129, %135 : vector<3x256xf32>
    %c2_69 = arith.constant 2 : index
    %c1_70 = arith.constant 1 : index
    %137 = vector.load %arg15[%c2_69, %c1_70] : memref<6x384xf32, #tpu.memory_space<vmem>>, vector<1x256xf32>
    %c0_71 = arith.constant 0 : index
    %c19 = arith.constant 19 : index
    %138 = vector.load %arg4[%c0_71, %c19] : memref<3x27xf32, #tpu.memory_space<vmem>>, vector<3x1xf32>
    %139 = vector.broadcast %138 : vector<3x1xf32> to vector<3x256xf32>
    %140 = vector.broadcast %137 : vector<1x256xf32> to vector<3x256xf32>
    %141 = arith.mulf %139, %140 : vector<3x256xf32>
    %142 = arith.addf %136, %141 : vector<3x256xf32>
    %c2_72 = arith.constant 2 : index
    %c2_73 = arith.constant 2 : index
    %143 = vector.load %arg15[%c2_72, %c2_73] : memref<6x384xf32, #tpu.memory_space<vmem>>, vector<1x256xf32>
    %144 = arith.mulf %143, %5 : vector<1x256xf32>
    %c0_74 = arith.constant 0 : index
    %c20 = arith.constant 20 : index
    %145 = vector.load %arg4[%c0_74, %c20] : memref<3x27xf32, #tpu.memory_space<vmem>>, vector<3x1xf32>
    %146 = vector.broadcast %145 : vector<3x1xf32> to vector<3x256xf32>
    %147 = vector.broadcast %144 : vector<1x256xf32> to vector<3x256xf32>
    %148 = arith.mulf %146, %147 : vector<3x256xf32>
    %149 = arith.addf %142, %148 : vector<3x256xf32>
    %c2_75 = arith.constant 2 : index
    %c16_76 = arith.constant 16 : index
    %150 = vector.load %arg15[%c2_75, %c16_76] : memref<6x384xf32, #tpu.memory_space<vmem>>, vector<1x256xf32>
    %151 = arith.mulf %150, %4 : vector<1x256xf32>
    %c0_77 = arith.constant 0 : index
    %c21 = arith.constant 21 : index
    %152 = vector.load %arg4[%c0_77, %c21] : memref<3x27xf32, #tpu.memory_space<vmem>>, vector<3x1xf32>
    %153 = vector.broadcast %152 : vector<3x1xf32> to vector<3x256xf32>
    %154 = vector.broadcast %151 : vector<1x256xf32> to vector<3x256xf32>
    %155 = arith.mulf %153, %154 : vector<3x256xf32>
    %156 = arith.addf %149, %155 : vector<3x256xf32>
    %c2_78 = arith.constant 2 : index
    %c17_79 = arith.constant 17 : index
    %157 = vector.load %arg15[%c2_78, %c17_79] : memref<6x384xf32, #tpu.memory_space<vmem>>, vector<1x256xf32>
    %c0_80 = arith.constant 0 : index
    %c22 = arith.constant 22 : index
    %158 = vector.load %arg4[%c0_80, %c22] : memref<3x27xf32, #tpu.memory_space<vmem>>, vector<3x1xf32>
    %159 = vector.broadcast %158 : vector<3x1xf32> to vector<3x256xf32>
    %160 = vector.broadcast %157 : vector<1x256xf32> to vector<3x256xf32>
    %161 = arith.mulf %159, %160 : vector<3x256xf32>
    %162 = arith.addf %156, %161 : vector<3x256xf32>
    %c2_81 = arith.constant 2 : index
    %c18_82 = arith.constant 18 : index
    %163 = vector.load %arg15[%c2_81, %c18_82] : memref<6x384xf32, #tpu.memory_space<vmem>>, vector<1x256xf32>
    %164 = arith.mulf %163, %5 : vector<1x256xf32>
    %c0_83 = arith.constant 0 : index
    %c23 = arith.constant 23 : index
    %165 = vector.load %arg4[%c0_83, %c23] : memref<3x27xf32, #tpu.memory_space<vmem>>, vector<3x1xf32>
    %166 = vector.broadcast %165 : vector<3x1xf32> to vector<3x256xf32>
    %167 = vector.broadcast %164 : vector<1x256xf32> to vector<3x256xf32>
    %168 = arith.mulf %166, %167 : vector<3x256xf32>
    %169 = arith.addf %162, %168 : vector<3x256xf32>
    %c2_84 = arith.constant 2 : index
    %c32_85 = arith.constant 32 : index
    %170 = vector.load %arg15[%c2_84, %c32_85] : memref<6x384xf32, #tpu.memory_space<vmem>>, vector<1x256xf32>
    %171 = arith.mulf %170, %4 : vector<1x256xf32>
    %c0_86 = arith.constant 0 : index
    %c24 = arith.constant 24 : index
    %172 = vector.load %arg4[%c0_86, %c24] : memref<3x27xf32, #tpu.memory_space<vmem>>, vector<3x1xf32>
    %173 = vector.broadcast %172 : vector<3x1xf32> to vector<3x256xf32>
    %174 = vector.broadcast %171 : vector<1x256xf32> to vector<3x256xf32>
    %175 = arith.mulf %173, %174 : vector<3x256xf32>
    %176 = arith.addf %169, %175 : vector<3x256xf32>
    %c2_87 = arith.constant 2 : index
    %c33_88 = arith.constant 33 : index
    %177 = vector.load %arg15[%c2_87, %c33_88] : memref<6x384xf32, #tpu.memory_space<vmem>>, vector<1x256xf32>
    %c0_89 = arith.constant 0 : index
    %c25 = arith.constant 25 : index
    %178 = vector.load %arg4[%c0_89, %c25] : memref<3x27xf32, #tpu.memory_space<vmem>>, vector<3x1xf32>
    %179 = vector.broadcast %178 : vector<3x1xf32> to vector<3x256xf32>
    %180 = vector.broadcast %177 : vector<1x256xf32> to vector<3x256xf32>
    %181 = arith.mulf %179, %180 : vector<3x256xf32>
    %182 = arith.addf %176, %181 : vector<3x256xf32>
    %c2_90 = arith.constant 2 : index
    %c34_91 = arith.constant 34 : index
    %183 = vector.load %arg15[%c2_90, %c34_91] : memref<6x384xf32, #tpu.memory_space<vmem>>, vector<1x256xf32>
    %184 = arith.mulf %183, %5 : vector<1x256xf32>
    %c0_92 = arith.constant 0 : index
    %c26 = arith.constant 26 : index
    %185 = vector.load %arg4[%c0_92, %c26] : memref<3x27xf32, #tpu.memory_space<vmem>>, vector<3x1xf32>
    %186 = vector.broadcast %185 : vector<3x1xf32> to vector<3x256xf32>
    %187 = vector.broadcast %184 : vector<1x256xf32> to vector<3x256xf32>
    %188 = arith.mulf %186, %187 : vector<3x256xf32>
    %189 = arith.addf %182, %188 : vector<3x256xf32>
    %c0_93 = arith.constant 0 : index
    %c0_94 = arith.constant 0 : index
    %190 = vector.load %arg5[%c0_93, %c0_94] : memref<3x1xf32, #tpu.memory_space<vmem>>, vector<3x1xf32>
    %191 = vector.broadcast %190 : vector<3x1xf32> to vector<3x256xf32>
    %192 = arith.addf %189, %191 : vector<3x256xf32>
    %c0_95 = arith.constant 0 : index
    %c0_96 = arith.constant 0 : index
    %c0_97 = arith.constant 0 : index
    %193 = vector.load %arg1[%c0_95, %c0_96, %c0_97] : memref<1x3x256xf32, #tpu.memory_space<vmem>>, vector<1x3x256xf32>
    %194 = vector.shape_cast %193 : vector<1x3x256xf32> to vector<3x256xf32>
    %195 = arith.subf %192, %194 : vector<3x256xf32>
    %c0_98 = arith.constant 0 : index
    %c6_99 = arith.constant 6 : index
    %c0_100 = arith.constant 0 : index
    %196 = vector.load %arg14[%c0_98, %c6_99, %c0_100] : memref<1x15x256xf32, #tpu.memory_space<vmem>>, vector<1x3x256xf32>
    %197 = vector.shape_cast %196 : vector<1x3x256xf32> to vector<3x256xf32>
    %198 = vector.shape_cast %195 : vector<3x256xf32> to vector<1x3x256xf32>
    tpu.vector_store %arg14[%c0_98, %c6_99, %c0_100], %198 {strides = array<i32>} : memref<1x15x256xf32, #tpu.memory_space<vmem>>, vector<1x3x256xf32>,
    %c0_101 = arith.constant 0 : index
    %c12_102 = arith.constant 12 : index
    %c0_103 = arith.constant 0 : index
    %199 = vector.load %arg14[%c0_101, %c12_102, %c0_103] : memref<1x15x256xf32, #tpu.memory_space<vmem>>, vector<1x3x256xf32>
    %200 = vector.shape_cast %199 : vector<1x3x256xf32> to vector<3x256xf32>
    %201 = vector.shape_cast %195 : vector<3x256xf32> to vector<1x3x256xf32>
    tpu.vector_store %arg14[%c0_101, %c12_102, %c0_103], %201 {strides = array<i32>} : memref<1x15x256xf32, #tpu.memory_space<vmem>>, vector<1x3x256xf32>,
    %c3_104 = arith.constant 3 : index
    %c17_105 = arith.constant 17 : index
    %202 = vector.load %arg16[%c3_104, %c17_105] : memref<6x384xf32, #tpu.memory_space<vmem>>, vector<3x256xf32>
    tpu.vector_store %arg16[%c3_104, %c17_105], %195 {strides = array<i32>} : memref<6x384xf32, #tpu.memory_space<vmem>>, vector<3x256xf32>,
    %cst_106 = arith.constant 0.000000e+00 : f32
    %203 = vector.broadcast %cst_106 : f32 to vector<3x256xf32>
    %c3_107 = arith.constant 3 : index
    %c0_108 = arith.constant 0 : index
    %204 = vector.load %arg16[%c3_107, %c0_108] : memref<6x384xf32, #tpu.memory_space<vmem>>, vector<1x256xf32>
    %205 = arith.mulf %204, %4 : vector<1x256xf32>
    %c0_109 = arith.constant 0 : index
    %c0_110 = arith.constant 0 : index
    %206 = vector.load %arg6[%c0_109, %c0_110] : memref<3x27xf32, #tpu.memory_space<vmem>>, vector<3x1xf32>
    %207 = vector.broadcast %206 : vector<3x1xf32> to vector<3x256xf32>
    %208 = vector.broadcast %205 : vector<1x256xf32> to vector<3x256xf32>
    %209 = arith.mulf %207, %208 : vector<3x256xf32>
    %210 = arith.addf %203, %209 : vector<3x256xf32>
    %c3_111 = arith.constant 3 : index
    %c1_112 = arith.constant 1 : index
    %211 = vector.load %arg16[%c3_111, %c1_112] : memref<6x384xf32, #tpu.memory_space<vmem>>, vector<1x256xf32>
    %c0_113 = arith.constant 0 : index
    %c1_114 = arith.constant 1 : index
    %212 = vector.load %arg6[%c0_113, %c1_114] : memref<3x27xf32, #tpu.memory_space<vmem>>, vector<3x1xf32>
    %213 = vector.broadcast %212 : vector<3x1xf32> to vector<3x256xf32>
    %214 = vector.broadcast %211 : vector<1x256xf32> to vector<3x256xf32>
    %215 = arith.mulf %213, %214 : vector<3x256xf32>
    %216 = arith.addf %210, %215 : vector<3x256xf32>
    %c3_115 = arith.constant 3 : index
    %c2_116 = arith.constant 2 : index
    %217 = vector.load %arg16[%c3_115, %c2_116] : memref<6x384xf32, #tpu.memory_space<vmem>>, vector<1x256xf32>
    %218 = arith.mulf %217, %5 : vector<1x256xf32>
    %c0_117 = arith.constant 0 : index
    %c2_118 = arith.constant 2 : index
    %219 = vector.load %arg6[%c0_117, %c2_118] : memref<3x27xf32, #tpu.memory_space<vmem>>, vector<3x1xf32>
    %220 = vector.broadcast %219 : vector<3x1xf32> to vector<3x256xf32>
    %221 = vector.broadcast %218 : vector<1x256xf32> to vector<3x256xf32>
    %222 = arith.mulf %220, %221 : vector<3x256xf32>
    %223 = arith.addf %216, %222 : vector<3x256xf32>
    %c3_119 = arith.constant 3 : index
    %c16_120 = arith.constant 16 : index
    %224 = vector.load %arg16[%c3_119, %c16_120] : memref<6x384xf32, #tpu.memory_space<vmem>>, vector<1x256xf32>
    %225 = arith.mulf %224, %4 : vector<1x256xf32>
    %c0_121 = arith.constant 0 : index
    %c3_122 = arith.constant 3 : index
    %226 = vector.load %arg6[%c0_121, %c3_122] : memref<3x27xf32, #tpu.memory_space<vmem>>, vector<3x1xf32>
    %227 = vector.broadcast %226 : vector<3x1xf32> to vector<3x256xf32>
    %228 = vector.broadcast %225 : vector<1x256xf32> to vector<3x256xf32>
    %229 = arith.mulf %227, %228 : vector<3x256xf32>
    %230 = arith.addf %223, %229 : vector<3x256xf32>
    %c3_123 = arith.constant 3 : index
    %c17_124 = arith.constant 17 : index
    %231 = vector.load %arg16[%c3_123, %c17_124] : memref<6x384xf32, #tpu.memory_space<vmem>>, vector<1x256xf32>
    %c0_125 = arith.constant 0 : index
    %c4_126 = arith.constant 4 : index
    %232 = vector.load %arg6[%c0_125, %c4_126] : memref<3x27xf32, #tpu.memory_space<vmem>>, vector<3x1xf32>
    %233 = vector.broadcast %232 : vector<3x1xf32> to vector<3x256xf32>
    %234 = vector.broadcast %231 : vector<1x256xf32> to vector<3x256xf32>
    %235 = arith.mulf %233, %234 : vector<3x256xf32>
    %236 = arith.addf %230, %235 : vector<3x256xf32>
    %c3_127 = arith.constant 3 : index
    %c18_128 = arith.constant 18 : index
    %237 = vector.load %arg16[%c3_127, %c18_128] : memref<6x384xf32, #tpu.memory_space<vmem>>, vector<1x256xf32>
    %238 = arith.mulf %237, %5 : vector<1x256xf32>
    %c0_129 = arith.constant 0 : index
    %c5_130 = arith.constant 5 : index
    %239 = vector.load %arg6[%c0_129, %c5_130] : memref<3x27xf32, #tpu.memory_space<vmem>>, vector<3x1xf32>
    %240 = vector.broadcast %239 : vector<3x1xf32> to vector<3x256xf32>
    %241 = vector.broadcast %238 : vector<1x256xf32> to vector<3x256xf32>
    %242 = arith.mulf %240, %241 : vector<3x256xf32>
    %243 = arith.addf %236, %242 : vector<3x256xf32>
    %c3_131 = arith.constant 3 : index
    %c32_132 = arith.constant 32 : index
    %244 = vector.load %arg16[%c3_131, %c32_132] : memref<6x384xf32, #tpu.memory_space<vmem>>, vector<1x256xf32>
    %245 = arith.mulf %244, %4 : vector<1x256xf32>
    %c0_133 = arith.constant 0 : index
    %c6_134 = arith.constant 6 : index
    %246 = vector.load %arg6[%c0_133, %c6_134] : memref<3x27xf32, #tpu.memory_space<vmem>>, vector<3x1xf32>
    %247 = vector.broadcast %246 : vector<3x1xf32> to vector<3x256xf32>
    %248 = vector.broadcast %245 : vector<1x256xf32> to vector<3x256xf32>
    %249 = arith.mulf %247, %248 : vector<3x256xf32>
    %250 = arith.addf %243, %249 : vector<3x256xf32>
    %c3_135 = arith.constant 3 : index
    %c33_136 = arith.constant 33 : index
    %251 = vector.load %arg16[%c3_135, %c33_136] : memref<6x384xf32, #tpu.memory_space<vmem>>, vector<1x256xf32>
    %c0_137 = arith.constant 0 : index
    %c7_138 = arith.constant 7 : index
    %252 = vector.load %arg6[%c0_137, %c7_138] : memref<3x27xf32, #tpu.memory_space<vmem>>, vector<3x1xf32>
    %253 = vector.broadcast %252 : vector<3x1xf32> to vector<3x256xf32>
    %254 = vector.broadcast %251 : vector<1x256xf32> to vector<3x256xf32>
    %255 = arith.mulf %253, %254 : vector<3x256xf32>
    %256 = arith.addf %250, %255 : vector<3x256xf32>
    %c3_139 = arith.constant 3 : index
    %c34_140 = arith.constant 34 : index
    %257 = vector.load %arg16[%c3_139, %c34_140] : memref<6x384xf32, #tpu.memory_space<vmem>>, vector<1x256xf32>
    %258 = arith.mulf %257, %5 : vector<1x256xf32>
    %c0_141 = arith.constant 0 : index
    %c8_142 = arith.constant 8 : index
    %259 = vector.load %arg6[%c0_141, %c8_142] : memref<3x27xf32, #tpu.memory_space<vmem>>, vector<3x1xf32>
    %260 = vector.broadcast %259 : vector<3x1xf32> to vector<3x256xf32>
    %261 = vector.broadcast %258 : vector<1x256xf32> to vector<3x256xf32>
    %262 = arith.mulf %260, %261 : vector<3x256xf32>
    %263 = arith.addf %256, %262 : vector<3x256xf32>
    %c4_143 = arith.constant 4 : index
    %c0_144 = arith.constant 0 : index
    %264 = vector.load %arg16[%c4_143, %c0_144] : memref<6x384xf32, #tpu.memory_space<vmem>>, vector<1x256xf32>
    %265 = arith.mulf %264, %4 : vector<1x256xf32>
    %c0_145 = arith.constant 0 : index
    %c9_146 = arith.constant 9 : index
    %266 = vector.load %arg6[%c0_145, %c9_146] : memref<3x27xf32, #tpu.memory_space<vmem>>, vector<3x1xf32>
    %267 = vector.broadcast %266 : vector<3x1xf32> to vector<3x256xf32>
    %268 = vector.broadcast %265 : vector<1x256xf32> to vector<3x256xf32>
    %269 = arith.mulf %267, %268 : vector<3x256xf32>
    %270 = arith.addf %263, %269 : vector<3x256xf32>
    %c4_147 = arith.constant 4 : index
    %c1_148 = arith.constant 1 : index
    %271 = vector.load %arg16[%c4_147, %c1_148] : memref<6x384xf32, #tpu.memory_space<vmem>>, vector<1x256xf32>
    %c0_149 = arith.constant 0 : index
    %c10_150 = arith.constant 10 : index
    %272 = vector.load %arg6[%c0_149, %c10_150] : memref<3x27xf32, #tpu.memory_space<vmem>>, vector<3x1xf32>
    %273 = vector.broadcast %272 : vector<3x1xf32> to vector<3x256xf32>
    %274 = vector.broadcast %271 : vector<1x256xf32> to vector<3x256xf32>
    %275 = arith.mulf %273, %274 : vector<3x256xf32>
    %276 = arith.addf %270, %275 : vector<3x256xf32>
    %c4_151 = arith.constant 4 : index
    %c2_152 = arith.constant 2 : index
    %277 = vector.load %arg16[%c4_151, %c2_152] : memref<6x384xf32, #tpu.memory_space<vmem>>, vector<1x256xf32>
    %278 = arith.mulf %277, %5 : vector<1x256xf32>
    %c0_153 = arith.constant 0 : index
    %c11_154 = arith.constant 11 : index
    %279 = vector.load %arg6[%c0_153, %c11_154] : memref<3x27xf32, #tpu.memory_space<vmem>>, vector<3x1xf32>
    %280 = vector.broadcast %279 : vector<3x1xf32> to vector<3x256xf32>
    %281 = vector.broadcast %278 : vector<1x256xf32> to vector<3x256xf32>
    %282 = arith.mulf %280, %281 : vector<3x256xf32>
    %283 = arith.addf %276, %282 : vector<3x256xf32>
    %c4_155 = arith.constant 4 : index
    %c16_156 = arith.constant 16 : index
    %284 = vector.load %arg16[%c4_155, %c16_156] : memref<6x384xf32, #tpu.memory_space<vmem>>, vector<1x256xf32>
    %285 = arith.mulf %284, %4 : vector<1x256xf32>
    %c0_157 = arith.constant 0 : index
    %c12_158 = arith.constant 12 : index
    %286 = vector.load %arg6[%c0_157, %c12_158] : memref<3x27xf32, #tpu.memory_space<vmem>>, vector<3x1xf32>
    %287 = vector.broadcast %286 : vector<3x1xf32> to vector<3x256xf32>
    %288 = vector.broadcast %285 : vector<1x256xf32> to vector<3x256xf32>
    %289 = arith.mulf %287, %288 : vector<3x256xf32>
    %290 = arith.addf %283, %289 : vector<3x256xf32>
    %c4_159 = arith.constant 4 : index
    %c17_160 = arith.constant 17 : index
    %291 = vector.load %arg16[%c4_159, %c17_160] : memref<6x384xf32, #tpu.memory_space<vmem>>, vector<1x256xf32>
    %c0_161 = arith.constant 0 : index
    %c13_162 = arith.constant 13 : index
    %292 = vector.load %arg6[%c0_161, %c13_162] : memref<3x27xf32, #tpu.memory_space<vmem>>, vector<3x1xf32>
    %293 = vector.broadcast %292 : vector<3x1xf32> to vector<3x256xf32>
    %294 = vector.broadcast %291 : vector<1x256xf32> to vector<3x256xf32>
    %295 = arith.mulf %293, %294 : vector<3x256xf32>
    %296 = arith.addf %290, %295 : vector<3x256xf32>
    %c4_163 = arith.constant 4 : index
    %c18_164 = arith.constant 18 : index
    %297 = vector.load %arg16[%c4_163, %c18_164] : memref<6x384xf32, #tpu.memory_space<vmem>>, vector<1x256xf32>
    %298 = arith.mulf %297, %5 : vector<1x256xf32>
    %c0_165 = arith.constant 0 : index
    %c14_166 = arith.constant 14 : index
    %299 = vector.load %arg6[%c0_165, %c14_166] : memref<3x27xf32, #tpu.memory_space<vmem>>, vector<3x1xf32>
    %300 = vector.broadcast %299 : vector<3x1xf32> to vector<3x256xf32>
    %301 = vector.broadcast %298 : vector<1x256xf32> to vector<3x256xf32>
    %302 = arith.mulf %300, %301 : vector<3x256xf32>
    %303 = arith.addf %296, %302 : vector<3x256xf32>
    %c4_167 = arith.constant 4 : index
    %c32_168 = arith.constant 32 : index
    %304 = vector.load %arg16[%c4_167, %c32_168] : memref<6x384xf32, #tpu.memory_space<vmem>>, vector<1x256xf32>
    %305 = arith.mulf %304, %4 : vector<1x256xf32>
    %c0_169 = arith.constant 0 : index
    %c15_170 = arith.constant 15 : index
    %306 = vector.load %arg6[%c0_169, %c15_170] : memref<3x27xf32, #tpu.memory_space<vmem>>, vector<3x1xf32>
    %307 = vector.broadcast %306 : vector<3x1xf32> to vector<3x256xf32>
    %308 = vector.broadcast %305 : vector<1x256xf32> to vector<3x256xf32>
    %309 = arith.mulf %307, %308 : vector<3x256xf32>
    %310 = arith.addf %303, %309 : vector<3x256xf32>
    %c4_171 = arith.constant 4 : index
    %c33_172 = arith.constant 33 : index
    %311 = vector.load %arg16[%c4_171, %c33_172] : memref<6x384xf32, #tpu.memory_space<vmem>>, vector<1x256xf32>
    %c0_173 = arith.constant 0 : index
    %c16_174 = arith.constant 16 : index
    %312 = vector.load %arg6[%c0_173, %c16_174] : memref<3x27xf32, #tpu.memory_space<vmem>>, vector<3x1xf32>
    %313 = vector.broadcast %312 : vector<3x1xf32> to vector<3x256xf32>
    %314 = vector.broadcast %311 : vector<1x256xf32> to vector<3x256xf32>
    %315 = arith.mulf %313, %314 : vector<3x256xf32>
    %316 = arith.addf %310, %315 : vector<3x256xf32>
    %c4_175 = arith.constant 4 : index
    %c34_176 = arith.constant 34 : index
    %317 = vector.load %arg16[%c4_175, %c34_176] : memref<6x384xf32, #tpu.memory_space<vmem>>, vector<1x256xf32>
    %318 = arith.mulf %317, %5 : vector<1x256xf32>
    %c0_177 = arith.constant 0 : index
    %c17_178 = arith.constant 17 : index
    %319 = vector.load %arg6[%c0_177, %c17_178] : memref<3x27xf32, #tpu.memory_space<vmem>>, vector<3x1xf32>
    %320 = vector.broadcast %319 : vector<3x1xf32> to vector<3x256xf32>
    %321 = vector.broadcast %318 : vector<1x256xf32> to vector<3x256xf32>
    %322 = arith.mulf %320, %321 : vector<3x256xf32>
    %323 = arith.addf %316, %322 : vector<3x256xf32>
    %c5_179 = arith.constant 5 : index
    %c0_180 = arith.constant 0 : index
    %324 = vector.load %arg16[%c5_179, %c0_180] : memref<6x384xf32, #tpu.memory_space<vmem>>, vector<1x256xf32>
    %325 = arith.mulf %324, %4 : vector<1x256xf32>
    %c0_181 = arith.constant 0 : index
    %c18_182 = arith.constant 18 : index
    %326 = vector.load %arg6[%c0_181, %c18_182] : memref<3x27xf32, #tpu.memory_space<vmem>>, vector<3x1xf32>
    %327 = vector.broadcast %326 : vector<3x1xf32> to vector<3x256xf32>
    %328 = vector.broadcast %325 : vector<1x256xf32> to vector<3x256xf32>
    %329 = arith.mulf %327, %328 : vector<3x256xf32>
    %330 = arith.addf %323, %329 : vector<3x256xf32>
    %c5_183 = arith.constant 5 : index
    %c1_184 = arith.constant 1 : index
    %331 = vector.load %arg16[%c5_183, %c1_184] : memref<6x384xf32, #tpu.memory_space<vmem>>, vector<1x256xf32>
    %c0_185 = arith.constant 0 : index
    %c19_186 = arith.constant 19 : index
    %332 = vector.load %arg6[%c0_185, %c19_186] : memref<3x27xf32, #tpu.memory_space<vmem>>, vector<3x1xf32>
    %333 = vector.broadcast %332 : vector<3x1xf32> to vector<3x256xf32>
    %334 = vector.broadcast %331 : vector<1x256xf32> to vector<3x256xf32>
    %335 = arith.mulf %333, %334 : vector<3x256xf32>
    %336 = arith.addf %330, %335 : vector<3x256xf32>
    %c5_187 = arith.constant 5 : index
    %c2_188 = arith.constant 2 : index
    %337 = vector.load %arg16[%c5_187, %c2_188] : memref<6x384xf32, #tpu.memory_space<vmem>>, vector<1x256xf32>
    %338 = arith.mulf %337, %5 : vector<1x256xf32>
    %c0_189 = arith.constant 0 : index
    %c20_190 = arith.constant 20 : index
    %339 = vector.load %arg6[%c0_189, %c20_190] : memref<3x27xf32, #tpu.memory_space<vmem>>, vector<3x1xf32>
    %340 = vector.broadcast %339 : vector<3x1xf32> to vector<3x256xf32>
    %341 = vector.broadcast %338 : vector<1x256xf32> to vector<3x256xf32>
    %342 = arith.mulf %340, %341 : vector<3x256xf32>
    %343 = arith.addf %336, %342 : vector<3x256xf32>
    %c5_191 = arith.constant 5 : index
    %c16_192 = arith.constant 16 : index
    %344 = vector.load %arg16[%c5_191, %c16_192] : memref<6x384xf32, #tpu.memory_space<vmem>>, vector<1x256xf32>
    %345 = arith.mulf %344, %4 : vector<1x256xf32>
    %c0_193 = arith.constant 0 : index
    %c21_194 = arith.constant 21 : index
    %346 = vector.load %arg6[%c0_193, %c21_194] : memref<3x27xf32, #tpu.memory_space<vmem>>, vector<3x1xf32>
    %347 = vector.broadcast %346 : vector<3x1xf32> to vector<3x256xf32>
    %348 = vector.broadcast %345 : vector<1x256xf32> to vector<3x256xf32>
    %349 = arith.mulf %347, %348 : vector<3x256xf32>
    %350 = arith.addf %343, %349 : vector<3x256xf32>
    %c5_195 = arith.constant 5 : index
    %c17_196 = arith.constant 17 : index
    %351 = vector.load %arg16[%c5_195, %c17_196] : memref<6x384xf32, #tpu.memory_space<vmem>>, vector<1x256xf32>
    %c0_197 = arith.constant 0 : index
    %c22_198 = arith.constant 22 : index
    %352 = vector.load %arg6[%c0_197, %c22_198] : memref<3x27xf32, #tpu.memory_space<vmem>>, vector<3x1xf32>
    %353 = vector.broadcast %352 : vector<3x1xf32> to vector<3x256xf32>
    %354 = vector.broadcast %351 : vector<1x256xf32> to vector<3x256xf32>
    %355 = arith.mulf %353, %354 : vector<3x256xf32>
    %356 = arith.addf %350, %355 : vector<3x256xf32>
    %c5_199 = arith.constant 5 : index
    %c18_200 = arith.constant 18 : index
    %357 = vector.load %arg16[%c5_199, %c18_200] : memref<6x384xf32, #tpu.memory_space<vmem>>, vector<1x256xf32>
    %358 = arith.mulf %357, %5 : vector<1x256xf32>
    %c0_201 = arith.constant 0 : index
    %c23_202 = arith.constant 23 : index
    %359 = vector.load %arg6[%c0_201, %c23_202] : memref<3x27xf32, #tpu.memory_space<vmem>>, vector<3x1xf32>
    %360 = vector.broadcast %359 : vector<3x1xf32> to vector<3x256xf32>
    %361 = vector.broadcast %358 : vector<1x256xf32> to vector<3x256xf32>
    %362 = arith.mulf %360, %361 : vector<3x256xf32>
    %363 = arith.addf %356, %362 : vector<3x256xf32>
    %c5_203 = arith.constant 5 : index
    %c32_204 = arith.constant 32 : index
    %364 = vector.load %arg16[%c5_203, %c32_204] : memref<6x384xf32, #tpu.memory_space<vmem>>, vector<1x256xf32>
    %365 = arith.mulf %364, %4 : vector<1x256xf32>
    %c0_205 = arith.constant 0 : index
    %c24_206 = arith.constant 24 : index
    %366 = vector.load %arg6[%c0_205, %c24_206] : memref<3x27xf32, #tpu.memory_space<vmem>>, vector<3x1xf32>
    %367 = vector.broadcast %366 : vector<3x1xf32> to vector<3x256xf32>
    %368 = vector.broadcast %365 : vector<1x256xf32> to vector<3x256xf32>
    %369 = arith.mulf %367, %368 : vector<3x256xf32>
    %370 = arith.addf %363, %369 : vector<3x256xf32>
    %c5_207 = arith.constant 5 : index
    %c33_208 = arith.constant 33 : index
    %371 = vector.load %arg16[%c5_207, %c33_208] : memref<6x384xf32, #tpu.memory_space<vmem>>, vector<1x256xf32>
    %c0_209 = arith.constant 0 : index
    %c25_210 = arith.constant 25 : index
    %372 = vector.load %arg6[%c0_209, %c25_210] : memref<3x27xf32, #tpu.memory_space<vmem>>, vector<3x1xf32>
    %373 = vector.broadcast %372 : vector<3x1xf32> to vector<3x256xf32>
    %374 = vector.broadcast %371 : vector<1x256xf32> to vector<3x256xf32>
    %375 = arith.mulf %373, %374 : vector<3x256xf32>
    %376 = arith.addf %370, %375 : vector<3x256xf32>
    %c5_211 = arith.constant 5 : index
    %c34_212 = arith.constant 34 : index
    %377 = vector.load %arg16[%c5_211, %c34_212] : memref<6x384xf32, #tpu.memory_space<vmem>>, vector<1x256xf32>
    %378 = arith.mulf %377, %5 : vector<1x256xf32>
    %c0_213 = arith.constant 0 : index
    %c26_214 = arith.constant 26 : index
    %379 = vector.load %arg6[%c0_213, %c26_214] : memref<3x27xf32, #tpu.memory_space<vmem>>, vector<3x1xf32>
    %380 = vector.broadcast %379 : vector<3x1xf32> to vector<3x256xf32>
    %381 = vector.broadcast %378 : vector<1x256xf32> to vector<3x256xf32>
    %382 = arith.mulf %380, %381 : vector<3x256xf32>
    %383 = arith.addf %376, %382 : vector<3x256xf32>
    %c0_215 = arith.constant 0 : index
    %c0_216 = arith.constant 0 : index
    %384 = vector.load %arg7[%c0_215, %c0_216] : memref<3x1xf32, #tpu.memory_space<vmem>>, vector<3x1xf32>
    %385 = vector.broadcast %384 : vector<3x1xf32> to vector<3x256xf32>
    %386 = arith.addf %383, %385 : vector<3x256xf32>
    %c0_217 = arith.constant 0 : index
    %c17_218 = arith.constant 17 : index
    %387 = vector.load %arg15[%c0_217, %c17_218] : memref<6x384xf32, #tpu.memory_space<vmem>>, vector<3x256xf32>
    tpu.vector_store %arg15[%c0_217, %c17_218], %386 {strides = array<i32>} : memref<6x384xf32, #tpu.memory_space<vmem>>, vector<3x256xf32>,
    %cst_219 = arith.constant 0.000000e+00 : f32
    %388 = vector.broadcast %cst_219 : f32 to vector<3x256xf32>
    %c0_220 = arith.constant 0 : index
    %c0_221 = arith.constant 0 : index
    %389 = vector.load %arg15[%c0_220, %c0_221] : memref<6x384xf32, #tpu.memory_space<vmem>>, vector<1x256xf32>
    %390 = arith.mulf %389, %4 : vector<1x256xf32>
    %c0_222 = arith.constant 0 : index
    %c0_223 = arith.constant 0 : index
    %391 = vector.load %arg8[%c0_222, %c0_223] : memref<3x27xf32, #tpu.memory_space<vmem>>, vector<3x1xf32>
    %392 = vector.broadcast %391 : vector<3x1xf32> to vector<3x256xf32>
    %393 = vector.broadcast %390 : vector<1x256xf32> to vector<3x256xf32>
    %394 = arith.mulf %392, %393 : vector<3x256xf32>
    %395 = arith.addf %388, %394 : vector<3x256xf32>
    %c0_224 = arith.constant 0 : index
    %c1_225 = arith.constant 1 : index
    %396 = vector.load %arg15[%c0_224, %c1_225] : memref<6x384xf32, #tpu.memory_space<vmem>>, vector<1x256xf32>
    %c0_226 = arith.constant 0 : index
    %c1_227 = arith.constant 1 : index
    %397 = vector.load %arg8[%c0_226, %c1_227] : memref<3x27xf32, #tpu.memory_space<vmem>>, vector<3x1xf32>
    %398 = vector.broadcast %397 : vector<3x1xf32> to vector<3x256xf32>
    %399 = vector.broadcast %396 : vector<1x256xf32> to vector<3x256xf32>
    %400 = arith.mulf %398, %399 : vector<3x256xf32>
    %401 = arith.addf %395, %400 : vector<3x256xf32>
    %c0_228 = arith.constant 0 : index
    %c2_229 = arith.constant 2 : index
    %402 = vector.load %arg15[%c0_228, %c2_229] : memref<6x384xf32, #tpu.memory_space<vmem>>, vector<1x256xf32>
    %403 = arith.mulf %402, %5 : vector<1x256xf32>
    %c0_230 = arith.constant 0 : index
    %c2_231 = arith.constant 2 : index
    %404 = vector.load %arg8[%c0_230, %c2_231] : memref<3x27xf32, #tpu.memory_space<vmem>>, vector<3x1xf32>
    %405 = vector.broadcast %404 : vector<3x1xf32> to vector<3x256xf32>
    %406 = vector.broadcast %403 : vector<1x256xf32> to vector<3x256xf32>
    %407 = arith.mulf %405, %406 : vector<3x256xf32>
    %408 = arith.addf %401, %407 : vector<3x256xf32>
    %c0_232 = arith.constant 0 : index
    %c16_233 = arith.constant 16 : index
    %409 = vector.load %arg15[%c0_232, %c16_233] : memref<6x384xf32, #tpu.memory_space<vmem>>, vector<1x256xf32>
    %410 = arith.mulf %409, %4 : vector<1x256xf32>
    %c0_234 = arith.constant 0 : index
    %c3_235 = arith.constant 3 : index
    %411 = vector.load %arg8[%c0_234, %c3_235] : memref<3x27xf32, #tpu.memory_space<vmem>>, vector<3x1xf32>
    %412 = vector.broadcast %411 : vector<3x1xf32> to vector<3x256xf32>
    %413 = vector.broadcast %410 : vector<1x256xf32> to vector<3x256xf32>
    %414 = arith.mulf %412, %413 : vector<3x256xf32>
    %415 = arith.addf %408, %414 : vector<3x256xf32>
    %c0_236 = arith.constant 0 : index
    %c17_237 = arith.constant 17 : index
    %416 = vector.load %arg15[%c0_236, %c17_237] : memref<6x384xf32, #tpu.memory_space<vmem>>, vector<1x256xf32>
    %c0_238 = arith.constant 0 : index
    %c4_239 = arith.constant 4 : index
    %417 = vector.load %arg8[%c0_238, %c4_239] : memref<3x27xf32, #tpu.memory_space<vmem>>, vector<3x1xf32>
    %418 = vector.broadcast %417 : vector<3x1xf32> to vector<3x256xf32>
    %419 = vector.broadcast %416 : vector<1x256xf32> to vector<3x256xf32>
    %420 = arith.mulf %418, %419 : vector<3x256xf32>
    %421 = arith.addf %415, %420 : vector<3x256xf32>
    %c0_240 = arith.constant 0 : index
    %c18_241 = arith.constant 18 : index
    %422 = vector.load %arg15[%c0_240, %c18_241] : memref<6x384xf32, #tpu.memory_space<vmem>>, vector<1x256xf32>
    %423 = arith.mulf %422, %5 : vector<1x256xf32>
    %c0_242 = arith.constant 0 : index
    %c5_243 = arith.constant 5 : index
    %424 = vector.load %arg8[%c0_242, %c5_243] : memref<3x27xf32, #tpu.memory_space<vmem>>, vector<3x1xf32>
    %425 = vector.broadcast %424 : vector<3x1xf32> to vector<3x256xf32>
    %426 = vector.broadcast %423 : vector<1x256xf32> to vector<3x256xf32>
    %427 = arith.mulf %425, %426 : vector<3x256xf32>
    %428 = arith.addf %421, %427 : vector<3x256xf32>
    %c0_244 = arith.constant 0 : index
    %c32_245 = arith.constant 32 : index
    %429 = vector.load %arg15[%c0_244, %c32_245] : memref<6x384xf32, #tpu.memory_space<vmem>>, vector<1x256xf32>
    %430 = arith.mulf %429, %4 : vector<1x256xf32>
    %c0_246 = arith.constant 0 : index
    %c6_247 = arith.constant 6 : index
    %431 = vector.load %arg8[%c0_246, %c6_247] : memref<3x27xf32, #tpu.memory_space<vmem>>, vector<3x1xf32>
    %432 = vector.broadcast %431 : vector<3x1xf32> to vector<3x256xf32>
    %433 = vector.broadcast %430 : vector<1x256xf32> to vector<3x256xf32>
    %434 = arith.mulf %432, %433 : vector<3x256xf32>
    %435 = arith.addf %428, %434 : vector<3x256xf32>
    %c0_248 = arith.constant 0 : index
    %c33_249 = arith.constant 33 : index
    %436 = vector.load %arg15[%c0_248, %c33_249] : memref<6x384xf32, #tpu.memory_space<vmem>>, vector<1x256xf32>
    %c0_250 = arith.constant 0 : index
    %c7_251 = arith.constant 7 : index
    %437 = vector.load %arg8[%c0_250, %c7_251] : memref<3x27xf32, #tpu.memory_space<vmem>>, vector<3x1xf32>
    %438 = vector.broadcast %437 : vector<3x1xf32> to vector<3x256xf32>
    %439 = vector.broadcast %436 : vector<1x256xf32> to vector<3x256xf32>
    %440 = arith.mulf %438, %439 : vector<3x256xf32>
    %441 = arith.addf %435, %440 : vector<3x256xf32>
    %c0_252 = arith.constant 0 : index
    %c34_253 = arith.constant 34 : index
    %442 = vector.load %arg15[%c0_252, %c34_253] : memref<6x384xf32, #tpu.memory_space<vmem>>, vector<1x256xf32>
    %443 = arith.mulf %442, %5 : vector<1x256xf32>
    %c0_254 = arith.constant 0 : index
    %c8_255 = arith.constant 8 : index
    %444 = vector.load %arg8[%c0_254, %c8_255] : memref<3x27xf32, #tpu.memory_space<vmem>>, vector<3x1xf32>
    %445 = vector.broadcast %444 : vector<3x1xf32> to vector<3x256xf32>
    %446 = vector.broadcast %443 : vector<1x256xf32> to vector<3x256xf32>
    %447 = arith.mulf %445, %446 : vector<3x256xf32>
    %448 = arith.addf %441, %447 : vector<3x256xf32>
    %c1_256 = arith.constant 1 : index
    %c0_257 = arith.constant 0 : index
    %449 = vector.load %arg15[%c1_256, %c0_257] : memref<6x384xf32, #tpu.memory_space<vmem>>, vector<1x256xf32>
    %450 = arith.mulf %449, %4 : vector<1x256xf32>
    %c0_258 = arith.constant 0 : index
    %c9_259 = arith.constant 9 : index
    %451 = vector.load %arg8[%c0_258, %c9_259] : memref<3x27xf32, #tpu.memory_space<vmem>>, vector<3x1xf32>
    %452 = vector.broadcast %451 : vector<3x1xf32> to vector<3x256xf32>
    %453 = vector.broadcast %450 : vector<1x256xf32> to vector<3x256xf32>
    %454 = arith.mulf %452, %453 : vector<3x256xf32>
    %455 = arith.addf %448, %454 : vector<3x256xf32>
    %c1_260 = arith.constant 1 : index
    %c1_261 = arith.constant 1 : index
    %456 = vector.load %arg15[%c1_260, %c1_261] : memref<6x384xf32, #tpu.memory_space<vmem>>, vector<1x256xf32>
    %c0_262 = arith.constant 0 : index
    %c10_263 = arith.constant 10 : index
    %457 = vector.load %arg8[%c0_262, %c10_263] : memref<3x27xf32, #tpu.memory_space<vmem>>, vector<3x1xf32>
    %458 = vector.broadcast %457 : vector<3x1xf32> to vector<3x256xf32>
    %459 = vector.broadcast %456 : vector<1x256xf32> to vector<3x256xf32>
    %460 = arith.mulf %458, %459 : vector<3x256xf32>
    %461 = arith.addf %455, %460 : vector<3x256xf32>
    %c1_264 = arith.constant 1 : index
    %c2_265 = arith.constant 2 : index
    %462 = vector.load %arg15[%c1_264, %c2_265] : memref<6x384xf32, #tpu.memory_space<vmem>>, vector<1x256xf32>
    %463 = arith.mulf %462, %5 : vector<1x256xf32>
    %c0_266 = arith.constant 0 : index
    %c11_267 = arith.constant 11 : index
    %464 = vector.load %arg8[%c0_266, %c11_267] : memref<3x27xf32, #tpu.memory_space<vmem>>, vector<3x1xf32>
    %465 = vector.broadcast %464 : vector<3x1xf32> to vector<3x256xf32>
    %466 = vector.broadcast %463 : vector<1x256xf32> to vector<3x256xf32>
    %467 = arith.mulf %465, %466 : vector<3x256xf32>
    %468 = arith.addf %461, %467 : vector<3x256xf32>
    %c1_268 = arith.constant 1 : index
    %c16_269 = arith.constant 16 : index
    %469 = vector.load %arg15[%c1_268, %c16_269] : memref<6x384xf32, #tpu.memory_space<vmem>>, vector<1x256xf32>
    %470 = arith.mulf %469, %4 : vector<1x256xf32>
    %c0_270 = arith.constant 0 : index
    %c12_271 = arith.constant 12 : index
    %471 = vector.load %arg8[%c0_270, %c12_271] : memref<3x27xf32, #tpu.memory_space<vmem>>, vector<3x1xf32>
    %472 = vector.broadcast %471 : vector<3x1xf32> to vector<3x256xf32>
    %473 = vector.broadcast %470 : vector<1x256xf32> to vector<3x256xf32>
    %474 = arith.mulf %472, %473 : vector<3x256xf32>
    %475 = arith.addf %468, %474 : vector<3x256xf32>
    %c1_272 = arith.constant 1 : index
    %c17_273 = arith.constant 17 : index
    %476 = vector.load %arg15[%c1_272, %c17_273] : memref<6x384xf32, #tpu.memory_space<vmem>>, vector<1x256xf32>
    %c0_274 = arith.constant 0 : index
    %c13_275 = arith.constant 13 : index
    %477 = vector.load %arg8[%c0_274, %c13_275] : memref<3x27xf32, #tpu.memory_space<vmem>>, vector<3x1xf32>
    %478 = vector.broadcast %477 : vector<3x1xf32> to vector<3x256xf32>
    %479 = vector.broadcast %476 : vector<1x256xf32> to vector<3x256xf32>
    %480 = arith.mulf %478, %479 : vector<3x256xf32>
    %481 = arith.addf %475, %480 : vector<3x256xf32>
    %c1_276 = arith.constant 1 : index
    %c18_277 = arith.constant 18 : index
    %482 = vector.load %arg15[%c1_276, %c18_277] : memref<6x384xf32, #tpu.memory_space<vmem>>, vector<1x256xf32>
    %483 = arith.mulf %482, %5 : vector<1x256xf32>
    %c0_278 = arith.constant 0 : index
    %c14_279 = arith.constant 14 : index
    %484 = vector.load %arg8[%c0_278, %c14_279] : memref<3x27xf32, #tpu.memory_space<vmem>>, vector<3x1xf32>
    %485 = vector.broadcast %484 : vector<3x1xf32> to vector<3x256xf32>
    %486 = vector.broadcast %483 : vector<1x256xf32> to vector<3x256xf32>
    %487 = arith.mulf %485, %486 : vector<3x256xf32>
    %488 = arith.addf %481, %487 : vector<3x256xf32>
    %c1_280 = arith.constant 1 : index
    %c32_281 = arith.constant 32 : index
    %489 = vector.load %arg15[%c1_280, %c32_281] : memref<6x384xf32, #tpu.memory_space<vmem>>, vector<1x256xf32>
    %490 = arith.mulf %489, %4 : vector<1x256xf32>
    %c0_282 = arith.constant 0 : index
    %c15_283 = arith.constant 15 : index
    %491 = vector.load %arg8[%c0_282, %c15_283] : memref<3x27xf32, #tpu.memory_space<vmem>>, vector<3x1xf32>
    %492 = vector.broadcast %491 : vector<3x1xf32> to vector<3x256xf32>
    %493 = vector.broadcast %490 : vector<1x256xf32> to vector<3x256xf32>
    %494 = arith.mulf %492, %493 : vector<3x256xf32>
    %495 = arith.addf %488, %494 : vector<3x256xf32>
    %c1_284 = arith.constant 1 : index
    %c33_285 = arith.constant 33 : index
    %496 = vector.load %arg15[%c1_284, %c33_285] : memref<6x384xf32, #tpu.memory_space<vmem>>, vector<1x256xf32>
    %c0_286 = arith.constant 0 : index
    %c16_287 = arith.constant 16 : index
    %497 = vector.load %arg8[%c0_286, %c16_287] : memref<3x27xf32, #tpu.memory_space<vmem>>, vector<3x1xf32>
    %498 = vector.broadcast %497 : vector<3x1xf32> to vector<3x256xf32>
    %499 = vector.broadcast %496 : vector<1x256xf32> to vector<3x256xf32>
    %500 = arith.mulf %498, %499 : vector<3x256xf32>
    %501 = arith.addf %495, %500 : vector<3x256xf32>
    %c1_288 = arith.constant 1 : index
    %c34_289 = arith.constant 34 : index
    %502 = vector.load %arg15[%c1_288, %c34_289] : memref<6x384xf32, #tpu.memory_space<vmem>>, vector<1x256xf32>
    %503 = arith.mulf %502, %5 : vector<1x256xf32>
    %c0_290 = arith.constant 0 : index
    %c17_291 = arith.constant 17 : index
    %504 = vector.load %arg8[%c0_290, %c17_291] : memref<3x27xf32, #tpu.memory_space<vmem>>, vector<3x1xf32>
    %505 = vector.broadcast %504 : vector<3x1xf32> to vector<3x256xf32>
    %506 = vector.broadcast %503 : vector<1x256xf32> to vector<3x256xf32>
    %507 = arith.mulf %505, %506 : vector<3x256xf32>
    %508 = arith.addf %501, %507 : vector<3x256xf32>
    %c2_292 = arith.constant 2 : index
    %c0_293 = arith.constant 0 : index
    %509 = vector.load %arg15[%c2_292, %c0_293] : memref<6x384xf32, #tpu.memory_space<vmem>>, vector<1x256xf32>
    %510 = arith.mulf %509, %4 : vector<1x256xf32>
    %c0_294 = arith.constant 0 : index
    %c18_295 = arith.constant 18 : index
    %511 = vector.load %arg8[%c0_294, %c18_295] : memref<3x27xf32, #tpu.memory_space<vmem>>, vector<3x1xf32>
    %512 = vector.broadcast %511 : vector<3x1xf32> to vector<3x256xf32>
    %513 = vector.broadcast %510 : vector<1x256xf32> to vector<3x256xf32>
    %514 = arith.mulf %512, %513 : vector<3x256xf32>
    %515 = arith.addf %508, %514 : vector<3x256xf32>
    %c2_296 = arith.constant 2 : index
    %c1_297 = arith.constant 1 : index
    %516 = vector.load %arg15[%c2_296, %c1_297] : memref<6x384xf32, #tpu.memory_space<vmem>>, vector<1x256xf32>
    %c0_298 = arith.constant 0 : index
    %c19_299 = arith.constant 19 : index
    %517 = vector.load %arg8[%c0_298, %c19_299] : memref<3x27xf32, #tpu.memory_space<vmem>>, vector<3x1xf32>
    %518 = vector.broadcast %517 : vector<3x1xf32> to vector<3x256xf32>
    %519 = vector.broadcast %516 : vector<1x256xf32> to vector<3x256xf32>
    %520 = arith.mulf %518, %519 : vector<3x256xf32>
    %521 = arith.addf %515, %520 : vector<3x256xf32>
    %c2_300 = arith.constant 2 : index
    %c2_301 = arith.constant 2 : index
    %522 = vector.load %arg15[%c2_300, %c2_301] : memref<6x384xf32, #tpu.memory_space<vmem>>, vector<1x256xf32>
    %523 = arith.mulf %522, %5 : vector<1x256xf32>
    %c0_302 = arith.constant 0 : index
    %c20_303 = arith.constant 20 : index
    %524 = vector.load %arg8[%c0_302, %c20_303] : memref<3x27xf32, #tpu.memory_space<vmem>>, vector<3x1xf32>
    %525 = vector.broadcast %524 : vector<3x1xf32> to vector<3x256xf32>
    %526 = vector.broadcast %523 : vector<1x256xf32> to vector<3x256xf32>
    %527 = arith.mulf %525, %526 : vector<3x256xf32>
    %528 = arith.addf %521, %527 : vector<3x256xf32>
    %c2_304 = arith.constant 2 : index
    %c16_305 = arith.constant 16 : index
    %529 = vector.load %arg15[%c2_304, %c16_305] : memref<6x384xf32, #tpu.memory_space<vmem>>, vector<1x256xf32>
    %530 = arith.mulf %529, %4 : vector<1x256xf32>
    %c0_306 = arith.constant 0 : index
    %c21_307 = arith.constant 21 : index
    %531 = vector.load %arg8[%c0_306, %c21_307] : memref<3x27xf32, #tpu.memory_space<vmem>>, vector<3x1xf32>
    %532 = vector.broadcast %531 : vector<3x1xf32> to vector<3x256xf32>
    %533 = vector.broadcast %530 : vector<1x256xf32> to vector<3x256xf32>
    %534 = arith.mulf %532, %533 : vector<3x256xf32>
    %535 = arith.addf %528, %534 : vector<3x256xf32>
    %c2_308 = arith.constant 2 : index
    %c17_309 = arith.constant 17 : index
    %536 = vector.load %arg15[%c2_308, %c17_309] : memref<6x384xf32, #tpu.memory_space<vmem>>, vector<1x256xf32>
    %c0_310 = arith.constant 0 : index
    %c22_311 = arith.constant 22 : index
    %537 = vector.load %arg8[%c0_310, %c22_311] : memref<3x27xf32, #tpu.memory_space<vmem>>, vector<3x1xf32>
    %538 = vector.broadcast %537 : vector<3x1xf32> to vector<3x256xf32>
    %539 = vector.broadcast %536 : vector<1x256xf32> to vector<3x256xf32>
    %540 = arith.mulf %538, %539 : vector<3x256xf32>
    %541 = arith.addf %535, %540 : vector<3x256xf32>
    %c2_312 = arith.constant 2 : index
    %c18_313 = arith.constant 18 : index
    %542 = vector.load %arg15[%c2_312, %c18_313] : memref<6x384xf32, #tpu.memory_space<vmem>>, vector<1x256xf32>
    %543 = arith.mulf %542, %5 : vector<1x256xf32>
    %c0_314 = arith.constant 0 : index
    %c23_315 = arith.constant 23 : index
    %544 = vector.load %arg8[%c0_314, %c23_315] : memref<3x27xf32, #tpu.memory_space<vmem>>, vector<3x1xf32>
    %545 = vector.broadcast %544 : vector<3x1xf32> to vector<3x256xf32>
    %546 = vector.broadcast %543 : vector<1x256xf32> to vector<3x256xf32>
    %547 = arith.mulf %545, %546 : vector<3x256xf32>
    %548 = arith.addf %541, %547 : vector<3x256xf32>
    %c2_316 = arith.constant 2 : index
    %c32_317 = arith.constant 32 : index
    %549 = vector.load %arg15[%c2_316, %c32_317] : memref<6x384xf32, #tpu.memory_space<vmem>>, vector<1x256xf32>
    %550 = arith.mulf %549, %4 : vector<1x256xf32>
    %c0_318 = arith.constant 0 : index
    %c24_319 = arith.constant 24 : index
    %551 = vector.load %arg8[%c0_318, %c24_319] : memref<3x27xf32, #tpu.memory_space<vmem>>, vector<3x1xf32>
    %552 = vector.broadcast %551 : vector<3x1xf32> to vector<3x256xf32>
    %553 = vector.broadcast %550 : vector<1x256xf32> to vector<3x256xf32>
    %554 = arith.mulf %552, %553 : vector<3x256xf32>
    %555 = arith.addf %548, %554 : vector<3x256xf32>
    %c2_320 = arith.constant 2 : index
    %c33_321 = arith.constant 33 : index
    %556 = vector.load %arg15[%c2_320, %c33_321] : memref<6x384xf32, #tpu.memory_space<vmem>>, vector<1x256xf32>
    %c0_322 = arith.constant 0 : index
    %c25_323 = arith.constant 25 : index
    %557 = vector.load %arg8[%c0_322, %c25_323] : memref<3x27xf32, #tpu.memory_space<vmem>>, vector<3x1xf32>
    %558 = vector.broadcast %557 : vector<3x1xf32> to vector<3x256xf32>
    %559 = vector.broadcast %556 : vector<1x256xf32> to vector<3x256xf32>
    %560 = arith.mulf %558, %559 : vector<3x256xf32>
    %561 = arith.addf %555, %560 : vector<3x256xf32>
    %c2_324 = arith.constant 2 : index
    %c34_325 = arith.constant 34 : index
    %562 = vector.load %arg15[%c2_324, %c34_325] : memref<6x384xf32, #tpu.memory_space<vmem>>, vector<1x256xf32>
    %563 = arith.mulf %562, %5 : vector<1x256xf32>
    %c0_326 = arith.constant 0 : index
    %c26_327 = arith.constant 26 : index
    %564 = vector.load %arg8[%c0_326, %c26_327] : memref<3x27xf32, #tpu.memory_space<vmem>>, vector<3x1xf32>
    %565 = vector.broadcast %564 : vector<3x1xf32> to vector<3x256xf32>
    %566 = vector.broadcast %563 : vector<1x256xf32> to vector<3x256xf32>
    %567 = arith.mulf %565, %566 : vector<3x256xf32>
    %568 = arith.addf %561, %567 : vector<3x256xf32>
    %c0_328 = arith.constant 0 : index
    %c0_329 = arith.constant 0 : index
    %569 = vector.load %arg9[%c0_328, %c0_329] : memref<3x1xf32, #tpu.memory_space<vmem>>, vector<3x1xf32>
    %570 = vector.broadcast %569 : vector<3x1xf32> to vector<3x256xf32>
    %571 = arith.addf %568, %570 : vector<3x256xf32>
    %c0_330 = arith.constant 0 : index
    %c9_331 = arith.constant 9 : index
    %c0_332 = arith.constant 0 : index
    %572 = vector.load %arg14[%c0_330, %c9_331, %c0_332] : memref<1x15x256xf32, #tpu.memory_space<vmem>>, vector<1x3x256xf32>
    %573 = vector.shape_cast %572 : vector<1x3x256xf32> to vector<3x256xf32>
    %574 = vector.shape_cast %571 : vector<3x256xf32> to vector<1x3x256xf32>
    tpu.vector_store %arg14[%c0_330, %c9_331, %c0_332], %574 {strides = array<i32>} : memref<1x15x256xf32, #tpu.memory_space<vmem>>, vector<1x3x256xf32>,
    %c0_333 = arith.constant 0 : index
    %c17_334 = arith.constant 17 : index
    %575 = vector.load %arg16[%c0_333, %c17_334] : memref<6x384xf32, #tpu.memory_space<vmem>>, vector<3x256xf32>
    tpu.vector_store %arg16[%c0_333, %c17_334], %571 {strides = array<i32>} : memref<6x384xf32, #tpu.memory_space<vmem>>, vector<3x256xf32>,
    %cst_335 = arith.constant 0.000000e+00 : f32
    %576 = vector.broadcast %cst_335 : f32 to vector<6x256xf32>
    %c0_336 = arith.constant 0 : index
    %c0_337 = arith.constant 0 : index
    %577 = vector.load %arg16[%c0_336, %c0_337] : memref<6x384xf32, #tpu.memory_space<vmem>>, vector<1x256xf32>
    %578 = arith.mulf %577, %4 : vector<1x256xf32>
    %c0_338 = arith.constant 0 : index
    %c0_339 = arith.constant 0 : index
    %579 = vector.load %arg10[%c0_338, %c0_339] : memref<6x54xf32, #tpu.memory_space<vmem>>, vector<6x1xf32>
    %580 = vector.broadcast %579 : vector<6x1xf32> to vector<6x256xf32>
    %581 = vector.broadcast %578 : vector<1x256xf32> to vector<6x256xf32>
    %582 = arith.mulf %580, %581 : vector<6x256xf32>
    %583 = arith.addf %576, %582 : vector<6x256xf32>
    %c0_340 = arith.constant 0 : index
    %c1_341 = arith.constant 1 : index
    %584 = vector.load %arg16[%c0_340, %c1_341] : memref<6x384xf32, #tpu.memory_space<vmem>>, vector<1x256xf32>
    %c0_342 = arith.constant 0 : index
    %c1_343 = arith.constant 1 : index
    %585 = vector.load %arg10[%c0_342, %c1_343] : memref<6x54xf32, #tpu.memory_space<vmem>>, vector<6x1xf32>
    %586 = vector.broadcast %585 : vector<6x1xf32> to vector<6x256xf32>
    %587 = vector.broadcast %584 : vector<1x256xf32> to vector<6x256xf32>
    %588 = arith.mulf %586, %587 : vector<6x256xf32>
    %589 = arith.addf %583, %588 : vector<6x256xf32>
    %c0_344 = arith.constant 0 : index
    %c2_345 = arith.constant 2 : index
    %590 = vector.load %arg16[%c0_344, %c2_345] : memref<6x384xf32, #tpu.memory_space<vmem>>, vector<1x256xf32>
    %591 = arith.mulf %590, %5 : vector<1x256xf32>
    %c0_346 = arith.constant 0 : index
    %c2_347 = arith.constant 2 : index
    %592 = vector.load %arg10[%c0_346, %c2_347] : memref<6x54xf32, #tpu.memory_space<vmem>>, vector<6x1xf32>
    %593 = vector.broadcast %592 : vector<6x1xf32> to vector<6x256xf32>
    %594 = vector.broadcast %591 : vector<1x256xf32> to vector<6x256xf32>
    %595 = arith.mulf %593, %594 : vector<6x256xf32>
    %596 = arith.addf %589, %595 : vector<6x256xf32>
    %c0_348 = arith.constant 0 : index
    %c16_349 = arith.constant 16 : index
    %597 = vector.load %arg16[%c0_348, %c16_349] : memref<6x384xf32, #tpu.memory_space<vmem>>, vector<1x256xf32>
    %598 = arith.mulf %597, %4 : vector<1x256xf32>
    %c0_350 = arith.constant 0 : index
    %c3_351 = arith.constant 3 : index
    %599 = vector.load %arg10[%c0_350, %c3_351] : memref<6x54xf32, #tpu.memory_space<vmem>>, vector<6x1xf32>
    %600 = vector.broadcast %599 : vector<6x1xf32> to vector<6x256xf32>
    %601 = vector.broadcast %598 : vector<1x256xf32> to vector<6x256xf32>
    %602 = arith.mulf %600, %601 : vector<6x256xf32>
    %603 = arith.addf %596, %602 : vector<6x256xf32>
    %c0_352 = arith.constant 0 : index
    %c17_353 = arith.constant 17 : index
    %604 = vector.load %arg16[%c0_352, %c17_353] : memref<6x384xf32, #tpu.memory_space<vmem>>, vector<1x256xf32>
    %c0_354 = arith.constant 0 : index
    %c4_355 = arith.constant 4 : index
    %605 = vector.load %arg10[%c0_354, %c4_355] : memref<6x54xf32, #tpu.memory_space<vmem>>, vector<6x1xf32>
    %606 = vector.broadcast %605 : vector<6x1xf32> to vector<6x256xf32>
    %607 = vector.broadcast %604 : vector<1x256xf32> to vector<6x256xf32>
    %608 = arith.mulf %606, %607 : vector<6x256xf32>
    %609 = arith.addf %603, %608 : vector<6x256xf32>
    %c0_356 = arith.constant 0 : index
    %c18_357 = arith.constant 18 : index
    %610 = vector.load %arg16[%c0_356, %c18_357] : memref<6x384xf32, #tpu.memory_space<vmem>>, vector<1x256xf32>
    %611 = arith.mulf %610, %5 : vector<1x256xf32>
    %c0_358 = arith.constant 0 : index
    %c5_359 = arith.constant 5 : index
    %612 = vector.load %arg10[%c0_358, %c5_359] : memref<6x54xf32, #tpu.memory_space<vmem>>, vector<6x1xf32>
    %613 = vector.broadcast %612 : vector<6x1xf32> to vector<6x256xf32>
    %614 = vector.broadcast %611 : vector<1x256xf32> to vector<6x256xf32>
    %615 = arith.mulf %613, %614 : vector<6x256xf32>
    %616 = arith.addf %609, %615 : vector<6x256xf32>
    %c0_360 = arith.constant 0 : index
    %c32_361 = arith.constant 32 : index
    %617 = vector.load %arg16[%c0_360, %c32_361] : memref<6x384xf32, #tpu.memory_space<vmem>>, vector<1x256xf32>
    %618 = arith.mulf %617, %4 : vector<1x256xf32>
    %c0_362 = arith.constant 0 : index
    %c6_363 = arith.constant 6 : index
    %619 = vector.load %arg10[%c0_362, %c6_363] : memref<6x54xf32, #tpu.memory_space<vmem>>, vector<6x1xf32>
    %620 = vector.broadcast %619 : vector<6x1xf32> to vector<6x256xf32>
    %621 = vector.broadcast %618 : vector<1x256xf32> to vector<6x256xf32>
    %622 = arith.mulf %620, %621 : vector<6x256xf32>
    %623 = arith.addf %616, %622 : vector<6x256xf32>
    %c0_364 = arith.constant 0 : index
    %c33_365 = arith.constant 33 : index
    %624 = vector.load %arg16[%c0_364, %c33_365] : memref<6x384xf32, #tpu.memory_space<vmem>>, vector<1x256xf32>
    %c0_366 = arith.constant 0 : index
    %c7_367 = arith.constant 7 : index
    %625 = vector.load %arg10[%c0_366, %c7_367] : memref<6x54xf32, #tpu.memory_space<vmem>>, vector<6x1xf32>
    %626 = vector.broadcast %625 : vector<6x1xf32> to vector<6x256xf32>
    %627 = vector.broadcast %624 : vector<1x256xf32> to vector<6x256xf32>
    %628 = arith.mulf %626, %627 : vector<6x256xf32>
    %629 = arith.addf %623, %628 : vector<6x256xf32>
    %c0_368 = arith.constant 0 : index
    %c34_369 = arith.constant 34 : index
    %630 = vector.load %arg16[%c0_368, %c34_369] : memref<6x384xf32, #tpu.memory_space<vmem>>, vector<1x256xf32>
    %631 = arith.mulf %630, %5 : vector<1x256xf32>
    %c0_370 = arith.constant 0 : index
    %c8_371 = arith.constant 8 : index
    %632 = vector.load %arg10[%c0_370, %c8_371] : memref<6x54xf32, #tpu.memory_space<vmem>>, vector<6x1xf32>
    %633 = vector.broadcast %632 : vector<6x1xf32> to vector<6x256xf32>
    %634 = vector.broadcast %631 : vector<1x256xf32> to vector<6x256xf32>
    %635 = arith.mulf %633, %634 : vector<6x256xf32>
    %636 = arith.addf %629, %635 : vector<6x256xf32>
    %c1_372 = arith.constant 1 : index
    %c0_373 = arith.constant 0 : index
    %637 = vector.load %arg16[%c1_372, %c0_373] : memref<6x384xf32, #tpu.memory_space<vmem>>, vector<1x256xf32>
    %638 = arith.mulf %637, %4 : vector<1x256xf32>
    %c0_374 = arith.constant 0 : index
    %c9_375 = arith.constant 9 : index
    %639 = vector.load %arg10[%c0_374, %c9_375] : memref<6x54xf32, #tpu.memory_space<vmem>>, vector<6x1xf32>
    %640 = vector.broadcast %639 : vector<6x1xf32> to vector<6x256xf32>
    %641 = vector.broadcast %638 : vector<1x256xf32> to vector<6x256xf32>
    %642 = arith.mulf %640, %641 : vector<6x256xf32>
    %643 = arith.addf %636, %642 : vector<6x256xf32>
    %c1_376 = arith.constant 1 : index
    %c1_377 = arith.constant 1 : index
    %644 = vector.load %arg16[%c1_376, %c1_377] : memref<6x384xf32, #tpu.memory_space<vmem>>, vector<1x256xf32>
    %c0_378 = arith.constant 0 : index
    %c10_379 = arith.constant 10 : index
    %645 = vector.load %arg10[%c0_378, %c10_379] : memref<6x54xf32, #tpu.memory_space<vmem>>, vector<6x1xf32>
    %646 = vector.broadcast %645 : vector<6x1xf32> to vector<6x256xf32>
    %647 = vector.broadcast %644 : vector<1x256xf32> to vector<6x256xf32>
    %648 = arith.mulf %646, %647 : vector<6x256xf32>
    %649 = arith.addf %643, %648 : vector<6x256xf32>
    %c1_380 = arith.constant 1 : index
    %c2_381 = arith.constant 2 : index
    %650 = vector.load %arg16[%c1_380, %c2_381] : memref<6x384xf32, #tpu.memory_space<vmem>>, vector<1x256xf32>
    %651 = arith.mulf %650, %5 : vector<1x256xf32>
    %c0_382 = arith.constant 0 : index
    %c11_383 = arith.constant 11 : index
    %652 = vector.load %arg10[%c0_382, %c11_383] : memref<6x54xf32, #tpu.memory_space<vmem>>, vector<6x1xf32>
    %653 = vector.broadcast %652 : vector<6x1xf32> to vector<6x256xf32>
    %654 = vector.broadcast %651 : vector<1x256xf32> to vector<6x256xf32>
    %655 = arith.mulf %653, %654 : vector<6x256xf32>
    %656 = arith.addf %649, %655 : vector<6x256xf32>
    %c1_384 = arith.constant 1 : index
    %c16_385 = arith.constant 16 : index
    %657 = vector.load %arg16[%c1_384, %c16_385] : memref<6x384xf32, #tpu.memory_space<vmem>>, vector<1x256xf32>
    %658 = arith.mulf %657, %4 : vector<1x256xf32>
    %c0_386 = arith.constant 0 : index
    %c12_387 = arith.constant 12 : index
    %659 = vector.load %arg10[%c0_386, %c12_387] : memref<6x54xf32, #tpu.memory_space<vmem>>, vector<6x1xf32>
    %660 = vector.broadcast %659 : vector<6x1xf32> to vector<6x256xf32>
    %661 = vector.broadcast %658 : vector<1x256xf32> to vector<6x256xf32>
    %662 = arith.mulf %660, %661 : vector<6x256xf32>
    %663 = arith.addf %656, %662 : vector<6x256xf32>
    %c1_388 = arith.constant 1 : index
    %c17_389 = arith.constant 17 : index
    %664 = vector.load %arg16[%c1_388, %c17_389] : memref<6x384xf32, #tpu.memory_space<vmem>>, vector<1x256xf32>
    %c0_390 = arith.constant 0 : index
    %c13_391 = arith.constant 13 : index
    %665 = vector.load %arg10[%c0_390, %c13_391] : memref<6x54xf32, #tpu.memory_space<vmem>>, vector<6x1xf32>
    %666 = vector.broadcast %665 : vector<6x1xf32> to vector<6x256xf32>
    %667 = vector.broadcast %664 : vector<1x256xf32> to vector<6x256xf32>
    %668 = arith.mulf %666, %667 : vector<6x256xf32>
    %669 = arith.addf %663, %668 : vector<6x256xf32>
    %c1_392 = arith.constant 1 : index
    %c18_393 = arith.constant 18 : index
    %670 = vector.load %arg16[%c1_392, %c18_393] : memref<6x384xf32, #tpu.memory_space<vmem>>, vector<1x256xf32>
    %671 = arith.mulf %670, %5 : vector<1x256xf32>
    %c0_394 = arith.constant 0 : index
    %c14_395 = arith.constant 14 : index
    %672 = vector.load %arg10[%c0_394, %c14_395] : memref<6x54xf32, #tpu.memory_space<vmem>>, vector<6x1xf32>
    %673 = vector.broadcast %672 : vector<6x1xf32> to vector<6x256xf32>
    %674 = vector.broadcast %671 : vector<1x256xf32> to vector<6x256xf32>
    %675 = arith.mulf %673, %674 : vector<6x256xf32>
    %676 = arith.addf %669, %675 : vector<6x256xf32>
    %c1_396 = arith.constant 1 : index
    %c32_397 = arith.constant 32 : index
    %677 = vector.load %arg16[%c1_396, %c32_397] : memref<6x384xf32, #tpu.memory_space<vmem>>, vector<1x256xf32>
    %678 = arith.mulf %677, %4 : vector<1x256xf32>
    %c0_398 = arith.constant 0 : index
    %c15_399 = arith.constant 15 : index
    %679 = vector.load %arg10[%c0_398, %c15_399] : memref<6x54xf32, #tpu.memory_space<vmem>>, vector<6x1xf32>
    %680 = vector.broadcast %679 : vector<6x1xf32> to vector<6x256xf32>
    %681 = vector.broadcast %678 : vector<1x256xf32> to vector<6x256xf32>
    %682 = arith.mulf %680, %681 : vector<6x256xf32>
    %683 = arith.addf %676, %682 : vector<6x256xf32>
    %c1_400 = arith.constant 1 : index
    %c33_401 = arith.constant 33 : index
    %684 = vector.load %arg16[%c1_400, %c33_401] : memref<6x384xf32, #tpu.memory_space<vmem>>, vector<1x256xf32>
    %c0_402 = arith.constant 0 : index
    %c16_403 = arith.constant 16 : index
    %685 = vector.load %arg10[%c0_402, %c16_403] : memref<6x54xf32, #tpu.memory_space<vmem>>, vector<6x1xf32>
    %686 = vector.broadcast %685 : vector<6x1xf32> to vector<6x256xf32>
    %687 = vector.broadcast %684 : vector<1x256xf32> to vector<6x256xf32>
    %688 = arith.mulf %686, %687 : vector<6x256xf32>
    %689 = arith.addf %683, %688 : vector<6x256xf32>
    %c1_404 = arith.constant 1 : index
    %c34_405 = arith.constant 34 : index
    %690 = vector.load %arg16[%c1_404, %c34_405] : memref<6x384xf32, #tpu.memory_space<vmem>>, vector<1x256xf32>
    %691 = arith.mulf %690, %5 : vector<1x256xf32>
    %c0_406 = arith.constant 0 : index
    %c17_407 = arith.constant 17 : index
    %692 = vector.load %arg10[%c0_406, %c17_407] : memref<6x54xf32, #tpu.memory_space<vmem>>, vector<6x1xf32>
    %693 = vector.broadcast %692 : vector<6x1xf32> to vector<6x256xf32>
    %694 = vector.broadcast %691 : vector<1x256xf32> to vector<6x256xf32>
    %695 = arith.mulf %693, %694 : vector<6x256xf32>
    %696 = arith.addf %689, %695 : vector<6x256xf32>
    %c2_408 = arith.constant 2 : index
    %c0_409 = arith.constant 0 : index
    %697 = vector.load %arg16[%c2_408, %c0_409] : memref<6x384xf32, #tpu.memory_space<vmem>>, vector<1x256xf32>
    %698 = arith.mulf %697, %4 : vector<1x256xf32>
    %c0_410 = arith.constant 0 : index
    %c18_411 = arith.constant 18 : index
    %699 = vector.load %arg10[%c0_410, %c18_411] : memref<6x54xf32, #tpu.memory_space<vmem>>, vector<6x1xf32>
    %700 = vector.broadcast %699 : vector<6x1xf32> to vector<6x256xf32>
    %701 = vector.broadcast %698 : vector<1x256xf32> to vector<6x256xf32>
    %702 = arith.mulf %700, %701 : vector<6x256xf32>
    %703 = arith.addf %696, %702 : vector<6x256xf32>
    %c2_412 = arith.constant 2 : index
    %c1_413 = arith.constant 1 : index
    %704 = vector.load %arg16[%c2_412, %c1_413] : memref<6x384xf32, #tpu.memory_space<vmem>>, vector<1x256xf32>
    %c0_414 = arith.constant 0 : index
    %c19_415 = arith.constant 19 : index
    %705 = vector.load %arg10[%c0_414, %c19_415] : memref<6x54xf32, #tpu.memory_space<vmem>>, vector<6x1xf32>
    %706 = vector.broadcast %705 : vector<6x1xf32> to vector<6x256xf32>
    %707 = vector.broadcast %704 : vector<1x256xf32> to vector<6x256xf32>
    %708 = arith.mulf %706, %707 : vector<6x256xf32>
    %709 = arith.addf %703, %708 : vector<6x256xf32>
    %c2_416 = arith.constant 2 : index
    %c2_417 = arith.constant 2 : index
    %710 = vector.load %arg16[%c2_416, %c2_417] : memref<6x384xf32, #tpu.memory_space<vmem>>, vector<1x256xf32>
    %711 = arith.mulf %710, %5 : vector<1x256xf32>
    %c0_418 = arith.constant 0 : index
    %c20_419 = arith.constant 20 : index
    %712 = vector.load %arg10[%c0_418, %c20_419] : memref<6x54xf32, #tpu.memory_space<vmem>>, vector<6x1xf32>
    %713 = vector.broadcast %712 : vector<6x1xf32> to vector<6x256xf32>
    %714 = vector.broadcast %711 : vector<1x256xf32> to vector<6x256xf32>
    %715 = arith.mulf %713, %714 : vector<6x256xf32>
    %716 = arith.addf %709, %715 : vector<6x256xf32>
    %c2_420 = arith.constant 2 : index
    %c16_421 = arith.constant 16 : index
    %717 = vector.load %arg16[%c2_420, %c16_421] : memref<6x384xf32, #tpu.memory_space<vmem>>, vector<1x256xf32>
    %718 = arith.mulf %717, %4 : vector<1x256xf32>
    %c0_422 = arith.constant 0 : index
    %c21_423 = arith.constant 21 : index
    %719 = vector.load %arg10[%c0_422, %c21_423] : memref<6x54xf32, #tpu.memory_space<vmem>>, vector<6x1xf32>
    %720 = vector.broadcast %719 : vector<6x1xf32> to vector<6x256xf32>
    %721 = vector.broadcast %718 : vector<1x256xf32> to vector<6x256xf32>
    %722 = arith.mulf %720, %721 : vector<6x256xf32>
    %723 = arith.addf %716, %722 : vector<6x256xf32>
    %c2_424 = arith.constant 2 : index
    %c17_425 = arith.constant 17 : index
    %724 = vector.load %arg16[%c2_424, %c17_425] : memref<6x384xf32, #tpu.memory_space<vmem>>, vector<1x256xf32>
    %c0_426 = arith.constant 0 : index
    %c22_427 = arith.constant 22 : index
    %725 = vector.load %arg10[%c0_426, %c22_427] : memref<6x54xf32, #tpu.memory_space<vmem>>, vector<6x1xf32>
    %726 = vector.broadcast %725 : vector<6x1xf32> to vector<6x256xf32>
    %727 = vector.broadcast %724 : vector<1x256xf32> to vector<6x256xf32>
    %728 = arith.mulf %726, %727 : vector<6x256xf32>
    %729 = arith.addf %723, %728 : vector<6x256xf32>
    %c2_428 = arith.constant 2 : index
    %c18_429 = arith.constant 18 : index
    %730 = vector.load %arg16[%c2_428, %c18_429] : memref<6x384xf32, #tpu.memory_space<vmem>>, vector<1x256xf32>
    %731 = arith.mulf %730, %5 : vector<1x256xf32>
    %c0_430 = arith.constant 0 : index
    %c23_431 = arith.constant 23 : index
    %732 = vector.load %arg10[%c0_430, %c23_431] : memref<6x54xf32, #tpu.memory_space<vmem>>, vector<6x1xf32>
    %733 = vector.broadcast %732 : vector<6x1xf32> to vector<6x256xf32>
    %734 = vector.broadcast %731 : vector<1x256xf32> to vector<6x256xf32>
    %735 = arith.mulf %733, %734 : vector<6x256xf32>
    %736 = arith.addf %729, %735 : vector<6x256xf32>
    %c2_432 = arith.constant 2 : index
    %c32_433 = arith.constant 32 : index
    %737 = vector.load %arg16[%c2_432, %c32_433] : memref<6x384xf32, #tpu.memory_space<vmem>>, vector<1x256xf32>
    %738 = arith.mulf %737, %4 : vector<1x256xf32>
    %c0_434 = arith.constant 0 : index
    %c24_435 = arith.constant 24 : index
    %739 = vector.load %arg10[%c0_434, %c24_435] : memref<6x54xf32, #tpu.memory_space<vmem>>, vector<6x1xf32>
    %740 = vector.broadcast %739 : vector<6x1xf32> to vector<6x256xf32>
    %741 = vector.broadcast %738 : vector<1x256xf32> to vector<6x256xf32>
    %742 = arith.mulf %740, %741 : vector<6x256xf32>
    %743 = arith.addf %736, %742 : vector<6x256xf32>
    %c2_436 = arith.constant 2 : index
    %c33_437 = arith.constant 33 : index
    %744 = vector.load %arg16[%c2_436, %c33_437] : memref<6x384xf32, #tpu.memory_space<vmem>>, vector<1x256xf32>
    %c0_438 = arith.constant 0 : index
    %c25_439 = arith.constant 25 : index
    %745 = vector.load %arg10[%c0_438, %c25_439] : memref<6x54xf32, #tpu.memory_space<vmem>>, vector<6x1xf32>
    %746 = vector.broadcast %745 : vector<6x1xf32> to vector<6x256xf32>
    %747 = vector.broadcast %744 : vector<1x256xf32> to vector<6x256xf32>
    %748 = arith.mulf %746, %747 : vector<6x256xf32>
    %749 = arith.addf %743, %748 : vector<6x256xf32>
    %c2_440 = arith.constant 2 : index
    %c34_441 = arith.constant 34 : index
    %750 = vector.load %arg16[%c2_440, %c34_441] : memref<6x384xf32, #tpu.memory_space<vmem>>, vector<1x256xf32>
    %751 = arith.mulf %750, %5 : vector<1x256xf32>
    %c0_442 = arith.constant 0 : index
    %c26_443 = arith.constant 26 : index
    %752 = vector.load %arg10[%c0_442, %c26_443] : memref<6x54xf32, #tpu.memory_space<vmem>>, vector<6x1xf32>
    %753 = vector.broadcast %752 : vector<6x1xf32> to vector<6x256xf32>
    %754 = vector.broadcast %751 : vector<1x256xf32> to vector<6x256xf32>
    %755 = arith.mulf %753, %754 : vector<6x256xf32>
    %756 = arith.addf %749, %755 : vector<6x256xf32>
    %c3_444 = arith.constant 3 : index
    %c0_445 = arith.constant 0 : index
    %757 = vector.load %arg16[%c3_444, %c0_445] : memref<6x384xf32, #tpu.memory_space<vmem>>, vector<1x256xf32>
    %758 = arith.mulf %757, %4 : vector<1x256xf32>
    %c0_446 = arith.constant 0 : index
    %c27 = arith.constant 27 : index
    %759 = vector.load %arg10[%c0_446, %c27] : memref<6x54xf32, #tpu.memory_space<vmem>>, vector<6x1xf32>
    %760 = vector.broadcast %759 : vector<6x1xf32> to vector<6x256xf32>
    %761 = vector.broadcast %758 : vector<1x256xf32> to vector<6x256xf32>
    %762 = arith.mulf %760, %761 : vector<6x256xf32>
    %763 = arith.addf %756, %762 : vector<6x256xf32>
    %c3_447 = arith.constant 3 : index
    %c1_448 = arith.constant 1 : index
    %764 = vector.load %arg16[%c3_447, %c1_448] : memref<6x384xf32, #tpu.memory_space<vmem>>, vector<1x256xf32>
    %c0_449 = arith.constant 0 : index
    %c28 = arith.constant 28 : index
    %765 = vector.load %arg10[%c0_449, %c28] : memref<6x54xf32, #tpu.memory_space<vmem>>, vector<6x1xf32>
    %766 = vector.broadcast %765 : vector<6x1xf32> to vector<6x256xf32>
    %767 = vector.broadcast %764 : vector<1x256xf32> to vector<6x256xf32>
    %768 = arith.mulf %766, %767 : vector<6x256xf32>
    %769 = arith.addf %763, %768 : vector<6x256xf32>
    %c3_450 = arith.constant 3 : index
    %c2_451 = arith.constant 2 : index
    %770 = vector.load %arg16[%c3_450, %c2_451] : memref<6x384xf32, #tpu.memory_space<vmem>>, vector<1x256xf32>
    %771 = arith.mulf %770, %5 : vector<1x256xf32>
    %c0_452 = arith.constant 0 : index
    %c29 = arith.constant 29 : index
    %772 = vector.load %arg10[%c0_452, %c29] : memref<6x54xf32, #tpu.memory_space<vmem>>, vector<6x1xf32>
    %773 = vector.broadcast %772 : vector<6x1xf32> to vector<6x256xf32>
    %774 = vector.broadcast %771 : vector<1x256xf32> to vector<6x256xf32>
    %775 = arith.mulf %773, %774 : vector<6x256xf32>
    %776 = arith.addf %769, %775 : vector<6x256xf32>
    %c3_453 = arith.constant 3 : index
    %c16_454 = arith.constant 16 : index
    %777 = vector.load %arg16[%c3_453, %c16_454] : memref<6x384xf32, #tpu.memory_space<vmem>>, vector<1x256xf32>
    %778 = arith.mulf %777, %4 : vector<1x256xf32>
    %c0_455 = arith.constant 0 : index
    %c30 = arith.constant 30 : index
    %779 = vector.load %arg10[%c0_455, %c30] : memref<6x54xf32, #tpu.memory_space<vmem>>, vector<6x1xf32>
    %780 = vector.broadcast %779 : vector<6x1xf32> to vector<6x256xf32>
    %781 = vector.broadcast %778 : vector<1x256xf32> to vector<6x256xf32>
    %782 = arith.mulf %780, %781 : vector<6x256xf32>
    %783 = arith.addf %776, %782 : vector<6x256xf32>
    %c3_456 = arith.constant 3 : index
    %c17_457 = arith.constant 17 : index
    %784 = vector.load %arg16[%c3_456, %c17_457] : memref<6x384xf32, #tpu.memory_space<vmem>>, vector<1x256xf32>
    %c0_458 = arith.constant 0 : index
    %c31 = arith.constant 31 : index
    %785 = vector.load %arg10[%c0_458, %c31] : memref<6x54xf32, #tpu.memory_space<vmem>>, vector<6x1xf32>
    %786 = vector.broadcast %785 : vector<6x1xf32> to vector<6x256xf32>
    %787 = vector.broadcast %784 : vector<1x256xf32> to vector<6x256xf32>
    %788 = arith.mulf %786, %787 : vector<6x256xf32>
    %789 = arith.addf %783, %788 : vector<6x256xf32>
    %c3_459 = arith.constant 3 : index
    %c18_460 = arith.constant 18 : index
    %790 = vector.load %arg16[%c3_459, %c18_460] : memref<6x384xf32, #tpu.memory_space<vmem>>, vector<1x256xf32>
    %791 = arith.mulf %790, %5 : vector<1x256xf32>
    %c0_461 = arith.constant 0 : index
    %c32_462 = arith.constant 32 : index
    %792 = vector.load %arg10[%c0_461, %c32_462] : memref<6x54xf32, #tpu.memory_space<vmem>>, vector<6x1xf32>
    %793 = vector.broadcast %792 : vector<6x1xf32> to vector<6x256xf32>
    %794 = vector.broadcast %791 : vector<1x256xf32> to vector<6x256xf32>
    %795 = arith.mulf %793, %794 : vector<6x256xf32>
    %796 = arith.addf %789, %795 : vector<6x256xf32>
    %c3_463 = arith.constant 3 : index
    %c32_464 = arith.constant 32 : index
    %797 = vector.load %arg16[%c3_463, %c32_464] : memref<6x384xf32, #tpu.memory_space<vmem>>, vector<1x256xf32>
    %798 = arith.mulf %797, %4 : vector<1x256xf32>
    %c0_465 = arith.constant 0 : index
    %c33_466 = arith.constant 33 : index
    %799 = vector.load %arg10[%c0_465, %c33_466] : memref<6x54xf32, #tpu.memory_space<vmem>>, vector<6x1xf32>
    %800 = vector.broadcast %799 : vector<6x1xf32> to vector<6x256xf32>
    %801 = vector.broadcast %798 : vector<1x256xf32> to vector<6x256xf32>
    %802 = arith.mulf %800, %801 : vector<6x256xf32>
    %803 = arith.addf %796, %802 : vector<6x256xf32>
    %c3_467 = arith.constant 3 : index
    %c33_468 = arith.constant 33 : index
    %804 = vector.load %arg16[%c3_467, %c33_468] : memref<6x384xf32, #tpu.memory_space<vmem>>, vector<1x256xf32>
    %c0_469 = arith.constant 0 : index
    %c34_470 = arith.constant 34 : index
    %805 = vector.load %arg10[%c0_469, %c34_470] : memref<6x54xf32, #tpu.memory_space<vmem>>, vector<6x1xf32>
    %806 = vector.broadcast %805 : vector<6x1xf32> to vector<6x256xf32>
    %807 = vector.broadcast %804 : vector<1x256xf32> to vector<6x256xf32>
    %808 = arith.mulf %806, %807 : vector<6x256xf32>
    %809 = arith.addf %803, %808 : vector<6x256xf32>
    %c3_471 = arith.constant 3 : index
    %c34_472 = arith.constant 34 : index
    %810 = vector.load %arg16[%c3_471, %c34_472] : memref<6x384xf32, #tpu.memory_space<vmem>>, vector<1x256xf32>
    %811 = arith.mulf %810, %5 : vector<1x256xf32>
    %c0_473 = arith.constant 0 : index
    %c35 = arith.constant 35 : index
    %812 = vector.load %arg10[%c0_473, %c35] : memref<6x54xf32, #tpu.memory_space<vmem>>, vector<6x1xf32>
    %813 = vector.broadcast %812 : vector<6x1xf32> to vector<6x256xf32>
    %814 = vector.broadcast %811 : vector<1x256xf32> to vector<6x256xf32>
    %815 = arith.mulf %813, %814 : vector<6x256xf32>
    %816 = arith.addf %809, %815 : vector<6x256xf32>
    %c4_474 = arith.constant 4 : index
    %c0_475 = arith.constant 0 : index
    %817 = vector.load %arg16[%c4_474, %c0_475] : memref<6x384xf32, #tpu.memory_space<vmem>>, vector<1x256xf32>
    %818 = arith.mulf %817, %4 : vector<1x256xf32>
    %c0_476 = arith.constant 0 : index
    %c36 = arith.constant 36 : index
    %819 = vector.load %arg10[%c0_476, %c36] : memref<6x54xf32, #tpu.memory_space<vmem>>, vector<6x1xf32>
    %820 = vector.broadcast %819 : vector<6x1xf32> to vector<6x256xf32>
    %821 = vector.broadcast %818 : vector<1x256xf32> to vector<6x256xf32>
    %822 = arith.mulf %820, %821 : vector<6x256xf32>
    %823 = arith.addf %816, %822 : vector<6x256xf32>
    %c4_477 = arith.constant 4 : index
    %c1_478 = arith.constant 1 : index
    %824 = vector.load %arg16[%c4_477, %c1_478] : memref<6x384xf32, #tpu.memory_space<vmem>>, vector<1x256xf32>
    %c0_479 = arith.constant 0 : index
    %c37 = arith.constant 37 : index
    %825 = vector.load %arg10[%c0_479, %c37] : memref<6x54xf32, #tpu.memory_space<vmem>>, vector<6x1xf32>
    %826 = vector.broadcast %825 : vector<6x1xf32> to vector<6x256xf32>
    %827 = vector.broadcast %824 : vector<1x256xf32> to vector<6x256xf32>
    %828 = arith.mulf %826, %827 : vector<6x256xf32>
    %829 = arith.addf %823, %828 : vector<6x256xf32>
    %c4_480 = arith.constant 4 : index
    %c2_481 = arith.constant 2 : index
    %830 = vector.load %arg16[%c4_480, %c2_481] : memref<6x384xf32, #tpu.memory_space<vmem>>, vector<1x256xf32>
    %831 = arith.mulf %830, %5 : vector<1x256xf32>
    %c0_482 = arith.constant 0 : index
    %c38 = arith.constant 38 : index
    %832 = vector.load %arg10[%c0_482, %c38] : memref<6x54xf32, #tpu.memory_space<vmem>>, vector<6x1xf32>
    %833 = vector.broadcast %832 : vector<6x1xf32> to vector<6x256xf32>
    %834 = vector.broadcast %831 : vector<1x256xf32> to vector<6x256xf32>
    %835 = arith.mulf %833, %834 : vector<6x256xf32>
    %836 = arith.addf %829, %835 : vector<6x256xf32>
    %c4_483 = arith.constant 4 : index
    %c16_484 = arith.constant 16 : index
    %837 = vector.load %arg16[%c4_483, %c16_484] : memref<6x384xf32, #tpu.memory_space<vmem>>, vector<1x256xf32>
    %838 = arith.mulf %837, %4 : vector<1x256xf32>
    %c0_485 = arith.constant 0 : index
    %c39 = arith.constant 39 : index
    %839 = vector.load %arg10[%c0_485, %c39] : memref<6x54xf32, #tpu.memory_space<vmem>>, vector<6x1xf32>
    %840 = vector.broadcast %839 : vector<6x1xf32> to vector<6x256xf32>
    %841 = vector.broadcast %838 : vector<1x256xf32> to vector<6x256xf32>
    %842 = arith.mulf %840, %841 : vector<6x256xf32>
    %843 = arith.addf %836, %842 : vector<6x256xf32>
    %c4_486 = arith.constant 4 : index
    %c17_487 = arith.constant 17 : index
    %844 = vector.load %arg16[%c4_486, %c17_487] : memref<6x384xf32, #tpu.memory_space<vmem>>, vector<1x256xf32>
    %c0_488 = arith.constant 0 : index
    %c40 = arith.constant 40 : index
    %845 = vector.load %arg10[%c0_488, %c40] : memref<6x54xf32, #tpu.memory_space<vmem>>, vector<6x1xf32>
    %846 = vector.broadcast %845 : vector<6x1xf32> to vector<6x256xf32>
    %847 = vector.broadcast %844 : vector<1x256xf32> to vector<6x256xf32>
    %848 = arith.mulf %846, %847 : vector<6x256xf32>
    %849 = arith.addf %843, %848 : vector<6x256xf32>
    %c4_489 = arith.constant 4 : index
    %c18_490 = arith.constant 18 : index
    %850 = vector.load %arg16[%c4_489, %c18_490] : memref<6x384xf32, #tpu.memory_space<vmem>>, vector<1x256xf32>
    %851 = arith.mulf %850, %5 : vector<1x256xf32>
    %c0_491 = arith.constant 0 : index
    %c41 = arith.constant 41 : index
    %852 = vector.load %arg10[%c0_491, %c41] : memref<6x54xf32, #tpu.memory_space<vmem>>, vector<6x1xf32>
    %853 = vector.broadcast %852 : vector<6x1xf32> to vector<6x256xf32>
    %854 = vector.broadcast %851 : vector<1x256xf32> to vector<6x256xf32>
    %855 = arith.mulf %853, %854 : vector<6x256xf32>
    %856 = arith.addf %849, %855 : vector<6x256xf32>
    %c4_492 = arith.constant 4 : index
    %c32_493 = arith.constant 32 : index
    %857 = vector.load %arg16[%c4_492, %c32_493] : memref<6x384xf32, #tpu.memory_space<vmem>>, vector<1x256xf32>
    %858 = arith.mulf %857, %4 : vector<1x256xf32>
    %c0_494 = arith.constant 0 : index
    %c42 = arith.constant 42 : index
    %859 = vector.load %arg10[%c0_494, %c42] : memref<6x54xf32, #tpu.memory_space<vmem>>, vector<6x1xf32>
    %860 = vector.broadcast %859 : vector<6x1xf32> to vector<6x256xf32>
    %861 = vector.broadcast %858 : vector<1x256xf32> to vector<6x256xf32>
    %862 = arith.mulf %860, %861 : vector<6x256xf32>
    %863 = arith.addf %856, %862 : vector<6x256xf32>
    %c4_495 = arith.constant 4 : index
    %c33_496 = arith.constant 33 : index
    %864 = vector.load %arg16[%c4_495, %c33_496] : memref<6x384xf32, #tpu.memory_space<vmem>>, vector<1x256xf32>
    %c0_497 = arith.constant 0 : index
    %c43 = arith.constant 43 : index
    %865 = vector.load %arg10[%c0_497, %c43] : memref<6x54xf32, #tpu.memory_space<vmem>>, vector<6x1xf32>
    %866 = vector.broadcast %865 : vector<6x1xf32> to vector<6x256xf32>
    %867 = vector.broadcast %864 : vector<1x256xf32> to vector<6x256xf32>
    %868 = arith.mulf %866, %867 : vector<6x256xf32>
    %869 = arith.addf %863, %868 : vector<6x256xf32>
    %c4_498 = arith.constant 4 : index
    %c34_499 = arith.constant 34 : index
    %870 = vector.load %arg16[%c4_498, %c34_499] : memref<6x384xf32, #tpu.memory_space<vmem>>, vector<1x256xf32>
    %871 = arith.mulf %870, %5 : vector<1x256xf32>
    %c0_500 = arith.constant 0 : index
    %c44 = arith.constant 44 : index
    %872 = vector.load %arg10[%c0_500, %c44] : memref<6x54xf32, #tpu.memory_space<vmem>>, vector<6x1xf32>
    %873 = vector.broadcast %872 : vector<6x1xf32> to vector<6x256xf32>
    %874 = vector.broadcast %871 : vector<1x256xf32> to vector<6x256xf32>
    %875 = arith.mulf %873, %874 : vector<6x256xf32>
    %876 = arith.addf %869, %875 : vector<6x256xf32>
    %c5_501 = arith.constant 5 : index
    %c0_502 = arith.constant 0 : index
    %877 = vector.load %arg16[%c5_501, %c0_502] : memref<6x384xf32, #tpu.memory_space<vmem>>, vector<1x256xf32>
    %878 = arith.mulf %877, %4 : vector<1x256xf32>
    %c0_503 = arith.constant 0 : index
    %c45 = arith.constant 45 : index
    %879 = vector.load %arg10[%c0_503, %c45] : memref<6x54xf32, #tpu.memory_space<vmem>>, vector<6x1xf32>
    %880 = vector.broadcast %879 : vector<6x1xf32> to vector<6x256xf32>
    %881 = vector.broadcast %878 : vector<1x256xf32> to vector<6x256xf32>
    %882 = arith.mulf %880, %881 : vector<6x256xf32>
    %883 = arith.addf %876, %882 : vector<6x256xf32>
    %c5_504 = arith.constant 5 : index
    %c1_505 = arith.constant 1 : index
    %884 = vector.load %arg16[%c5_504, %c1_505] : memref<6x384xf32, #tpu.memory_space<vmem>>, vector<1x256xf32>
    %c0_506 = arith.constant 0 : index
    %c46 = arith.constant 46 : index
    %885 = vector.load %arg10[%c0_506, %c46] : memref<6x54xf32, #tpu.memory_space<vmem>>, vector<6x1xf32>
    %886 = vector.broadcast %885 : vector<6x1xf32> to vector<6x256xf32>
    %887 = vector.broadcast %884 : vector<1x256xf32> to vector<6x256xf32>
    %888 = arith.mulf %886, %887 : vector<6x256xf32>
    %889 = arith.addf %883, %888 : vector<6x256xf32>
    %c5_507 = arith.constant 5 : index
    %c2_508 = arith.constant 2 : index
    %890 = vector.load %arg16[%c5_507, %c2_508] : memref<6x384xf32, #tpu.memory_space<vmem>>, vector<1x256xf32>
    %891 = arith.mulf %890, %5 : vector<1x256xf32>
    %c0_509 = arith.constant 0 : index
    %c47 = arith.constant 47 : index
    %892 = vector.load %arg10[%c0_509, %c47] : memref<6x54xf32, #tpu.memory_space<vmem>>, vector<6x1xf32>
    %893 = vector.broadcast %892 : vector<6x1xf32> to vector<6x256xf32>
    %894 = vector.broadcast %891 : vector<1x256xf32> to vector<6x256xf32>
    %895 = arith.mulf %893, %894 : vector<6x256xf32>
    %896 = arith.addf %889, %895 : vector<6x256xf32>
    %c5_510 = arith.constant 5 : index
    %c16_511 = arith.constant 16 : index
    %897 = vector.load %arg16[%c5_510, %c16_511] : memref<6x384xf32, #tpu.memory_space<vmem>>, vector<1x256xf32>
    %898 = arith.mulf %897, %4 : vector<1x256xf32>
    %c0_512 = arith.constant 0 : index
    %c48 = arith.constant 48 : index
    %899 = vector.load %arg10[%c0_512, %c48] : memref<6x54xf32, #tpu.memory_space<vmem>>, vector<6x1xf32>
    %900 = vector.broadcast %899 : vector<6x1xf32> to vector<6x256xf32>
    %901 = vector.broadcast %898 : vector<1x256xf32> to vector<6x256xf32>
    %902 = arith.mulf %900, %901 : vector<6x256xf32>
    %903 = arith.addf %896, %902 : vector<6x256xf32>
    %c5_513 = arith.constant 5 : index
    %c17_514 = arith.constant 17 : index
    %904 = vector.load %arg16[%c5_513, %c17_514] : memref<6x384xf32, #tpu.memory_space<vmem>>, vector<1x256xf32>
    %c0_515 = arith.constant 0 : index
    %c49 = arith.constant 49 : index
    %905 = vector.load %arg10[%c0_515, %c49] : memref<6x54xf32, #tpu.memory_space<vmem>>, vector<6x1xf32>
    %906 = vector.broadcast %905 : vector<6x1xf32> to vector<6x256xf32>
    %907 = vector.broadcast %904 : vector<1x256xf32> to vector<6x256xf32>
    %908 = arith.mulf %906, %907 : vector<6x256xf32>
    %909 = arith.addf %903, %908 : vector<6x256xf32>
    %c5_516 = arith.constant 5 : index
    %c18_517 = arith.constant 18 : index
    %910 = vector.load %arg16[%c5_516, %c18_517] : memref<6x384xf32, #tpu.memory_space<vmem>>, vector<1x256xf32>
    %911 = arith.mulf %910, %5 : vector<1x256xf32>
    %c0_518 = arith.constant 0 : index
    %c50 = arith.constant 50 : index
    %912 = vector.load %arg10[%c0_518, %c50] : memref<6x54xf32, #tpu.memory_space<vmem>>, vector<6x1xf32>
    %913 = vector.broadcast %912 : vector<6x1xf32> to vector<6x256xf32>
    %914 = vector.broadcast %911 : vector<1x256xf32> to vector<6x256xf32>
    %915 = arith.mulf %913, %914 : vector<6x256xf32>
    %916 = arith.addf %909, %915 : vector<6x256xf32>
    %c5_519 = arith.constant 5 : index
    %c32_520 = arith.constant 32 : index
    %917 = vector.load %arg16[%c5_519, %c32_520] : memref<6x384xf32, #tpu.memory_space<vmem>>, vector<1x256xf32>
    %918 = arith.mulf %917, %4 : vector<1x256xf32>
    %c0_521 = arith.constant 0 : index
    %c51 = arith.constant 51 : index
    %919 = vector.load %arg10[%c0_521, %c51] : memref<6x54xf32, #tpu.memory_space<vmem>>, vector<6x1xf32>
    %920 = vector.broadcast %919 : vector<6x1xf32> to vector<6x256xf32>
    %921 = vector.broadcast %918 : vector<1x256xf32> to vector<6x256xf32>
    %922 = arith.mulf %920, %921 : vector<6x256xf32>
    %923 = arith.addf %916, %922 : vector<6x256xf32>
    %c5_522 = arith.constant 5 : index
    %c33_523 = arith.constant 33 : index
    %924 = vector.load %arg16[%c5_522, %c33_523] : memref<6x384xf32, #tpu.memory_space<vmem>>, vector<1x256xf32>
    %c0_524 = arith.constant 0 : index
    %c52 = arith.constant 52 : index
    %925 = vector.load %arg10[%c0_524, %c52] : memref<6x54xf32, #tpu.memory_space<vmem>>, vector<6x1xf32>
    %926 = vector.broadcast %925 : vector<6x1xf32> to vector<6x256xf32>
    %927 = vector.broadcast %924 : vector<1x256xf32> to vector<6x256xf32>
    %928 = arith.mulf %926, %927 : vector<6x256xf32>
    %929 = arith.addf %923, %928 : vector<6x256xf32>
    %c5_525 = arith.constant 5 : index
    %c34_526 = arith.constant 34 : index
    %930 = vector.load %arg16[%c5_525, %c34_526] : memref<6x384xf32, #tpu.memory_space<vmem>>, vector<1x256xf32>
    %931 = arith.mulf %930, %5 : vector<1x256xf32>
    %c0_527 = arith.constant 0 : index
    %c53 = arith.constant 53 : index
    %932 = vector.load %arg10[%c0_527, %c53] : memref<6x54xf32, #tpu.memory_space<vmem>>, vector<6x1xf32>
    %933 = vector.broadcast %932 : vector<6x1xf32> to vector<6x256xf32>
    %934 = vector.broadcast %931 : vector<1x256xf32> to vector<6x256xf32>
    %935 = arith.mulf %933, %934 : vector<6x256xf32>
    %936 = arith.addf %929, %935 : vector<6x256xf32>
    %c0_528 = arith.constant 0 : index
    %c0_529 = arith.constant 0 : index
    %937 = vector.load %arg11[%c0_528, %c0_529] : memref<6x1xf32, #tpu.memory_space<vmem>>, vector<6x1xf32>
    %938 = vector.broadcast %937 : vector<6x1xf32> to vector<6x256xf32>
    %939 = arith.addf %936, %938 : vector<6x256xf32>
    %c0_530 = arith.constant 0 : index
    %c17_531 = arith.constant 17 : index
    %940 = vector.load %arg15[%c0_530, %c17_531] : memref<6x384xf32, #tpu.memory_space<vmem>>, vector<6x256xf32>
    tpu.vector_store %arg15[%c0_530, %c17_531], %939 {strides = array<i32>} : memref<6x384xf32, #tpu.memory_space<vmem>>, vector<6x256xf32>,
    %cst_532 = arith.constant 0.000000e+00 : f32
    %941 = vector.broadcast %cst_532 : f32 to vector<6x256xf32>
    %c0_533 = arith.constant 0 : index
    %c0_534 = arith.constant 0 : index
    %942 = vector.load %arg15[%c0_533, %c0_534] : memref<6x384xf32, #tpu.memory_space<vmem>>, vector<1x256xf32>
    %943 = arith.mulf %942, %4 : vector<1x256xf32>
    %c0_535 = arith.constant 0 : index
    %c0_536 = arith.constant 0 : index
    %944 = vector.load %arg12[%c0_535, %c0_536] : memref<6x54xf32, #tpu.memory_space<vmem>>, vector<6x1xf32>
    %945 = vector.broadcast %944 : vector<6x1xf32> to vector<6x256xf32>
    %946 = vector.broadcast %943 : vector<1x256xf32> to vector<6x256xf32>
    %947 = arith.mulf %945, %946 : vector<6x256xf32>
    %948 = arith.addf %941, %947 : vector<6x256xf32>
    %c0_537 = arith.constant 0 : index
    %c1_538 = arith.constant 1 : index
    %949 = vector.load %arg15[%c0_537, %c1_538] : memref<6x384xf32, #tpu.memory_space<vmem>>, vector<1x256xf32>
    %c0_539 = arith.constant 0 : index
    %c1_540 = arith.constant 1 : index
    %950 = vector.load %arg12[%c0_539, %c1_540] : memref<6x54xf32, #tpu.memory_space<vmem>>, vector<6x1xf32>
    %951 = vector.broadcast %950 : vector<6x1xf32> to vector<6x256xf32>
    %952 = vector.broadcast %949 : vector<1x256xf32> to vector<6x256xf32>
    %953 = arith.mulf %951, %952 : vector<6x256xf32>
    %954 = arith.addf %948, %953 : vector<6x256xf32>
    %c0_541 = arith.constant 0 : index
    %c2_542 = arith.constant 2 : index
    %955 = vector.load %arg15[%c0_541, %c2_542] : memref<6x384xf32, #tpu.memory_space<vmem>>, vector<1x256xf32>
    %956 = arith.mulf %955, %5 : vector<1x256xf32>
    %c0_543 = arith.constant 0 : index
    %c2_544 = arith.constant 2 : index
    %957 = vector.load %arg12[%c0_543, %c2_544] : memref<6x54xf32, #tpu.memory_space<vmem>>, vector<6x1xf32>
    %958 = vector.broadcast %957 : vector<6x1xf32> to vector<6x256xf32>
    %959 = vector.broadcast %956 : vector<1x256xf32> to vector<6x256xf32>
    %960 = arith.mulf %958, %959 : vector<6x256xf32>
    %961 = arith.addf %954, %960 : vector<6x256xf32>
    %c0_545 = arith.constant 0 : index
    %c16_546 = arith.constant 16 : index
    %962 = vector.load %arg15[%c0_545, %c16_546] : memref<6x384xf32, #tpu.memory_space<vmem>>, vector<1x256xf32>
    %963 = arith.mulf %962, %4 : vector<1x256xf32>
    %c0_547 = arith.constant 0 : index
    %c3_548 = arith.constant 3 : index
    %964 = vector.load %arg12[%c0_547, %c3_548] : memref<6x54xf32, #tpu.memory_space<vmem>>, vector<6x1xf32>
    %965 = vector.broadcast %964 : vector<6x1xf32> to vector<6x256xf32>
    %966 = vector.broadcast %963 : vector<1x256xf32> to vector<6x256xf32>
    %967 = arith.mulf %965, %966 : vector<6x256xf32>
    %968 = arith.addf %961, %967 : vector<6x256xf32>
    %c0_549 = arith.constant 0 : index
    %c17_550 = arith.constant 17 : index
    %969 = vector.load %arg15[%c0_549, %c17_550] : memref<6x384xf32, #tpu.memory_space<vmem>>, vector<1x256xf32>
    %c0_551 = arith.constant 0 : index
    %c4_552 = arith.constant 4 : index
    %970 = vector.load %arg12[%c0_551, %c4_552] : memref<6x54xf32, #tpu.memory_space<vmem>>, vector<6x1xf32>
    %971 = vector.broadcast %970 : vector<6x1xf32> to vector<6x256xf32>
    %972 = vector.broadcast %969 : vector<1x256xf32> to vector<6x256xf32>
    %973 = arith.mulf %971, %972 : vector<6x256xf32>
    %974 = arith.addf %968, %973 : vector<6x256xf32>
    %c0_553 = arith.constant 0 : index
    %c18_554 = arith.constant 18 : index
    %975 = vector.load %arg15[%c0_553, %c18_554] : memref<6x384xf32, #tpu.memory_space<vmem>>, vector<1x256xf32>
    %976 = arith.mulf %975, %5 : vector<1x256xf32>
    %c0_555 = arith.constant 0 : index
    %c5_556 = arith.constant 5 : index
    %977 = vector.load %arg12[%c0_555, %c5_556] : memref<6x54xf32, #tpu.memory_space<vmem>>, vector<6x1xf32>
    %978 = vector.broadcast %977 : vector<6x1xf32> to vector<6x256xf32>
    %979 = vector.broadcast %976 : vector<1x256xf32> to vector<6x256xf32>
    %980 = arith.mulf %978, %979 : vector<6x256xf32>
    %981 = arith.addf %974, %980 : vector<6x256xf32>
    %c0_557 = arith.constant 0 : index
    %c32_558 = arith.constant 32 : index
    %982 = vector.load %arg15[%c0_557, %c32_558] : memref<6x384xf32, #tpu.memory_space<vmem>>, vector<1x256xf32>
    %983 = arith.mulf %982, %4 : vector<1x256xf32>
    %c0_559 = arith.constant 0 : index
    %c6_560 = arith.constant 6 : index
    %984 = vector.load %arg12[%c0_559, %c6_560] : memref<6x54xf32, #tpu.memory_space<vmem>>, vector<6x1xf32>
    %985 = vector.broadcast %984 : vector<6x1xf32> to vector<6x256xf32>
    %986 = vector.broadcast %983 : vector<1x256xf32> to vector<6x256xf32>
    %987 = arith.mulf %985, %986 : vector<6x256xf32>
    %988 = arith.addf %981, %987 : vector<6x256xf32>
    %c0_561 = arith.constant 0 : index
    %c33_562 = arith.constant 33 : index
    %989 = vector.load %arg15[%c0_561, %c33_562] : memref<6x384xf32, #tpu.memory_space<vmem>>, vector<1x256xf32>
    %c0_563 = arith.constant 0 : index
    %c7_564 = arith.constant 7 : index
    %990 = vector.load %arg12[%c0_563, %c7_564] : memref<6x54xf32, #tpu.memory_space<vmem>>, vector<6x1xf32>
    %991 = vector.broadcast %990 : vector<6x1xf32> to vector<6x256xf32>
    %992 = vector.broadcast %989 : vector<1x256xf32> to vector<6x256xf32>
    %993 = arith.mulf %991, %992 : vector<6x256xf32>
    %994 = arith.addf %988, %993 : vector<6x256xf32>
    %c0_565 = arith.constant 0 : index
    %c34_566 = arith.constant 34 : index
    %995 = vector.load %arg15[%c0_565, %c34_566] : memref<6x384xf32, #tpu.memory_space<vmem>>, vector<1x256xf32>
    %996 = arith.mulf %995, %5 : vector<1x256xf32>
    %c0_567 = arith.constant 0 : index
    %c8_568 = arith.constant 8 : index
    %997 = vector.load %arg12[%c0_567, %c8_568] : memref<6x54xf32, #tpu.memory_space<vmem>>, vector<6x1xf32>
    %998 = vector.broadcast %997 : vector<6x1xf32> to vector<6x256xf32>
    %999 = vector.broadcast %996 : vector<1x256xf32> to vector<6x256xf32>
    %1000 = arith.mulf %998, %999 : vector<6x256xf32>
    %1001 = arith.addf %994, %1000 : vector<6x256xf32>
    %c1_569 = arith.constant 1 : index
    %c0_570 = arith.constant 0 : index
    %1002 = vector.load %arg15[%c1_569, %c0_570] : memref<6x384xf32, #tpu.memory_space<vmem>>, vector<1x256xf32>
    %1003 = arith.mulf %1002, %4 : vector<1x256xf32>
    %c0_571 = arith.constant 0 : index
    %c9_572 = arith.constant 9 : index
    %1004 = vector.load %arg12[%c0_571, %c9_572] : memref<6x54xf32, #tpu.memory_space<vmem>>, vector<6x1xf32>
    %1005 = vector.broadcast %1004 : vector<6x1xf32> to vector<6x256xf32>
    %1006 = vector.broadcast %1003 : vector<1x256xf32> to vector<6x256xf32>
    %1007 = arith.mulf %1005, %1006 : vector<6x256xf32>
    %1008 = arith.addf %1001, %1007 : vector<6x256xf32>
    %c1_573 = arith.constant 1 : index
    %c1_574 = arith.constant 1 : index
    %1009 = vector.load %arg15[%c1_573, %c1_574] : memref<6x384xf32, #tpu.memory_space<vmem>>, vector<1x256xf32>
    %c0_575 = arith.constant 0 : index
    %c10_576 = arith.constant 10 : index
    %1010 = vector.load %arg12[%c0_575, %c10_576] : memref<6x54xf32, #tpu.memory_space<vmem>>, vector<6x1xf32>
    %1011 = vector.broadcast %1010 : vector<6x1xf32> to vector<6x256xf32>
    %1012 = vector.broadcast %1009 : vector<1x256xf32> to vector<6x256xf32>
    %1013 = arith.mulf %1011, %1012 : vector<6x256xf32>
    %1014 = arith.addf %1008, %1013 : vector<6x256xf32>
    %c1_577 = arith.constant 1 : index
    %c2_578 = arith.constant 2 : index
    %1015 = vector.load %arg15[%c1_577, %c2_578] : memref<6x384xf32, #tpu.memory_space<vmem>>, vector<1x256xf32>
    %1016 = arith.mulf %1015, %5 : vector<1x256xf32>
    %c0_579 = arith.constant 0 : index
    %c11_580 = arith.constant 11 : index
    %1017 = vector.load %arg12[%c0_579, %c11_580] : memref<6x54xf32, #tpu.memory_space<vmem>>, vector<6x1xf32>
    %1018 = vector.broadcast %1017 : vector<6x1xf32> to vector<6x256xf32>
    %1019 = vector.broadcast %1016 : vector<1x256xf32> to vector<6x256xf32>
    %1020 = arith.mulf %1018, %1019 : vector<6x256xf32>
    %1021 = arith.addf %1014, %1020 : vector<6x256xf32>
    %c1_581 = arith.constant 1 : index
    %c16_582 = arith.constant 16 : index
    %1022 = vector.load %arg15[%c1_581, %c16_582] : memref<6x384xf32, #tpu.memory_space<vmem>>, vector<1x256xf32>
    %1023 = arith.mulf %1022, %4 : vector<1x256xf32>
    %c0_583 = arith.constant 0 : index
    %c12_584 = arith.constant 12 : index
    %1024 = vector.load %arg12[%c0_583, %c12_584] : memref<6x54xf32, #tpu.memory_space<vmem>>, vector<6x1xf32>
    %1025 = vector.broadcast %1024 : vector<6x1xf32> to vector<6x256xf32>
    %1026 = vector.broadcast %1023 : vector<1x256xf32> to vector<6x256xf32>
    %1027 = arith.mulf %1025, %1026 : vector<6x256xf32>
    %1028 = arith.addf %1021, %1027 : vector<6x256xf32>
    %c1_585 = arith.constant 1 : index
    %c17_586 = arith.constant 17 : index
    %1029 = vector.load %arg15[%c1_585, %c17_586] : memref<6x384xf32, #tpu.memory_space<vmem>>, vector<1x256xf32>
    %c0_587 = arith.constant 0 : index
    %c13_588 = arith.constant 13 : index
    %1030 = vector.load %arg12[%c0_587, %c13_588] : memref<6x54xf32, #tpu.memory_space<vmem>>, vector<6x1xf32>
    %1031 = vector.broadcast %1030 : vector<6x1xf32> to vector<6x256xf32>
    %1032 = vector.broadcast %1029 : vector<1x256xf32> to vector<6x256xf32>
    %1033 = arith.mulf %1031, %1032 : vector<6x256xf32>
    %1034 = arith.addf %1028, %1033 : vector<6x256xf32>
    %c1_589 = arith.constant 1 : index
    %c18_590 = arith.constant 18 : index
    %1035 = vector.load %arg15[%c1_589, %c18_590] : memref<6x384xf32, #tpu.memory_space<vmem>>, vector<1x256xf32>
    %1036 = arith.mulf %1035, %5 : vector<1x256xf32>
    %c0_591 = arith.constant 0 : index
    %c14_592 = arith.constant 14 : index
    %1037 = vector.load %arg12[%c0_591, %c14_592] : memref<6x54xf32, #tpu.memory_space<vmem>>, vector<6x1xf32>
    %1038 = vector.broadcast %1037 : vector<6x1xf32> to vector<6x256xf32>
    %1039 = vector.broadcast %1036 : vector<1x256xf32> to vector<6x256xf32>
    %1040 = arith.mulf %1038, %1039 : vector<6x256xf32>
    %1041 = arith.addf %1034, %1040 : vector<6x256xf32>
    %c1_593 = arith.constant 1 : index
    %c32_594 = arith.constant 32 : index
    %1042 = vector.load %arg15[%c1_593, %c32_594] : memref<6x384xf32, #tpu.memory_space<vmem>>, vector<1x256xf32>
    %1043 = arith.mulf %1042, %4 : vector<1x256xf32>
    %c0_595 = arith.constant 0 : index
    %c15_596 = arith.constant 15 : index
    %1044 = vector.load %arg12[%c0_595, %c15_596] : memref<6x54xf32, #tpu.memory_space<vmem>>, vector<6x1xf32>
    %1045 = vector.broadcast %1044 : vector<6x1xf32> to vector<6x256xf32>
    %1046 = vector.broadcast %1043 : vector<1x256xf32> to vector<6x256xf32>
    %1047 = arith.mulf %1045, %1046 : vector<6x256xf32>
    %1048 = arith.addf %1041, %1047 : vector<6x256xf32>
    %c1_597 = arith.constant 1 : index
    %c33_598 = arith.constant 33 : index
    %1049 = vector.load %arg15[%c1_597, %c33_598] : memref<6x384xf32, #tpu.memory_space<vmem>>, vector<1x256xf32>
    %c0_599 = arith.constant 0 : index
    %c16_600 = arith.constant 16 : index
    %1050 = vector.load %arg12[%c0_599, %c16_600] : memref<6x54xf32, #tpu.memory_space<vmem>>, vector<6x1xf32>
    %1051 = vector.broadcast %1050 : vector<6x1xf32> to vector<6x256xf32>
    %1052 = vector.broadcast %1049 : vector<1x256xf32> to vector<6x256xf32>
    %1053 = arith.mulf %1051, %1052 : vector<6x256xf32>
    %1054 = arith.addf %1048, %1053 : vector<6x256xf32>
    %c1_601 = arith.constant 1 : index
    %c34_602 = arith.constant 34 : index
    %1055 = vector.load %arg15[%c1_601, %c34_602] : memref<6x384xf32, #tpu.memory_space<vmem>>, vector<1x256xf32>
    %1056 = arith.mulf %1055, %5 : vector<1x256xf32>
    %c0_603 = arith.constant 0 : index
    %c17_604 = arith.constant 17 : index
    %1057 = vector.load %arg12[%c0_603, %c17_604] : memref<6x54xf32, #tpu.memory_space<vmem>>, vector<6x1xf32>
    %1058 = vector.broadcast %1057 : vector<6x1xf32> to vector<6x256xf32>
    %1059 = vector.broadcast %1056 : vector<1x256xf32> to vector<6x256xf32>
    %1060 = arith.mulf %1058, %1059 : vector<6x256xf32>
    %1061 = arith.addf %1054, %1060 : vector<6x256xf32>
    %c2_605 = arith.constant 2 : index
    %c0_606 = arith.constant 0 : index
    %1062 = vector.load %arg15[%c2_605, %c0_606] : memref<6x384xf32, #tpu.memory_space<vmem>>, vector<1x256xf32>
    %1063 = arith.mulf %1062, %4 : vector<1x256xf32>
    %c0_607 = arith.constant 0 : index
    %c18_608 = arith.constant 18 : index
    %1064 = vector.load %arg12[%c0_607, %c18_608] : memref<6x54xf32, #tpu.memory_space<vmem>>, vector<6x1xf32>
    %1065 = vector.broadcast %1064 : vector<6x1xf32> to vector<6x256xf32>
    %1066 = vector.broadcast %1063 : vector<1x256xf32> to vector<6x256xf32>
    %1067 = arith.mulf %1065, %1066 : vector<6x256xf32>
    %1068 = arith.addf %1061, %1067 : vector<6x256xf32>
    %c2_609 = arith.constant 2 : index
    %c1_610 = arith.constant 1 : index
    %1069 = vector.load %arg15[%c2_609, %c1_610] : memref<6x384xf32, #tpu.memory_space<vmem>>, vector<1x256xf32>
    %c0_611 = arith.constant 0 : index
    %c19_612 = arith.constant 19 : index
    %1070 = vector.load %arg12[%c0_611, %c19_612] : memref<6x54xf32, #tpu.memory_space<vmem>>, vector<6x1xf32>
    %1071 = vector.broadcast %1070 : vector<6x1xf32> to vector<6x256xf32>
    %1072 = vector.broadcast %1069 : vector<1x256xf32> to vector<6x256xf32>
    %1073 = arith.mulf %1071, %1072 : vector<6x256xf32>
    %1074 = arith.addf %1068, %1073 : vector<6x256xf32>
    %c2_613 = arith.constant 2 : index
    %c2_614 = arith.constant 2 : index
    %1075 = vector.load %arg15[%c2_613, %c2_614] : memref<6x384xf32, #tpu.memory_space<vmem>>, vector<1x256xf32>
    %1076 = arith.mulf %1075, %5 : vector<1x256xf32>
    %c0_615 = arith.constant 0 : index
    %c20_616 = arith.constant 20 : index
    %1077 = vector.load %arg12[%c0_615, %c20_616] : memref<6x54xf32, #tpu.memory_space<vmem>>, vector<6x1xf32>
    %1078 = vector.broadcast %1077 : vector<6x1xf32> to vector<6x256xf32>
    %1079 = vector.broadcast %1076 : vector<1x256xf32> to vector<6x256xf32>
    %1080 = arith.mulf %1078, %1079 : vector<6x256xf32>
    %1081 = arith.addf %1074, %1080 : vector<6x256xf32>
    %c2_617 = arith.constant 2 : index
    %c16_618 = arith.constant 16 : index
    %1082 = vector.load %arg15[%c2_617, %c16_618] : memref<6x384xf32, #tpu.memory_space<vmem>>, vector<1x256xf32>
    %1083 = arith.mulf %1082, %4 : vector<1x256xf32>
    %c0_619 = arith.constant 0 : index
    %c21_620 = arith.constant 21 : index
    %1084 = vector.load %arg12[%c0_619, %c21_620] : memref<6x54xf32, #tpu.memory_space<vmem>>, vector<6x1xf32>
    %1085 = vector.broadcast %1084 : vector<6x1xf32> to vector<6x256xf32>
    %1086 = vector.broadcast %1083 : vector<1x256xf32> to vector<6x256xf32>
    %1087 = arith.mulf %1085, %1086 : vector<6x256xf32>
    %1088 = arith.addf %1081, %1087 : vector<6x256xf32>
    %c2_621 = arith.constant 2 : index
    %c17_622 = arith.constant 17 : index
    %1089 = vector.load %arg15[%c2_621, %c17_622] : memref<6x384xf32, #tpu.memory_space<vmem>>, vector<1x256xf32>
    %c0_623 = arith.constant 0 : index
    %c22_624 = arith.constant 22 : index
    %1090 = vector.load %arg12[%c0_623, %c22_624] : memref<6x54xf32, #tpu.memory_space<vmem>>, vector<6x1xf32>
    %1091 = vector.broadcast %1090 : vector<6x1xf32> to vector<6x256xf32>
    %1092 = vector.broadcast %1089 : vector<1x256xf32> to vector<6x256xf32>
    %1093 = arith.mulf %1091, %1092 : vector<6x256xf32>
    %1094 = arith.addf %1088, %1093 : vector<6x256xf32>
    %c2_625 = arith.constant 2 : index
    %c18_626 = arith.constant 18 : index
    %1095 = vector.load %arg15[%c2_625, %c18_626] : memref<6x384xf32, #tpu.memory_space<vmem>>, vector<1x256xf32>
    %1096 = arith.mulf %1095, %5 : vector<1x256xf32>
    %c0_627 = arith.constant 0 : index
    %c23_628 = arith.constant 23 : index
    %1097 = vector.load %arg12[%c0_627, %c23_628] : memref<6x54xf32, #tpu.memory_space<vmem>>, vector<6x1xf32>
    %1098 = vector.broadcast %1097 : vector<6x1xf32> to vector<6x256xf32>
    %1099 = vector.broadcast %1096 : vector<1x256xf32> to vector<6x256xf32>
    %1100 = arith.mulf %1098, %1099 : vector<6x256xf32>
    %1101 = arith.addf %1094, %1100 : vector<6x256xf32>
    %c2_629 = arith.constant 2 : index
    %c32_630 = arith.constant 32 : index
    %1102 = vector.load %arg15[%c2_629, %c32_630] : memref<6x384xf32, #tpu.memory_space<vmem>>, vector<1x256xf32>
    %1103 = arith.mulf %1102, %4 : vector<1x256xf32>
    %c0_631 = arith.constant 0 : index
    %c24_632 = arith.constant 24 : index
    %1104 = vector.load %arg12[%c0_631, %c24_632] : memref<6x54xf32, #tpu.memory_space<vmem>>, vector<6x1xf32>
    %1105 = vector.broadcast %1104 : vector<6x1xf32> to vector<6x256xf32>
    %1106 = vector.broadcast %1103 : vector<1x256xf32> to vector<6x256xf32>
    %1107 = arith.mulf %1105, %1106 : vector<6x256xf32>
    %1108 = arith.addf %1101, %1107 : vector<6x256xf32>
    %c2_633 = arith.constant 2 : index
    %c33_634 = arith.constant 33 : index
    %1109 = vector.load %arg15[%c2_633, %c33_634] : memref<6x384xf32, #tpu.memory_space<vmem>>, vector<1x256xf32>
    %c0_635 = arith.constant 0 : index
    %c25_636 = arith.constant 25 : index
    %1110 = vector.load %arg12[%c0_635, %c25_636] : memref<6x54xf32, #tpu.memory_space<vmem>>, vector<6x1xf32>
    %1111 = vector.broadcast %1110 : vector<6x1xf32> to vector<6x256xf32>
    %1112 = vector.broadcast %1109 : vector<1x256xf32> to vector<6x256xf32>
    %1113 = arith.mulf %1111, %1112 : vector<6x256xf32>
    %1114 = arith.addf %1108, %1113 : vector<6x256xf32>
    %c2_637 = arith.constant 2 : index
    %c34_638 = arith.constant 34 : index
    %1115 = vector.load %arg15[%c2_637, %c34_638] : memref<6x384xf32, #tpu.memory_space<vmem>>, vector<1x256xf32>
    %1116 = arith.mulf %1115, %5 : vector<1x256xf32>
    %c0_639 = arith.constant 0 : index
    %c26_640 = arith.constant 26 : index
    %1117 = vector.load %arg12[%c0_639, %c26_640] : memref<6x54xf32, #tpu.memory_space<vmem>>, vector<6x1xf32>
    %1118 = vector.broadcast %1117 : vector<6x1xf32> to vector<6x256xf32>
    %1119 = vector.broadcast %1116 : vector<1x256xf32> to vector<6x256xf32>
    %1120 = arith.mulf %1118, %1119 : vector<6x256xf32>
    %1121 = arith.addf %1114, %1120 : vector<6x256xf32>
    %c3_641 = arith.constant 3 : index
    %c0_642 = arith.constant 0 : index
    %1122 = vector.load %arg15[%c3_641, %c0_642] : memref<6x384xf32, #tpu.memory_space<vmem>>, vector<1x256xf32>
    %1123 = arith.mulf %1122, %4 : vector<1x256xf32>
    %c0_643 = arith.constant 0 : index
    %c27_644 = arith.constant 27 : index
    %1124 = vector.load %arg12[%c0_643, %c27_644] : memref<6x54xf32, #tpu.memory_space<vmem>>, vector<6x1xf32>
    %1125 = vector.broadcast %1124 : vector<6x1xf32> to vector<6x256xf32>
    %1126 = vector.broadcast %1123 : vector<1x256xf32> to vector<6x256xf32>
    %1127 = arith.mulf %1125, %1126 : vector<6x256xf32>
    %1128 = arith.addf %1121, %1127 : vector<6x256xf32>
    %c3_645 = arith.constant 3 : index
    %c1_646 = arith.constant 1 : index
    %1129 = vector.load %arg15[%c3_645, %c1_646] : memref<6x384xf32, #tpu.memory_space<vmem>>, vector<1x256xf32>
    %c0_647 = arith.constant 0 : index
    %c28_648 = arith.constant 28 : index
    %1130 = vector.load %arg12[%c0_647, %c28_648] : memref<6x54xf32, #tpu.memory_space<vmem>>, vector<6x1xf32>
    %1131 = vector.broadcast %1130 : vector<6x1xf32> to vector<6x256xf32>
    %1132 = vector.broadcast %1129 : vector<1x256xf32> to vector<6x256xf32>
    %1133 = arith.mulf %1131, %1132 : vector<6x256xf32>
    %1134 = arith.addf %1128, %1133 : vector<6x256xf32>
    %c3_649 = arith.constant 3 : index
    %c2_650 = arith.constant 2 : index
    %1135 = vector.load %arg15[%c3_649, %c2_650] : memref<6x384xf32, #tpu.memory_space<vmem>>, vector<1x256xf32>
    %1136 = arith.mulf %1135, %5 : vector<1x256xf32>
    %c0_651 = arith.constant 0 : index
    %c29_652 = arith.constant 29 : index
    %1137 = vector.load %arg12[%c0_651, %c29_652] : memref<6x54xf32, #tpu.memory_space<vmem>>, vector<6x1xf32>
    %1138 = vector.broadcast %1137 : vector<6x1xf32> to vector<6x256xf32>
    %1139 = vector.broadcast %1136 : vector<1x256xf32> to vector<6x256xf32>
    %1140 = arith.mulf %1138, %1139 : vector<6x256xf32>
    %1141 = arith.addf %1134, %1140 : vector<6x256xf32>
    %c3_653 = arith.constant 3 : index
    %c16_654 = arith.constant 16 : index
    %1142 = vector.load %arg15[%c3_653, %c16_654] : memref<6x384xf32, #tpu.memory_space<vmem>>, vector<1x256xf32>
    %1143 = arith.mulf %1142, %4 : vector<1x256xf32>
    %c0_655 = arith.constant 0 : index
    %c30_656 = arith.constant 30 : index
    %1144 = vector.load %arg12[%c0_655, %c30_656] : memref<6x54xf32, #tpu.memory_space<vmem>>, vector<6x1xf32>
    %1145 = vector.broadcast %1144 : vector<6x1xf32> to vector<6x256xf32>
    %1146 = vector.broadcast %1143 : vector<1x256xf32> to vector<6x256xf32>
    %1147 = arith.mulf %1145, %1146 : vector<6x256xf32>
    %1148 = arith.addf %1141, %1147 : vector<6x256xf32>
    %c3_657 = arith.constant 3 : index
    %c17_658 = arith.constant 17 : index
    %1149 = vector.load %arg15[%c3_657, %c17_658] : memref<6x384xf32, #tpu.memory_space<vmem>>, vector<1x256xf32>
    %c0_659 = arith.constant 0 : index
    %c31_660 = arith.constant 31 : index
    %1150 = vector.load %arg12[%c0_659, %c31_660] : memref<6x54xf32, #tpu.memory_space<vmem>>, vector<6x1xf32>
    %1151 = vector.broadcast %1150 : vector<6x1xf32> to vector<6x256xf32>
    %1152 = vector.broadcast %1149 : vector<1x256xf32> to vector<6x256xf32>
    %1153 = arith.mulf %1151, %1152 : vector<6x256xf32>
    %1154 = arith.addf %1148, %1153 : vector<6x256xf32>
    %c3_661 = arith.constant 3 : index
    %c18_662 = arith.constant 18 : index
    %1155 = vector.load %arg15[%c3_661, %c18_662] : memref<6x384xf32, #tpu.memory_space<vmem>>, vector<1x256xf32>
    %1156 = arith.mulf %1155, %5 : vector<1x256xf32>
    %c0_663 = arith.constant 0 : index
    %c32_664 = arith.constant 32 : index
    %1157 = vector.load %arg12[%c0_663, %c32_664] : memref<6x54xf32, #tpu.memory_space<vmem>>, vector<6x1xf32>
    %1158 = vector.broadcast %1157 : vector<6x1xf32> to vector<6x256xf32>
    %1159 = vector.broadcast %1156 : vector<1x256xf32> to vector<6x256xf32>
    %1160 = arith.mulf %1158, %1159 : vector<6x256xf32>
    %1161 = arith.addf %1154, %1160 : vector<6x256xf32>
    %c3_665 = arith.constant 3 : index
    %c32_666 = arith.constant 32 : index
    %1162 = vector.load %arg15[%c3_665, %c32_666] : memref<6x384xf32, #tpu.memory_space<vmem>>, vector<1x256xf32>
    %1163 = arith.mulf %1162, %4 : vector<1x256xf32>
    %c0_667 = arith.constant 0 : index
    %c33_668 = arith.constant 33 : index
    %1164 = vector.load %arg12[%c0_667, %c33_668] : memref<6x54xf32, #tpu.memory_space<vmem>>, vector<6x1xf32>
    %1165 = vector.broadcast %1164 : vector<6x1xf32> to vector<6x256xf32>
    %1166 = vector.broadcast %1163 : vector<1x256xf32> to vector<6x256xf32>
    %1167 = arith.mulf %1165, %1166 : vector<6x256xf32>
    %1168 = arith.addf %1161, %1167 : vector<6x256xf32>
    %c3_669 = arith.constant 3 : index
    %c33_670 = arith.constant 33 : index
    %1169 = vector.load %arg15[%c3_669, %c33_670] : memref<6x384xf32, #tpu.memory_space<vmem>>, vector<1x256xf32>
    %c0_671 = arith.constant 0 : index
    %c34_672 = arith.constant 34 : index
    %1170 = vector.load %arg12[%c0_671, %c34_672] : memref<6x54xf32, #tpu.memory_space<vmem>>, vector<6x1xf32>
    %1171 = vector.broadcast %1170 : vector<6x1xf32> to vector<6x256xf32>
    %1172 = vector.broadcast %1169 : vector<1x256xf32> to vector<6x256xf32>
    %1173 = arith.mulf %1171, %1172 : vector<6x256xf32>
    %1174 = arith.addf %1168, %1173 : vector<6x256xf32>
    %c3_673 = arith.constant 3 : index
    %c34_674 = arith.constant 34 : index
    %1175 = vector.load %arg15[%c3_673, %c34_674] : memref<6x384xf32, #tpu.memory_space<vmem>>, vector<1x256xf32>
    %1176 = arith.mulf %1175, %5 : vector<1x256xf32>
    %c0_675 = arith.constant 0 : index
    %c35_676 = arith.constant 35 : index
    %1177 = vector.load %arg12[%c0_675, %c35_676] : memref<6x54xf32, #tpu.memory_space<vmem>>, vector<6x1xf32>
    %1178 = vector.broadcast %1177 : vector<6x1xf32> to vector<6x256xf32>
    %1179 = vector.broadcast %1176 : vector<1x256xf32> to vector<6x256xf32>
    %1180 = arith.mulf %1178, %1179 : vector<6x256xf32>
    %1181 = arith.addf %1174, %1180 : vector<6x256xf32>
    %c4_677 = arith.constant 4 : index
    %c0_678 = arith.constant 0 : index
    %1182 = vector.load %arg15[%c4_677, %c0_678] : memref<6x384xf32, #tpu.memory_space<vmem>>, vector<1x256xf32>
    %1183 = arith.mulf %1182, %4 : vector<1x256xf32>
    %c0_679 = arith.constant 0 : index
    %c36_680 = arith.constant 36 : index
    %1184 = vector.load %arg12[%c0_679, %c36_680] : memref<6x54xf32, #tpu.memory_space<vmem>>, vector<6x1xf32>
    %1185 = vector.broadcast %1184 : vector<6x1xf32> to vector<6x256xf32>
    %1186 = vector.broadcast %1183 : vector<1x256xf32> to vector<6x256xf32>
    %1187 = arith.mulf %1185, %1186 : vector<6x256xf32>
    %1188 = arith.addf %1181, %1187 : vector<6x256xf32>
    %c4_681 = arith.constant 4 : index
    %c1_682 = arith.constant 1 : index
    %1189 = vector.load %arg15[%c4_681, %c1_682] : memref<6x384xf32, #tpu.memory_space<vmem>>, vector<1x256xf32>
    %c0_683 = arith.constant 0 : index
    %c37_684 = arith.constant 37 : index
    %1190 = vector.load %arg12[%c0_683, %c37_684] : memref<6x54xf32, #tpu.memory_space<vmem>>, vector<6x1xf32>
    %1191 = vector.broadcast %1190 : vector<6x1xf32> to vector<6x256xf32>
    %1192 = vector.broadcast %1189 : vector<1x256xf32> to vector<6x256xf32>
    %1193 = arith.mulf %1191, %1192 : vector<6x256xf32>
    %1194 = arith.addf %1188, %1193 : vector<6x256xf32>
    %c4_685 = arith.constant 4 : index
    %c2_686 = arith.constant 2 : index
    %1195 = vector.load %arg15[%c4_685, %c2_686] : memref<6x384xf32, #tpu.memory_space<vmem>>, vector<1x256xf32>
    %1196 = arith.mulf %1195, %5 : vector<1x256xf32>
    %c0_687 = arith.constant 0 : index
    %c38_688 = arith.constant 38 : index
    %1197 = vector.load %arg12[%c0_687, %c38_688] : memref<6x54xf32, #tpu.memory_space<vmem>>, vector<6x1xf32>
    %1198 = vector.broadcast %1197 : vector<6x1xf32> to vector<6x256xf32>
    %1199 = vector.broadcast %1196 : vector<1x256xf32> to vector<6x256xf32>
    %1200 = arith.mulf %1198, %1199 : vector<6x256xf32>
    %1201 = arith.addf %1194, %1200 : vector<6x256xf32>
    %c4_689 = arith.constant 4 : index
    %c16_690 = arith.constant 16 : index
    %1202 = vector.load %arg15[%c4_689, %c16_690] : memref<6x384xf32, #tpu.memory_space<vmem>>, vector<1x256xf32>
    %1203 = arith.mulf %1202, %4 : vector<1x256xf32>
    %c0_691 = arith.constant 0 : index
    %c39_692 = arith.constant 39 : index
    %1204 = vector.load %arg12[%c0_691, %c39_692] : memref<6x54xf32, #tpu.memory_space<vmem>>, vector<6x1xf32>
    %1205 = vector.broadcast %1204 : vector<6x1xf32> to vector<6x256xf32>
    %1206 = vector.broadcast %1203 : vector<1x256xf32> to vector<6x256xf32>
    %1207 = arith.mulf %1205, %1206 : vector<6x256xf32>
    %1208 = arith.addf %1201, %1207 : vector<6x256xf32>
    %c4_693 = arith.constant 4 : index
    %c17_694 = arith.constant 17 : index
    %1209 = vector.load %arg15[%c4_693, %c17_694] : memref<6x384xf32, #tpu.memory_space<vmem>>, vector<1x256xf32>
    %c0_695 = arith.constant 0 : index
    %c40_696 = arith.constant 40 : index
    %1210 = vector.load %arg12[%c0_695, %c40_696] : memref<6x54xf32, #tpu.memory_space<vmem>>, vector<6x1xf32>
    %1211 = vector.broadcast %1210 : vector<6x1xf32> to vector<6x256xf32>
    %1212 = vector.broadcast %1209 : vector<1x256xf32> to vector<6x256xf32>
    %1213 = arith.mulf %1211, %1212 : vector<6x256xf32>
    %1214 = arith.addf %1208, %1213 : vector<6x256xf32>
    %c4_697 = arith.constant 4 : index
    %c18_698 = arith.constant 18 : index
    %1215 = vector.load %arg15[%c4_697, %c18_698] : memref<6x384xf32, #tpu.memory_space<vmem>>, vector<1x256xf32>
    %1216 = arith.mulf %1215, %5 : vector<1x256xf32>
    %c0_699 = arith.constant 0 : index
    %c41_700 = arith.constant 41 : index
    %1217 = vector.load %arg12[%c0_699, %c41_700] : memref<6x54xf32, #tpu.memory_space<vmem>>, vector<6x1xf32>
    %1218 = vector.broadcast %1217 : vector<6x1xf32> to vector<6x256xf32>
    %1219 = vector.broadcast %1216 : vector<1x256xf32> to vector<6x256xf32>
    %1220 = arith.mulf %1218, %1219 : vector<6x256xf32>
    %1221 = arith.addf %1214, %1220 : vector<6x256xf32>
    %c4_701 = arith.constant 4 : index
    %c32_702 = arith.constant 32 : index
    %1222 = vector.load %arg15[%c4_701, %c32_702] : memref<6x384xf32, #tpu.memory_space<vmem>>, vector<1x256xf32>
    %1223 = arith.mulf %1222, %4 : vector<1x256xf32>
    %c0_703 = arith.constant 0 : index
    %c42_704 = arith.constant 42 : index
    %1224 = vector.load %arg12[%c0_703, %c42_704] : memref<6x54xf32, #tpu.memory_space<vmem>>, vector<6x1xf32>
    %1225 = vector.broadcast %1224 : vector<6x1xf32> to vector<6x256xf32>
    %1226 = vector.broadcast %1223 : vector<1x256xf32> to vector<6x256xf32>
    %1227 = arith.mulf %1225, %1226 : vector<6x256xf32>
    %1228 = arith.addf %1221, %1227 : vector<6x256xf32>
    %c4_705 = arith.constant 4 : index
    %c33_706 = arith.constant 33 : index
    %1229 = vector.load %arg15[%c4_705, %c33_706] : memref<6x384xf32, #tpu.memory_space<vmem>>, vector<1x256xf32>
    %c0_707 = arith.constant 0 : index
    %c43_708 = arith.constant 43 : index
    %1230 = vector.load %arg12[%c0_707, %c43_708] : memref<6x54xf32, #tpu.memory_space<vmem>>, vector<6x1xf32>
    %1231 = vector.broadcast %1230 : vector<6x1xf32> to vector<6x256xf32>
    %1232 = vector.broadcast %1229 : vector<1x256xf32> to vector<6x256xf32>
    %1233 = arith.mulf %1231, %1232 : vector<6x256xf32>
    %1234 = arith.addf %1228, %1233 : vector<6x256xf32>
    %c4_709 = arith.constant 4 : index
    %c34_710 = arith.constant 34 : index
    %1235 = vector.load %arg15[%c4_709, %c34_710] : memref<6x384xf32, #tpu.memory_space<vmem>>, vector<1x256xf32>
    %1236 = arith.mulf %1235, %5 : vector<1x256xf32>
    %c0_711 = arith.constant 0 : index
    %c44_712 = arith.constant 44 : index
    %1237 = vector.load %arg12[%c0_711, %c44_712] : memref<6x54xf32, #tpu.memory_space<vmem>>, vector<6x1xf32>
    %1238 = vector.broadcast %1237 : vector<6x1xf32> to vector<6x256xf32>
    %1239 = vector.broadcast %1236 : vector<1x256xf32> to vector<6x256xf32>
    %1240 = arith.mulf %1238, %1239 : vector<6x256xf32>
    %1241 = arith.addf %1234, %1240 : vector<6x256xf32>
    %c5_713 = arith.constant 5 : index
    %c0_714 = arith.constant 0 : index
    %1242 = vector.load %arg15[%c5_713, %c0_714] : memref<6x384xf32, #tpu.memory_space<vmem>>, vector<1x256xf32>
    %1243 = arith.mulf %1242, %4 : vector<1x256xf32>
    %c0_715 = arith.constant 0 : index
    %c45_716 = arith.constant 45 : index
    %1244 = vector.load %arg12[%c0_715, %c45_716] : memref<6x54xf32, #tpu.memory_space<vmem>>, vector<6x1xf32>
    %1245 = vector.broadcast %1244 : vector<6x1xf32> to vector<6x256xf32>
    %1246 = vector.broadcast %1243 : vector<1x256xf32> to vector<6x256xf32>
    %1247 = arith.mulf %1245, %1246 : vector<6x256xf32>
    %1248 = arith.addf %1241, %1247 : vector<6x256xf32>
    %c5_717 = arith.constant 5 : index
    %c1_718 = arith.constant 1 : index
    %1249 = vector.load %arg15[%c5_717, %c1_718] : memref<6x384xf32, #tpu.memory_space<vmem>>, vector<1x256xf32>
    %c0_719 = arith.constant 0 : index
    %c46_720 = arith.constant 46 : index
    %1250 = vector.load %arg12[%c0_719, %c46_720] : memref<6x54xf32, #tpu.memory_space<vmem>>, vector<6x1xf32>
    %1251 = vector.broadcast %1250 : vector<6x1xf32> to vector<6x256xf32>
    %1252 = vector.broadcast %1249 : vector<1x256xf32> to vector<6x256xf32>
    %1253 = arith.mulf %1251, %1252 : vector<6x256xf32>
    %1254 = arith.addf %1248, %1253 : vector<6x256xf32>
    %c5_721 = arith.constant 5 : index
    %c2_722 = arith.constant 2 : index
    %1255 = vector.load %arg15[%c5_721, %c2_722] : memref<6x384xf32, #tpu.memory_space<vmem>>, vector<1x256xf32>
    %1256 = arith.mulf %1255, %5 : vector<1x256xf32>
    %c0_723 = arith.constant 0 : index
    %c47_724 = arith.constant 47 : index
    %1257 = vector.load %arg12[%c0_723, %c47_724] : memref<6x54xf32, #tpu.memory_space<vmem>>, vector<6x1xf32>
    %1258 = vector.broadcast %1257 : vector<6x1xf32> to vector<6x256xf32>
    %1259 = vector.broadcast %1256 : vector<1x256xf32> to vector<6x256xf32>
    %1260 = arith.mulf %1258, %1259 : vector<6x256xf32>
    %1261 = arith.addf %1254, %1260 : vector<6x256xf32>
    %c5_725 = arith.constant 5 : index
    %c16_726 = arith.constant 16 : index
    %1262 = vector.load %arg15[%c5_725, %c16_726] : memref<6x384xf32, #tpu.memory_space<vmem>>, vector<1x256xf32>
    %1263 = arith.mulf %1262, %4 : vector<1x256xf32>
    %c0_727 = arith.constant 0 : index
    %c48_728 = arith.constant 48 : index
    %1264 = vector.load %arg12[%c0_727, %c48_728] : memref<6x54xf32, #tpu.memory_space<vmem>>, vector<6x1xf32>
    %1265 = vector.broadcast %1264 : vector<6x1xf32> to vector<6x256xf32>
    %1266 = vector.broadcast %1263 : vector<1x256xf32> to vector<6x256xf32>
    %1267 = arith.mulf %1265, %1266 : vector<6x256xf32>
    %1268 = arith.addf %1261, %1267 : vector<6x256xf32>
    %c5_729 = arith.constant 5 : index
    %c17_730 = arith.constant 17 : index
    %1269 = vector.load %arg15[%c5_729, %c17_730] : memref<6x384xf32, #tpu.memory_space<vmem>>, vector<1x256xf32>
    %c0_731 = arith.constant 0 : index
    %c49_732 = arith.constant 49 : index
    %1270 = vector.load %arg12[%c0_731, %c49_732] : memref<6x54xf32, #tpu.memory_space<vmem>>, vector<6x1xf32>
    %1271 = vector.broadcast %1270 : vector<6x1xf32> to vector<6x256xf32>
    %1272 = vector.broadcast %1269 : vector<1x256xf32> to vector<6x256xf32>
    %1273 = arith.mulf %1271, %1272 : vector<6x256xf32>
    %1274 = arith.addf %1268, %1273 : vector<6x256xf32>
    %c5_733 = arith.constant 5 : index
    %c18_734 = arith.constant 18 : index
    %1275 = vector.load %arg15[%c5_733, %c18_734] : memref<6x384xf32, #tpu.memory_space<vmem>>, vector<1x256xf32>
    %1276 = arith.mulf %1275, %5 : vector<1x256xf32>
    %c0_735 = arith.constant 0 : index
    %c50_736 = arith.constant 50 : index
    %1277 = vector.load %arg12[%c0_735, %c50_736] : memref<6x54xf32, #tpu.memory_space<vmem>>, vector<6x1xf32>
    %1278 = vector.broadcast %1277 : vector<6x1xf32> to vector<6x256xf32>
    %1279 = vector.broadcast %1276 : vector<1x256xf32> to vector<6x256xf32>
    %1280 = arith.mulf %1278, %1279 : vector<6x256xf32>
    %1281 = arith.addf %1274, %1280 : vector<6x256xf32>
    %c5_737 = arith.constant 5 : index
    %c32_738 = arith.constant 32 : index
    %1282 = vector.load %arg15[%c5_737, %c32_738] : memref<6x384xf32, #tpu.memory_space<vmem>>, vector<1x256xf32>
    %1283 = arith.mulf %1282, %4 : vector<1x256xf32>
    %c0_739 = arith.constant 0 : index
    %c51_740 = arith.constant 51 : index
    %1284 = vector.load %arg12[%c0_739, %c51_740] : memref<6x54xf32, #tpu.memory_space<vmem>>, vector<6x1xf32>
    %1285 = vector.broadcast %1284 : vector<6x1xf32> to vector<6x256xf32>
    %1286 = vector.broadcast %1283 : vector<1x256xf32> to vector<6x256xf32>
    %1287 = arith.mulf %1285, %1286 : vector<6x256xf32>
    %1288 = arith.addf %1281, %1287 : vector<6x256xf32>
    %c5_741 = arith.constant 5 : index
    %c33_742 = arith.constant 33 : index
    %1289 = vector.load %arg15[%c5_741, %c33_742] : memref<6x384xf32, #tpu.memory_space<vmem>>, vector<1x256xf32>
    %c0_743 = arith.constant 0 : index
    %c52_744 = arith.constant 52 : index
    %1290 = vector.load %arg12[%c0_743, %c52_744] : memref<6x54xf32, #tpu.memory_space<vmem>>, vector<6x1xf32>
    %1291 = vector.broadcast %1290 : vector<6x1xf32> to vector<6x256xf32>
    %1292 = vector.broadcast %1289 : vector<1x256xf32> to vector<6x256xf32>
    %1293 = arith.mulf %1291, %1292 : vector<6x256xf32>
    %1294 = arith.addf %1288, %1293 : vector<6x256xf32>
    %c5_745 = arith.constant 5 : index
    %c34_746 = arith.constant 34 : index
    %1295 = vector.load %arg15[%c5_745, %c34_746] : memref<6x384xf32, #tpu.memory_space<vmem>>, vector<1x256xf32>
    %1296 = arith.mulf %1295, %5 : vector<1x256xf32>
    %c0_747 = arith.constant 0 : index
    %c53_748 = arith.constant 53 : index
    %1297 = vector.load %arg12[%c0_747, %c53_748] : memref<6x54xf32, #tpu.memory_space<vmem>>, vector<6x1xf32>
    %1298 = vector.broadcast %1297 : vector<6x1xf32> to vector<6x256xf32>
    %1299 = vector.broadcast %1296 : vector<1x256xf32> to vector<6x256xf32>
    %1300 = arith.mulf %1298, %1299 : vector<6x256xf32>
    %1301 = arith.addf %1294, %1300 : vector<6x256xf32>
    %c0_749 = arith.constant 0 : index
    %c0_750 = arith.constant 0 : index
    %1302 = vector.load %arg13[%c0_749, %c0_750] : memref<6x1xf32, #tpu.memory_space<vmem>>, vector<6x1xf32>
    %1303 = vector.broadcast %1302 : vector<6x1xf32> to vector<6x256xf32>
    %1304 = arith.addf %1301, %1303 : vector<6x256xf32>
    %c0_751 = arith.constant 0 : index
    %c0_752 = arith.constant 0 : index
    %c0_753 = arith.constant 0 : index
    %1305 = vector.load %arg14[%c0_751, %c0_752, %c0_753] : memref<1x15x256xf32, #tpu.memory_space<vmem>>, vector<1x6x256xf32>
    %1306 = vector.shape_cast %1305 : vector<1x6x256xf32> to vector<6x256xf32>
    %1307 = vector.shape_cast %1304 : vector<6x256xf32> to vector<1x6x256xf32>
    tpu.vector_store %arg14[%c0_751, %c0_752, %c0_753], %1307 {strides = array<i32>} : memref<1x15x256xf32, #tpu.memory_space<vmem>>, vector<1x6x256xf32>,
    return
  }
  func.func @transform_0(%arg0: i32) -> (i32, i32, i32) {
    %c0_i32 = arith.constant 0 : i32
    %c0_i32_0 = arith.constant 0 : i32
    %c0_i32_1 = arith.constant 0 : i32
    return %arg0, %c0_i32, %c0_i32_0 : i32, i32, i32
  }
  func.func @transform_1(%arg0: i32) -> (i32, i32) {
    %c0_i32 = arith.constant 0 : i32
    %c0_i32_0 = arith.constant 0 : i32
    %c0_i32_1 = arith.constant 0 : i32
    return %c0_i32, %c0_i32_0 : i32, i32
  }
  func.func @transform_2(%arg0: i32) -> (i32, i32) {
    %c0_i32 = arith.constant 0 : i32
    %c0_i32_0 = arith.constant 0 : i32
    %c0_i32_1 = arith.constant 0 : i32
    return %c0_i32, %c0_i32_0 : i32, i32
  }
  func.func @transform_3(%arg0: i32) -> (i32, i32) {
    %c0_i32 = arith.constant 0 : i32
    %c0_i32_0 = arith.constant 0 : i32
    %c0_i32_1 = arith.constant 0 : i32
    return %c0_i32, %c0_i32_0 : i32, i32
  }
  func.func @transform_4(%arg0: i32) -> (i32, i32) {
    %c0_i32 = arith.constant 0 : i32
    %c0_i32_0 = arith.constant 0 : i32
    %c0_i32_1 = arith.constant 0 : i32
    return %c0_i32, %c0_i32_0 : i32, i32
  }
  func.func @transform_5(%arg0: i32) -> (i32, i32) {
    %c0_i32 = arith.constant 0 : i32
    %c0_i32_0 = arith.constant 0 : i32
    %c0_i32_1 = arith.constant 0 : i32
    return %c0_i32, %c0_i32_0 : i32, i32
  }
  func.func @transform_6(%arg0: i32) -> (i32, i32) {
    %c0_i32 = arith.constant 0 : i32
    %c0_i32_0 = arith.constant 0 : i32
    %c0_i32_1 = arith.constant 0 : i32
    return %c0_i32, %c0_i32_0 : i32, i32
  }
  func.func @transform_7(%arg0: i32) -> (i32, i32) {
    %c0_i32 = arith.constant 0 : i32
    %c0_i32_0 = arith.constant 0 : i32
    %c0_i32_1 = arith.constant 0 : i32
    return %c0_i32, %c0_i32_0 : i32, i32
  }
  func.func @transform_8(%arg0: i32) -> (i32, i32) {
    %c0_i32 = arith.constant 0 : i32
    %c0_i32_0 = arith.constant 0 : i32
    %c0_i32_1 = arith.constant 0 : i32
    return %c0_i32, %c0_i32_0 : i32, i32
  }
  func.func @transform_9(%arg0: i32) -> (i32, i32) {
    %c0_i32 = arith.constant 0 : i32
    %c0_i32_0 = arith.constant 0 : i32
    %c0_i32_1 = arith.constant 0 : i32
    return %c0_i32, %c0_i32_0 : i32, i32
  }
  func.func @transform_10(%arg0: i32) -> (i32, i32) {
    %c0_i32 = arith.constant 0 : i32
    %c0_i32_0 = arith.constant 0 : i32
    %c0_i32_1 = arith.constant 0 : i32
    return %c0_i32, %c0_i32_0 : i32, i32
  }
  func.func @transform_11(%arg0: i32) -> (i32, i32) {
    %c0_i32 = arith.constant 0 : i32
    %c0_i32_0 = arith.constant 0 : i32
    %c0_i32_1 = arith.constant 0 : i32
    return %c0_i32, %c0_i32_0 : i32, i32
  }
  func.func @transform_12(%arg0: i32) -> (i32, i32) {
    %c0_i32 = arith.constant 0 : i32
    %c0_i32_0 = arith.constant 0 : i32
    %c0_i32_1 = arith.constant 0 : i32
    return %c0_i32, %c0_i32_0 : i32, i32
  }
  func.func @transform_13(%arg0: i32) -> (i32, i32, i32) {
    %c0_i32 = arith.constant 0 : i32
    %c0_i32_0 = arith.constant 0 : i32
    %c0_i32_1 = arith.constant 0 : i32
    return %arg0, %c0_i32, %c0_i32_0 : i32, i32, i32
  }
}

</mosaic_0001>

<bundles_post_ra>
// kernel: amten_forward.1
= control target key start
LH: loop header
LB: loop body
LE: loop exit
PB: predicated region body
PF: predicated region fallthrough
CT: control target
= control target key end

     0   :  { %s7424_s25 = smov 0   ;;  %s11827_s0 = inlined_call_operand.vmem [shape: f32[2,3,256], index: 0, kind: input, shape index: {}]   ;;  %s11828_s1 = inlined_call_operand.vmem [shape: f32[1,256], index: 1, kind: input, shape index: {}]   ;;  %s11829_s2 = inlined_call_operand.vmem [shape: f32[1,256], index: 2, kind: input, shape index: {}]   ;;  %s11830_s3 = inlined_call_operand.vmem [shape: f32[3,27], index: 3, kind: input, shape index: {}]   ;;  %s11831_s4 = inlined_call_operand.vmem [shape: f32[3,1], index: 4, kind: input, shape index: {}]   ;;  %s11832_s5 = inlined_call_operand.vmem [shape: f32[3,27], index: 5, kind: input, shape index: {}]   ;;  %s11833_s6 = inlined_call_operand.vmem [shape: f32[3,1], index: 6, kind: input, shape index: {}]   ;;  %s11834_s7 = inlined_call_operand.vmem [shape: f32[3,27], index: 7, kind: input, shape index: {}]   ;;  %s11835_s8 = inlined_call_operand.vmem [shape: f32[3,1], index: 8, kind: input, shape index: {}]   ;;  %s11836_s9 = inlined_call_operand.vmem [shape: f32[6,54], index: 9, kind: input, shape index: {}]   ;;  %s11837_s10 = inlined_call_operand.vmem [shape: f32[6,1], index: 10, kind: input, shape index: {}]   ;;  %s11838_s11 = inlined_call_operand.vmem [shape: f32[6,54], index: 11, kind: input, shape index: {}]   ;;  %s11839_s12 = inlined_call_operand.vmem [shape: f32[6,1], index: 12, kind: input, shape index: {}]   ;;  %s11840_s13 = inlined_call_operand.vmem [shape: f32[2,15,256], index: 13, kind: output, shape index: {}]  }
   0x1 LB: > { %s6986_s26 = sadd.s32 4294967295, %s7283_s25   ;;  %p6990_p0 = scmp.ge.s32.totalorder %s7283_s25, 1  ;;  %s7283_s25 = sphi %s7424_s25, %s23_s25  }
   0x2   : > { %p387_p1 = scmp.lt.s32.totalorder %s7283_s25, 3 }
   0x4   : > { %p388_p2 = pnand %p6990_p0, %p387_p1 }
   0x6   : > { %391 = sbr.rel (%p388_p2) target bundleno = 6710 (0x1a36), region = 72 }
   0xd   : > { %v7435_v0 = vld [vmem:[%s11830_s3] sm:$0x7]  ;;  %p431_p3 = scmp.lt.s32.totalorder %s6986_s26, 1  ;;  %v11881_v1 = vmov 0   ;;  %v11869_v2 = vmov 2   ;;  %v11879_v3 = vmov 1   ;;  %v475_v24 = vlaneseq }
   0xe   : > { %7076 = vset.pattern.permute.xlu1 %v11881_v1  ;;  %7078 = vset.pattern.permute.xlu0 %v11869_v2  ;;  %v7288_v5 = vmov 0.0   ;;  %s7289_s16 = smov 17   ;;  %v448_v7 = vld [vmem:[%s11829_s2] sm:$0x3]  ;;  %s7290_s19 = smov 2   ;;  %v11871_v9 = vmov 4  }
   0xf   : > { %471 = vperm.xlu1 %7076, %v7435_v0   ;;  %s12632_s26 = smov (!%p431_p3, %s6986_s26), 1  ;;  %441 = vst [vmem:[#allocation2] sm:$0x3f] %v7288_v5  ;;  %442 = vst [vmem:[#allocation2 + $0x8] sm:$0x3f] %v7288_v5  ;;  %s7292_s22 = smov 16  }
  0x10   : > { %s6997_s29 = sshll.u32 %s12632_s26, 3  ;;  %443 = vst [vmem:[#allocation2 + $0x10] sm:$0x3f] %v7288_v5  ;;  %444 = vst [vmem:[#allocation3] sm:$0x3f] %v7288_v5  ;;  %v11875_v10 = vmov 3  }
  0x11   : > { %s7446_s15 = scalar_lea.vmem %s11827_s0, %s6997_s29  ;;  %445 = vst [vmem:[#allocation3 + $0x8] sm:$0x3f] %v7288_v5  ;;  %446 = vst [vmem:[#allocation3 + $0x10] sm:$0x3f] %v7288_v5  ;;  %v7459_v8 = vld [vmem:[%s11828_s1] sm:$0x3] }
  0x12   : > { %v449_v4 = vld [vmem:[%s7446_s15] sm:$0x77]  ;;  %s7294_s23 = smov 18   ;;  %v11867_v11 = vmov 5   ;;  %v11863_v12 = vmov 7   ;;  %s7297_s24 = smov 32  }
  0x13   : > { %7077 = vset.pattern.permute.xlu1 %v11879_v3  ;;  %452 = vrot.lane.b32.xlu0 %v449_v4, %s7289_s16  ;;  %v451_v6 = vcombine.high %v449_v4, %v449_v4  ;;  %v11865_v13 = vmov 6   ;;  %v11861_v14 = vmov 8   ;;  %s7300_s27 = smov 34   ;;  %v11859_v15 = vmov 9   ;;  %s7309_s28 = smov 127  }
  0x14   : > { %491 = vperm.xlu1 %7077, %v7435_v0   ;;  %v11877_v16 = vmov 10   ;;  %v11857_v17 = vmov 11   ;;  %v11855_v18 = vmov 12   ;;  %v11853_v19 = vmov 13   ;;  %s7310_s29 = smov 111   ;;  %s7311_s30 = smov 95  }
  0x15   : > { %v11849_v20 = vmov 14   ;;  %v11847_v21 = vmov 15   ;;  %v11845_v22 = vmov 16   ;;  %vm461_vm0 = vcmask 1042568   ;;  %s7312_s14 = smov 126   ;;  %s7313_s17 = smov 112  }
  0x16   : > { %vm456_vm1 = vcmask 138240   ;;  %vm464_vm2 = vcmask 133120   ;;  %v476_v27 = vshrl.u32 %v475_v24, 7  ;;  %vm533_vm3 = vcmask 15360   ;;  %s7314_s18 = smov 110   ;;  %s7316_s20 = smov 94  }
  0x17   : > { %454 = vrot.lane.b32.xlu0 %v451_v6, %s7289_s16  ;;  %vm580_vm4 = vcmask 130048   ;;  %vm649_vm5 = vcmask 146432   ;;  %vm695_vm6 = vcmask 261120   ;;  %vm764_vm7 = vcmask 277504  }
  0x18   : > { %530 = vrot.lane.b32.xlu1 %v448_v7, %s7290_s19  ;;  %v7496_v29 = vsub.s32 0, %v476_v27  ;;  %v7498_v30 = vsub.s32 1, %v476_v27  ;;  %v7500_v31 = vsub.s32 2, %v476_v27  ;;  %s7315_s19 = smov 96   ;;  %vm522_vm8 = vcmask 1039360  }
  0x19   : > { %7080 = vset.pattern.permute.xlu1 %v11871_v9  ;;  %vm569_vm9 = vcmask 1031168   ;;  %vm616_vm10 = vcmask 916480   ;;  %vm639_vm11 = vcmask 908288   ;;  %vm685_vm12 = vcmask 900096  }
  0x1a   : > { %12070 = vst [vmem:[#allocation4_spill] sm:$0xff] %v7500_v31  ;;  %vm731_vm13 = vcmask 785408   ;;  %vm754_vm14 = vcmask 777216   ;;  %vm800_vm15 = vcmask 769024  }
  0x1b   : > { %538 = vperm.xlu0 %7078, %v7435_v0  }
  0x1c   : > { %577 = vrot.lane.b32.xlu1 %v7459_v8, %s7292_s22  ;;  %s6998_s22 = sshll.u32 %s12632_s26, 5 }
  0x1f   : > { %7079 = vset.pattern.permute.xlu0 %v11875_v10 }
  0x20   : > { %624 = vperm.xlu1 %7080, %v7435_v0   ;;  %585 = vperm.xlu0 %7079, %v7435_v0  }
  0x24   : > { %646 = vrot.lane.b32.xlu1 %v448_v7, %s7294_s23  ;;  %7081 = vset.pattern.permute.xlu0 %v11867_v11 }
  0x25   : > { %7083 = vset.pattern.permute.xlu1 %v11863_v12  ;;  %654 = vperm.xlu0 %7081, %v7435_v0  }
  0x28   : > { %692 = vrot.lane.b32.xlu1 %v7459_v8, %s7297_s24 }
  0x29   : > { %7082 = vset.pattern.permute.xlu0 %v11865_v13 }
  0x2a   : > { %700 = vperm.xlu0 %7082, %v7435_v0  }
  0x2c   : > { %739 = vperm.xlu1 %7083, %v7435_v0  }
  0x2e   : > { %7084 = vset.pattern.permute.xlu0 %v11861_v14 }
  0x2f   : > { %769 = vperm.xlu0 %7084, %v7435_v0  }
  0x30   : > { %761 = vrot.lane.b32.xlu1 %v448_v7, %s7300_s27  ;;  %s8119_s27 = scalar_lea.vmem %s11840_s13, %s6998_s22 }
  0x31   : > { %7085 = vset.pattern.permute.xlu1 %v11859_v15 }
  0x33   : > { %7086 = vset.pattern.permute.xlu0 %v11877_v16 }
  0x34   : > { %811 = vperm.xlu1 %7085, %v7435_v0   ;;  %831 = vperm.xlu0 %7086, %v7435_v0  }
  0x38   : > { %7087 = vset.pattern.permute.xlu1 %v11857_v17 }
  0x39   : > { %870 = vperm.xlu1 %7087, %v7435_v0  }
  0x3d   : > { %7088 = vset.pattern.permute.xlu1 %v11855_v18 }
  0x3e   : > { %909 = vperm.xlu1 %7088, %v7435_v0  }
  0x42   : > { %7089 = vset.pattern.permute.xlu1 %v11853_v19 }
  0x43   : > { %947 = vperm.xlu1 %7089, %v7435_v0  }
  0x47   : > { %7090 = vset.pattern.permute.xlu1 %v11849_v20 }
  0x48   : > { %970 = vperm.xlu1 %7090, %v7435_v0  }
  0x4c   : > { %7091 = vset.pattern.permute.xlu1 %v11847_v21 }
  0x4d   : > { %1009 = vperm.xlu1 %7091, %v7435_v0  }
  0x51   : > { %7092 = vset.pattern.permute.xlu1 %v11845_v22 }
  0x85   : > { %v453_v23 = vpop.permute.xlu0 %452 }
  0x86   : > { %462 = vst.msk [vmem:[#allocation2] sm:$0x7] %vm461_vm0, %v453_v23 }
  0x89   : > { %v455_v25 = vpop.permute.xlu0 %454 }
  0x8a   : > { %v457_v26 = vsel %vm456_vm1, %v453_v23, %v455_v25  ;;  %465 = vst.msk [vmem:[#allocation2 + $0x10] sm:$0x7] %vm464_vm2, %v455_v25 }
  0x8b   : > { %463 = vst [vmem:[#allocation2 + $0x8] sm:$0x7] %v457_v26 }
  0x8e   : > { %v7494_v28 = vpop.permute.xlu1 %471 }
  0x92   : > { %v7502_v32 = vld [vmem:[#allocation2] ss:$8 sm:$0x7]  ;;  %v7528_v57 = vld [vmem:[#allocation2 + $0x1] ss:$8 sm:$0x7] }
  0x93   : > { %v492_v33 = vpop.permute.xlu1 %491  ;;  %v502_v34 = vrot.slane %v7502_v32, %v7498_v30  ;;  %v498_v35 = vrot.slane %v7502_v32, %v7496_v29  ;;  %v506_v38 = vrot.slane %v7502_v32, %v7500_v31  ;;  %v7535_v60 = vrot.slane %v7528_v57, %v7500_v31  ;;  %v7779_v9 = vld [vmem:[#allocation2 + $0x2] ss:$8 sm:$0x7] }
  0x94   : > { %v7539_v61 = vrot.slane %v7528_v57, %v7496_v29  ;;  %v7547_v5 = vrot.slane %v7528_v57, %v7498_v30  ;;  %v7785_v10 = vrot.slane %v7779_v9, %v7500_v31  ;;  %v7789_v16 = vrot.slane %v7779_v9, %v7496_v29 }
  0x95   : > { %v511_v36 = vmul.f32 %v502_v34, %v492_v33  ;;  %v510_v37 = vmul.f32 %v498_v35, %v492_v33  ;;  %v512_v40 = vmul.f32 %v506_v38, %v492_v33 }
  0x97   : > { %v531_v39 = vpop.permute.xlu1 %530  ;;  %518 = vrot.lane.b32.xlu1 %v511_v36, %s7309_s28  ;;  %516 = vrot.lane.b32.xlu0 %v510_v37, %s7309_s28 }
  0x98   : > { %v532_v6 = vrot.slane %v531_v39, 7 }
  0x9a   : > { %v7512_v42 = vpop.permute.xlu0 %538  ;;  %v7553_v24 = vsel %vm533_vm3, %v532_v6, %v531_v39  ;;  %vm1450_vm3 = vcmask 136195  }
  0x9b   : > { %v578_v41 = vpop.permute.xlu1 %577  ;;  %520 = vrot.lane.b32.xlu0 %v512_v40, %s7309_s28  ;;  %12071 = vst [vmem:[#allocation5_spill] sm:$0xff] %v7553_v24  ;;  %v536_v26 = vmul.f32 %v7553_v24, %v7502_v32 }
  0x9c   : > { %v579_v27 = vrot.slane %v578_v41, 7 }
  0x9d   : > { %v545_v36 = vrot.slane %v536_v26, %v7496_v29  ;;  %v553_v39 = vrot.slane %v536_v26, %v7500_v31 }
  0x9e   : > { %v7562_v37 = vsel %vm580_vm4, %v579_v27, %v578_v41  ;;  %vm1447_vm4 = vcmask 1045643  }
  0x9f   : > { %v625_v43 = vpop.permute.xlu1 %624  ;;  %v7515_v46 = vpop.permute.xlu0 %585  ;;  %12072 = vst [vmem:[#allocation6_spill] sm:$0xff] %v7562_v37 }
  0xa0   : > { %v628_v44 = vmul.f32 %v625_v43, %v502_v34  ;;  %v627_v45 = vmul.f32 %v625_v43, %v498_v35  ;;  %v629_v48 = vmul.f32 %v625_v43, %v506_v38  ;;  %v557_v43 = vmul.f32 %v545_v36, %v7512_v42 }
  0xa2   : > { %635 = vrot.lane.b32.xlu1 %v628_v44, %s7310_s29  ;;  %633 = vrot.lane.b32.xlu0 %v627_v45, %s7310_s29  ;;  %v549_v44 = vrot.slane %v536_v26, %v7498_v30  ;;  %v583_v45 = vmul.f32 %v7562_v37, %v7502_v32 }
  0xa3   : > { %v647_v47 = vpop.permute.xlu1 %646 }
  0xa4   : > { %v7519_v49 = vpop.permute.xlu0 %654 }
  0xa6   : > { %637 = vrot.lane.b32.xlu0 %v629_v48, %s7310_s29 }
  0xa7   : > { %v693_v50 = vpop.permute.xlu1 %692 }
  0xa8   : > { %v694_v41 = vrot.slane %v693_v50, 7 }
  0xa9   : > { %v7522_v51 = vpop.permute.xlu0 %700 }
  0xab   : > { %v740_v52 = vpop.permute.xlu1 %739 }
  0xac   : > { %v743_v53 = vmul.f32 %v740_v52, %v502_v34  ;;  %v742_v54 = vmul.f32 %v740_v52, %v498_v35  ;;  %v744_v58 = vmul.f32 %v740_v52, %v506_v38  ;;  %v648_v38 = vrot.slane %v647_v47, 7 }
  0xad   : > { %v559_v52 = vmul.f32 %v553_v39, %v7512_v42 }
  0xae   : > { %750 = vrot.lane.b32.xlu1 %v743_v53, %s7311_s30  ;;  %748 = vrot.lane.b32.xlu0 %v742_v54, %s7311_s30  ;;  %v7526_v56 = vpop.permute.xlu0 %769  ;;  %v7572_v48 = vsel %vm649_vm5, %v648_v38, %v647_v47  ;;  %v558_v53 = vmul.f32 %v549_v44, %v7512_v42  ;;  %v600_v54 = vrot.slane %v583_v45, %v7500_v31 }
  0xaf   : > { %v762_v55 = vpop.permute.xlu1 %761  ;;  %12073 = vst [vmem:[#allocation7_spill] sm:$0xff] %v7572_v48  ;;  %v7582_v47 = vsel %vm695_vm6, %v694_v41, %v693_v50 }
  0xb0   : > { %12074 = vst [vmem:[#allocation8_spill] sm:$0xff] %v7582_v47  ;;  %v606_v6 = vmul.f32 %v600_v54, %v7515_v46  ;;  %v698_v26 = vmul.f32 %v7582_v47, %v7502_v32  ;;  %v907_v54 = vmul.f32 %v7528_v57, %v7562_v37 }
  0xb2   : > { %752 = vrot.lane.b32.xlu0 %v744_v58, %s7311_s30  ;;  %v592_v58 = vrot.slane %v583_v45, %v7496_v29  ;;  %v707_v44 = vrot.slane %v698_v26, %v7496_v29 }
  0xb3   : > { %v7531_v59 = vpop.permute.xlu1 %811  ;;  %v832_v62 = vpop.permute.xlu0 %831 }
  0xb4   : > { %v852_v63 = vmul.f32 %v7535_v60, %v832_v62  ;;  %v850_v4 = vmul.f32 %v7539_v61, %v832_v62  ;;  %v851_v23 = vmul.f32 %v7547_v5, %v832_v62  ;;  %v652_v62 = vmul.f32 %v7572_v48, %v7502_v32 }
  0xb5   : > { %v604_v42 = vmul.f32 %v592_v58, %v7515_v46 }
  0xb6   : > { %860 = vrot.lane.b32.xlu0 %v852_v63, %s7309_s28  ;;  %856 = vrot.lane.b32.xlu1 %v850_v4, %s7309_s28  ;;  %v763_v63 = vrot.slane %v762_v55, 7  ;;  %v596_v4 = vrot.slane %v583_v45, %v7498_v30  ;;  %v665_v39 = vrot.slane %v652_v62, %v7498_v30 }
  0xb8   : > { %v7549_v7 = vpop.permute.xlu1 %870  ;;  %v7592_v27 = vsel %vm764_vm7, %v763_v63, %v762_v55  ;;  %v605_v50 = vmul.f32 %v596_v4, %v7515_v46  ;;  %v916_v4 = vrot.slane %v907_v54, %v7496_v29 }
  0xb9   : > { %12075 = vst [vmem:[#allocation9_spill] sm:$0xff] %v7592_v27  ;;  %v767_v36 = vmul.f32 %v7592_v27, %v7502_v32  ;;  %v868_v32 = vmul.f32 %v7528_v57, %v7553_v24 }
  0xba   : > { %858 = vrot.lane.b32.xlu1 %v851_v23, %s7309_s28  ;;  %v669_v23 = vrot.slane %v652_v62, %v7500_v31 }
  0xbb   : > { %v784_v46 = vrot.slane %v767_v36, %v7500_v31  ;;  %v877_v45 = vrot.slane %v868_v32, %v7496_v29  ;;  %v776_v63 = vrot.slane %v767_v36, %v7496_v29 }
  0xbd   : > { %v7555_v25 = vpop.permute.xlu1 %909  ;;  %v889_v41 = vmul.f32 %v877_v45, %v7549_v7 }
  0xc2   : > { %v948_v33 = vpop.permute.xlu1 %947 }
  0xc3   : > { %v950_v34 = vmul.f32 %v948_v33, %v7539_v61  ;;  %v951_v35 = vmul.f32 %v948_v33, %v7547_v5  ;;  %v952_v40 = vmul.f32 %v948_v33, %v7535_v60  ;;  %v675_v33 = vmul.f32 %v669_v23, %v7519_v49 }
  0xc4   : > { %v780_v23 = vrot.slane %v767_v36, %v7498_v30  ;;  %v881_v36 = vrot.slane %v868_v32, %v7498_v30 }
  0xc5   : > { %956 = vrot.lane.b32.xlu0 %v950_v34, %s7310_s29  ;;  %958 = vrot.lane.b32.xlu1 %v951_v35, %s7310_s29  ;;  %v715_v34 = vrot.slane %v698_v26, %v7500_v31  ;;  %v661_v35 = vrot.slane %v652_v62, %v7496_v29 }
  0xc7   : > { %v721_v55 = vmul.f32 %v715_v34, %v7522_v51  ;;  %v673_v38 = vmul.f32 %v661_v35, %v7519_v49  ;;  %v971_v34 = vpop.permute.xlu1 %970 }
  0xc9   : > { %960 = vrot.lane.b32.xlu0 %v952_v40, %s7310_s29  ;;  %563 = vrot.lane.b32.xlu1 %v557_v43, %s7312_s14  ;;  %v790_v40 = vmul.f32 %v784_v46, %v7526_v56  ;;  %v674_v43 = vmul.f32 %v665_v39, %v7519_v49  ;;  %v885_v49 = vrot.slane %v868_v32, %v7500_v31 }
  0xca   : > { %v1007_v39 = vmul.f32 %v7528_v57, %v7582_v47 }
  0xcb   : > { %v891_v58 = vmul.f32 %v885_v49, %v7549_v7 }
  0xcd   : > { %567 = vrot.lane.b32.xlu0 %v559_v52, %s7312_s14  ;;  %565 = vrot.lane.b32.xlu1 %v558_v53, %s7312_s14  ;;  %v719_v52 = vmul.f32 %v707_v44, %v7522_v51  ;;  %v711_v53 = vrot.slane %v698_v26, %v7498_v30  ;;  %v968_v26 = vmul.f32 %v7528_v57, %v7572_v48  ;;  %v1010_v44 = vpop.permute.xlu1 %1009 }
  0xcf   : > { %v720_v62 = vmul.f32 %v711_v53, %v7522_v51  ;;  %v924_v51 = vrot.slane %v907_v54, %v7500_v31  ;;  %v977_v35 = vrot.slane %v968_v26, %v7496_v29  ;;  %v985_v46 = vrot.slane %v968_v26, %v7500_v31 }
  0xd0   : > { %v981_v32 = vrot.slane %v968_v26, %v7498_v30  ;;  %v1020_v53 = vrot.slane %v1007_v39, %v7498_v30 }
  0xd1   : > { %614 = vrot.lane.b32.xlu0 %v606_v6, %s7313_s17  ;;  %610 = vrot.lane.b32.xlu1 %v604_v42, %s7313_s17  ;;  %v928_v6 = vmul.f32 %v916_v4, %v7555_v25  ;;  %v788_v42 = vmul.f32 %v776_v63, %v7526_v56 }
  0xd2   : > { %v1029_v49 = vmul.f32 %v1020_v53, %v1010_v44 }
  0xd5   : > { %683 = vrot.lane.b32.xlu0 %v675_v33, %s7314_s18  ;;  %612 = vrot.lane.b32.xlu1 %v605_v50, %s7313_s17  ;;  %v930_v50 = vmul.f32 %v924_v51, %v7555_v25  ;;  %v789_v33 = vmul.f32 %v780_v23, %v7526_v56  ;;  %v920_v56 = vrot.slane %v907_v54, %v7498_v30  ;;  %v11843_v54 = vmov 17  }
  0xd9   : > { %729 = vrot.lane.b32.xlu0 %v721_v55, %s7315_s19  ;;  %679 = vrot.lane.b32.xlu1 %v673_v38, %s7314_s18  ;;  %v989_v55 = vmul.f32 %v977_v35, %v971_v34  ;;  %v890_v38 = vmul.f32 %v881_v36, %v7549_v7  ;;  %v1016_v7 = vrot.slane %v1007_v39, %v7496_v29 }
  0xdb   : > { %v1028_v45 = vmul.f32 %v1016_v7, %v1010_v44 }
  0xdd   : > { %798 = vrot.lane.b32.xlu0 %v790_v40, %s7316_s20  ;;  %681 = vrot.lane.b32.xlu1 %v674_v43, %s7314_s18  ;;  %v991_v40 = vmul.f32 %v985_v46, %v971_v34  ;;  %v929_v43 = vmul.f32 %v920_v56, %v7555_v25 }
  0xe1   : > { %895 = vrot.lane.b32.xlu0 %v889_v41, %s7312_s14  ;;  %725 = vrot.lane.b32.xlu1 %v719_v52, %s7315_s19  ;;  %v990_v41 = vmul.f32 %v981_v32, %v971_v34  ;;  %v1024_v52 = vrot.slane %v1007_v39, %v7500_v31 }
  0xe3   : > { %v1030_v25 = vmul.f32 %v1024_v52, %v1010_v44 }
  0xe5   : > { %899 = vrot.lane.b32.xlu0 %v891_v58, %s7312_s14  ;;  %727 = vrot.lane.b32.xlu1 %v720_v62, %s7315_s19 }
  0xe9   : > { %934 = vrot.lane.b32.xlu0 %v928_v6, %s7313_s17  ;;  %794 = vrot.lane.b32.xlu1 %v788_v42, %s7316_s20 }
  0xed   : > { %938 = vrot.lane.b32.xlu0 %v930_v50, %s7313_s17  ;;  %796 = vrot.lane.b32.xlu1 %v789_v33, %s7316_s20 }
  0xf1   : > { %995 = vrot.lane.b32.xlu0 %v989_v55, %s7314_s18  ;;  %897 = vrot.lane.b32.xlu1 %v890_v38, %s7312_s14 }
  0xf5   : > { %999 = vrot.lane.b32.xlu0 %v991_v40, %s7314_s18  ;;  %936 = vrot.lane.b32.xlu1 %v929_v43, %s7313_s17 }
  0xf9   : > { %1034 = vrot.lane.b32.xlu0 %v1028_v45, %s7315_s19  ;;  %997 = vrot.lane.b32.xlu1 %v990_v41, %s7314_s18  ;;  %v11841_v45 = vmov 18   ;;  %v11873_v41 = vmov 19  }
  0xfa   : > { %7095 = vset.pattern.permute.xlu0 %v11873_v41 }
  0xfd   : > { %1038 = vrot.lane.b32.xlu0 %v1030_v25, %s7315_s19  ;;  %1036 = vrot.lane.b32.xlu1 %v1029_v49, %s7315_s19 }
 0x101   : > { %1047 = vperm.xlu1 %7092, %v7435_v0  }
 0x105   : > { %7093 = vset.pattern.permute.xlu1 %v11843_v54 }
 0x109   : > { %v7666_v58 = vpop.permute.xlu1 %518  ;;  %v7715_v52 = vpop.permute.xlu0 %516 }
 0x10d   : > { %v7723_v25 = vpop.permute.xlu0 %520 }
 0x114   : > { %v7668_v62 = vpop.permute.xlu1 %635 }
 0x120   : > { %v7670_v63 = vpop.permute.xlu1 %750 }
 0x128   : > { %v7672_v4 = vpop.permute.xlu1 %856 }
 0x12c   : > { %v7674_v6 = vpop.permute.xlu1 %858 }
 0x137   : > { %v7676_v42 = vpop.permute.xlu1 %958 }
 0x13b   : > { %v7678_v23 = vpop.permute.xlu1 %563 }
 0x13f   : > { %v7680_v51 = vpop.permute.xlu1 %565 }
 0x143   : > { %v7682_v26 = vpop.permute.xlu1 %610 }
 0x147   : > { %v7684_v50 = vpop.permute.xlu1 %612 }
 0x14b   : > { %v7686_v33 = vpop.permute.xlu1 %679 }
 0x14f   : > { %v7688_v34 = vpop.permute.xlu1 %681 }
 0x153   : > { %v7690_v35 = vpop.permute.xlu1 %725 }
 0x157   : > { %v7692_v36 = vpop.permute.xlu1 %727 }
 0x15b   : > { %v7694_v55 = vpop.permute.xlu1 %794 }
 0x15f   : > { %v7696_v38 = vpop.permute.xlu1 %796 }
 0x163   : > { %v7698_v46 = vpop.permute.xlu1 %897 }
 0x167   : > { %v7700_v56 = vpop.permute.xlu1 %936 }
 0x16b   : > { %v7702_v39 = vpop.permute.xlu1 %997 }
 0x16f   : > { %v7704_v40 = vpop.permute.xlu1 %1036 }
 0x170   : > { %12076 = vst [vmem:[#allocation10_spill] sm:$0xff] %v7704_v40 }
 0x180   : > { %v1048_v43 = vpop.permute.xlu1 %1047 }
 0x181   : > { %v1051_v44 = vmul.f32 %v1048_v43, %v7547_v5  ;;  %v1050_v7 = vmul.f32 %v1048_v43, %v7539_v61  ;;  %v1052_v32 = vmul.f32 %v1048_v43, %v7535_v60  ;;  %v1068_v61 = vmul.f32 %v7528_v57, %v7592_v27 }
 0x183   : > { %1058 = vrot.lane.b32.xlu1 %v1051_v44, %s7311_s30  ;;  %1056 = vrot.lane.b32.xlu0 %v1050_v7, %s7311_s30  ;;  %v1081_v53 = vrot.slane %v1068_v61, %v7498_v30  ;;  %v1077_v60 = vrot.slane %v1068_v61, %v7496_v29  ;;  %v1085_v7 = vrot.slane %v1068_v61, %v7500_v31 }
 0x187   : > { %1070 = vperm.xlu1 %7093, %v7435_v0   ;;  %1060 = vrot.lane.b32.xlu0 %v1052_v32, %s7311_s30  ;;  %v7728_v32 = vpop.permute.xlu0 %633 }
 0x18b   : > { %7094 = vset.pattern.permute.xlu1 %v11841_v45  ;;  %v7732_v45 = vpop.permute.xlu0 %637 }
 0x18f   : > { %v7735_v54 = vpop.permute.xlu0 %748 }
 0x1f5   : > { %v7719_v5 = vpop.permute.xlu1 %1058 }
 0x1f6   : > { %12077 = vst [vmem:[#allocation11_spill] sm:$0xff] %v7719_v5 }
 0x206   : > { %v1071_v49 = vpop.permute.xlu1 %1070 }
 0x207   : > { %v1090_v43 = vmul.f32 %v1081_v53, %v1071_v49  ;;  %v1089_v44 = vmul.f32 %v1077_v60, %v1071_v49  ;;  %v1091_v57 = vmul.f32 %v1085_v7, %v1071_v49  ;;  %v11851_v53 = vmov 20   ;;  %v7739_v60 = vpop.permute.xlu0 %752 }
 0x209   : > { %1097 = vrot.lane.b32.xlu1 %v1090_v43, %s7316_s20  ;;  %1095 = vrot.lane.b32.xlu0 %v1089_v44, %s7316_s20 }
 0x20b   : > { %v7741_v61 = vpop.permute.xlu0 %860 }
 0x20d   : > { %1111 = vperm.xlu1 %7094, %v7435_v0   ;;  %1099 = vrot.lane.b32.xlu0 %v1091_v57, %s7316_s20 }
 0x20f   : > { %v7743_v49 = vpop.permute.xlu0 %956 }
 0x211   : > { %1131 = vperm.xlu0 %7095, %v7435_v0   ;;  %7096 = vset.pattern.permute.xlu1 %v11851_v53 }
 0x213   : > { %v7745_v43 = vpop.permute.xlu0 %960 }
 0x215   : > { %7104 = vset.pattern.permute.xlu0 %v11881_v1 }
 0x217   : > { %v7747_v44 = vpop.permute.xlu0 %567 }
 0x21b   : > { %v7749_v7 = vpop.permute.xlu0 %614 }
 0x21f   : > { %v7751_v57 = vpop.permute.xlu0 %683 }
 0x223   : > { %v7753_v22 = vpop.permute.xlu0 %729 }
 0x227   : > { %v7755_v21 = vpop.permute.xlu0 %798 }
 0x22b   : > { %v7757_v20 = vpop.permute.xlu0 %895 }
 0x22f   : > { %v7759_v53 = vpop.permute.xlu0 %899 }
 0x233   : > { %v7761_v19 = vpop.permute.xlu0 %934 }
 0x237   : > { %v7763_v18 = vpop.permute.xlu0 %938 }
 0x23b   : > { %v7765_v17 = vpop.permute.xlu0 %995 }
 0x23c   : > { %12078 = vst [vmem:[#allocation12_spill] sm:$0xff] %v7765_v17 }
 0x23f   : > { %v7767_v15 = vpop.permute.xlu0 %999 }
 0x240   : > { %12079 = vst [vmem:[#allocation13_spill] sm:$0xff] %v7767_v15 }
 0x243   : > { %v7769_v14 = vpop.permute.xlu0 %1034 }
 0x244   : > { %12080 = vst [vmem:[#allocation14_spill] sm:$0xff] %v7769_v14 }
 0x247   : > { %v7771_v12 = vpop.permute.xlu0 %1038 }
 0x248   : > { %12081 = vst [vmem:[#allocation15_spill] sm:$0xff] %v7771_v12 }
 0x24b   : > { %v7773_v13 = vpop.permute.xlu0 %1056 }
 0x24c   : > { %12082 = vst [vmem:[#allocation16_spill] sm:$0xff] %v7773_v13 }
 0x24f   : > { %v7775_v11 = vpop.permute.xlu0 %1060 }
 0x250   : > { %12083 = vst [vmem:[#allocation17_spill] sm:$0xff] %v7775_v11  ;;  %v11885_v11 = vmov 21  }
 0x27b   : > { %v7777_v2 = vpop.permute.xlu0 %1095  ;;  %v7803_v5 = vpop.permute.xlu1 %1097 }
 0x27c   : > { %12084 = vst [vmem:[#allocation18_spill] sm:$0xff] %v7777_v2 }
 0x27f   : > { %v7781_v41 = vpop.permute.xlu0 %1099 }
 0x280   : > { %12085 = vst [vmem:[#allocation19_spill] sm:$0xff] %v7781_v41  ;;  %v7797_v41 = vrot.slane %v7779_v9, %v7498_v30 }
 0x28c   : > { %v7805_v12 = vpop.permute.xlu1 %1111 }
 0x28d   : > { %12086 = vst [vmem:[#allocation20_spill] sm:$0xff] %v7805_v12 }
 0x290   : > { %v1132_v3 = vpop.permute.xlu0 %1131 }
 0x291   : > { %v1152_v1 = vmul.f32 %v7785_v10, %v1132_v3  ;;  %v1150_v13 = vmul.f32 %v7789_v16, %v1132_v3  ;;  %v1151_v2 = vmul.f32 %v7797_v41, %v1132_v3 }
 0x293   : > { %1160 = vrot.lane.b32.xlu0 %v1152_v1, %s7309_s28  ;;  %1156 = vrot.lane.b32.xlu1 %v1150_v13, %s7309_s28  ;;  %v1168_v13 = vmul.f32 %v7779_v9, %v7553_v24  ;;  %v11891_v24 = vmov 22  }
 0x295   : > { %v1181_v3 = vrot.slane %v1168_v13, %v7498_v30 }
 0x297   : > { %1158 = vrot.lane.b32.xlu1 %v1151_v2, %s7309_s28  ;;  %v1177_v2 = vrot.slane %v1168_v13, %v7496_v29 }
 0x29b   : > { %1170 = vperm.xlu1 %7096, %v7435_v0  }
 0x29f   : > { %7097 = vset.pattern.permute.xlu1 %v11885_v11  ;;  %v1185_v11 = vrot.slane %v1168_v13, %v7500_v31 }
 0x305   : > { %v7807_v1 = vpop.permute.xlu1 %1156 }
 0x306   : > { %12087 = vst [vmem:[#allocation21_spill] sm:$0xff] %v7807_v1  ;;  %v1207_v1 = vmul.f32 %v7779_v9, %v7562_v37 }
 0x309   : > { %v7811_v14 = vpop.permute.xlu1 %1158 }
 0x30a   : > { %12088 = vst [vmem:[#allocation22_spill] sm:$0xff] %v7811_v14 }
 0x31a   : > { %v1171_v40 = vpop.permute.xlu1 %1170 }
 0x31b   : > { %v1190_v15 = vmul.f32 %v1181_v3, %v1171_v40  ;;  %v1189_v17 = vmul.f32 %v1177_v2, %v1171_v40  ;;  %v1191_v12 = vmul.f32 %v1185_v11, %v1171_v40  ;;  %v1220_v3 = vrot.slane %v1207_v1, %v7498_v30 }
 0x31c   : > { %v1224_v11 = vrot.slane %v1207_v1, %v7500_v31  ;;  %v11895_v40 = vmov 23  }
 0x31d   : > { %1197 = vrot.lane.b32.xlu1 %v1190_v15, %s7312_s14  ;;  %1195 = vrot.lane.b32.xlu0 %v1189_v17, %s7312_s14  ;;  %v1216_v15 = vrot.slane %v1207_v1, %v7496_v29 }
 0x321   : > { %1209 = vperm.xlu1 %7097, %v7435_v0   ;;  %1199 = vrot.lane.b32.xlu0 %v1191_v12, %s7312_s14 }
 0x325   : > { %7098 = vset.pattern.permute.xlu1 %v11891_v24 }
 0x38f   : > { %v7823_v14 = vpop.permute.xlu1 %1197 }
 0x3a0   : > { %v1210_v17 = vpop.permute.xlu1 %1209 }
 0x3a1   : > { %v1229_v2 = vmul.f32 %v1220_v3, %v1210_v17  ;;  %v1228_v13 = vmul.f32 %v1216_v15, %v1210_v17  ;;  %v1230_v12 = vmul.f32 %v1224_v11, %v1210_v17  ;;  %v11897_v17 = vmov 24  }
 0x3a3   : > { %1236 = vrot.lane.b32.xlu1 %v1229_v2, %s7313_s17  ;;  %1234 = vrot.lane.b32.xlu0 %v1228_v13, %s7313_s17  ;;  %v1268_v2 = vmul.f32 %v7779_v9, %v7572_v48  ;;  %v1307_v48 = vmul.f32 %v7779_v9, %v7582_v47 }
 0x3a5   : > { %v1281_v11 = vrot.slane %v1268_v2, %v7498_v30 }
 0x3a7   : > { %1247 = vperm.xlu1 %7098, %v7435_v0   ;;  %1238 = vrot.lane.b32.xlu0 %v1230_v12, %s7313_s17  ;;  %v1277_v12 = vrot.slane %v1268_v2, %v7496_v29 }
 0x3ab   : > { %7099 = vset.pattern.permute.xlu1 %v11895_v40 }
 0x415   : > { %v7833_v24 = vpop.permute.xlu1 %1236 }
 0x426   : > { %v1248_v37 = vpop.permute.xlu1 %1247 }
 0x427   : > { %v1251_v3 = vmul.f32 %v1248_v37, %v7797_v41  ;;  %v1250_v15 = vmul.f32 %v1248_v37, %v7789_v16  ;;  %v1252_v1 = vmul.f32 %v1248_v37, %v7785_v10  ;;  %v1285_v37 = vrot.slane %v1268_v2, %v7500_v31 }
 0x429   : > { %1258 = vrot.lane.b32.xlu1 %v1251_v3, %s7310_s29  ;;  %1256 = vrot.lane.b32.xlu0 %v1250_v15, %s7310_s29 }
 0x42d   : > { %1270 = vperm.xlu1 %7099, %v7435_v0   ;;  %1260 = vrot.lane.b32.xlu0 %v1252_v1, %s7310_s29 }
 0x431   : > { %7100 = vset.pattern.permute.xlu1 %v11897_v17  ;;  %v11902_v17 = vmov 25  }
 0x49b   : > { %v7845_v13 = vpop.permute.xlu1 %1258 }
 0x49c   : > { %12089 = vst [vmem:[#allocation23_spill] sm:$0xff] %v7845_v13 }
 0x4ac   : > { %v1271_v3 = vpop.permute.xlu1 %1270 }
 0x4ad   : > { %v1290_v15 = vmul.f32 %v1281_v11, %v1271_v3  ;;  %v1289_v40 = vmul.f32 %v1277_v12, %v1271_v3  ;;  %v1291_v1 = vmul.f32 %v1285_v37, %v1271_v3  ;;  %v1320_v11 = vrot.slane %v1307_v48, %v7498_v30 }
 0x4ae   : > { %v1316_v12 = vrot.slane %v1307_v48, %v7496_v29  ;;  %v1324_v3 = vrot.slane %v1307_v48, %v7500_v31 }
 0x4af   : > { %1297 = vrot.lane.b32.xlu1 %v1290_v15, %s7314_s18  ;;  %1295 = vrot.lane.b32.xlu0 %v1289_v40, %s7314_s18 }
 0x4b3   : > { %1309 = vperm.xlu1 %7100, %v7435_v0   ;;  %1299 = vrot.lane.b32.xlu0 %v1291_v1, %s7314_s18  ;;  %v11906_v1 = vmov 26  }
 0x4b7   : > { %7101 = vset.pattern.permute.xlu1 %v11902_v17 }
 0x521   : > { %v7857_v13 = vpop.permute.xlu1 %1297 }
 0x532   : > { %v1310_v40 = vpop.permute.xlu1 %1309 }
 0x533   : > { %v1329_v15 = vmul.f32 %v1320_v11, %v1310_v40  ;;  %v1328_v2 = vmul.f32 %v1316_v12, %v1310_v40  ;;  %v1330_v37 = vmul.f32 %v1324_v3, %v1310_v40  ;;  %v12090_v40 = vmov 0  }
 0x535   : > { %1336 = vrot.lane.b32.xlu1 %v1329_v15, %s7315_s19  ;;  %1334 = vrot.lane.b32.xlu0 %v1328_v2, %s7315_s19  ;;  %v1368_v15 = vmul.f32 %v7779_v9, %v7592_v27  ;;  %v12105_v27 = vmov 14  }
 0x539   : > { %1347 = vperm.xlu1 %7101, %v7435_v0   ;;  %1338 = vrot.lane.b32.xlu0 %v1330_v37, %s7315_s19 }
 0x53d   : > { %7102 = vset.pattern.permute.xlu1 %v11906_v1  ;;  %v12102_v1 = vmov 11  }
 0x5a7   : > { %v7867_v17 = vpop.permute.xlu1 %1336 }
 0x5b8   : > { %v1348_v47 = vpop.permute.xlu1 %1347 }
 0x5b9   : > { %v1351_v11 = vmul.f32 %v1348_v47, %v7797_v41  ;;  %v1350_v12 = vmul.f32 %v1348_v47, %v7789_v16  ;;  %v1352_v48 = vmul.f32 %v1348_v47, %v7785_v10  ;;  %v1381_v41 = vrot.slane %v1368_v15, %v7498_v30  ;;  %v7893_v47 = vld [vmem:[%s11832_s5] sm:$0x7] }
 0x5ba   : > { %v1377_v16 = vrot.slane %v1368_v15, %v7496_v29  ;;  %v1385_v10 = vrot.slane %v1368_v15, %v7500_v31  ;;  %v12093_v15 = vmov 3  }
 0x5bb   : > { %1358 = vrot.lane.b32.xlu1 %v1351_v11, %s7311_s30  ;;  %1356 = vrot.lane.b32.xlu0 %v1350_v12, %s7311_s30  ;;  %v12091_v12 = vmov 1  }
 0x5bf   : > { %1370 = vperm.xlu1 %7102, %v7435_v0   ;;  %1360 = vrot.lane.b32.xlu0 %v1352_v48, %s7311_s30  ;;  %v1407_v0 = vld [vmem:[%s11831_s4] sm:$0x7]  ;;  %v12092_v48 = vmov 10  }
 0x5c3   : > { %7103 = vset.pattern.permute.xlu1 %v12090_v40 }
 0x62d   : > { %v7879_v2 = vpop.permute.xlu1 %1358 }
 0x63e   : > { %v1371_v3 = vpop.permute.xlu1 %1370 }
 0x63f   : > { %v1390_v37 = vmul.f32 %v1381_v41, %v1371_v3  ;;  %v1389_v11 = vmul.f32 %v1377_v16, %v1371_v3  ;;  %v1391_v9 = vmul.f32 %v1385_v10, %v1371_v3  ;;  %v12094_v41 = vmov 19  }
 0x640   : > { %v12095_v16 = vmov 4   ;;  %v12096_v3 = vmov 2   ;;  %v12099_v10 = vmov 7  }
 0x641   : > { %1397 = vrot.lane.b32.xlu1 %v1390_v37, %s7316_s20  ;;  %1395 = vrot.lane.b32.xlu0 %v1389_v11, %s7316_s20  ;;  %v12097_v37 = vmov 5   ;;  %v12098_v11 = vmov 6  }
 0x645   : > { %1410 = vperm.xlu1 %7103, %v1407_v0   ;;  %1399 = vrot.lane.b32.xlu0 %v1391_v9, %s7316_s20  ;;  %v12100_v0 = vmov 8   ;;  %v12101_v9 = vmov 9  }
 0x649   : > { %7105 = vset.pattern.permute.xlu1 %v12091_v12  ;;  %1458 = vperm.xlu0 %7104, %v7893_v47  }
 0x64a   : > { %1478 = vperm.xlu1 %7105, %v7893_v47  }
 0x64d   : > { %7113 = vset.pattern.permute.xlu0 %v12092_v48 }
 0x64e   : > { %7106 = vset.pattern.permute.xlu1 %v12093_v15  ;;  %1778 = vperm.xlu0 %7113, %v7893_v47  }
 0x64f   : > { %1556 = vperm.xlu1 %7106, %v7893_v47  }
 0x652   : > { %7122 = vset.pattern.permute.xlu0 %v12094_v41  ;;  %v12103_v41 = vmov 12  }
 0x653   : > { %7107 = vset.pattern.permute.xlu1 %v12095_v16  ;;  %2078 = vperm.xlu0 %7122, %v7893_v47   ;;  %v571_v16 = vsel %vm569_vm9, %v7680_v51, %v7747_v44 }
 0x654   : > { %1594 = vperm.xlu1 %7107, %v7893_v47  }
 0x657   : > { %7123 = vset.pattern.permute.xlu0 %v12096_v3  ;;  %v466_v3 = vld [vmem:[#allocation2] ss:$8 sm:$0x3] }
 0x658   : > { %7108 = vset.pattern.permute.xlu1 %v12097_v37  ;;  %1517 = vperm.xlu0 %7123, %v7893_v47   ;;  %v467_v48 = vmul.f32 %v466_v3, %v7459_v8  ;;  %v12104_v37 = vmov 13   ;;  %v523_v3 = vsel %vm522_vm8, %v7715_v52, %v7666_v58 }
 0x659   : > { %1617 = vperm.xlu1 %7108, %v7893_v47  }
 0x65d   : > { %7109 = vset.pattern.permute.xlu1 %v12098_v11  ;;  %v482_v11 = vrot.slane %v467_v48, %v7498_v30 }
 0x65e   : > { %1656 = vperm.xlu1 %7109, %v7893_v47  }
 0x662   : > { %7110 = vset.pattern.permute.xlu1 %v12099_v10  ;;  %v7922_v10 = vpop.permute.xlu0 %1160 }
 0x663   : > { %1694 = vperm.xlu1 %7110, %v7893_v47  }
 0x667   : > { %7111 = vset.pattern.permute.xlu1 %v12100_v0  ;;  %v478_v0 = vrot.slane %v467_v48, %v7496_v29  ;;  %v486_v48 = vmul.f32 %v482_v11, %v7494_v28  ;;  %v732_v11 = vsel %vm731_vm13, %v7690_v35, %v7692_v36 }
 0x668   : > { %1717 = vperm.xlu1 %7111, %v7893_v47  }
 0x66c   : > { %7112 = vset.pattern.permute.xlu1 %v12101_v9  ;;  %v7927_v9 = vpop.permute.xlu0 %1195 }
 0x66d   : > { %1758 = vperm.xlu1 %7112, %v7893_v47  }
 0x670   : > { %v7946_v15 = vpop.permute.xlu0 %1199 }
 0x671   : > { %7114 = vset.pattern.permute.xlu1 %v12102_v1  ;;  %v485_v1 = vmul.f32 %v478_v0, %v7494_v28  ;;  %v617_v28 = vsel %vm616_vm10, %v7682_v26, %v7684_v50  ;;  %v640_v26 = vsel %vm639_vm11, %v7728_v32, %v7668_v62  ;;  %v733_v32 = vsel %vm731_vm13, %v7692_v36, %v7753_v22 }
 0x672   : > { %1817 = vperm.xlu1 %7114, %v7893_v47   ;;  %v12107_v0 = vmov 16   ;;  %v755_v22 = vsel %vm754_vm14, %v7735_v54, %v7670_v63  ;;  %v756_v36 = vsel %vm754_vm14, %v7670_v63, %v7739_v60 }
 0x673   : > { %v527_v52 = vadd.f32 %v523_v3, %v485_v1 }
 0x674   : > { %v7955_v1 = vpop.permute.xlu0 %1234 }
 0x676   : > { %7115 = vset.pattern.permute.xlu1 %v12103_v41  ;;  %v524_v41 = vsel %vm522_vm8, %v7666_v58, %v7723_v25  ;;  %v618_v58 = vsel %vm616_vm10, %v7684_v50, %v7749_v7  ;;  %v641_v50 = vsel %vm639_vm11, %v7668_v62, %v7732_v45  ;;  %v687_v7 = vsel %vm685_vm12, %v7688_v34, %v7751_v57 }
 0x677   : > { %1856 = vperm.xlu1 %7115, %v7893_v47   ;;  %v528_v31 = vadd.f32 %v524_v41, %v486_v48  ;;  %v12106_v41 = vmov 15  }
 0x678   : > { %v7978_v3 = vpop.permute.xlu0 %1238 }
 0x679   : > { %v575_v25 = vadd.f32 %v571_v16, %v528_v31  ;;  %v686_v31 = vsel %vm685_vm12, %v7686_v33, %v7688_v34  ;;  %v808_v33 = vld [vmem:[#allocation2 + $0x1] ss:$8 sm:$0x3] }
 0x67a   : > { %v809_v48 = vmul.f32 %v808_v33, %v7459_v8  ;;  %v802_v8 = vsel %vm800_vm15, %v7696_v38, %v7755_v21 }
 0x67b   : > { %7116 = vset.pattern.permute.xlu1 %v12104_v37  ;;  %v570_v37 = vsel %vm569_vm9, %v7678_v23, %v7680_v51  ;;  %v622_v44 = vadd.f32 %v618_v58, %v575_v25 }
 0x67c   : > { %1894 = vperm.xlu1 %7116, %v7893_v47   ;;  %v574_v23 = vadd.f32 %v570_v37, %v527_v52  ;;  %v7982_v35 = vpop.permute.xlu0 %1256  ;;  %v12108_v52 = vmov 17   ;;  %v818_v25 = vrot.slane %v809_v48, %v7496_v29  ;;  %v822_v54 = vrot.slane %v809_v48, %v7498_v30 }
 0x67d   : > { %v645_v37 = vadd.f32 %v641_v50, %v622_v44  ;;  %v12112_v48 = vmov 22  }
 0x67e   : > { %v621_v51 = vadd.f32 %v617_v28, %v574_v23  ;;  %v801_v28 = vsel %vm800_vm15, %v7694_v55, %v7696_v38  ;;  %v825_v63 = vmul.f32 %v818_v25, %v7531_v59  ;;  %v826_v55 = vmul.f32 %v822_v54, %v7531_v59  ;;  %v12117_v25 = vld [vmem:[#allocation14_spill] sm:$0xff] }
 0x67f   : > { %v691_v45 = vadd.f32 %v687_v7, %v645_v37  ;;  %v862_v7 = vsel %vm522_vm8, %v7672_v4, %v7674_v6 }
 0x680   : > { %7117 = vset.pattern.permute.xlu1 %v12105_v27  ;;  %v644_v16 = vadd.f32 %v640_v26, %v621_v51  ;;  %v12109_v26 = vmov 18   ;;  %v8003_v60 = vpop.permute.xlu0 %1260 }
 0x681   : > { %1917 = vperm.xlu1 %7117, %v7893_v47   ;;  %v737_v57 = vadd.f32 %v733_v32, %v691_v45  ;;  %v902_v32 = vsel %vm569_vm9, %v7698_v46, %v7759_v53  ;;  %v963_v53 = vsel %vm639_vm11, %v7676_v42, %v7745_v43 }
 0x682   : > { %v690_v62 = vadd.f32 %v686_v31, %v644_v16  ;;  %v12110_v31 = vmov 20   ;;  %v863_v16 = vsel %vm522_vm8, %v7674_v6, %v7741_v61  ;;  %v940_v6 = vsel %vm616_vm10, %v7761_v19, %v7700_v56  ;;  %v1108_v19 = vld [vmem:[#allocation2 + $0x2] ss:$8 sm:$0x3] }
 0x683   : > { %v760_v23 = vadd.f32 %v756_v36, %v737_v57  ;;  %v941_v61 = vsel %vm616_vm10, %v7700_v56, %v7763_v18  ;;  %v12113_v18 = vld [vmem:[#allocation12_spill] sm:$0xff] }
 0x684   : > { %v736_v34 = vadd.f32 %v732_v11, %v690_v62  ;;  %v8006_v50 = vpop.permute.xlu0 %1295  ;;  %v901_v11 = vsel %vm569_vm9, %v7757_v20, %v7698_v46  ;;  %v12111_v62 = vmov 21   ;;  %v962_v46 = vsel %vm639_vm11, %v7743_v49, %v7676_v42  ;;  %v8048_v49 = vld [vmem:[%s11828_s1] sm:$0x3] }
 0x685   : > { %7118 = vset.pattern.permute.xlu1 %v12106_v41  ;;  %v806_v44 = vadd.f32 %v802_v8, %v760_v23  ;;  %v1001_v56 = vsel %vm685_vm12, %v12113_v18, %v7702_v39  ;;  %v1109_v42 = vmul.f32 %v8048_v49, %v1108_v19  ;;  %v12116_v23 = vld [vmem:[#allocation10_spill] sm:$0xff]  ;;  %v12125_v19 = vld [vmem:[#allocation20_spill] sm:$0xff] }
 0x686   : > { %1956 = vperm.xlu1 %7118, %v7893_v47   ;;  %v759_v58 = vadd.f32 %v755_v22, %v736_v34  ;;  %v1040_v54 = vsel %vm731_vm13, %v12117_v25, %v12116_v23 }
 0x687   : > { %v828_v38 = vadd.f32 %v826_v55, %v806_v44  ;;  %v12119_v55 = vld [vmem:[#allocation11_spill] sm:$0xff] }
 0x688   : > { %v805_v51 = vadd.f32 %v801_v28, %v759_v58  ;;  %v1300_v33 = vpop.permute.xlu0 %1299  ;;  %v12114_v28 = vld [vmem:[#allocation13_spill] sm:$0xff]  ;;  %v12115_v58 = vmov 23  }
 0x689   : > { %v867_v37 = vadd.f32 %v863_v16, %v828_v38  ;;  %v1002_v8 = vsel %vm685_vm12, %v7702_v39, %v12114_v28  ;;  %v12126_v28 = vld [vmem:[#allocation22_spill] sm:$0xff] }
 0x68a   : > { %7119 = vset.pattern.permute.xlu1 %v12107_v0  ;;  %v827_v21 = vadd.f32 %v825_v63, %v805_v51  ;;  %v12118_v51 = vld [vmem:[#allocation15_spill] sm:$0xff] }
 0x68b   : > { %1994 = vperm.xlu1 %7119, %v7893_v47   ;;  %v906_v4 = vadd.f32 %v902_v32, %v867_v37  ;;  %v1041_v39 = vsel %vm731_vm13, %v12116_v23, %v12118_v51  ;;  %v1122_v32 = vrot.slane %v1109_v42, %v7498_v30  ;;  %v1163_v23 = vsel %vm522_vm8, %v12126_v28, %v7922_v10 }
 0x68c   : > { %v866_v59 = vadd.f32 %v862_v7, %v827_v21  ;;  %v1335_v57 = vpop.permute.xlu0 %1334  ;;  %v12120_v21 = vld [vmem:[#allocation16_spill] sm:$0xff]  ;;  %v12121_v7 = vld [vmem:[#allocation17_spill] sm:$0xff]  ;;  %v1241_v10 = vsel %vm616_vm10, %v7833_v24, %v7978_v3 }
 0x68d   : > { %v945_v34 = vadd.f32 %v941_v61, %v906_v4  ;;  %v1062_v38 = vsel %vm754_vm14, %v12120_v21, %v12119_v55  ;;  %v1063_v16 = vsel %vm754_vm14, %v12119_v55, %v12121_v7  ;;  %v12122_v4 = vmov 24  }
 0x68e   : > { %v905_v45 = vadd.f32 %v901_v11, %v866_v59  ;;  %v1118_v11 = vrot.slane %v1109_v42, %v7496_v29  ;;  %v1240_v55 = vsel %vm616_vm10, %v7955_v1, %v7833_v24  ;;  %v1301_v1 = vsel %vm685_vm12, %v8006_v50, %v7857_v13 }
 0x68f   : > { %7120 = vset.pattern.permute.xlu1 %v12108_v52  ;;  %v967_v36 = vadd.f32 %v963_v53, %v945_v34  ;;  %v1302_v24 = vsel %vm685_vm12, %v7857_v13, %v1300_v33 }
 0x690   : > { %2017 = vperm.xlu1 %7120, %v7893_v47   ;;  %v944_v20 = vadd.f32 %v940_v6, %v905_v45  ;;  %v1339_v43 = vpop.permute.xlu0 %1338  ;;  %v12123_v6 = vld [vmem:[#allocation18_spill] sm:$0xff] }
 0x691   : > { %v1006_v63 = vadd.f32 %v1002_v8, %v967_v36  ;;  %v1101_v61 = vsel %vm800_vm15, %v12123_v6, %v7803_v5  ;;  %v1126_v36 = vmul.f32 %v1122_v32, %v12125_v19  ;;  %v12127_v8 = vld [vmem:[#allocation21_spill] sm:$0xff] }
 0x692   : > { %v966_v22 = vadd.f32 %v962_v46, %v944_v20  ;;  %v12124_v20 = vld [vmem:[#allocation19_spill] sm:$0xff]  ;;  %v1162_v42 = vsel %vm522_vm8, %v12127_v8, %v12126_v28 }
 0x693   : > { %v1045_v37 = vadd.f32 %v1041_v39, %v1006_v63  ;;  %v1102_v34 = vsel %vm800_vm15, %v7803_v5, %v12124_v20  ;;  %v1201_v5 = vsel %vm569_vm9, %v7927_v9, %v7823_v14  ;;  %v1202_v39 = vsel %vm569_vm9, %v7823_v14, %v7946_v15 }
 0x694   : > { %7121 = vset.pattern.permute.xlu1 %v12109_v26  ;;  %v1005_v44 = vadd.f32 %v1001_v56, %v966_v22  ;;  %v1357_v45 = vpop.permute.xlu0 %1356  ;;  %v1125_v22 = vmul.f32 %v1118_v11, %v12125_v19  ;;  %v1340_v11 = vsel %vm731_vm13, %v1335_v57, %v7867_v17 }
 0x695   : > { %2058 = vperm.xlu1 %7121, %v7893_v47   ;;  %v1067_v53 = vadd.f32 %v1063_v16, %v1045_v37  ;;  %v12128_v16 = vld [vmem:[#allocation23_spill] sm:$0xff]  ;;  %v1362_v20 = vsel %vm754_vm14, %v1357_v45, %v7879_v2 }
 0x696   : > { %v1044_v59 = vadd.f32 %v1040_v54, %v1005_v44  ;;  %v1262_v9 = vsel %vm639_vm11, %v7982_v35, %v12128_v16  ;;  %v1263_v14 = vsel %vm639_vm11, %v12128_v16, %v8003_v60  ;;  %v1341_v35 = vsel %vm731_vm13, %v7867_v17, %v1339_v43 }
 0x697   : > { %v1106_v56 = vadd.f32 %v1102_v34, %v1067_v53  ;;  %v1415_v34 = vld [vmem:[%s7446_s15] sm:$0x77] }
 0x698   : > { %v1066_v46 = vadd.f32 %v1062_v38, %v1044_v59  ;;  %v1361_v51 = vpop.permute.xlu0 %1360  ;;  %v1417_v43 = vcombine.high %v1415_v34, %v1415_v34 }
 0x699   : > { %7124 = vset.pattern.permute.xlu1 %v12110_v31  ;;  %v1128_v54 = vadd.f32 %v1126_v36, %v1106_v56  ;;  %v1363_v50 = vsel %vm754_vm14, %v7879_v2, %v1361_v51 }
 0x69a   : > { %2117 = vperm.xlu1 %7124, %v7893_v47   ;;  %v1105_v18 = vadd.f32 %v1101_v61, %v1066_v46 }
 0x69b   : > { %v1167_v63 = vadd.f32 %v1163_v23, %v1128_v54 }
 0x69c   : > { %v1127_v25 = vadd.f32 %v1125_v22, %v1105_v18 }
 0x69d   : > { %v1206_v38 = vadd.f32 %v1202_v39, %v1167_v63 }
 0x69e   : > { %7125 = vset.pattern.permute.xlu1 %v12111_v62  ;;  %v1166_v44 = vadd.f32 %v1162_v42, %v1127_v25 }
 0x69f   : > { %2156 = vperm.xlu1 %7125, %v7893_v47   ;;  %v1245_v59 = vadd.f32 %v1241_v10, %v1206_v38  ;;  %v2354_v10 = vld [vmem:[%s11833_s6] sm:$0x7] }
 0x6a0   : > { %v1205_v21 = vadd.f32 %v1201_v5, %v1166_v44  ;;  %v12129_v44 = vmov 25   ;;  %v8145_v38 = vld [vmem:[%s11834_s7] sm:$0x7] }
 0x6a1   : > { %v1267_v37 = vadd.f32 %v1263_v14, %v1245_v59 }
 0x6a2   : > { %v1244_v15 = vadd.f32 %v1240_v55, %v1205_v21  ;;  %v12130_v55 = vmov 26  }
 0x6a3   : > { %7126 = vset.pattern.permute.xlu1 %v12112_v48  ;;  %v1306_v60 = vadd.f32 %v1302_v24, %v1267_v37 }
 0x6a4   : > { %2194 = vperm.xlu1 %7126, %v7893_v47   ;;  %v1266_v3 = vadd.f32 %v1262_v9, %v1244_v15 }
 0x6a5   : > { %v1345_v33 = vadd.f32 %v1341_v35, %v1306_v60 }
 0x6a6   : > { %v1305_v32 = vadd.f32 %v1301_v1, %v1266_v3 }
 0x6a7   : > { %v1367_v17 = vadd.f32 %v1363_v50, %v1345_v33 }
 0x6a8   : > { %7127 = vset.pattern.permute.xlu1 %v12115_v58  ;;  %v1344_v13 = vadd.f32 %v1340_v11, %v1305_v32 }
 0x6a9   : > { %2217 = vperm.xlu1 %7127, %v7893_v47  }
 0x6aa   : > { %v1366_v53 = vadd.f32 %v1362_v20, %v1344_v13 }
 0x6ad   : > { %7128 = vset.pattern.permute.xlu1 %v12122_v4 }
 0x6b3   : > { %v1396_v7 = vpop.permute.xlu0 %1395  ;;  %v1398_v6 = vpop.permute.xlu1 %1397 }
 0x6b4   : > { %v1401_v46 = vsel %vm800_vm15, %v1396_v7, %v1398_v6 }
 0x6b5   : > { %v1405_v19 = vadd.f32 %v1401_v46, %v1366_v53 }
 0x6b7   : > { %v1400_v61 = vpop.permute.xlu0 %1399 }
 0x6b8   : > { %v1402_v57 = vsel %vm800_vm15, %v1398_v6, %v1400_v61 }
 0x6b9   : > { %v1406_v22 = vadd.f32 %v1402_v57, %v1367_v17 }
 0x6c4   : > { %v1411_v36 = vpop.permute.xlu1 %1410 }
 0x6c5   : > { %v1413_v18 = vadd.f32 %v1411_v36, %v1405_v19  ;;  %v1414_v56 = vadd.f32 %v1411_v36, %v1406_v22  ;;  %v12132_v22 = vld [vmem:[#allocation4_spill] sm:$0xff] }
 0x6c7   : > { %v1419_v45 = vsub.f32 %v1413_v18, %v1415_v34  ;;  %v1420_v28 = vsub.f32 %v1414_v56, %v1417_v43 }
 0x6c8   : > { %v8170_v32 = vpop.permute.xlu0 %1458 }
 0x6c9   : > { %v1423_v2 = vrot.slane %v1419_v45, 2  ;;  %v1424_v8 = vrot.slane %v1420_v28, 2  ;;  %v1431_v42 = vrot.slane %v1419_v45, 4  ;;  %v1432_v23 = vrot.slane %v1420_v28, 4  ;;  %v1479_v25 = vpop.permute.xlu1 %1478 }
 0x6ca   : > { %v1437_v54 = vrot.slane %v1419_v45, 5  ;;  %v1438_v51 = vrot.slane %v1420_v28, 5 }
 0x6cb   : > { %1427 = vst [vmem:[%s8119_s27 + $0x10] ss:$-12 sps:$4 sm:$0xc1] %v1423_v2   ;;  %1428 = vst [vmem:[%s8119_s27 + $0x18] ss:$-12 sps:$4 sm:$0xc1] %v1424_v8  }
 0x6cc   : > { %1435 = vst [vmem:[%s8119_s27 + $0x10] sm:$0x70] %v1431_v42  ;;  %1436 = vst [vmem:[%s8119_s27 + $0x18] sm:$0x70] %v1432_v23  ;;  %1439 = vrot.lane.b32.xlu0 %v1437_v54, %s7289_s16  ;;  %1441 = vrot.lane.b32.xlu1 %v1438_v51, %s7289_s16 }
 0x6cd   : > { %v1779_v6 = vpop.permute.xlu0 %1778 }
 0x6ce   : > { %v8127_v5 = vpop.permute.xlu1 %1556 }
 0x6d0   : > { %2256 = vperm.xlu1 %7128, %v7893_v47  }
 0x6d2   : > { %v8176_v20 = vpop.permute.xlu0 %2078 }
 0x6d3   : > { %v1595_v39 = vpop.permute.xlu1 %1594 }
 0x6d4   : > { %7129 = vset.pattern.permute.xlu1 %v12129_v44 }
 0x6d5   : > { %2294 = vperm.xlu1 %7129, %v7893_v47  }
 0x6d7   : > { %v8180_v13 = vpop.permute.xlu0 %1517 }
 0x6d8   : > { %v8132_v63 = vpop.permute.xlu1 %1617 }
 0x6d9   : > { %7130 = vset.pattern.permute.xlu1 %v12130_v55 }
 0x6da   : > { %2317 = vperm.xlu1 %7130, %v7893_v47   ;;  %v12131_v47 = vmov 3  }
 0x6dd   : > { %v8139_v21 = vpop.permute.xlu1 %1656 }
 0x6de   : > { %7131 = vset.pattern.permute.xlu1 %v12090_v40 }
 0x6df   : > { %2357 = vperm.xlu1 %7131, %v2354_v10  }
 0x6e2   : > { %v1695_v7 = vpop.permute.xlu1 %1694 }
 0x6e3   : > { %7132 = vset.pattern.permute.xlu1 %v12091_v12 }
 0x6e4   : > { %2400 = vperm.xlu1 %7132, %v8145_v38  }
 0x6e7   : > { %v8150_v16 = vpop.permute.xlu1 %1717 }
 0x6e8   : > { %7133 = vset.pattern.permute.xlu1 %v12131_v47 }
 0x6ec   : > { %v8152_v9 = vpop.permute.xlu1 %1758 }
 0x6f1   : > { %v8154_v14 = vpop.permute.xlu1 %1817 }
 0x6f6   : > { %v8156_v15 = vpop.permute.xlu1 %1856 }
 0x6fb   : > { %v1895_v59 = vpop.permute.xlu1 %1894 }
 0x700   : > { %v8158_v1 = vpop.permute.xlu1 %1917 }
 0x705   : > { %v8160_v24 = vpop.permute.xlu1 %1956 }
 0x70a   : > { %v8162_v3 = vpop.permute.xlu1 %1994 }
 0x70f   : > { %v8164_v37 = vpop.permute.xlu1 %2017 }
 0x714   : > { %v8166_v11 = vpop.permute.xlu1 %2058 }
 0x719   : > { %v8168_v35 = vpop.permute.xlu1 %2117 }
 0x71e   : > { %v8172_v60 = vpop.permute.xlu1 %2156 }
 0x723   : > { %v8174_v61 = vpop.permute.xlu1 %2194 }
 0x728   : > { %v8178_v50 = vpop.permute.xlu1 %2217 }
 0x73e   : > { %v1442_v33 = vpop.permute.xlu1 %1441  ;;  %v1440_v34 = vpop.permute.xlu0 %1439 }
 0x73f   : > { %1451 = vst.msk [vmem:[#allocation3 + $0x10] sm:$0x38] %vm1450_vm3, %v1442_v33  ;;  %v1443_v46 = vsel %vm456_vm1, %v1440_v34, %v1442_v33 }
 0x740   : > { %1448 = vst.msk [vmem:[#allocation3] sm:$0x38] %vm1447_vm4, %v1440_v34  ;;  %1449 = vst [vmem:[#allocation3 + $0x8] sm:$0x38] %v1443_v46 }
 0x747   : > { %v8183_v57 = vld [vmem:[#allocation3 + $0x3] ss:$8 sm:$0x7]  ;;  %v8195_v2 = vld [vmem:[#allocation3 + $0x4] ss:$8 sm:$0x7] }
 0x748   : > { %v1489_v53 = vrot.slane %v8183_v57, %v7498_v30  ;;  %v1485_v17 = vrot.slane %v8183_v57, %v7496_v29  ;;  %v1493_v36 = vrot.slane %v8183_v57, %v12132_v22  ;;  %v1785_v23 = vrot.slane %v8195_v2, %v7496_v29 }
 0x749   : > { %v1793_v51 = vrot.slane %v8195_v2, %v12132_v22 }
 0x74a   : > { %v1498_v43 = vmul.f32 %v1489_v53, %v1479_v25  ;;  %v1497_v19 = vmul.f32 %v1485_v17, %v1479_v25  ;;  %v1597_v18 = vmul.f32 %v1595_v39, %v1485_v17  ;;  %v1499_v56 = vmul.f32 %v1493_v36, %v1479_v25 }
 0x74b   : > { %v1599_v45 = vmul.f32 %v1595_v39, %v1493_v36  ;;  %v1598_v28 = vmul.f32 %v1595_v39, %v1489_v53  ;;  %v1697_v8 = vmul.f32 %v1695_v7, %v1485_v17  ;;  %v1698_v42 = vmul.f32 %v1695_v7, %v1489_v53 }
 0x74c   : > { %1505 = vrot.lane.b32.xlu0 %v1498_v43, %s7309_s28  ;;  %1503 = vrot.lane.b32.xlu1 %v1497_v19, %s7309_s28  ;;  %v1699_v25 = vmul.f32 %v1695_v7, %v1493_v36  ;;  %v1797_v54 = vmul.f32 %v1785_v23, %v1779_v6  ;;  %v1789_v39 = vrot.slane %v8195_v2, %v7498_v30  ;;  %v8211_v7 = vld [vmem:[#allocation3 + $0x5] ss:$8 sm:$0x7] }
 0x74d   : > { %v1799_v10 = vmul.f32 %v1793_v51, %v1779_v6  ;;  %v1897_v34 = vmul.f32 %v1895_v59, %v1785_v23  ;;  %v2085_v53 = vrot.slane %v8211_v7, %v7496_v29  ;;  %v1899_v17 = vmul.f32 %v1895_v59, %v1793_v51 }
 0x74e   : > { %v1798_v33 = vmul.f32 %v1789_v39, %v1779_v6  ;;  %v1898_v46 = vmul.f32 %v1895_v59, %v1789_v39  ;;  %v1998_v43 = vmul.f32 %v8162_v3, %v1789_v39  ;;  %v2089_v6 = vrot.slane %v8211_v7, %v7498_v30 }
 0x74f   : > { %v1997_v19 = vmul.f32 %v8162_v3, %v1785_v23  ;;  %v2097_v36 = vmul.f32 %v2085_v53, %v8176_v20  ;;  %v2093_v59 = vrot.slane %v8211_v7, %v12132_v22 }
 0x750   : > { %1603 = vrot.lane.b32.xlu0 %v1597_v18, %s7310_s29  ;;  %1507 = vrot.lane.b32.xlu1 %v1499_v56, %s7309_s28  ;;  %v8226_v18 = vpop.permute.xlu1 %2256  ;;  %v1999_v56 = vmul.f32 %v8162_v3, %v1793_v51  ;;  %v2197_v3 = vmul.f32 %v8174_v61, %v2085_v53 }
 0x754   : > { %1607 = vrot.lane.b32.xlu0 %v1599_v45, %s7310_s29  ;;  %1605 = vrot.lane.b32.xlu1 %v1598_v28, %s7310_s29  ;;  %v2098_v45 = vmul.f32 %v2089_v6, %v8176_v20  ;;  %v2099_v28 = vmul.f32 %v2093_v59, %v8176_v20  ;;  %v2199_v20 = vmul.f32 %v8174_v61, %v2093_v59 }
 0x758   : > { %1703 = vrot.lane.b32.xlu0 %v1697_v8, %s7311_s30  ;;  %1705 = vrot.lane.b32.xlu1 %v1698_v42, %s7311_s30  ;;  %v2198_v8 = vmul.f32 %v8174_v61, %v2089_v6  ;;  %v12133_v42 = vld [vmem:[#allocation5_spill] sm:$0xff]  ;;  %v12136_v61 = vld [vmem:[#allocation8_spill] sm:$0xff] }
 0x759   : > { %v1515_v23 = vmul.f32 %v8183_v57, %v12133_v42 }
 0x75b   : > { %v1524_v51 = vrot.slane %v1515_v23, %v7496_v29 }
 0x75c   : > { %1707 = vrot.lane.b32.xlu0 %v1699_v25, %s7311_s30  ;;  %1803 = vrot.lane.b32.xlu1 %v1797_v54, %s7309_s28  ;;  %v2295_v25 = vpop.permute.xlu1 %2294 }
 0x75d   : > { %v2298_v54 = vmul.f32 %v2295_v25, %v2089_v6  ;;  %v1536_v39 = vmul.f32 %v1524_v51, %v8180_v13  ;;  %v12135_v6 = vld [vmem:[#allocation7_spill] sm:$0xff] }
 0x760   : > { %1807 = vrot.lane.b32.xlu0 %v1799_v10, %s7309_s28  ;;  %1805 = vrot.lane.b32.xlu1 %v1798_v33, %s7309_s28  ;;  %v1528_v10 = vrot.slane %v1515_v23, %v7498_v30  ;;  %v12134_v33 = vld [vmem:[#allocation6_spill] sm:$0xff] }
 0x764   : > { %1903 = vrot.lane.b32.xlu0 %v1897_v34, %s7310_s29  ;;  %1905 = vrot.lane.b32.xlu1 %v1898_v46, %s7310_s29  ;;  %v1554_v34 = vmul.f32 %v8183_v57, %v12134_v33  ;;  %v2297_v46 = vmul.f32 %v2295_v25, %v2085_v53 }
 0x768   : > { %1907 = vrot.lane.b32.xlu0 %v1899_v17, %s7310_s29  ;;  %2005 = vrot.lane.b32.xlu1 %v1998_v43, %s7311_s30  ;;  %v1537_v17 = vmul.f32 %v1528_v10, %v8180_v13  ;;  %v1567_v43 = vrot.slane %v1554_v34, %v7498_v30 }
 0x76c   : > { %2003 = vrot.lane.b32.xlu0 %v1997_v19, %s7311_s30  ;;  %2103 = vrot.lane.b32.xlu1 %v2097_v36, %s7309_s28  ;;  %v1615_v19 = vmul.f32 %v8183_v57, %v12135_v6  ;;  %v1654_v36 = vmul.f32 %v8183_v57, %v12136_v61 }
 0x76e   : > { %v1628_v53 = vrot.slane %v1615_v19, %v7498_v30 }
 0x770   : > { %2007 = vrot.lane.b32.xlu0 %v1999_v56, %s7311_s30  ;;  %2105 = vrot.lane.b32.xlu1 %v2098_v45, %s7309_s28  ;;  %v2299_v56 = vmul.f32 %v2295_v25, %v2093_v59  ;;  %v1576_v45 = vmul.f32 %v1567_v43, %v8127_v5  ;;  %v1637_v51 = vmul.f32 %v1628_v53, %v8132_v63 }
 0x771   : > { %v1667_v59 = vrot.slane %v1654_v36, %v7498_v30  ;;  %v8286_v43 = vmul.f32 %v8195_v2, %v12134_v33  ;;  %v8297_v53 = vmul.f32 %v8195_v2, %v12135_v6 }
 0x774   : > { %2107 = vrot.lane.b32.xlu0 %v2099_v28, %s7309_s28  ;;  %2205 = vrot.lane.b32.xlu1 %v2198_v8, %s7310_s29  ;;  %v1532_v28 = vrot.slane %v1515_v23, %v12132_v22  ;;  %v12137_v8 = vld [vmem:[#allocation9_spill] sm:$0xff]  ;;  %v1571_v23 = vrot.slane %v1554_v34, %v12132_v22 }
 0x776   : > { %v1577_v10 = vmul.f32 %v1571_v23, %v8127_v5 }
 0x778   : > { %2203 = vrot.lane.b32.xlu0 %v2197_v3, %s7310_s29  ;;  %2305 = vrot.lane.b32.xlu1 %v2298_v54, %s7311_s30  ;;  %v1715_v54 = vmul.f32 %v8183_v57, %v12137_v8  ;;  %v1538_v3 = vmul.f32 %v1532_v28, %v8180_v13  ;;  %v1815_v13 = vmul.f32 %v8195_v2, %v12133_v42 }
 0x779   : > { %v1867_v28 = vrot.slane %v8286_v43, %v7498_v30 }
 0x77a   : > { %v1728_v57 = vrot.slane %v1715_v54, %v7498_v30 }
 0x77c   : > { %2207 = vrot.lane.b32.xlu0 %v2199_v20, %s7310_s29  ;;  %1542 = vrot.lane.b32.xlu1 %v1536_v39, %s7312_s14  ;;  %v1563_v20 = vrot.slane %v1554_v34, %v7496_v29  ;;  %v1676_v39 = vmul.f32 %v1667_v59, %v8139_v21  ;;  %v1828_v34 = vrot.slane %v1815_v13, %v7498_v30 }
 0x77d   : > { %v8308_v59 = vmul.f32 %v8195_v2, %v12136_v61 }
 0x77e   : > { %v1575_v25 = vmul.f32 %v1563_v20, %v8127_v5  ;;  %v1837_v5 = vmul.f32 %v1828_v34, %v8154_v14  ;;  %v1928_v20 = vrot.slane %v8297_v53, %v7498_v30  ;;  %v8330_v34 = vmul.f32 %v8211_v7, %v12133_v42 }
 0x780   : > { %2303 = vrot.lane.b32.xlu0 %v2297_v46, %s7311_s30  ;;  %1544 = vrot.lane.b32.xlu1 %v1537_v17, %s7312_s14  ;;  %v1737_v46 = vmul.f32 %v1728_v57, %v8150_v16  ;;  %v1624_v17 = vrot.slane %v1615_v19, %v7496_v29  ;;  %v8319_v57 = vmul.f32 %v8195_v2, %v12137_v8 }
 0x784   : > { %2307 = vrot.lane.b32.xlu0 %v2299_v56, %s7311_s30  ;;  %1583 = vrot.lane.b32.xlu1 %v1576_v45, %s7313_s17  ;;  %v1632_v56 = vrot.slane %v1615_v19, %v12132_v22  ;;  %v1636_v45 = vmul.f32 %v1624_v17, %v8132_v63  ;;  %v1876_v19 = vmul.f32 %v1867_v28, %v8156_v15 }
 0x785   : > { %v1824_v28 = vrot.slane %v1815_v13, %v7496_v29 }
 0x788   : > { %1546 = vrot.lane.b32.xlu0 %v1538_v3, %s7312_s14  ;;  %1644 = vrot.lane.b32.xlu1 %v1637_v51, %s7314_s18  ;;  %v1663_v3 = vrot.slane %v1654_v36, %v7496_v29  ;;  %v1638_v51 = vmul.f32 %v1632_v56, %v8132_v63  ;;  %v1967_v63 = vrot.slane %v8308_v59, %v7498_v30 }
 0x78a   : > { %v1675_v23 = vmul.f32 %v1663_v3, %v8139_v21  ;;  %v1976_v17 = vmul.f32 %v1967_v63, %v8160_v24  ;;  %v8367_v63 = vpop.permute.xlu1 %2317 }
 0x78c   : > { %1581 = vrot.lane.b32.xlu0 %v1575_v25, %s7313_s17  ;;  %1683 = vrot.lane.b32.xlu1 %v1676_v39, %s7315_s19  ;;  %v1937_v25 = vmul.f32 %v1928_v20, %v8158_v1  ;;  %v1671_v39 = vrot.slane %v1654_v36, %v12132_v22  ;;  %v2028_v36 = vrot.slane %v8319_v57, %v7498_v30 }
 0x78d   : > { %v1836_v20 = vmul.f32 %v1824_v28, %v8154_v14 }
 0x78e   : > { %v2037_v56 = vmul.f32 %v2028_v36, %v8164_v37  ;;  %v8377_v36 = vmul.f32 %v8211_v7, %v12137_v8 }
 0x790   : > { %1585 = vrot.lane.b32.xlu0 %v1577_v10, %s7313_s17  ;;  %1744 = vrot.lane.b32.xlu1 %v1737_v46, %s7316_s20  ;;  %v1724_v10 = vrot.slane %v1715_v54, %v7496_v29  ;;  %v1677_v46 = vmul.f32 %v1671_v39, %v8139_v21  ;;  %v2128_v21 = vrot.slane %v8330_v34, %v7498_v30 }
 0x791   : > { %v8363_v39 = vmul.f32 %v8211_v7, %v12136_v61 }
 0x792   : > { %v1736_v2 = vmul.f32 %v1724_v10, %v8150_v16 }
 0x794   : > { %1642 = vrot.lane.b32.xlu0 %v1636_v45, %s7314_s18  ;;  %1844 = vrot.lane.b32.xlu1 %v1837_v5, %s7312_s14  ;;  %v1732_v45 = vrot.slane %v1715_v54, %v12132_v22  ;;  %v8341_v5 = vmul.f32 %v8211_v7, %v12134_v33 }
 0x796   : > { %v1738_v3 = vmul.f32 %v1732_v45, %v8150_v16  ;;  %v2167_v54 = vrot.slane %v8341_v5, %v7498_v30  ;;  %v1871_v45 = vrot.slane %v8286_v43, %v12132_v22  ;;  %v2171_v61 = vrot.slane %v8341_v5, %v12132_v22 }
 0x798   : > { %1646 = vrot.lane.b32.xlu0 %v1638_v51, %s7314_s18  ;;  %1883 = vrot.lane.b32.xlu1 %v1876_v19, %s7313_s17  ;;  %v2137_v51 = vmul.f32 %v2128_v21, %v8168_v35  ;;  %v8352_v19 = vmul.f32 %v8211_v7, %v12135_v6  ;;  %v2328_v21 = vrot.slane %v8377_v36, %v7498_v30 }
 0x799   : > { %v1877_v28 = vmul.f32 %v1871_v45, %v8156_v15  ;;  %v2024_v45 = vrot.slane %v8319_v57, %v7496_v29  ;;  %v2177_v6 = vmul.f32 %v2171_v61, %v8172_v60 }
 0x79a   : > { %v2228_v16 = vrot.slane %v8352_v19, %v7498_v30  ;;  %v2337_v7 = vmul.f32 %v2328_v21, %v8367_v63  ;;  %v2224_v33 = vrot.slane %v8352_v19, %v7496_v29  ;;  %v2232_v42 = vrot.slane %v8352_v19, %v12132_v22 }
 0x79c   : > { %1681 = vrot.lane.b32.xlu0 %v1675_v23, %s7315_s19  ;;  %1944 = vrot.lane.b32.xlu1 %v1937_v25, %s7314_s18  ;;  %v2176_v23 = vmul.f32 %v2167_v54, %v8172_v60  ;;  %v1832_v25 = vrot.slane %v1815_v13, %v12132_v22  ;;  %v1863_v13 = vrot.slane %v8286_v43, %v7496_v29 }
 0x79d   : > { %v1932_v54 = vrot.slane %v8297_v53, %v12132_v22 }
 0x79e   : > { %v1838_v10 = vmul.f32 %v1832_v25, %v8154_v14  ;;  %v1875_v14 = vmul.f32 %v1863_v13, %v8156_v15  ;;  %v1963_v25 = vrot.slane %v8308_v59, %v7496_v29  ;;  %v1971_v13 = vrot.slane %v8308_v59, %v12132_v22 }
 0x79f   : > { %v12142_v59 = vmov 6  }
 0x7a0   : > { %1685 = vrot.lane.b32.xlu0 %v1677_v46, %s7315_s19  ;;  %1983 = vrot.lane.b32.xlu1 %v1976_v17, %s7315_s19  ;;  %v2237_v46 = vmul.f32 %v2228_v16, %v8178_v50  ;;  %v2267_v17 = vrot.slane %v8363_v39, %v7498_v30  ;;  %v12140_v16 = vmov 4  }
 0x7a4   : > { %1742 = vrot.lane.b32.xlu0 %v1736_v2, %s7316_s20  ;;  %2044 = vrot.lane.b32.xlu1 %v2037_v56, %s7316_s20  ;;  %v2276_v2 = vmul.f32 %v2267_v17, %v8226_v18  ;;  %v8383_v56 = vpop.permute.xlu1 %2357 }
 0x7a5   : > { %12138 = vst [vmem:[#allocation12_spill] sm:$0xff] %v8383_v56  ;;  %v2263_v56 = vrot.slane %v8363_v39, %v7496_v29 }
 0x7a7   : > { %v2275_v19 = vmul.f32 %v2263_v56, %v8226_v18  ;;  %v2324_v56 = vrot.slane %v8377_v36, %v7496_v29 }
 0x7a8   : > { %1746 = vrot.lane.b32.xlu0 %v1738_v3, %s7316_s20  ;;  %2144 = vrot.lane.b32.xlu1 %v2137_v51, %s7312_s14  ;;  %v1924_v3 = vrot.slane %v8297_v53, %v7496_v29  ;;  %v8397_v51 = vpop.permute.xlu1 %2400 }
 0x7a9   : > { %12139 = vst [vmem:[#allocation13_spill] sm:$0xff] %v8397_v51  ;;  %v12149_v51 = vmov 12  }
 0x7aa   : > { %v1936_v43 = vmul.f32 %v1924_v3, %v8158_v1  ;;  %v2032_v3 = vrot.slane %v8319_v57, %v12132_v22 }
 0x7ac   : > { %1842 = vrot.lane.b32.xlu0 %v1836_v20, %s7312_s14  ;;  %2183 = vrot.lane.b32.xlu1 %v2176_v23, %s7313_s17  ;;  %v1938_v23 = vmul.f32 %v1932_v54, %v8158_v1  ;;  %v12141_v1 = vmov 5   ;;  %v2038_v54 = vmul.f32 %v2032_v3, %v8164_v37 }
 0x7b0   : > { %1846 = vrot.lane.b32.xlu0 %v1838_v10, %s7312_s14  ;;  %2244 = vrot.lane.b32.xlu1 %v2237_v46, %s7314_s18  ;;  %v1975_v46 = vmul.f32 %v1963_v25, %v8160_v24  ;;  %v12143_v25 = vmov 7  }
 0x7b4   : > { %1881 = vrot.lane.b32.xlu0 %v1875_v14, %s7313_s17  ;;  %2283 = vrot.lane.b32.xlu1 %v2276_v2, %s7315_s19  ;;  %v1977_v14 = vmul.f32 %v1971_v13, %v8160_v24 }
 0x7b8   : > { %1885 = vrot.lane.b32.xlu0 %v1877_v28, %s7313_s17  ;;  %2344 = vrot.lane.b32.xlu1 %v2337_v7, %s7316_s20  ;;  %v2036_v28 = vmul.f32 %v2024_v45, %v8164_v37  ;;  %v12144_v37 = vmov 8  }
 0x7bc   : > { %1942 = vrot.lane.b32.xlu0 %v1936_v43, %s7314_s18  ;;  %2478 = vperm.xlu1 %7133, %v8145_v38  }
 0x7be   : > { %v8404_v20 = vpop.permute.xlu0 %1505  ;;  %v8406_v15 = vpop.permute.xlu1 %1503 }
 0x7c0   : > { %1946 = vrot.lane.b32.xlu0 %v1938_v23, %s7314_s18  ;;  %7134 = vset.pattern.permute.xlu1 %v12140_v16  ;;  %v2124_v23 = vrot.slane %v8330_v34, %v7496_v29 }
 0x7c1   : > { %2516 = vperm.xlu1 %7134, %v8145_v38  }
 0x7c2   : > { %v8414_v53 = vpop.permute.xlu0 %1603  ;;  %v8416_v10 = vpop.permute.xlu1 %1507  ;;  %v2136_v13 = vmul.f32 %v2124_v23, %v8168_v35  ;;  %v12145_v23 = vmov 9  }
 0x7c4   : > { %1981 = vrot.lane.b32.xlu0 %v1975_v46, %s7315_s19 }
 0x7c5   : > { %7135 = vset.pattern.permute.xlu1 %v12141_v1 }
 0x7c6   : > { %v8423_v17 = vpop.permute.xlu0 %1607  ;;  %2539 = vperm.xlu1 %7135, %v8145_v38   ;;  %v8426_v2 = vpop.permute.xlu1 %1605 }
 0x7c8   : > { %1985 = vrot.lane.b32.xlu0 %v1977_v14, %s7315_s19  ;;  %v2132_v14 = vrot.slane %v8330_v34, %v12132_v22 }
 0x7ca   : > { %v8432_v21 = vpop.permute.xlu0 %1703  ;;  %7136 = vset.pattern.permute.xlu1 %v12142_v59  ;;  %v8435_v7 = vpop.permute.xlu1 %1705  ;;  %v2138_v3 = vmul.f32 %v2132_v14, %v8168_v35  ;;  %v12147_v14 = vmov 11  }
 0x7cb   : > { %2578 = vperm.xlu1 %7136, %v8145_v38  }
 0x7cc   : > { %2042 = vrot.lane.b32.xlu0 %v2036_v28, %s7316_s20 }
 0x7ce   : > { %v8442_v24 = vpop.permute.xlu0 %1707  ;;  %v8444_v43 = vpop.permute.xlu1 %1803 }
 0x7cf   : > { %7137 = vset.pattern.permute.xlu1 %v12143_v25 }
 0x7d0   : > { %2046 = vrot.lane.b32.xlu0 %v2038_v54, %s7316_s20  ;;  %2616 = vperm.xlu1 %7137, %v8145_v38   ;;  %v2163_v54 = vrot.slane %v8341_v5, %v7496_v29 }
 0x7d2   : > { %v8452_v57 = vpop.permute.xlu0 %1807  ;;  %v8454_v46 = vpop.permute.xlu1 %1805  ;;  %v2175_v8 = vmul.f32 %v2163_v54, %v8172_v60 }
 0x7d4   : > { %2142 = vrot.lane.b32.xlu0 %v2136_v13, %s7312_s14  ;;  %7138 = vset.pattern.permute.xlu1 %v12144_v37 }
 0x7d5   : > { %2639 = vperm.xlu1 %7138, %v8145_v38  }
 0x7d6   : > { %v8462_v45 = vpop.permute.xlu0 %1903  ;;  %v8464_v28 = vpop.permute.xlu1 %1905 }
 0x7d8   : > { %2146 = vrot.lane.b32.xlu0 %v2138_v3, %s7312_s14 }
 0x7d9   : > { %7139 = vset.pattern.permute.xlu1 %v12145_v23 }
 0x7da   : > { %v8471_v34 = vpop.permute.xlu0 %1907  ;;  %2679 = vperm.xlu1 %7139, %v8145_v38   ;;  %v8474_v13 = vpop.permute.xlu1 %2005 }
 0x7db   : > { %12146 = vst [vmem:[#allocation10_spill] sm:$0xff] %v8471_v34 }
 0x7dc   : > { %2181 = vrot.lane.b32.xlu0 %v2175_v8, %s7313_s17  ;;  %v2236_v8 = vmul.f32 %v2224_v33, %v8178_v50  ;;  %v12152_v33 = vmov 13  }
 0x7de   : > { %v8480_v35 = vpop.permute.xlu0 %2003  ;;  %7140 = vset.pattern.permute.xlu1 %v12147_v14  ;;  %v8483_v3 = vpop.permute.xlu1 %2103 }
 0x7df   : > { %2738 = vperm.xlu1 %7140, %v8145_v38  }
 0x7e0   : > { %2185 = vrot.lane.b32.xlu0 %v2177_v6, %s7313_s17  ;;  %v2238_v6 = vmul.f32 %v2232_v42, %v8178_v50 }
 0x7e2   : > { %v8490_v54 = vpop.permute.xlu0 %2007  ;;  %v8492_v5 = vpop.permute.xlu1 %2105 }
 0x7e3   : > { %12148 = vst [vmem:[#allocation14_spill] sm:$0xff] %v8490_v54  ;;  %7141 = vset.pattern.permute.xlu1 %v12149_v51 }
 0x7e4   : > { %2242 = vrot.lane.b32.xlu0 %v2236_v8, %s7314_s18  ;;  %2777 = vperm.xlu1 %7141, %v8145_v38  }
 0x7e6   : > { %v8500_v60 = vpop.permute.xlu0 %2107  ;;  %v8502_v61 = vpop.permute.xlu1 %2205 }
 0x7e7   : > { %12150 = vst [vmem:[#allocation15_spill] sm:$0xff] %v8500_v60  ;;  %12151 = vst [vmem:[#allocation11_spill] sm:$0xff] %v8502_v61  ;;  %v2271_v60 = vrot.slane %v8363_v39, %v12132_v22 }
 0x7e8   : > { %2246 = vrot.lane.b32.xlu0 %v2238_v6, %s7314_s18  ;;  %7142 = vset.pattern.permute.xlu1 %v12152_v33 }
 0x7e9   : > { %2815 = vperm.xlu1 %7142, %v8145_v38   ;;  %v2277_v50 = vmul.f32 %v2271_v60, %v8226_v18  ;;  %v2332_v18 = vrot.slane %v8377_v36, %v12132_v22 }
 0x7ea   : > { %v8511_v8 = vpop.permute.xlu0 %2203  ;;  %v8513_v54 = vpop.permute.xlu1 %2305 }
 0x7eb   : > { %12153 = vst [vmem:[#allocation16_spill] sm:$0xff] %v8511_v8  ;;  %12154 = vst [vmem:[#allocation17_spill] sm:$0xff] %v8513_v54  ;;  %v2336_v54 = vmul.f32 %v2324_v56, %v8367_v63  ;;  %v2338_v60 = vmul.f32 %v2332_v18, %v8367_v63  ;;  %v1453_v56 = vld [vmem:[#allocation3 + $0x3] ss:$8 sm:$0x3] }
 0x7ec   : > { %2281 = vrot.lane.b32.xlu0 %v2275_v19, %s7315_s19  ;;  %v8549_v36 = vmul.f32 %v8048_v49, %v1453_v56  ;;  %v8557_v63 = vld [vmem:[%s11836_s9] sm:$0x3f] }
 0x7ed   : > { %7143 = vset.pattern.permute.xlu1 %v12105_v27 }
 0x7ee   : > { %v8520_v42 = vpop.permute.xlu0 %2207  ;;  %2838 = vperm.xlu1 %7143, %v8145_v38   ;;  %v1543_v6 = vpop.permute.xlu1 %1542 }
 0x7ef   : > { %12155 = vst [vmem:[#allocation18_spill] sm:$0xff] %v8520_v42 }
 0x7f0   : > { %2285 = vrot.lane.b32.xlu0 %v2277_v50, %s7315_s19 }
 0x7f2   : > { %v8527_v33 = vpop.permute.xlu0 %2303  ;;  %7144 = vset.pattern.permute.xlu1 %v12106_v41  ;;  %v8530_v39 = vpop.permute.xlu1 %1544 }
 0x7f3   : > { %12156 = vst [vmem:[#allocation19_spill] sm:$0xff] %v8527_v33  ;;  %2877 = vperm.xlu1 %7144, %v8145_v38   ;;  %v1548_v27 = vsel %vm569_vm9, %v1543_v6, %v8530_v39 }
 0x7f4   : > { %2342 = vrot.lane.b32.xlu0 %v2336_v54, %s7316_s20 }
 0x7f6   : > { %v8537_v19 = vpop.permute.xlu0 %2307  ;;  %v8539_v50 = vpop.permute.xlu1 %1583 }
 0x7f7   : > { %12157 = vst [vmem:[#allocation20_spill] sm:$0xff] %v8537_v19  ;;  %7145 = vset.pattern.permute.xlu1 %v12107_v0  ;;  %v1509_v19 = vsel %vm522_vm8, %v8406_v15, %v8404_v20  ;;  %v12158_v0 = vmov 10  }
 0x7f8   : > { %2346 = vrot.lane.b32.xlu0 %v2338_v60, %s7316_s20  ;;  %2915 = vperm.xlu1 %7145, %v8145_v38   ;;  %v1465_v60 = vrot.slane %v8549_v36, %v7496_v29 }
 0x7fa   : > { %v8544_v42 = vpop.permute.xlu0 %1546  ;;  %v8546_v41 = vpop.permute.xlu1 %1644 }
 0x7fc   : > { %2439 = vperm.xlu0 %7123, %v8145_v38   ;;  %7146 = vset.pattern.permute.xlu1 %v12108_v52  ;;  %v1472_v52 = vmul.f32 %v1465_v60, %v8170_v32 }
 0x7fd   : > { %2938 = vperm.xlu1 %7146, %v8145_v38  }
 0x7fe   : > { %v1582_v54 = vpop.permute.xlu0 %1581  ;;  %v8559_v18 = vpop.permute.xlu1 %1683 }
 0x7ff   : > { %v1587_v61 = vsel %vm616_vm10, %v1582_v54, %v8539_v50  ;;  %v1755_v54 = vld [vmem:[#allocation3 + $0x4] ss:$8 sm:$0x3] }
 0x800   : > { %3365 = vperm.xlu0 %7123, %v8557_v63  }
 0x801   : > { %7147 = vset.pattern.permute.xlu1 %v12109_v26  ;;  %v1513_v26 = vadd.f32 %v1509_v19, %v1472_v52  ;;  %v1609_v52 = vsel %vm639_vm11, %v8414_v53, %v8426_v2  ;;  %v8604_v53 = vmul.f32 %v8048_v49, %v1755_v54 }
 0x802   : > { %v8565_v56 = vpop.permute.xlu0 %1585  ;;  %2978 = vperm.xlu1 %7147, %v8145_v38   ;;  %v8568_v22 = vpop.permute.xlu1 %1744 }
 0x803   : > { %v1552_v15 = vadd.f32 %v1548_v27, %v1513_v26  ;;  %v12159_v27 = vmov 19  }
 0x804   : > { %7157 = vset.pattern.permute.xlu0 %v12158_v0 }
 0x805   : > { %2699 = vperm.xlu0 %7157, %v8145_v38   ;;  %v1591_v60 = vadd.f32 %v1587_v61, %v1552_v15 }
 0x806   : > { %v1643_v33 = vpop.permute.xlu0 %1642  ;;  %7148 = vset.pattern.permute.xlu1 %v12110_v31  ;;  %v8579_v8 = vpop.permute.xlu1 %1844 }
 0x807   : > { %3037 = vperm.xlu1 %7148, %v8145_v38   ;;  %v1648_v19 = vsel %vm685_vm12, %v1643_v33, %v8546_v41  ;;  %v1613_v26 = vadd.f32 %v1609_v52, %v1591_v60  ;;  %v1765_v52 = vrot.slane %v8604_v53, %v7496_v29 }
 0x809   : > { %3626 = vperm.xlu0 %7157, %v8557_v63   ;;  %v1652_v31 = vadd.f32 %v1648_v19, %v1613_v26  ;;  %v1709_v19 = vsel %vm754_vm14, %v8432_v21, %v8435_v7  ;;  %v1809_v21 = vsel %vm522_vm8, %v8444_v43, %v8454_v46  ;;  %v3274_v43 = vld [vmem:[%s11835_s8] sm:$0x7] }
 0x80a   : > { %v8585_v0 = vpop.permute.xlu0 %1646  ;;  %v8587_v6 = vpop.permute.xlu1 %1883 }
 0x80b   : > { %7149 = vset.pattern.permute.xlu1 %v12111_v62 }
 0x80c   : > { %3076 = vperm.xlu1 %7149, %v8145_v38  }
 0x80d   : > { %7165 = vset.pattern.permute.xlu0 %v12159_v27 }
 0x80e   : > { %v1682_v61 = vpop.permute.xlu0 %1681  ;;  %v8597_v15 = vpop.permute.xlu1 %1944  ;;  %2998 = vperm.xlu0 %7165, %v8145_v38  }
 0x80f   : > { %v1687_v62 = vsel %vm731_vm13, %v1682_v61, %v8559_v18 }
 0x810   : > { %7150 = vset.pattern.permute.xlu1 %v12112_v48  ;;  %v1691_v33 = vadd.f32 %v1687_v62, %v1652_v31  ;;  %v1772_v62 = vmul.f32 %v1765_v52, %v8152_v9 }
 0x811   : > { %3114 = vperm.xlu1 %7150, %v8145_v38  }
 0x812   : > { %v8607_v34 = vpop.permute.xlu0 %1685  ;;  %3926 = vperm.xlu0 %7165, %v8557_v63   ;;  %v8610_v60 = vpop.permute.xlu1 %1983  ;;  %v1713_v54 = vadd.f32 %v1709_v19, %v1691_v33 }
 0x815   : > { %7151 = vset.pattern.permute.xlu1 %v12115_v58 }
 0x816   : > { %v1743_v49 = vpop.permute.xlu0 %1742  ;;  %3137 = vperm.xlu1 %7151, %v8145_v38   ;;  %v8622_v61 = vpop.permute.xlu1 %2044 }
 0x817   : > { %v1748_v31 = vsel %vm800_vm15, %v1743_v49, %v8568_v22 }
 0x818   : > { %v1752_v26 = vadd.f32 %v1748_v31, %v1713_v54 }
 0x81a   : > { %v1774_v27 = vadd.f32 %v1772_v62, %v1752_v26  ;;  %v8624_v48 = vpop.permute.xlu0 %1746  ;;  %7152 = vset.pattern.permute.xlu1 %v12122_v4  ;;  %v8631_v58 = vpop.permute.xlu1 %2144 }
 0x81b   : > { %3176 = vperm.xlu1 %7152, %v8145_v38  }
 0x81c   : > { %v1813_v33 = vadd.f32 %v1809_v21, %v1774_v27  ;;  %v1469_v21 = vrot.slane %v8549_v36, %v7498_v30 }
 0x81e   : > { %v1843_v19 = vpop.permute.xlu0 %1842  ;;  %v8638_v49 = vpop.permute.xlu1 %2183 }
 0x81f   : > { %7153 = vset.pattern.permute.xlu1 %v12129_v44  ;;  %v1848_v36 = vsel %vm569_vm9, %v1843_v19, %v8579_v8 }
 0x820   : > { %3214 = vperm.xlu1 %7153, %v8145_v38  }
 0x822   : > { %v8635_v52 = vpop.permute.xlu0 %1846  ;;  %v8647_v31 = vpop.permute.xlu1 %2244 }
 0x824   : > { %7154 = vset.pattern.permute.xlu1 %v12130_v55  ;;  %v1473_v55 = vmul.f32 %v1469_v21, %v8170_v32  ;;  %v1852_v21 = vadd.f32 %v1848_v36, %v1813_v33  ;;  %v1688_v33 = vsel %vm731_vm13, %v8559_v18, %v8607_v34  ;;  %v1710_v18 = vsel %vm754_vm14, %v8435_v7, %v8442_v24 }
 0x825   : > { %3237 = vperm.xlu1 %7154, %v8145_v38  }
 0x826   : > { %v1882_v54 = vpop.permute.xlu0 %1881  ;;  %v8651_v26 = vpop.permute.xlu1 %2283 }
 0x829   : > { %7155 = vset.pattern.permute.xlu1 %v12090_v40 }
 0x82a   : > { %v8645_v27 = vpop.permute.xlu0 %1885  ;;  %3277 = vperm.xlu1 %7155, %v3274_v43   ;;  %v8659_v43 = vpop.permute.xlu1 %2344 }
 0x82b   : > { %12160 = vst [vmem:[#allocation22_spill] sm:$0xff] %v8659_v43 }
 0x82e   : > { %v1943_v62 = vpop.permute.xlu0 %1942  ;;  %7156 = vset.pattern.permute.xlu1 %v12091_v12  ;;  %v1510_v12 = vsel %vm522_vm8, %v8404_v20, %v8416_v10  ;;  %v1588_v20 = vsel %vm616_vm10, %v8539_v50, %v8565_v56  ;;  %v1887_v10 = vsel %vm616_vm10, %v1882_v54, %v8587_v6 }
 0x82f   : > { %3326 = vperm.xlu1 %7156, %v8557_v63  }
 0x832   : > { %v8653_v38 = vpop.permute.xlu0 %1946 }
 0x833   : > { %7158 = vset.pattern.permute.xlu1 %v12131_v47  ;;  %v1549_v47 = vsel %vm569_vm9, %v8530_v39, %v8544_v42  ;;  %v1891_v39 = vadd.f32 %v1887_v10, %v1852_v21  ;;  %v1749_v21 = vsel %vm800_vm15, %v8568_v22, %v8624_v48 }
 0x834   : > { %3404 = vperm.xlu1 %7158, %v8557_v63  }
 0x836   : > { %v1982_v40 = vpop.permute.xlu0 %1981 }
 0x838   : > { %7159 = vset.pattern.permute.xlu1 %v12140_v16  ;;  %v1514_v16 = vadd.f32 %v1510_v12, %v1473_v55  ;;  %v1610_v12 = vsel %vm639_vm11, %v8426_v2, %v8423_v17  ;;  %v1909_v55 = vsel %vm639_vm11, %v8462_v45, %v8464_v28  ;;  %v1987_v17 = vsel %vm731_vm13, %v1982_v40, %v8610_v60  ;;  %v2055_v2 = vld [vmem:[#allocation3 + $0x5] ss:$8 sm:$0x3] }
 0x839   : > { %3442 = vperm.xlu1 %7159, %v8557_v63   ;;  %v1913_v56 = vadd.f32 %v1909_v55, %v1891_v39  ;;  %v1769_v39 = vrot.slane %v8604_v53, %v7498_v30 }
 0x83a   : > { %v8667_v44 = vpop.permute.xlu0 %1985  ;;  %v1553_v32 = vadd.f32 %v1549_v47, %v1514_v16  ;;  %v1649_v47 = vsel %vm685_vm12, %v8546_v41, %v8585_v0  ;;  %v1948_v16 = vsel %vm685_vm12, %v1943_v62, %v8597_v15 }
 0x83b   : > { %v8674_v4 = vpop.permute.xlu1 %2478  ;;  %v1952_v36 = vadd.f32 %v1948_v16, %v1913_v56  ;;  %v1773_v48 = vmul.f32 %v1769_v39, %v8152_v9  ;;  %v2109_v9 = vsel %vm522_vm8, %v8483_v3, %v8492_v5 }
 0x83c   : > { %12161 = vst [vmem:[#allocation21_spill] sm:$0xff] %v8674_v4  ;;  %v1592_v42 = vadd.f32 %v1588_v20, %v1553_v32  ;;  %v7268_v20 = vld [vmem:[%s11828_s1] sm:$0x3]  ;;  %v2009_v32 = vsel %vm754_vm14, %v8480_v35, %v8474_v13 }
 0x83d   : > { %7160 = vset.pattern.permute.xlu1 %v12141_v1  ;;  %v1991_v62 = vadd.f32 %v1987_v17, %v1952_v36  ;;  %v8711_v10 = vmul.f32 %v7268_v20, %v2055_v2  ;;  %v1849_v17 = vsel %vm569_vm9, %v8579_v8, %v8635_v52 }
 0x83e   : > { %v2043_v43 = vpop.permute.xlu0 %2042  ;;  %3465 = vperm.xlu1 %7160, %v8557_v63   ;;  %v1614_v50 = vadd.f32 %v1610_v12, %v1592_v42 }
 0x83f   : > { %v2048_v42 = vsel %vm800_vm15, %v2043_v43, %v8622_v61  ;;  %v2065_v55 = vrot.slane %v8711_v10, %v7496_v29 }
 0x840   : > { %v8683_v19 = vpop.permute.xlu1 %2516  ;;  %v1653_v54 = vadd.f32 %v1649_v47, %v1614_v50  ;;  %v2013_v47 = vadd.f32 %v2009_v32, %v1991_v62  ;;  %v12164_v32 = vld [vmem:[#allocation16_spill] sm:$0xff] }
 0x841   : > { %v2072_v22 = vmul.f32 %v2065_v55, %v8166_v11 }
 0x842   : > { %v8685_v4 = vpop.permute.xlu0 %2046  ;;  %7161 = vset.pattern.permute.xlu1 %v12142_v59  ;;  %v1692_v0 = vadd.f32 %v1688_v33, %v1653_v54  ;;  %v2052_v24 = vadd.f32 %v2048_v42, %v2013_v47  ;;  %v1810_v33 = vsel %vm522_vm8, %v8454_v46, %v8452_v57  ;;  %v1888_v57 = vsel %vm616_vm10, %v8587_v6, %v8645_v27  ;;  %v12163_v27 = vld [vmem:[#allocation11_spill] sm:$0xff] }
 0x843   : > { %3504 = vperm.xlu1 %7161, %v8557_v63   ;;  %v1949_v42 = vsel %vm685_vm12, %v8597_v15, %v8653_v38 }
 0x844   : > { %v1714_v12 = vadd.f32 %v1710_v18, %v1692_v0  ;;  %v2074_v43 = vadd.f32 %v2072_v22, %v2052_v24  ;;  %v12162_v18 = vld [vmem:[#allocation10_spill] sm:$0xff]  ;;  %v12165_v22 = vmov 13  }
 0x845   : > { %v8705_v45 = vpop.permute.xlu1 %2539  ;;  %v1910_v6 = vsel %vm639_vm11, %v8464_v28, %v12162_v18  ;;  %v1988_v28 = vsel %vm731_vm13, %v8610_v60, %v8667_v44  ;;  %v12168_v44 = vld [vmem:[#allocation19_spill] sm:$0xff] }
 0x846   : > { %v2143_v41 = vpop.permute.xlu0 %2142  ;;  %v1753_v7 = vadd.f32 %v1749_v21, %v1714_v12  ;;  %v2113_v36 = vadd.f32 %v2109_v9, %v2074_v43  ;;  %v2209_v21 = vsel %vm639_vm11, %v12164_v32, %v12163_v27 }
 0x847   : > { %7162 = vset.pattern.permute.xlu1 %v12143_v25  ;;  %v2148_v2 = vsel %vm569_vm9, %v2143_v41, %v8631_v58 }
 0x848   : > { %3542 = vperm.xlu1 %7162, %v8557_v63   ;;  %v1775_v53 = vadd.f32 %v1773_v48, %v1753_v7  ;;  %v2152_v62 = vadd.f32 %v2148_v2, %v2113_v36  ;;  %v2049_v2 = vsel %vm800_vm15, %v8622_v61, %v8685_v4  ;;  %v2069_v36 = vrot.slane %v8711_v10, %v7498_v30  ;;  %v12171_v4 = vld [vmem:[#allocation12_spill] sm:$0xff] }
 0x84a   : > { %v8714_v34 = vpop.permute.xlu0 %2146  ;;  %v8716_v40 = vpop.permute.xlu1 %2578  ;;  %v1814_v54 = vadd.f32 %v1810_v33, %v1775_v53  ;;  %v12166_v33 = vld [vmem:[#allocation14_spill] sm:$0xff]  ;;  %v2073_v18 = vmul.f32 %v2069_v36, %v8166_v11  ;;  %v12174_v11 = vmov 16   ;;  %v12181_v36 = vmov 21  }
 0x84b   : > { %v2010_v9 = vsel %vm754_vm14, %v8474_v13, %v12166_v33 }
 0x84c   : > { %7163 = vset.pattern.permute.xlu1 %v12144_v37  ;;  %v1853_v3 = vadd.f32 %v1849_v17, %v1814_v54  ;;  %v12167_v17 = vld [vmem:[#allocation17_spill] sm:$0xff]  ;;  %v12169_v54 = vmov 14  }
 0x84d   : > { %3565 = vperm.xlu1 %7163, %v8557_v63   ;;  %v2309_v60 = vsel %vm754_vm14, %v12168_v44, %v12167_v17 }
 0x84e   : > { %v2182_v35 = vpop.permute.xlu0 %2181  ;;  %v1892_v52 = vadd.f32 %v1888_v57, %v1853_v3  ;;  %v12170_v3 = vld [vmem:[#allocation22_spill] sm:$0xff] }
 0x84f   : > { %v8735_v16 = vpop.permute.xlu1 %2616  ;;  %v2187_v46 = vsel %vm616_vm10, %v2182_v35, %v8638_v49 }
 0x850   : > { %v2191_v41 = vadd.f32 %v2187_v46, %v2152_v62  ;;  %v1914_v12 = vadd.f32 %v1910_v6, %v1892_v52  ;;  %v12172_v6 = vmov 15  }
 0x851   : > { %7164 = vset.pattern.permute.xlu1 %v12145_v23 }
 0x852   : > { %v8740_v50 = vpop.permute.xlu0 %2185  ;;  %3606 = vperm.xlu1 %7164, %v8557_v63   ;;  %v2213_v55 = vadd.f32 %v2209_v21, %v2191_v41  ;;  %v1953_v35 = vadd.f32 %v1949_v42, %v1914_v12  ;;  %v12173_v21 = vld [vmem:[#allocation15_spill] sm:$0xff] }
 0x853   : > { %v2110_v42 = vsel %vm522_vm8, %v8492_v5, %v12173_v21  ;;  %v12176_v5 = vld [vmem:[#allocation18_spill] sm:$0xff] }
 0x854   : > { %v8743_v56 = vpop.permute.xlu1 %2639  ;;  %v1992_v15 = vadd.f32 %v1988_v28, %v1953_v35  ;;  %v12175_v35 = vmov 17  }
 0x856   : > { %v2243_v0 = vpop.permute.xlu0 %2242  ;;  %7166 = vset.pattern.permute.xlu1 %v12147_v14  ;;  %v12210_v14 = vld [vmem:[#allocation4_spill] sm:$0xff] }
 0x857   : > { %3665 = vperm.xlu1 %7166, %v8557_v63   ;;  %v2248_v39 = vsel %vm685_vm12, %v2243_v0, %v8647_v31  ;;  %v2014_v0 = vadd.f32 %v2010_v9, %v1992_v15 }
 0x858   : > { %v2252_v48 = vadd.f32 %v2248_v39, %v2213_v55  ;;  %v2149_v39 = vsel %vm569_vm9, %v8631_v58, %v8714_v34  ;;  %v2188_v55 = vsel %vm616_vm10, %v8638_v49, %v8740_v50  ;;  %v2210_v58 = vsel %vm639_vm11, %v12163_v27, %v12176_v5  ;;  %v12179_v27 = vld [vmem:[#allocation20_spill] sm:$0xff] }
 0x859   : > { %v8763_v8 = vpop.permute.xlu1 %2679  ;;  %v2053_v62 = vadd.f32 %v2049_v2, %v2014_v0  ;;  %v12177_v50 = vmov 18  }
 0x85a   : > { %v2247_v20 = vpop.permute.xlu0 %2246 }
 0x85b   : > { %7167 = vset.pattern.permute.xlu1 %v12149_v51  ;;  %v2075_v10 = vadd.f32 %v2073_v18, %v2053_v62  ;;  %v2249_v34 = vsel %vm685_vm12, %v8647_v31, %v2247_v20  ;;  %v2310_v31 = vsel %vm754_vm14, %v12167_v17, %v12179_v27  ;;  %v12182_v17 = vmov 22  }
 0x85c   : > { %3704 = vperm.xlu1 %7167, %v8557_v63  }
 0x85d   : > { %v2114_v12 = vadd.f32 %v2110_v42, %v2075_v10  ;;  %v12186_v10 = vmov 26  }
 0x85e   : > { %v2282_v47 = vpop.permute.xlu0 %2281  ;;  %v8778_v7 = vpop.permute.xlu1 %2738 }
 0x85f   : > { %v2287_v24 = vsel %vm731_vm13, %v2282_v47, %v8651_v26  ;;  %v2153_v47 = vadd.f32 %v2149_v39, %v2114_v12 }
 0x860   : > { %7168 = vset.pattern.permute.xlu1 %v12165_v22  ;;  %v2291_v38 = vadd.f32 %v2287_v24, %v2252_v48 }
 0x861   : > { %3742 = vperm.xlu1 %7168, %v8557_v63   ;;  %v2192_v24 = vadd.f32 %v2188_v55, %v2153_v47 }
 0x862   : > { %v2286_v53 = vpop.permute.xlu0 %2285  ;;  %v2313_v46 = vadd.f32 %v2309_v60, %v2291_v38  ;;  %v12178_v60 = vmov 20  }
 0x863   : > { %v8787_v43 = vpop.permute.xlu1 %2777  ;;  %v2214_v15 = vadd.f32 %v2210_v58, %v2192_v24  ;;  %v2288_v49 = vsel %vm731_vm13, %v8651_v26, %v2286_v53 }
 0x865   : > { %7169 = vset.pattern.permute.xlu1 %v12169_v54  ;;  %v2253_v38 = vadd.f32 %v2249_v34, %v2214_v15  ;;  %v12209_v54 = vld [vmem:[#allocation13_spill] sm:$0xff] }
 0x866   : > { %v2343_v57 = vpop.permute.xlu0 %2342  ;;  %3765 = vperm.xlu1 %7169, %v8557_v63  }
 0x867   : > { %v2348_v13 = vsel %vm800_vm15, %v2343_v57, %v12170_v3  ;;  %v2292_v33 = vadd.f32 %v2288_v49, %v2253_v38 }
 0x868   : > { %v2352_v52 = vadd.f32 %v2348_v13, %v2313_v46  ;;  %v8804_v41 = vpop.permute.xlu1 %2815  ;;  %v12183_v13 = vmov 23  }
 0x869   : > { %v2314_v26 = vadd.f32 %v2310_v31, %v2292_v33 }
 0x86a   : > { %v2360_v61 = vadd.f32 %v12171_v4, %v2352_v52  ;;  %7170 = vset.pattern.permute.xlu1 %v12172_v6  ;;  %v2347_v9 = vpop.permute.xlu0 %2346  ;;  %v12184_v52 = vmov 24  }
 0x86b   : > { %3804 = vperm.xlu1 %7170, %v8557_v63   ;;  %v2349_v20 = vsel %vm800_vm15, %v12170_v3, %v2347_v9 }
 0x86c   : > { %2364 = vrot.lane.b32.xlu0 %v2360_v61, %s7289_s16  ;;  %v2353_v2 = vadd.f32 %v2349_v20, %v2314_v26 }
 0x86d   : > { %v8811_v32 = vpop.permute.xlu1 %2838 }
 0x86e   : > { %v2361_v0 = vadd.f32 %v12171_v4, %v2353_v2  ;;  %v12185_v4 = vmov 25  }
 0x86f   : > { %7171 = vset.pattern.permute.xlu1 %v12174_v11 }
 0x870   : > { %3842 = vperm.xlu1 %7171, %v8557_v63  }
 0x872   : > { %v8824_v28 = vpop.permute.xlu1 %2877 }
 0x874   : > { %7172 = vset.pattern.permute.xlu1 %v12175_v35 }
 0x875   : > { %3865 = vperm.xlu1 %7172, %v8557_v63  }
 0x877   : > { %v8833_v48 = vpop.permute.xlu1 %2915 }
 0x879   : > { %7173 = vset.pattern.permute.xlu1 %v12177_v50 }
 0x87a   : > { %3906 = vperm.xlu1 %7173, %v8557_v63  }
 0x87b   : > { %v8885_v47 = vpop.permute.xlu0 %2439 }
 0x87c   : > { %v8839_v44 = vpop.permute.xlu1 %2938 }
 0x87e   : > { %7174 = vset.pattern.permute.xlu1 %v12178_v60 }
 0x87f   : > { %3965 = vperm.xlu1 %7174, %v8557_v63   ;;  %v8889_v5 = vpop.permute.xlu0 %3365 }
 0x880   : > { %12192 = vst [vmem:[#allocation19_spill] sm:$0xff] %v8889_v5 }
 0x881   : > { %v8848_v53 = vpop.permute.xlu1 %2978 }
 0x882   : > { %12180 = vst [vmem:[#allocation23_spill] sm:$0xff] %v8848_v53 }
 0x883   : > { %7175 = vset.pattern.permute.xlu1 %v12181_v36 }
 0x884   : > { %4004 = vperm.xlu1 %7175, %v8557_v63   ;;  %v2700_v34 = vpop.permute.xlu0 %2699 }
 0x886   : > { %v8853_v57 = vpop.permute.xlu1 %3037 }
 0x888   : > { %2366 = vrot.lane.b32.xlu1 %v2361_v0, %s7289_s16  ;;  %v8897_v38 = vpop.permute.xlu0 %3626 }
 0x889   : > { %7176 = vset.pattern.permute.xlu1 %v12182_v17  ;;  %12196 = vst [vmem:[#allocation18_spill] sm:$0xff] %v8897_v38 }
 0x88b   : > { %v8857_v46 = vpop.permute.xlu1 %3076 }
 0x88c   : > { %4042 = vperm.xlu1 %7176, %v8557_v63  }
 0x88d   : > { %v8901_v9 = vpop.permute.xlu0 %2998 }
 0x890   : > { %v8860_v3 = vpop.permute.xlu1 %3114  ;;  %7177 = vset.pattern.permute.xlu1 %v12183_v13 }
 0x891   : > { %4065 = vperm.xlu1 %7177, %v8557_v63   ;;  %v8905_v31 = vpop.permute.xlu0 %3926 }
 0x892   : > { %12199 = vst [vmem:[#allocation25_spill] sm:$0xff] %v8905_v31 }
 0x895   : > { %v8864_v62 = vpop.permute.xlu1 %3137  ;;  %7178 = vset.pattern.permute.xlu1 %v12184_v52 }
 0x896   : > { %4104 = vperm.xlu1 %7178, %v8557_v63  }
 0x89a   : > { %v8868_v18 = vpop.permute.xlu1 %3176  ;;  %7179 = vset.pattern.permute.xlu1 %v12185_v4 }
 0x89b   : > { %4142 = vperm.xlu1 %7179, %v8557_v63  }
 0x89f   : > { %v8872_v61 = vpop.permute.xlu1 %3214  ;;  %7180 = vset.pattern.permute.xlu1 %v12186_v10 }
 0x8a4   : > { %v8875_v21 = vpop.permute.xlu1 %3237 }
 0x8a9   : > { %v8877_v42 = vpop.permute.xlu1 %3277 }
 0x8aa   : > { %12187 = vst [vmem:[#allocation10_spill] sm:$0xff] %v8877_v42 }
 0x8ae   : > { %v8879_v39 = vpop.permute.xlu1 %3326 }
 0x8af   : > { %12188 = vst [vmem:[#allocation11_spill] sm:$0xff] %v8879_v39 }
 0x8b3   : > { %v8881_v12 = vpop.permute.xlu1 %3404 }
 0x8b4   : > { %12189 = vst [vmem:[#allocation16_spill] sm:$0xff] %v8881_v12 }
 0x8b8   : > { %v8883_v55 = vpop.permute.xlu1 %3442 }
 0x8b9   : > { %12190 = vst [vmem:[#allocation14_spill] sm:$0xff] %v8883_v55 }
 0x8bd   : > { %v8887_v24 = vpop.permute.xlu1 %3465 }
 0x8be   : > { %12191 = vst [vmem:[#allocation17_spill] sm:$0xff] %v8887_v24 }
 0x8c2   : > { %v8891_v58 = vpop.permute.xlu1 %3504 }
 0x8c3   : > { %12193 = vst [vmem:[#allocation22_spill] sm:$0xff] %v8891_v58 }
 0x8c7   : > { %v8893_v15 = vpop.permute.xlu1 %3542 }
 0x8c8   : > { %12194 = vst [vmem:[#allocation12_spill] sm:$0xff] %v8893_v15 }
 0x8cc   : > { %v8895_v49 = vpop.permute.xlu1 %3565 }
 0x8cd   : > { %12195 = vst [vmem:[#allocation15_spill] sm:$0xff] %v8895_v49 }
 0x8d1   : > { %v8899_v33 = vpop.permute.xlu1 %3606 }
 0x8d2   : > { %12197 = vst [vmem:[#allocation20_spill] sm:$0xff] %v8899_v33 }
 0x8d6   : > { %v8903_v27 = vpop.permute.xlu1 %3665 }
 0x8d7   : > { %12198 = vst [vmem:[#allocation24_spill] sm:$0xff] %v8903_v27 }
 0x8db   : > { %v8907_v20 = vpop.permute.xlu1 %3704 }
 0x8dc   : > { %12200 = vst [vmem:[#allocation26_spill] sm:$0xff] %v8907_v20 }
 0x8de   : > { %v2365_v26 = vpop.permute.xlu0 %2364 }
 0x8df   : > { %2372 = vst.msk [vmem:[#allocation2] sm:$0x7] %vm461_vm0, %v2365_v26 }
 0x8e0   : > { %v8910_v2 = vpop.permute.xlu1 %3742 }
 0x8e1   : > { %12201 = vst [vmem:[#allocation27_spill] sm:$0xff] %v8910_v2 }
 0x8e5   : > { %v8912_v0 = vpop.permute.xlu1 %3765 }
 0x8e6   : > { %12202 = vst [vmem:[#allocation28_spill] sm:$0xff] %v8912_v0 }
 0x8ea   : > { %v8914_v10 = vpop.permute.xlu1 %3804 }
 0x8eb   : > { %12203 = vst [vmem:[#allocation29_spill] sm:$0xff] %v8914_v10 }
 0x8ef   : > { %v8916_v4 = vpop.permute.xlu1 %3842 }
 0x8f0   : > { %12204 = vst [vmem:[#allocation30_spill] sm:$0xff] %v8916_v4 }
 0x8f4   : > { %v8918_v52 = vpop.permute.xlu1 %3865 }
 0x8f5   : > { %12205 = vst [vmem:[#allocation31_spill] sm:$0xff] %v8918_v52 }
 0x8f9   : > { %v8920_v13 = vpop.permute.xlu1 %3906 }
 0x8fa   : > { %12206 = vst [vmem:[#allocation32_spill] sm:$0xff] %v8920_v13 }
 0x8fe   : > { %v8922_v17 = vpop.permute.xlu1 %3965 }
 0x8ff   : > { %12207 = vst [vmem:[#allocation33_spill] sm:$0xff] %v8922_v17 }
 0x903   : > { %v8924_v36 = vpop.permute.xlu1 %4004 }
 0x904   : > { %12208 = vst [vmem:[#allocation34_spill] sm:$0xff] %v8924_v36 }
 0x907   : > { %v2367_v60 = vpop.permute.xlu1 %2366 }
 0x908   : > { %v2368_v50 = vsel %vm456_vm1, %v2365_v26, %v2367_v60  ;;  %2374 = vst.msk [vmem:[#allocation2 + $0x10] sm:$0x7] %vm464_vm2, %v2367_v60 }
 0x909   : > { %2373 = vst [vmem:[#allocation2 + $0x8] sm:$0x7] %v2368_v50 }
 0x910   : > { %v8928_v35 = vld [vmem:[#allocation2] ss:$8 sm:$0x7]  ;;  %v8946_v25 = vld [vmem:[#allocation2 + $0x1] ss:$8 sm:$0x7] }
 0x911   : > { %v2411_v11 = vrot.slane %v8928_v35, %v7498_v30  ;;  %v2407_v6 = vrot.slane %v8928_v35, %v7496_v29  ;;  %v2415_v23 = vrot.slane %v8928_v35, %v12210_v14 }
 0x913   : > { %v2420_v22 = vmul.f32 %v2411_v11, %v12209_v54  ;;  %v2419_v51 = vmul.f32 %v2407_v6, %v12209_v54  ;;  %v2519_v50 = vmul.f32 %v8683_v19, %v2407_v6  ;;  %v2421_v60 = vmul.f32 %v2415_v23, %v12209_v54 }
 0x914   : > { %v2521_v26 = vmul.f32 %v8683_v19, %v2415_v23  ;;  %v2520_v37 = vmul.f32 %v8683_v19, %v2411_v11  ;;  %v2706_v54 = vrot.slane %v8946_v25, %v7496_v29 }
 0x915   : > { %2427 = vrot.lane.b32.xlu0 %v2420_v22, %s7309_s28  ;;  %2425 = vrot.lane.b32.xlu1 %v2419_v51, %s7309_s28  ;;  %v2619_v51 = vmul.f32 %v8735_v16, %v2407_v6  ;;  %v2620_v22 = vmul.f32 %v8735_v16, %v2411_v11 }
 0x916   : > { %v2718_v19 = vmul.f32 %v2706_v54, %v2700_v34 }
 0x919   : > { %2525 = vrot.lane.b32.xlu0 %v2519_v50, %s7310_s29  ;;  %2429 = vrot.lane.b32.xlu1 %v2421_v60, %s7309_s28  ;;  %v2621_v50 = vmul.f32 %v8735_v16, %v2415_v23  ;;  %v2714_v60 = vrot.slane %v8946_v25, %v12210_v14  ;;  %v8967_v16 = vld [vmem:[#allocation2 + $0x2] ss:$8 sm:$0x7] }
 0x91b   : > { %v2720_v6 = vmul.f32 %v2714_v60, %v2700_v34 }
 0x91d   : > { %2529 = vrot.lane.b32.xlu0 %v2521_v26, %s7310_s29  ;;  %2527 = vrot.lane.b32.xlu1 %v2520_v37, %s7310_s29  ;;  %v2710_v37 = vrot.slane %v8946_v25, %v7498_v30  ;;  %v2818_v26 = vmul.f32 %v8804_v41, %v2706_v54 }
 0x91f   : > { %v2719_v11 = vmul.f32 %v2710_v37, %v2700_v34  ;;  %v2819_v23 = vmul.f32 %v8804_v41, %v2710_v37  ;;  %v3005_v34 = vrot.slane %v8967_v16, %v7496_v29 }
 0x921   : > { %2625 = vrot.lane.b32.xlu0 %v2619_v51, %s7311_s30  ;;  %2627 = vrot.lane.b32.xlu1 %v2620_v22, %s7311_s30  ;;  %v2820_v51 = vmul.f32 %v8804_v41, %v2714_v60  ;;  %v2919_v22 = vmul.f32 %v8833_v48, %v2710_v37  ;;  %v2920_v41 = vmul.f32 %v8833_v48, %v2714_v60 }
 0x925   : > { %2629 = vrot.lane.b32.xlu0 %v2621_v50, %s7311_s30  ;;  %2724 = vrot.lane.b32.xlu1 %v2718_v19, %s7309_s28  ;;  %v2918_v50 = vmul.f32 %v8833_v48, %v2706_v54  ;;  %v3017_v19 = vmul.f32 %v3005_v34, %v8901_v9  ;;  %v3117_v48 = vmul.f32 %v8860_v3, %v3005_v34 }
 0x929   : > { %2728 = vrot.lane.b32.xlu0 %v2720_v6, %s7309_s28  ;;  %2726 = vrot.lane.b32.xlu1 %v2719_v11, %s7309_s28  ;;  %v3009_v6 = vrot.slane %v8967_v16, %v7498_v30  ;;  %v3013_v11 = vrot.slane %v8967_v16, %v12210_v14 }
 0x92b   : > { %v3018_v37 = vmul.f32 %v3009_v6, %v8901_v9  ;;  %v3019_v54 = vmul.f32 %v3013_v11, %v8901_v9  ;;  %v3218_v60 = vmul.f32 %v8872_v61, %v3009_v6  ;;  %v11945_v9 = vmov 28  }
 0x92c   : > { %7182 = vset.pattern.permute.xlu0 %v11945_v9  ;;  %v12214_v9 = vld [vmem:[#allocation21_spill] sm:$0xff] }
 0x92d   : > { %2824 = vrot.lane.b32.xlu0 %v2818_v26, %s7310_s29  ;;  %2826 = vrot.lane.b32.xlu1 %v2819_v23, %s7310_s29  ;;  %v3118_v26 = vmul.f32 %v8860_v3, %v3009_v6  ;;  %v12211_v23 = vld [vmem:[#allocation5_spill] sm:$0xff]  ;;  %v3217_v6 = vmul.f32 %v8872_v61, %v3005_v34  ;;  %v12215_v34 = vld [vmem:[#allocation8_spill] sm:$0xff] }
 0x931   : > { %2828 = vrot.lane.b32.xlu0 %v2820_v51, %s7310_s29  ;;  %2926 = vrot.lane.b32.xlu1 %v2919_v22, %s7311_s30  ;;  %v2437_v51 = vmul.f32 %v8928_v35, %v12211_v23 }
 0x933   : > { %v2446_v22 = vrot.slane %v2437_v51, %v7496_v29 }
 0x935   : > { %2924 = vrot.lane.b32.xlu0 %v2918_v50, %s7311_s30  ;;  %3023 = vrot.lane.b32.xlu1 %v3017_v19, %s7309_s28  ;;  %v3119_v50 = vmul.f32 %v8860_v3, %v3013_v11  ;;  %v2458_v19 = vmul.f32 %v2446_v22, %v8885_v47  ;;  %v3219_v22 = vmul.f32 %v8872_v61, %v3013_v11  ;;  %v12216_v11 = vld [vmem:[#allocation9_spill] sm:$0xff] }
 0x939   : > { %2928 = vrot.lane.b32.xlu0 %v2920_v41, %s7311_s30  ;;  %3025 = vrot.lane.b32.xlu1 %v3018_v37, %s7309_s28  ;;  %v2450_v41 = vrot.slane %v2437_v51, %v7498_v30  ;;  %v12212_v37 = vld [vmem:[#allocation6_spill] sm:$0xff] }
 0x93d   : > { %3027 = vrot.lane.b32.xlu0 %v3019_v54, %s7309_s28  ;;  %3125 = vrot.lane.b32.xlu1 %v3118_v26, %s7310_s29  ;;  %v2476_v54 = vmul.f32 %v8928_v35, %v12212_v37  ;;  %v2459_v26 = vmul.f32 %v2450_v41, %v8885_v47  ;;  %v2576_v41 = vmul.f32 %v8928_v35, %v12215_v34 }
 0x93f   : > { %v2485_v1 = vrot.slane %v2476_v54, %v7496_v29  ;;  %v2589_v61 = vrot.slane %v2576_v41, %v7498_v30 }
 0x941   : > { %3123 = vrot.lane.b32.xlu0 %v3117_v48, %s7310_s29  ;;  %3225 = vrot.lane.b32.xlu1 %v3218_v60, %s7311_s30  ;;  %v2489_v48 = vrot.slane %v2476_v54, %v7498_v30  ;;  %v12213_v60 = vld [vmem:[#allocation7_spill] sm:$0xff] }
 0x942   : > { %v2537_v3 = vmul.f32 %v8928_v35, %v12213_v60 }
 0x943   : > { %v2498_v59 = vmul.f32 %v2489_v48, %v12214_v9  ;;  %v2493_v48 = vrot.slane %v2476_v54, %v12210_v14 }
 0x945   : > { %3127 = vrot.lane.b32.xlu0 %v3119_v50, %s7310_s29  ;;  %2464 = vrot.lane.b32.xlu1 %v2458_v19, %s7312_s14  ;;  %v2454_v50 = vrot.slane %v2437_v51, %v12210_v14  ;;  %v2550_v19 = vrot.slane %v2537_v3, %v7498_v30  ;;  %v2637_v51 = vmul.f32 %v8928_v35, %v12216_v11 }
 0x946   : > { %v2499_v35 = vmul.f32 %v2493_v48, %v12214_v9 }
 0x947   : > { %v2650_v13 = vrot.slane %v2637_v51, %v7498_v30 }
 0x949   : > { %3223 = vrot.lane.b32.xlu0 %v3217_v6, %s7311_s30  ;;  %2466 = vrot.lane.b32.xlu1 %v2459_v26, %s7312_s14  ;;  %v2460_v6 = vmul.f32 %v2454_v50, %v8885_v47  ;;  %v2559_v26 = vmul.f32 %v2550_v19, %v8705_v45  ;;  %v2736_v47 = vmul.f32 %v8946_v25, %v12211_v23 }
 0x94a   : > { %v2659_v50 = vmul.f32 %v2650_v13, %v8743_v56  ;;  %v2546_v19 = vrot.slane %v2537_v3, %v7496_v29 }
 0x94b   : > { %v2749_v54 = vrot.slane %v2736_v47, %v7498_v30 }
 0x94d   : > { %3227 = vrot.lane.b32.xlu0 %v3219_v22, %s7311_s30  ;;  %2505 = vrot.lane.b32.xlu1 %v2498_v59, %s7313_s17  ;;  %v2497_v22 = vmul.f32 %v2485_v1, %v12214_v9  ;;  %v2598_v59 = vmul.f32 %v2589_v61, %v8716_v40  ;;  %v9045_v1 = vmul.f32 %v8946_v25, %v12212_v37 }
 0x94e   : > { %v2758_v9 = vmul.f32 %v2749_v54, %v8778_v7  ;;  %v9056_v61 = vmul.f32 %v8946_v25, %v12213_v60 }
 0x94f   : > { %v2788_v13 = vrot.slane %v9045_v1, %v7498_v30 }
 0x951   : > { %2468 = vrot.lane.b32.xlu0 %v2460_v6, %s7312_s14  ;;  %2566 = vrot.lane.b32.xlu1 %v2559_v26, %s7314_s18  ;;  %v2554_v6 = vrot.slane %v2537_v3, %v12210_v14  ;;  %v2558_v26 = vmul.f32 %v2546_v19, %v8705_v45  ;;  %v2585_v3 = vrot.slane %v2576_v41, %v7496_v29 }
 0x953   : > { %v2560_v48 = vmul.f32 %v2554_v6, %v8705_v45  ;;  %v2597_v19 = vmul.f32 %v2585_v3, %v8716_v40  ;;  %v9078_v6 = vmul.f32 %v8946_v25, %v12216_v11  ;;  %v2654_v3 = vrot.slane %v2637_v51, %v12210_v14 }
 0x955   : > { %2503 = vrot.lane.b32.xlu0 %v2497_v22, %s7313_s17  ;;  %2605 = vrot.lane.b32.xlu1 %v2598_v59, %s7315_s19  ;;  %v2797_v22 = vmul.f32 %v2788_v13, %v8787_v43  ;;  %v2849_v59 = vrot.slane %v9056_v61, %v7498_v30  ;;  %v2949_v13 = vrot.slane %v9078_v6, %v7498_v30 }
 0x957   : > { %v2858_v45 = vmul.f32 %v2849_v59, %v8811_v32  ;;  %v9100_v59 = vmul.f32 %v8967_v16, %v12212_v37 }
 0x959   : > { %2507 = vrot.lane.b32.xlu0 %v2499_v35, %s7313_s17  ;;  %2666 = vrot.lane.b32.xlu1 %v2659_v50, %s7316_s20  ;;  %v9067_v35 = vmul.f32 %v8946_v25, %v12215_v34  ;;  %v2593_v50 = vrot.slane %v2576_v41, %v12210_v14 }
 0x95b   : > { %v2888_v54 = vrot.slane %v9067_v35, %v7498_v30 }
 0x95d   : > { %2564 = vrot.lane.b32.xlu0 %v2558_v26, %s7314_s18  ;;  %2765 = vrot.lane.b32.xlu1 %v2758_v9, %s7312_s14  ;;  %v2646_v26 = vrot.slane %v2637_v51, %v7496_v29  ;;  %v2599_v9 = vmul.f32 %v2593_v50, %v8716_v40  ;;  %v2897_v41 = vmul.f32 %v2888_v54, %v8824_v28 }
 0x95e   : > { %v2745_v50 = vrot.slane %v2736_v47, %v7496_v29  ;;  %v3087_v51 = vrot.slane %v9100_v59, %v7498_v30  ;;  %v9111_v54 = vmul.f32 %v8967_v16, %v12213_v60 }
 0x95f   : > { %v2658_v25 = vmul.f32 %v2646_v26, %v8743_v56  ;;  %v2753_v26 = vrot.slane %v2736_v47, %v12210_v14  ;;  %v2784_v47 = vrot.slane %v9045_v1, %v7496_v29 }
 0x961   : > { %2568 = vrot.lane.b32.xlu0 %v2560_v48, %s7314_s18  ;;  %2804 = vrot.lane.b32.xlu1 %v2797_v22, %s7313_s17  ;;  %v9089_v48 = vmul.f32 %v8967_v16, %v12211_v23  ;;  %v2958_v22 = vmul.f32 %v2949_v13, %v8839_v44  ;;  %v9122_v13 = vmul.f32 %v8967_v16, %v12215_v34 }
 0x963   : > { %v3048_v40 = vrot.slane %v9089_v48, %v7498_v30 }
 0x965   : > { %2603 = vrot.lane.b32.xlu0 %v2597_v19, %s7315_s19  ;;  %2865 = vrot.lane.b32.xlu1 %v2858_v45, %s7314_s18  ;;  %v2660_v19 = vmul.f32 %v2654_v3, %v8743_v56  ;;  %v3057_v45 = vmul.f32 %v3048_v40, %v8853_v57  ;;  %v3148_v56 = vrot.slane %v9111_v54, %v7498_v30 }
 0x966   : > { %v3187_v3 = vrot.slane %v9122_v13, %v7498_v30  ;;  %v9134_v40 = vmul.f32 %v8967_v16, %v12216_v11 }
 0x969   : > { %2607 = vrot.lane.b32.xlu0 %v2599_v9, %s7315_s19  ;;  %2904 = vrot.lane.b32.xlu1 %v2897_v41, %s7315_s19  ;;  %v2757_v9 = vmul.f32 %v2745_v50, %v8778_v7  ;;  %v3096_v41 = vmul.f32 %v3087_v51, %v8857_v46  ;;  %v2796_v50 = vmul.f32 %v2784_v47, %v8787_v43 }
 0x96a   : > { %v2892_v47 = vrot.slane %v9067_v35, %v12210_v14 }
 0x96d   : > { %2664 = vrot.lane.b32.xlu0 %v2658_v25, %s7316_s20  ;;  %2965 = vrot.lane.b32.xlu1 %v2958_v22, %s7316_s20  ;;  %v2759_v25 = vmul.f32 %v2753_v26, %v8778_v7  ;;  %v3157_v22 = vmul.f32 %v3148_v56, %v8864_v62  ;;  %v3196_v7 = vmul.f32 %v3187_v3, %v8868_v18 }
 0x96e   : > { %v2845_v26 = vrot.slane %v9056_v61, %v7496_v29  ;;  %v2884_v56 = vrot.slane %v9067_v35, %v7496_v29  ;;  %v2898_v3 = vmul.f32 %v2892_v47, %v8824_v28 }
 0x971   : > { %2668 = vrot.lane.b32.xlu0 %v2660_v19, %s7316_s20  ;;  %3064 = vrot.lane.b32.xlu1 %v3057_v45, %s7312_s14  ;;  %v2792_v19 = vrot.slane %v9045_v1, %v12210_v14  ;;  %v3248_v45 = vrot.slane %v9134_v40, %v7498_v30  ;;  %v2857_v1 = vmul.f32 %v2845_v26, %v8811_v32 }
 0x972   : > { %v3052_v26 = vrot.slane %v9089_v48, %v12210_v14 }
 0x973   : > { %v2798_v16 = vmul.f32 %v2792_v19, %v8787_v43  ;;  %v3257_v51 = vmul.f32 %v3248_v45, %v8875_v21  ;;  %v2953_v19 = vrot.slane %v9078_v6, %v12210_v14 }
 0x975   : > { %2763 = vrot.lane.b32.xlu0 %v2757_v9, %s7312_s14  ;;  %3103 = vrot.lane.b32.xlu1 %v3096_v41, %s7313_s17  ;;  %v2853_v9 = vrot.slane %v9056_v61, %v12210_v14  ;;  %v2896_v61 = vmul.f32 %v2884_v56, %v8824_v28  ;;  %v2959_v45 = vmul.f32 %v2953_v19, %v8839_v44 }
 0x976   : > { %v3044_v28 = vrot.slane %v9089_v48, %v7496_v29  ;;  %v3091_v56 = vrot.slane %v9100_v59, %v12210_v14 }
 0x977   : > { %v2859_v43 = vmul.f32 %v2853_v9, %v8811_v32 }
 0x979   : > { %2767 = vrot.lane.b32.xlu0 %v2759_v25, %s7312_s14  ;;  %3164 = vrot.lane.b32.xlu1 %v3157_v22, %s7314_s18  ;;  %v11950_v25 = vmov 27  }
 0x97d   : > { %2802 = vrot.lane.b32.xlu0 %v2796_v50, %s7313_s17  ;;  %3203 = vrot.lane.b32.xlu1 %v3196_v7, %s7315_s19  ;;  %v2945_v50 = vrot.slane %v9078_v6, %v7496_v29 }
 0x981   : > { %2806 = vrot.lane.b32.xlu0 %v2798_v16, %s7313_s17  ;;  %3264 = vrot.lane.b32.xlu1 %v3257_v51, %s7316_s20  ;;  %v3056_v51 = vmul.f32 %v3044_v28, %v8853_v57  ;;  %v3191_v28 = vrot.slane %v9122_v13, %v12210_v14 }
 0x985   : > { %2863 = vrot.lane.b32.xlu0 %v2857_v1, %s7314_s18  ;;  %4165 = vperm.xlu1 %7180, %v8557_v63   ;;  %v3058_v1 = vmul.f32 %v3052_v26, %v8853_v57  ;;  %v3144_v57 = vrot.slane %v9111_v54, %v7496_v29 }
 0x987   : > { %v9157_v41 = vpop.permute.xlu0 %2427 }
 0x989   : > { %2867 = vrot.lane.b32.xlu0 %v2859_v43, %s7314_s18  ;;  %7181 = vset.pattern.permute.xlu1 %v11950_v25  ;;  %v9278_v25 = vpop.permute.xlu1 %4042 }
 0x98a   : > { %4205 = vperm.xlu1 %7181, %v8557_v63   ;;  %v2957_v63 = vmul.f32 %v2945_v50, %v8839_v44  ;;  %v3083_v44 = vrot.slane %v9100_v59, %v7496_v29  ;;  %v3152_v50 = vrot.slane %v9111_v54, %v12210_v14  ;;  %12225 = vst [vmem:[#allocation41_spill] sm:$0xff] %v9278_v25 }
 0x98b   : > { %v9165_v22 = vpop.permute.xlu0 %2525 }
 0x98c   : > { %v3095_v43 = vmul.f32 %v3083_v44, %v8857_v46 }
 0x98d   : > { %2902 = vrot.lane.b32.xlu0 %v2896_v61, %s7315_s19  ;;  %v3097_v61 = vmul.f32 %v3091_v56, %v8857_v46  ;;  %v3183_v46 = vrot.slane %v9122_v13, %v7496_v29  ;;  %v9246_v13 = vld [vmem:[%s11836_s9] sm:$0x3f]  ;;  %v11949_v56 = vmov 29   ;;  %v9282_v36 = vpop.permute.xlu1 %4065 }
 0x98e   : > { %7183 = vset.pattern.permute.xlu1 %v11949_v56  ;;  %12227 = vst [vmem:[#allocation43_spill] sm:$0xff] %v9282_v36 }
 0x98f   : > { %v9171_v32 = vpop.permute.xlu0 %2529 }
 0x991   : > { %2906 = vrot.lane.b32.xlu0 %v2898_v3, %s7315_s19  ;;  %v3156_v3 = vmul.f32 %v3144_v57, %v8864_v62  ;;  %v9288_v10 = vpop.permute.xlu1 %4104 }
 0x992   : > { %12230 = vst [vmem:[#allocation46_spill] sm:$0xff] %v9288_v10 }
 0x993   : > { %v9177_v7 = vpop.permute.xlu0 %2625 }
 0x995   : > { %2963 = vrot.lane.b32.xlu0 %v2957_v63, %s7316_s20  ;;  %v3158_v63 = vmul.f32 %v3152_v50, %v8864_v62  ;;  %v3244_v62 = vrot.slane %v9134_v40, %v7496_v29  ;;  %v9292_v20 = vpop.permute.xlu1 %4142 }
 0x996   : > { %12232 = vst [vmem:[#allocation48_spill] sm:$0xff] %v9292_v20 }
 0x997   : > { %v9183_v35 = vpop.permute.xlu0 %2629 }
 0x999   : > { %2967 = vrot.lane.b32.xlu0 %v2959_v45, %s7316_s20  ;;  %v3195_v45 = vmul.f32 %v3183_v46, %v8868_v18  ;;  %v9298_v58 = vpop.permute.xlu1 %2425 }
 0x99b   : > { %v9189_v16 = vpop.permute.xlu0 %2728 }
 0x99d   : > { %3062 = vrot.lane.b32.xlu0 %v3056_v51, %s7312_s14  ;;  %v3197_v51 = vmul.f32 %v3191_v28, %v8868_v18  ;;  %v9302_v12 = vpop.permute.xlu1 %2429 }
 0x99f   : > { %v9195_v6 = vpop.permute.xlu0 %2824 }
 0x9a1   : > { %3066 = vrot.lane.b32.xlu0 %v3058_v1, %s7312_s14  ;;  %v3256_v1 = vmul.f32 %v3244_v62, %v8875_v21  ;;  %v9306_v5 = vpop.permute.xlu1 %2527 }
 0x9a3   : > { %v9201_v9 = vpop.permute.xlu0 %2828 }
 0x9a5   : > { %3101 = vrot.lane.b32.xlu0 %v3095_v43, %s7313_s17  ;;  %v9310_v10 = vpop.permute.xlu1 %2627 }
 0x9a7   : > { %v9207_v48 = vpop.permute.xlu0 %2924 }
 0x9a8   : > { %12217 = vst [vmem:[#allocation13_spill] sm:$0xff] %v9207_v48 }
 0x9a9   : > { %3105 = vrot.lane.b32.xlu0 %v3097_v61, %s7313_s17  ;;  %v9314_v20 = vpop.permute.xlu1 %2724 }
 0x9ab   : > { %v9213_v47 = vpop.permute.xlu0 %2928 }
 0x9ac   : > { %12218 = vst [vmem:[#allocation21_spill] sm:$0xff] %v9213_v47 }
 0x9ad   : > { %3162 = vrot.lane.b32.xlu0 %v3156_v3, %s7314_s18  ;;  %v9318_v2 = vpop.permute.xlu1 %2726 }
 0x9af   : > { %v9219_v59 = vpop.permute.xlu0 %3027 }
 0x9b0   : > { %12219 = vst [vmem:[#allocation35_spill] sm:$0xff] %v9219_v59 }
 0x9b1   : > { %3166 = vrot.lane.b32.xlu0 %v3158_v63, %s7314_s18  ;;  %v9322_v15 = vpop.permute.xlu1 %2826 }
 0x9b3   : > { %v9225_v19 = vpop.permute.xlu0 %3123 }
 0x9b4   : > { %12220 = vst [vmem:[#allocation36_spill] sm:$0xff] %v9225_v19 }
 0x9b5   : > { %3201 = vrot.lane.b32.xlu0 %v3195_v45, %s7315_s19  ;;  %v9326_v39 = vpop.permute.xlu1 %2926 }
 0x9b6   : > { %12242 = vst [vmem:[#allocation58_spill] sm:$0xff] %v9326_v39 }
 0x9b7   : > { %v9231_v54 = vpop.permute.xlu0 %3127 }
 0x9b8   : > { %12221 = vst [vmem:[#allocation37_spill] sm:$0xff] %v9231_v54 }
 0x9b9   : > { %3205 = vrot.lane.b32.xlu0 %v3197_v51, %s7315_s19 }
 0x9bb   : > { %v9237_v26 = vpop.permute.xlu0 %3223 }
 0x9bc   : > { %12222 = vst [vmem:[#allocation38_spill] sm:$0xff] %v9237_v26 }
 0x9bd   : > { %3262 = vrot.lane.b32.xlu0 %v3256_v1, %s7316_s20 }
 0x9bf   : > { %v9241_v44 = vpop.permute.xlu0 %3227 }
 0x9c0   : > { %12223 = vst [vmem:[#allocation39_spill] sm:$0xff] %v9241_v44  ;;  %v9330_v44 = vld [vmem:[#allocation3 + $0x3] ss:$8 sm:$0x7] }
 0x9c1   : > { %4225 = vperm.xlu0 %7182, %v9246_v13   ;;  %v9334_v26 = vrot.slane %v9330_v44, %v7496_v29 }
 0x9c3   : > { %v9249_v18 = vpop.permute.xlu0 %2468 }
 0x9c7   : > { %v9251_v43 = vpop.permute.xlu0 %2503 }
 0x9cb   : > { %v9254_v61 = vpop.permute.xlu0 %2507 }
 0x9cf   : > { %v9256_v57 = vpop.permute.xlu0 %2564 }
 0x9d3   : > { %v9258_v3 = vpop.permute.xlu0 %2568 }
 0x9d7   : > { %v9260_v50 = vpop.permute.xlu0 %2603 }
 0x9db   : > { %v9262_v63 = vpop.permute.xlu0 %2607 }
 0x9df   : > { %v9264_v46 = vpop.permute.xlu0 %2664 }
 0x9e3   : > { %v9266_v45 = vpop.permute.xlu0 %2668 }
 0x9e7   : > { %v9268_v28 = vpop.permute.xlu0 %2763 }
 0x9eb   : > { %v9270_v51 = vpop.permute.xlu0 %2767 }
 0x9ef   : > { %v9272_v62 = vpop.permute.xlu0 %2802 }
 0x9f3   : > { %v9274_v1 = vpop.permute.xlu0 %2806 }
 0x9f7   : > { %v9276_v56 = vpop.permute.xlu0 %2863 }
 0x9f8   : > { %12224 = vst [vmem:[#allocation40_spill] sm:$0xff] %v9276_v56 }
 0x9fb   : > { %v9280_v33 = vpop.permute.xlu0 %2867 }
 0x9fc   : > { %12226 = vst [vmem:[#allocation42_spill] sm:$0xff] %v9280_v33 }
 0x9ff   : > { %v9284_v17 = vpop.permute.xlu0 %2902 }
 0xa00   : > { %12228 = vst [vmem:[#allocation44_spill] sm:$0xff] %v9284_v17 }
 0xa03   : > { %v9286_v52 = vpop.permute.xlu0 %2906 }
 0xa04   : > { %12229 = vst [vmem:[#allocation45_spill] sm:$0xff] %v9286_v52 }
 0xa07   : > { %v9290_v0 = vpop.permute.xlu0 %2963 }
 0xa08   : > { %12231 = vst [vmem:[#allocation47_spill] sm:$0xff] %v9290_v0 }
 0xa0b   : > { %v9294_v27 = vpop.permute.xlu0 %2967 }
 0xa0c   : > { %12233 = vst [vmem:[#allocation49_spill] sm:$0xff] %v9294_v27 }
 0xa0f   : > { %v9296_v49 = vpop.permute.xlu0 %3062 }
 0xa10   : > { %12234 = vst [vmem:[#allocation50_spill] sm:$0xff] %v9296_v49 }
 0xa13   : > { %v9300_v24 = vpop.permute.xlu0 %3066 }
 0xa14   : > { %12235 = vst [vmem:[#allocation51_spill] sm:$0xff] %v9300_v24  ;;  %v11979_v24 = vmov 30  }
 0xa17   : > { %v9304_v36 = vpop.permute.xlu0 %3101 }
 0xa18   : > { %12236 = vst [vmem:[#allocation52_spill] sm:$0xff] %v9304_v36 }
 0xa1b   : > { %v9308_v25 = vpop.permute.xlu0 %3105 }
 0xa1c   : > { %12237 = vst [vmem:[#allocation53_spill] sm:$0xff] %v9308_v25 }
 0xa1f   : > { %v9312_v31 = vpop.permute.xlu0 %3162 }
 0xa20   : > { %12238 = vst [vmem:[#allocation54_spill] sm:$0xff] %v9312_v31  ;;  %v9340_v31 = vpop.permute.xlu1 %3023 }
 0xa21   : > { %12244 = vst [vmem:[#allocation60_spill] sm:$0xff] %v9340_v31 }
 0xa23   : > { %v9316_v4 = vpop.permute.xlu0 %3166 }
 0xa24   : > { %12239 = vst [vmem:[#allocation55_spill] sm:$0xff] %v9316_v4  ;;  %v9338_v4 = vrot.slane %v9330_v44, %v12210_v14  ;;  %v9351_v25 = vpop.permute.xlu1 %3025 }
 0xa25   : > { %12245 = vst [vmem:[#allocation61_spill] sm:$0xff] %v9351_v25 }
 0xa27   : > { %v9320_v38 = vpop.permute.xlu0 %3201 }
 0xa28   : > { %12240 = vst [vmem:[#allocation56_spill] sm:$0xff] %v9320_v38  ;;  %v9355_v36 = vpop.permute.xlu1 %3125 }
 0xa29   : > { %12246 = vst [vmem:[#allocation62_spill] sm:$0xff] %v9355_v36 }
 0xa2b   : > { %v9324_v55 = vpop.permute.xlu0 %3205 }
 0xa2c   : > { %12241 = vst [vmem:[#allocation57_spill] sm:$0xff] %v9324_v55  ;;  %v9358_v49 = vpop.permute.xlu1 %3225 }
 0xa2d   : > { %12247 = vst [vmem:[#allocation63_spill] sm:$0xff] %v9358_v49 }
 0xa2f   : > { %v9328_v42 = vpop.permute.xlu0 %3262 }
 0xa30   : > { %12243 = vst [vmem:[#allocation59_spill] sm:$0xff] %v9328_v42  ;;  %v9346_v42 = vrot.slane %v9330_v44, %v7498_v30  ;;  %v9360_v59 = vpop.permute.xlu1 %2464 }
 0xa40   : > { %v4226_v38 = vpop.permute.xlu0 %4225 }
 0xa41   : > { %v4244_v54 = vmul.f32 %v9334_v26, %v4226_v38  ;;  %v4246_v55 = vmul.f32 %v9338_v4, %v4226_v38  ;;  %v4245_v19 = vmul.f32 %v9346_v42, %v4226_v38 }
 0xa43   : > { %4254 = vrot.lane.b32.xlu0 %v4246_v55, %s7309_s28  ;;  %4250 = vrot.lane.b32.xlu1 %v4244_v54, %s7309_s28  ;;  %v9362_v55 = vpop.permute.xlu1 %2466 }
 0xa47   : > { %4252 = vrot.lane.b32.xlu1 %v4245_v19, %s7309_s28  ;;  %v9364_v54 = vpop.permute.xlu1 %2505 }
 0xa4b   : > { %4264 = vperm.xlu1 %7183, %v9246_v13   ;;  %v9366_v38 = vpop.permute.xlu1 %2566 }
 0xa4f   : > { %7184 = vset.pattern.permute.xlu1 %v11979_v24  ;;  %v9368_v31 = vpop.permute.xlu1 %2605 }
 0xa53   : > { %v9370_v19 = vpop.permute.xlu1 %2666 }
 0xa57   : > { %v9372_v25 = vpop.permute.xlu1 %2765 }
 0xa5b   : > { %v9374_v36 = vpop.permute.xlu1 %2804 }
 0xa5f   : > { %v9376_v53 = vpop.permute.xlu1 %2865 }
 0xa63   : > { %v9378_v24 = vpop.permute.xlu1 %2904 }
 0xa64   : > { %12248 = vst [vmem:[#allocation64_spill] sm:$0xff] %v9378_v24  ;;  %v4262_v24 = vmul.f32 %v9330_v44, %v12211_v23 }
 0xa67   : > { %v9380_v49 = vpop.permute.xlu1 %2965 }
 0xa68   : > { %12249 = vst [vmem:[#allocation65_spill] sm:$0xff] %v9380_v49 }
 0xa6b   : > { %v9382_v27 = vpop.permute.xlu1 %3064 }
 0xa6c   : > { %12250 = vst [vmem:[#allocation66_spill] sm:$0xff] %v9382_v27  ;;  %v4271_v27 = vrot.slane %v4262_v24, %v7496_v29 }
 0xa6f   : > { %v9384_v0 = vpop.permute.xlu1 %3103 }
 0xa70   : > { %12251 = vst [vmem:[#allocation67_spill] sm:$0xff] %v9384_v0  ;;  %v4275_v0 = vrot.slane %v4262_v24, %v7498_v30 }
 0xa73   : > { %v9386_v47 = vpop.permute.xlu1 %3164 }
 0xa74   : > { %12252 = vst [vmem:[#allocation68_spill] sm:$0xff] %v9386_v47 }
 0xa77   : > { %v9388_v48 = vpop.permute.xlu1 %3203 }
 0xa78   : > { %12253 = vst [vmem:[#allocation69_spill] sm:$0xff] %v9388_v48 }
 0xa7b   : > { %v9390_v39 = vpop.permute.xlu1 %3264 }
 0xa7c   : > { %12254 = vst [vmem:[#allocation70_spill] sm:$0xff] %v9390_v39  ;;  %v4279_v39 = vrot.slane %v4262_v24, %v12210_v14 }
 0xa7f   : > { %v9392_v52 = vpop.permute.xlu1 %4165 }
 0xa80   : > { %12255 = vst [vmem:[#allocation71_spill] sm:$0xff] %v9392_v52 }
 0xa83   : > { %v9394_v17 = vpop.permute.xlu1 %4205 }
 0xa84   : > { %12256 = vst [vmem:[#allocation72_spill] sm:$0xff] %v9394_v17 }
 0xab5   : > { %v9396_v33 = vpop.permute.xlu1 %4250 }
 0xab6   : > { %12257 = vst [vmem:[#allocation73_spill] sm:$0xff] %v9396_v33  ;;  %v11992_v33 = vmov 31  }
 0xab9   : > { %v9400_v49 = vpop.permute.xlu1 %4252 }
 0xaba   : > { %12258 = vst [vmem:[#allocation74_spill] sm:$0xff] %v9400_v49  ;;  %v4301_v49 = vmul.f32 %v9330_v44, %v12212_v37 }
 0xabc   : > { %v4314_v24 = vrot.slane %v4301_v49, %v7498_v30 }
 0xaca   : > { %v4265_v47 = vpop.permute.xlu1 %4264 }
 0xacb   : > { %v4283_v56 = vmul.f32 %v4271_v27, %v4265_v47  ;;  %v4284_v48 = vmul.f32 %v4275_v0, %v4265_v47  ;;  %v4285_v17 = vmul.f32 %v4279_v39, %v4265_v47  ;;  %v4310_v27 = vrot.slane %v4301_v49, %v7496_v29 }
 0xacc   : > { %v4318_v39 = vrot.slane %v4301_v49, %v12210_v14  ;;  %v11994_v47 = vmov 32  }
 0xacd   : > { %4291 = vrot.lane.b32.xlu1 %v4284_v48, %s7312_s14  ;;  %4289 = vrot.lane.b32.xlu0 %v4283_v56, %s7312_s14 }
 0xad1   : > { %4303 = vperm.xlu1 %7184, %v9246_v13   ;;  %4293 = vrot.lane.b32.xlu0 %v4285_v17, %s7312_s14 }
 0xad5   : > { %7185 = vset.pattern.permute.xlu1 %v11992_v33 }
 0xb3f   : > { %v9412_v52 = vpop.permute.xlu1 %4291 }
 0xb40   : > { %12259 = vst [vmem:[#allocation75_spill] sm:$0xff] %v9412_v52 }
 0xb50   : > { %v4304_v0 = vpop.permute.xlu1 %4303 }
 0xb51   : > { %v4322_v48 = vmul.f32 %v4310_v27, %v4304_v0  ;;  %v4323_v56 = vmul.f32 %v4314_v24, %v4304_v0  ;;  %v4324_v17 = vmul.f32 %v4318_v39, %v4304_v0  ;;  %v11995_v0 = vmov 33  }
 0xb53   : > { %4330 = vrot.lane.b32.xlu1 %v4323_v56, %s7313_s17  ;;  %4328 = vrot.lane.b32.xlu0 %v4322_v48, %s7313_s17  ;;  %v4362_v48 = vmul.f32 %v9330_v44, %v12213_v60 }
 0xb55   : > { %v4371_v39 = vrot.slane %v4362_v48, %v7496_v29 }
 0xb57   : > { %4341 = vperm.xlu1 %7185, %v9246_v13   ;;  %4332 = vrot.lane.b32.xlu0 %v4324_v17, %s7313_s17  ;;  %v4375_v17 = vrot.slane %v4362_v48, %v7498_v30 }
 0xb5b   : > { %7186 = vset.pattern.permute.xlu1 %v11994_v47 }
 0xbc5   : > { %v9422_v33 = vpop.permute.xlu1 %4330 }
 0xbc6   : > { %12260 = vst [vmem:[#allocation76_spill] sm:$0xff] %v9422_v33 }
 0xbd6   : > { %v4342_v52 = vpop.permute.xlu1 %4341 }
 0xbd7   : > { %v4344_v27 = vmul.f32 %v4342_v52, %v9334_v26  ;;  %v4345_v24 = vmul.f32 %v4342_v52, %v9346_v42  ;;  %v4346_v49 = vmul.f32 %v4342_v52, %v9338_v4  ;;  %v4379_v52 = vrot.slane %v4362_v48, %v12210_v14 }
 0xbd9   : > { %4352 = vrot.lane.b32.xlu1 %v4345_v24, %s7310_s29  ;;  %4350 = vrot.lane.b32.xlu0 %v4344_v27, %s7310_s29 }
 0xbdd   : > { %4364 = vperm.xlu1 %7186, %v9246_v13   ;;  %4354 = vrot.lane.b32.xlu0 %v4346_v49, %s7310_s29 }
 0xbe1   : > { %7187 = vset.pattern.permute.xlu1 %v11995_v0  ;;  %v11998_v0 = vmov 34  }
 0xc4b   : > { %v9434_v56 = vpop.permute.xlu1 %4352 }
 0xc4c   : > { %12261 = vst [vmem:[#allocation77_spill] sm:$0xff] %v9434_v56  ;;  %v4401_v56 = vmul.f32 %v9330_v44, %v12215_v34 }
 0xc4e   : > { %v4414_v48 = vrot.slane %v4401_v56, %v7498_v30 }
 0xc5c   : > { %v4365_v24 = vpop.permute.xlu1 %4364 }
 0xc5d   : > { %v4383_v27 = vmul.f32 %v4371_v39, %v4365_v24  ;;  %v4384_v47 = vmul.f32 %v4375_v17, %v4365_v24  ;;  %v4385_v49 = vmul.f32 %v4379_v52, %v4365_v24  ;;  %v4410_v39 = vrot.slane %v4401_v56, %v7496_v29 }
 0xc5e   : > { %v4418_v24 = vrot.slane %v4401_v56, %v12210_v14 }
 0xc5f   : > { %4391 = vrot.lane.b32.xlu1 %v4384_v47, %s7314_s18  ;;  %4389 = vrot.lane.b32.xlu0 %v4383_v27, %s7314_s18 }
 0xc63   : > { %4403 = vperm.xlu1 %7187, %v9246_v13   ;;  %4393 = vrot.lane.b32.xlu0 %v4385_v49, %s7314_s18  ;;  %v12001_v49 = vmov 35  }
 0xc67   : > { %7188 = vset.pattern.permute.xlu1 %v11998_v0 }
 0xcd1   : > { %v9446_v33 = vpop.permute.xlu1 %4391 }
 0xcd2   : > { %12262 = vst [vmem:[#allocation78_spill] sm:$0xff] %v9446_v33 }
 0xce2   : > { %v4404_v47 = vpop.permute.xlu1 %4403 }
 0xce3   : > { %v4422_v17 = vmul.f32 %v4410_v39, %v4404_v47  ;;  %v4423_v27 = vmul.f32 %v4414_v48, %v4404_v47  ;;  %v4424_v52 = vmul.f32 %v4418_v24, %v4404_v47  ;;  %v12000_v47 = vmov 36  }
 0xce5   : > { %4430 = vrot.lane.b32.xlu1 %v4423_v27, %s7315_s19  ;;  %4428 = vrot.lane.b32.xlu0 %v4422_v17, %s7315_s19  ;;  %v12003_v17 = vmov 37  }
 0xce6   : > { %7191 = vset.pattern.permute.xlu0 %v12003_v17 }
 0xce9   : > { %4441 = vperm.xlu1 %7188, %v9246_v13   ;;  %4432 = vrot.lane.b32.xlu0 %v4424_v52, %s7315_s19 }
 0xced   : > { %7189 = vset.pattern.permute.xlu1 %v12001_v49 }
 0xd57   : > { %v9456_v0 = vpop.permute.xlu1 %4430 }
 0xd58   : > { %12263 = vst [vmem:[#allocation79_spill] sm:$0xff] %v9456_v0 }
 0xd68   : > { %v4442_v33 = vpop.permute.xlu1 %4441 }
 0xd69   : > { %v4444_v39 = vmul.f32 %v4442_v33, %v9334_v26  ;;  %v4445_v48 = vmul.f32 %v4442_v33, %v9346_v42  ;;  %v4446_v56 = vmul.f32 %v4442_v33, %v9338_v4  ;;  %v4462_v26 = vmul.f32 %v9330_v44, %v12216_v11 }
 0xd6b   : > { %4452 = vrot.lane.b32.xlu1 %v4445_v48, %s7311_s30  ;;  %4450 = vrot.lane.b32.xlu0 %v4444_v39, %s7311_s30  ;;  %v4471_v27 = vrot.slane %v4462_v26, %v7496_v29  ;;  %v4475_v24 = vrot.slane %v4462_v26, %v7498_v30  ;;  %v4479_v39 = vrot.slane %v4462_v26, %v12210_v14  ;;  %v9484_v26 = vpop.permute.xlu0 %4254 }
 0xd6c   : > { %12265 = vst [vmem:[#allocation81_spill] sm:$0xff] %v9484_v26  ;;  %v2431_v26 = vsel %vm522_vm8, %v9298_v58, %v9157_v41  ;;  %v2509_v58 = vsel %vm616_vm10, %v9251_v43, %v9364_v54 }
 0xd6f   : > { %4464 = vperm.xlu1 %7189, %v9246_v13   ;;  %4454 = vrot.lane.b32.xlu0 %v4446_v56, %s7311_s30  ;;  %v3252_v56 = vrot.slane %v9134_v40, %v12210_v14 }
 0xd71   : > { %v3258_v44 = vmul.f32 %v3252_v56, %v8875_v21 }
 0xd73   : > { %7190 = vset.pattern.permute.xlu1 %v12000_v47 }
 0xddd   : > { %v9469_v42 = vpop.permute.xlu1 %4452 }
 0xdde   : > { %12264 = vst [vmem:[#allocation80_spill] sm:$0xff] %v9469_v42 }
 0xdee   : > { %v4465_v4 = vpop.permute.xlu1 %4464 }
 0xdef   : > { %v4483_v33 = vmul.f32 %v4471_v27, %v4465_v4  ;;  %v4484_v52 = vmul.f32 %v4475_v24, %v4465_v4  ;;  %v4485_v48 = vmul.f32 %v4479_v39, %v4465_v4  ;;  %v12002_v27 = vmov 38   ;;  %v9486_v24 = vpop.permute.xlu0 %4289 }
 0xdf0   : > { %12266 = vst [vmem:[#allocation82_spill] sm:$0xff] %v9486_v24 }
 0xdf1   : > { %4491 = vrot.lane.b32.xlu1 %v4484_v52, %s7316_s20  ;;  %4489 = vrot.lane.b32.xlu0 %v4483_v33, %s7316_s20 }
 0xdf3   : > { %v9488_v4 = vpop.permute.xlu0 %4293 }
 0xdf4   : > { %12267 = vst [vmem:[#allocation83_spill] sm:$0xff] %v9488_v4 }
 0xdf5   : > { %4504 = vperm.xlu1 %7190, %v9246_v13   ;;  %4493 = vrot.lane.b32.xlu0 %v4485_v48, %s7316_s20 }
 0xdf7   : > { %v9490_v40 = vpop.permute.xlu0 %4328 }
 0xdf8   : > { %12268 = vst [vmem:[#allocation84_spill] sm:$0xff] %v9490_v40 }
 0xdf9   : > { %3266 = vrot.lane.b32.xlu0 %v3258_v44, %s7316_s20  ;;  %7192 = vset.pattern.permute.xlu1 %v12002_v27 }
 0xdfb   : > { %v9492_v33 = vpop.permute.xlu0 %4332 }
 0xdfc   : > { %12269 = vst [vmem:[#allocation85_spill] sm:$0xff] %v9492_v33 }
 0xdfd   : > { %4524 = vperm.xlu0 %7191, %v9246_v13  }
 0xdff   : > { %v9494_v52 = vpop.permute.xlu0 %4350 }
 0xe00   : > { %12270 = vst [vmem:[#allocation86_spill] sm:$0xff] %v9494_v52  ;;  %v9516_v52 = vld [vmem:[#allocation3 + $0x4] ss:$8 sm:$0x7] }
 0xe03   : > { %v9496_v21 = vpop.permute.xlu0 %4354 }
 0xe04   : > { %12271 = vst [vmem:[#allocation87_spill] sm:$0xff] %v9496_v21 }
 0xe07   : > { %v9498_v39 = vpop.permute.xlu0 %4389 }
 0xe08   : > { %12272 = vst [vmem:[#allocation88_spill] sm:$0xff] %v9498_v39  ;;  %v9520_v39 = vrot.slane %v9516_v52, %v7496_v29 }
 0xe0b   : > { %v9500_v48 = vpop.permute.xlu0 %4393 }
 0xe0c   : > { %12273 = vst [vmem:[#allocation89_spill] sm:$0xff] %v9500_v48 }
 0xe0f   : > { %v9502_v56 = vpop.permute.xlu0 %4428 }
 0xe10   : > { %12274 = vst [vmem:[#allocation90_spill] sm:$0xff] %v9502_v56  ;;  %v9524_v56 = vrot.slane %v9516_v52, %v12210_v14 }
 0xe13   : > { %v9504_v44 = vpop.permute.xlu0 %4432 }
 0xe14   : > { %12275 = vst [vmem:[#allocation91_spill] sm:$0xff] %v9504_v44 }
 0xe17   : > { %v9506_v47 = vpop.permute.xlu0 %4450 }
 0xe18   : > { %12276 = vst [vmem:[#allocation92_spill] sm:$0xff] %v9506_v47 }
 0xe1b   : > { %v9508_v49 = vpop.permute.xlu0 %4454 }
 0xe1c   : > { %12277 = vst [vmem:[#allocation93_spill] sm:$0xff] %v9508_v49  ;;  %v12006_v49 = vmov 39  }
 0xe63   : > { %v9510_v27 = vpop.permute.xlu0 %4489  ;;  %v9538_v0 = vpop.permute.xlu1 %4491 }
 0xe64   : > { %12278 = vst [vmem:[#allocation94_spill] sm:$0xff] %v9510_v27  ;;  %v9530_v27 = vrot.slane %v9516_v52, %v7498_v30  ;;  %12280 = vst [vmem:[#allocation96_spill] sm:$0xff] %v9538_v0 }
 0xe67   : > { %v9512_v17 = vpop.permute.xlu0 %4493 }
 0xe68   : > { %12279 = vst [vmem:[#allocation95_spill] sm:$0xff] %v9512_v17 }
 0xe6b   : > { %v9514_v40 = vpop.permute.xlu0 %3266 }
 0xe74   : > { %v9540_v44 = vpop.permute.xlu1 %4504 }
 0xe75   : > { %12281 = vst [vmem:[#allocation97_spill] sm:$0xff] %v9540_v44 }
 0xe7c   : > { %v4525_v24 = vpop.permute.xlu0 %4524 }
 0xe7d   : > { %v4543_v47 = vmul.f32 %v9520_v39, %v4525_v24  ;;  %v4545_v42 = vmul.f32 %v9524_v56, %v4525_v24  ;;  %v4544_v17 = vmul.f32 %v9530_v27, %v4525_v24 }
 0xe7f   : > { %4553 = vrot.lane.b32.xlu0 %v4545_v42, %s7309_s28  ;;  %4549 = vrot.lane.b32.xlu1 %v4543_v47, %s7309_s28  ;;  %v4561_v42 = vmul.f32 %v9516_v52, %v12211_v23 }
 0xe81   : > { %v4570_v47 = vrot.slane %v4561_v42, %v7496_v29 }
 0xe83   : > { %4551 = vrot.lane.b32.xlu1 %v4544_v17, %s7309_s28  ;;  %v4574_v17 = vrot.slane %v4561_v42, %v7498_v30 }
 0xe87   : > { %4563 = vperm.xlu1 %7192, %v9246_v13  }
 0xe8b   : > { %7193 = vset.pattern.permute.xlu1 %v12006_v49  ;;  %v4578_v49 = vrot.slane %v4561_v42, %v12210_v14 }
 0xef1   : > { %v9542_v48 = vpop.permute.xlu1 %4549 }
 0xef2   : > { %12282 = vst [vmem:[#allocation98_spill] sm:$0xff] %v9542_v48  ;;  %v12010_v48 = vmov 40  }
 0xef5   : > { %v9546_v21 = vpop.permute.xlu1 %4551 }
 0xef6   : > { %12283 = vst [vmem:[#allocation99_spill] sm:$0xff] %v9546_v21  ;;  %v4600_v21 = vmul.f32 %v9516_v52, %v12212_v37 }
 0xef8   : > { %v4613_v42 = vrot.slane %v4600_v21, %v7498_v30 }
 0xf06   : > { %v4564_v24 = vpop.permute.xlu1 %4563 }
 0xf07   : > { %v4582_v33 = vmul.f32 %v4570_v47, %v4564_v24  ;;  %v4583_v4 = vmul.f32 %v4574_v17, %v4564_v24  ;;  %v4584_v44 = vmul.f32 %v4578_v49, %v4564_v24  ;;  %v4609_v47 = vrot.slane %v4600_v21, %v7496_v29 }
 0xf08   : > { %v4617_v49 = vrot.slane %v4600_v21, %v12210_v14  ;;  %v12012_v24 = vmov 41  }
 0xf09   : > { %4590 = vrot.lane.b32.xlu1 %v4583_v4, %s7312_s14  ;;  %4588 = vrot.lane.b32.xlu0 %v4582_v33, %s7312_s14 }
 0xf0d   : > { %4602 = vperm.xlu1 %7193, %v9246_v13   ;;  %4592 = vrot.lane.b32.xlu0 %v4584_v44, %s7312_s14 }
 0xf11   : > { %7194 = vset.pattern.permute.xlu1 %v12010_v48 }
 0xf7b   : > { %v9558_v0 = vpop.permute.xlu1 %4590 }
 0xf7c   : > { %12284 = vst [vmem:[#allocation100_spill] sm:$0xff] %v9558_v0 }
 0xf8c   : > { %v4603_v4 = vpop.permute.xlu1 %4602 }
 0xf8d   : > { %v4621_v17 = vmul.f32 %v4609_v47, %v4603_v4  ;;  %v4622_v33 = vmul.f32 %v4613_v42, %v4603_v4  ;;  %v4623_v44 = vmul.f32 %v4617_v49, %v4603_v4  ;;  %v12013_v4 = vmov 42  }
 0xf8f   : > { %4629 = vrot.lane.b32.xlu1 %v4622_v33, %s7313_s17  ;;  %4627 = vrot.lane.b32.xlu0 %v4621_v17, %s7313_s17  ;;  %v4661_v17 = vmul.f32 %v9516_v52, %v12213_v60 }
 0xf91   : > { %v4670_v49 = vrot.slane %v4661_v17, %v7496_v29 }
 0xf93   : > { %4640 = vperm.xlu1 %7194, %v9246_v13   ;;  %4631 = vrot.lane.b32.xlu0 %v4623_v44, %s7313_s17  ;;  %v4674_v44 = vrot.slane %v4661_v17, %v7498_v30 }
 0xf97   : > { %7195 = vset.pattern.permute.xlu1 %v12012_v24 }
0x1001   : > { %v9568_v48 = vpop.permute.xlu1 %4629 }
0x1002   : > { %12285 = vst [vmem:[#allocation101_spill] sm:$0xff] %v9568_v48 }
0x1012   : > { %v4641_v0 = vpop.permute.xlu1 %4640 }
0x1013   : > { %v4643_v47 = vmul.f32 %v4641_v0, %v9520_v39  ;;  %v4644_v42 = vmul.f32 %v4641_v0, %v9530_v27  ;;  %v4645_v21 = vmul.f32 %v4641_v0, %v9524_v56  ;;  %v4678_v0 = vrot.slane %v4661_v17, %v12210_v14 }
0x1015   : > { %4651 = vrot.lane.b32.xlu1 %v4644_v42, %s7310_s29  ;;  %4649 = vrot.lane.b32.xlu0 %v4643_v47, %s7310_s29 }
0x1019   : > { %4663 = vperm.xlu1 %7195, %v9246_v13   ;;  %4653 = vrot.lane.b32.xlu0 %v4645_v21, %s7310_s29 }
0x101d   : > { %7196 = vset.pattern.permute.xlu1 %v12013_v4  ;;  %v12016_v4 = vmov 43  }
0x1087   : > { %v9580_v33 = vpop.permute.xlu1 %4651 }
0x1088   : > { %12286 = vst [vmem:[#allocation102_spill] sm:$0xff] %v9580_v33  ;;  %v4700_v33 = vmul.f32 %v9516_v52, %v12215_v34 }
0x108a   : > { %v4713_v17 = vrot.slane %v4700_v33, %v7498_v30 }
0x1098   : > { %v4664_v42 = vpop.permute.xlu1 %4663 }
0x1099   : > { %v4682_v47 = vmul.f32 %v4670_v49, %v4664_v42  ;;  %v4683_v24 = vmul.f32 %v4674_v44, %v4664_v42  ;;  %v4684_v21 = vmul.f32 %v4678_v0, %v4664_v42  ;;  %v4709_v49 = vrot.slane %v4700_v33, %v7496_v29 }
0x109a   : > { %v4717_v42 = vrot.slane %v4700_v33, %v12210_v14 }
0x109b   : > { %4690 = vrot.lane.b32.xlu1 %v4683_v24, %s7314_s18  ;;  %4688 = vrot.lane.b32.xlu0 %v4682_v47, %s7314_s18 }
0x109f   : > { %4702 = vperm.xlu1 %7196, %v9246_v13   ;;  %4692 = vrot.lane.b32.xlu0 %v4684_v21, %s7314_s18  ;;  %v12021_v21 = vmov 44  }
0x10a3   : > { %7197 = vset.pattern.permute.xlu1 %v12016_v4 }
0x110d   : > { %v9592_v48 = vpop.permute.xlu1 %4690 }
0x110e   : > { %12287 = vst [vmem:[#allocation103_spill] sm:$0xff] %v9592_v48 }
0x111e   : > { %v4703_v24 = vpop.permute.xlu1 %4702 }
0x111f   : > { %v4721_v44 = vmul.f32 %v4709_v49, %v4703_v24  ;;  %v4722_v47 = vmul.f32 %v4713_v17, %v4703_v24  ;;  %v4723_v0 = vmul.f32 %v4717_v42, %v4703_v24  ;;  %v12018_v24 = vmov 45  }
0x1121   : > { %4729 = vrot.lane.b32.xlu1 %v4722_v47, %s7315_s19  ;;  %4727 = vrot.lane.b32.xlu0 %v4721_v44, %s7315_s19  ;;  %v12019_v44 = vmov 46  }
0x1122   : > { %7200 = vset.pattern.permute.xlu0 %v12019_v44 }
0x1125   : > { %4740 = vperm.xlu1 %7197, %v9246_v13   ;;  %4731 = vrot.lane.b32.xlu0 %v4723_v0, %s7315_s19 }
0x1129   : > { %7198 = vset.pattern.permute.xlu1 %v12021_v21 }
0x1193   : > { %v9602_v4 = vpop.permute.xlu1 %4729 }
0x1194   : > { %12288 = vst [vmem:[#allocation104_spill] sm:$0xff] %v9602_v4 }
0x11a4   : > { %v4741_v48 = vpop.permute.xlu1 %4740 }
0x11a5   : > { %v4743_v49 = vmul.f32 %v4741_v48, %v9520_v39  ;;  %v4744_v17 = vmul.f32 %v4741_v48, %v9530_v27  ;;  %v4745_v33 = vmul.f32 %v4741_v48, %v9524_v56  ;;  %v4761_v39 = vmul.f32 %v9516_v52, %v12216_v11 }
0x11a6   : > { %v12290_v52 = vmov 0   ;;  %v2432_v11 = vsel %vm522_vm8, %v9157_v41, %v9302_v12  ;;  %v2510_v12 = vsel %vm616_vm10, %v9364_v54, %v9254_v61  ;;  %v2676_v41 = vld [vmem:[#allocation2 + $0x1] ss:$8 sm:$0x3]  ;;  %v2570_v61 = vsel %vm685_vm12, %v9256_v57, %v9366_v38 }
0x11a7   : > { %4751 = vrot.lane.b32.xlu1 %v4744_v17, %s7311_s30  ;;  %4749 = vrot.lane.b32.xlu0 %v4743_v49, %s7311_s30  ;;  %v4770_v47 = vrot.slane %v4761_v39, %v7496_v29  ;;  %v4774_v42 = vrot.slane %v4761_v39, %v7498_v30  ;;  %v4778_v49 = vrot.slane %v4761_v39, %v12210_v14  ;;  %v12020_v39 = vmov 47  }
0x11a8   : > { %v2571_v54 = vsel %vm685_vm12, %v9366_v38, %v9258_v3  ;;  %v2631_v3 = vsel %vm754_vm14, %v9177_v7, %v9310_v10  ;;  %v2632_v38 = vsel %vm754_vm14, %v9310_v10, %v9183_v35  ;;  %v2730_v10 = vsel %vm522_vm8, %v9314_v20, %v9318_v2 }
0x11a9   : > { %v2731_v35 = vsel %vm522_vm8, %v9318_v2, %v9189_v16  ;;  %v2808_v20 = vsel %vm616_vm10, %v9272_v62, %v9374_v36  ;;  %v2809_v2 = vsel %vm616_vm10, %v9374_v36, %v9274_v1  ;;  %v2975_v16 = vld [vmem:[#allocation2 + $0x2] ss:$8 sm:$0x3]  ;;  %v12306_v62 = vld [vmem:[#allocation40_spill] sm:$0xff] }
0x11aa   : > { %v12307_v36 = vld [vmem:[#allocation42_spill] sm:$0xff] }
0x11ab   : > { %4763 = vperm.xlu1 %7198, %v9246_v13   ;;  %4753 = vrot.lane.b32.xlu0 %v4745_v33, %s7311_s30  ;;  %v7270_v33 = vld [vmem:[%s11834_s7] sm:$0x7]  ;;  %v2870_v1 = vsel %vm685_vm12, %v9376_v53, %v12307_v36  ;;  %v12326_v36 = vld [vmem:[#allocation53_spill] sm:$0xff] }
0x11af   : > { %7199 = vset.pattern.permute.xlu1 %v12018_v24 }
0x1219   : > { %v9615_v27 = vpop.permute.xlu1 %4751 }
0x121a   : > { %12289 = vst [vmem:[#allocation105_spill] sm:$0xff] %v9615_v27  ;;  %v9661_v27 = vld [vmem:[#allocation3 + $0x5] ss:$8 sm:$0x7] }
0x122a   : > { %v4764_v48 = vpop.permute.xlu1 %4763 }
0x122b   : > { %v4782_v56 = vmul.f32 %v4770_v47, %v4764_v48  ;;  %v4783_v0 = vmul.f32 %v4774_v42, %v4764_v48  ;;  %v4784_v17 = vmul.f32 %v4778_v49, %v4764_v48  ;;  %v9631_v47 = vpop.permute.xlu0 %4553 }
0x122c   : > { %12291 = vst [vmem:[#allocation106_spill] sm:$0xff] %v9631_v47 }
0x122d   : > { %4790 = vrot.lane.b32.xlu1 %v4783_v0, %s7316_s20  ;;  %4788 = vrot.lane.b32.xlu0 %v4782_v56, %s7316_s20 }
0x122f   : > { %v9633_v42 = vpop.permute.xlu0 %4588 }
0x1230   : > { %12292 = vst [vmem:[#allocation107_spill] sm:$0xff] %v9633_v42 }
0x1231   : > { %4803 = vperm.xlu1 %7199, %v9246_v13   ;;  %4792 = vrot.lane.b32.xlu0 %v4784_v17, %s7316_s20 }
0x1233   : > { %v9635_v48 = vpop.permute.xlu0 %4592 }
0x1234   : > { %12293 = vst [vmem:[#allocation108_spill] sm:$0xff] %v9635_v48 }
0x1235   : > { %4823 = vperm.xlu0 %7200, %v9246_v13   ;;  %7202 = vset.pattern.permute.xlu1 %v12020_v39 }
0x1237   : > { %v9637_v56 = vpop.permute.xlu0 %4627 }
0x1238   : > { %12294 = vst [vmem:[#allocation109_spill] sm:$0xff] %v9637_v56 }
0x1239   : > { %7201 = vset.pattern.permute.xlu0 %v12290_v52 }
0x123a   : > { %2380 = vperm.xlu0 %7201, %v7270_v33  }
0x123b   : > { %v9639_v0 = vpop.permute.xlu0 %4631 }
0x123c   : > { %12295 = vst [vmem:[#allocation110_spill] sm:$0xff] %v9639_v0 }
0x123e   : > { %3306 = vperm.xlu0 %7201, %v9246_v13  }
0x123f   : > { %v9641_v49 = vpop.permute.xlu0 %4649 }
0x1240   : > { %12296 = vst [vmem:[#allocation111_spill] sm:$0xff] %v9641_v49  ;;  %v2375_v49 = vld [vmem:[#allocation2] ss:$8 sm:$0x3] }
0x1243   : > { %v9643_v17 = vpop.permute.xlu0 %4653 }
0x1244   : > { %12297 = vst [vmem:[#allocation112_spill] sm:$0xff] %v9643_v17 }
0x1247   : > { %v9645_v33 = vpop.permute.xlu0 %4688 }
0x1248   : > { %12298 = vst [vmem:[#allocation113_spill] sm:$0xff] %v9645_v33  ;;  %v9665_v33 = vrot.slane %v9661_v27, %v7496_v29 }
0x124b   : > { %v9647_v24 = vpop.permute.xlu0 %4692 }
0x124c   : > { %12299 = vst [vmem:[#allocation114_spill] sm:$0xff] %v9647_v24 }
0x124f   : > { %v9649_v44 = vpop.permute.xlu0 %4727 }
0x1250   : > { %12300 = vst [vmem:[#allocation115_spill] sm:$0xff] %v9649_v44  ;;  %v9669_v44 = vrot.slane %v9661_v27, %v12210_v14 }
0x1253   : > { %v9651_v39 = vpop.permute.xlu0 %4731 }
0x1254   : > { %12301 = vst [vmem:[#allocation116_spill] sm:$0xff] %v9651_v39  ;;  %v9681_v39 = vrot.slane %v9661_v27, %v7498_v30 }
0x1257   : > { %v9653_v21 = vpop.permute.xlu0 %4749 }
0x1258   : > { %12302 = vst [vmem:[#allocation117_spill] sm:$0xff] %v9653_v21  ;;  %v9674_v21 = vld [vmem:[%s11828_s1] sm:$0x3] }
0x125b   : > { %v9655_v42 = vpop.permute.xlu0 %4753 }
0x125c   : > { %12303 = vst [vmem:[#allocation118_spill] sm:$0xff] %v9655_v42 }
0x129f   : > { %v9657_v52 = vpop.permute.xlu0 %4788 }
0x12a0   : > { %12304 = vst [vmem:[#allocation119_spill] sm:$0xff] %v9657_v52  ;;  %v2376_v52 = vmul.f32 %v9674_v21, %v2375_v49 }
0x12a2   : > { %v2387_v24 = vrot.slane %v2376_v52, %v7496_v29  ;;  %v2391_v17 = vrot.slane %v2376_v52, %v7498_v30  ;;  %v2470_v52 = vsel %vm569_vm9, %v9360_v59, %v9362_v55  ;;  %v2531_v59 = vsel %vm639_vm11, %v9165_v22, %v9306_v5 }
0x12a3   : > { %v9659_v56 = vpop.permute.xlu0 %4792 }
0x12a4   : > { %12305 = vst [vmem:[#allocation120_spill] sm:$0xff] %v9659_v56 }
0x12b4   : > { %v4824_v4 = vpop.permute.xlu0 %4823 }
0x12b5   : > { %v4842_v56 = vmul.f32 %v9665_v33, %v4824_v4  ;;  %v4844_v42 = vmul.f32 %v9669_v44, %v4824_v4  ;;  %v4843_v0 = vmul.f32 %v9681_v39, %v4824_v4  ;;  %v2471_v4 = vsel %vm569_vm9, %v9362_v55, %v9249_v18 }
0x12b6   : > { %v2532_v18 = vsel %vm639_vm11, %v9306_v5, %v9171_v32  ;;  %v2677_v55 = vmul.f32 %v9674_v21, %v2676_v41  ;;  %v2609_v5 = vsel %vm731_vm13, %v9260_v50, %v9368_v31  ;;  %v2610_v32 = vsel %vm731_vm13, %v9368_v31, %v9262_v63 }
0x12b7   : > { %4852 = vrot.lane.b32.xlu0 %v4844_v42, %s7309_s28  ;;  %4848 = vrot.lane.b32.xlu1 %v4842_v56, %s7309_s28  ;;  %v2670_v31 = vsel %vm800_vm15, %v9264_v46, %v9370_v19  ;;  %v2671_v63 = vsel %vm800_vm15, %v9370_v19, %v9266_v45  ;;  %v2769_v45 = vsel %vm569_vm9, %v9268_v28, %v9372_v25 }
0x12b8   : > { %v2690_v57 = vrot.slane %v2677_v55, %v7498_v30  ;;  %v2830_v28 = vsel %vm639_vm11, %v9195_v6, %v9322_v15  ;;  %v12309_v6 = vld [vmem:[#allocation44_spill] sm:$0xff] }
0x12b9   : > { %v2381_v48 = vpop.permute.xlu0 %2380 }
0x12ba   : > { %v2394_v49 = vmul.f32 %v2387_v24, %v2381_v48  ;;  %v2395_v47 = vmul.f32 %v2391_v17, %v2381_v48 }
0x12bb   : > { %4850 = vrot.lane.b32.xlu1 %v4843_v0, %s7309_s28  ;;  %v12029_v0 = vmov 48  }
0x12bc   : > { %v2435_v42 = vadd.f32 %v2431_v26, %v2394_v49  ;;  %v2436_v56 = vadd.f32 %v2432_v11, %v2395_v47  ;;  %v2686_v49 = vrot.slane %v2677_v55, %v7496_v29  ;;  %v2976_v55 = vmul.f32 %v9674_v21, %v2975_v16  ;;  %v12321_v16 = vld [vmem:[#allocation66_spill] sm:$0xff] }
0x12be   : > { %v2474_v24 = vadd.f32 %v2470_v52, %v2435_v42  ;;  %v2475_v48 = vadd.f32 %v2471_v4, %v2436_v56  ;;  %v2693_v4 = vmul.f32 %v2686_v49, %v8763_v8  ;;  %v2985_v49 = vrot.slane %v2976_v55, %v7496_v29 }
0x12bf   : > { %4862 = vperm.xlu1 %7202, %v9246_v13  }
0x12c0   : > { %v2513_v11 = vadd.f32 %v2509_v58, %v2474_v24  ;;  %v2514_v26 = vadd.f32 %v2510_v12, %v2475_v48  ;;  %v2694_v24 = vmul.f32 %v2690_v57, %v8763_v8  ;;  %v2770_v8 = vsel %vm569_vm9, %v9372_v25, %v9270_v51  ;;  %v12311_v57 = vld [vmem:[#allocation58_spill] sm:$0xff] }
0x12c1   : > { %v2831_v25 = vsel %vm639_vm11, %v9322_v15, %v9201_v9 }
0x12c2   : > { %v2535_v43 = vadd.f32 %v2531_v59, %v2513_v11  ;;  %v2536_v47 = vadd.f32 %v2532_v18, %v2514_v26 }
0x12c3   : > { %7203 = vset.pattern.permute.xlu1 %v12029_v0 }
0x12c4   : > { %v2574_v22 = vadd.f32 %v2570_v61, %v2535_v43  ;;  %v2575_v17 = vadd.f32 %v2571_v54, %v2536_v47  ;;  %v2869_v43 = vsel %vm685_vm12, %v12306_v62, %v9376_v53  ;;  %v12308_v54 = vld [vmem:[#allocation64_spill] sm:$0xff] }
0x12c5   : > { %v12325_v62 = vld [vmem:[#allocation52_spill] sm:$0xff] }
0x12c6   : > { %v2613_v42 = vadd.f32 %v2609_v5, %v2574_v22  ;;  %v2614_v56 = vadd.f32 %v2610_v32, %v2575_v17  ;;  %v2908_v22 = vsel %vm731_vm13, %v12309_v6, %v12308_v54  ;;  %v12310_v17 = vld [vmem:[#allocation45_spill] sm:$0xff]  ;;  %v2989_v5 = vrot.slane %v2976_v55, %v7498_v30  ;;  %v12324_v55 = vld [vmem:[#allocation67_spill] sm:$0xff]  ;;  %v12328_v6 = vld [vmem:[#allocation36_spill] sm:$0xff] }
0x12c7   : > { %v2909_v15 = vsel %vm731_vm13, %v12308_v54, %v12310_v17  ;;  %v12327_v54 = vld [vmem:[#allocation62_spill] sm:$0xff]  ;;  %v12329_v17 = vld [vmem:[#allocation37_spill] sm:$0xff] }
0x12c8   : > { %v2635_v52 = vadd.f32 %v2631_v3, %v2613_v42  ;;  %v2636_v50 = vadd.f32 %v2632_v38, %v2614_v56  ;;  %v12312_v42 = vld [vmem:[#allocation13_spill] sm:$0xff] }
0x12c9   : > { %v2930_v53 = vsel %vm754_vm14, %v12312_v42, %v12311_v57  ;;  %v12313_v56 = vld [vmem:[#allocation21_spill] sm:$0xff]  ;;  %v12332_v42 = vld [vmem:[#allocation55_spill] sm:$0xff] }
0x12ca   : > { %v2674_v48 = vadd.f32 %v2670_v31, %v2635_v52  ;;  %v2675_v7 = vadd.f32 %v2671_v63, %v2636_v50  ;;  %v2931_v3 = vsel %vm754_vm14, %v12311_v57, %v12313_v56  ;;  %v12314_v50 = vld [vmem:[#allocation65_spill] sm:$0xff]  ;;  %v12315_v31 = vld [vmem:[#allocation47_spill] sm:$0xff] }
0x12cb   : > { %v2969_v63 = vsel %vm800_vm15, %v12315_v31, %v12314_v50  ;;  %v12335_v31 = vld [vmem:[#allocation57_spill] sm:$0xff] }
0x12cc   : > { %v2695_v58 = vadd.f32 %v2693_v4, %v2674_v48  ;;  %v2696_v12 = vadd.f32 %v2694_v24, %v2675_v7  ;;  %v12316_v4 = vld [vmem:[#allocation49_spill] sm:$0xff]  ;;  %v12317_v7 = vld [vmem:[#allocation23_spill] sm:$0xff] }
0x12cd   : > { %v2970_v24 = vsel %vm800_vm15, %v12314_v50, %v12316_v4 }
0x12ce   : > { %v2734_v46 = vadd.f32 %v2730_v10, %v2695_v58  ;;  %v2735_v41 = vadd.f32 %v2731_v35, %v2696_v12  ;;  %v2993_v58 = vmul.f32 %v2989_v5, %v12317_v7  ;;  %v2992_v10 = vmul.f32 %v2985_v49, %v12317_v7  ;;  %v12331_v49 = vld [vmem:[#allocation54_spill] sm:$0xff] }
0x12cf   : > { %v12337_v7 = vld [vmem:[#allocation38_spill] sm:$0xff] }
0x12d0   : > { %v2773_v19 = vadd.f32 %v2769_v45, %v2734_v46  ;;  %v2774_v11 = vadd.f32 %v2770_v8, %v2735_v41  ;;  %v12318_v41 = vld [vmem:[#allocation61_spill] sm:$0xff]  ;;  %v12319_v45 = vld [vmem:[#allocation60_spill] sm:$0xff] }
0x12d1   : > { %v3029_v8 = vsel %vm522_vm8, %v12319_v45, %v12318_v41  ;;  %v12340_v45 = vld [vmem:[#allocation59_spill] sm:$0xff] }
0x12d2   : > { %v2812_v26 = vadd.f32 %v2808_v20, %v2773_v19  ;;  %v2813_v59 = vadd.f32 %v2809_v2, %v2774_v11  ;;  %v12320_v19 = vld [vmem:[#allocation35_spill] sm:$0xff] }
0x12d3   : > { %v3030_v11 = vsel %vm522_vm8, %v12318_v41, %v12320_v19  ;;  %v12339_v41 = vld [vmem:[#allocation70_spill] sm:$0xff] }
0x12d4   : > { %v2834_v51 = vadd.f32 %v2830_v28, %v2812_v26  ;;  %v2835_v18 = vadd.f32 %v2831_v25, %v2813_v59  ;;  %v12322_v26 = vld [vmem:[#allocation50_spill] sm:$0xff]  ;;  %v12323_v28 = vld [vmem:[#allocation51_spill] sm:$0xff]  ;;  %v3269_v19 = vsel %vm800_vm15, %v12339_v41, %v9514_v40 }
0x12d5   : > { %v3068_v59 = vsel %vm569_vm9, %v12322_v26, %v12321_v16  ;;  %v3069_v25 = vsel %vm569_vm9, %v12321_v16, %v12323_v28 }
0x12d6   : > { %v2873_v47 = vadd.f32 %v2869_v43, %v2834_v51  ;;  %v2874_v61 = vadd.f32 %v2870_v1, %v2835_v18  ;;  %v3107_v43 = vsel %vm616_vm10, %v12325_v62, %v12324_v55  ;;  %v3108_v1 = vsel %vm616_vm10, %v12324_v55, %v12326_v36 }
0x12d7   : > { %v4860_v55 = vmul.f32 %v9661_v27, %v12211_v23 }
0x12d8   : > { %v2913_v9 = vadd.f32 %v2909_v15, %v2874_v61  ;;  %v2912_v32 = vadd.f32 %v2908_v22, %v2873_v47  ;;  %v3129_v22 = vsel %vm639_vm11, %v12328_v6, %v12327_v54  ;;  %v3130_v15 = vsel %vm639_vm11, %v12327_v54, %v12329_v17 }
0x12d9   : > { %v4869_v62 = vrot.slane %v4860_v55, %v7496_v29  ;;  %v12027_v6 = vmov 49  }
0x12da   : > { %v2935_v38 = vadd.f32 %v2931_v3, %v2913_v9  ;;  %v2934_v52 = vadd.f32 %v2930_v53, %v2912_v32  ;;  %v12330_v32 = vld [vmem:[#allocation68_spill] sm:$0xff] }
0x12db   : > { %v3168_v57 = vsel %vm685_vm12, %v12331_v49, %v12330_v32  ;;  %v3169_v53 = vsel %vm685_vm12, %v12330_v32, %v12332_v42 }
0x12dc   : > { %v2974_v48 = vadd.f32 %v2970_v24, %v2935_v38  ;;  %v2973_v12 = vadd.f32 %v2969_v63, %v2934_v52  ;;  %v12333_v38 = vld [vmem:[#allocation69_spill] sm:$0xff]  ;;  %v12334_v52 = vld [vmem:[#allocation56_spill] sm:$0xff] }
0x12dd   : > { %v3207_v50 = vsel %vm731_vm13, %v12334_v52, %v12333_v38  ;;  %v3208_v63 = vsel %vm731_vm13, %v12333_v38, %v12335_v31 }
0x12de   : > { %v2995_v35 = vadd.f32 %v2993_v58, %v2974_v48  ;;  %v2994_v46 = vadd.f32 %v2992_v10, %v2973_v12  ;;  %v12336_v48 = vld [vmem:[#allocation63_spill] sm:$0xff] }
0x12df   : > { %v3229_v58 = vsel %vm754_vm14, %v12337_v7, %v12336_v48  ;;  %v12338_v12 = vld [vmem:[#allocation39_spill] sm:$0xff] }
0x12e0   : > { %v3034_v20 = vadd.f32 %v3030_v11, %v2995_v35  ;;  %v3033_v2 = vadd.f32 %v3029_v8, %v2994_v46  ;;  %v3230_v10 = vsel %vm754_vm14, %v12336_v48, %v12338_v12  ;;  %v3268_v8 = vsel %vm800_vm15, %v12340_v45, %v12339_v41  ;;  %v9904_v12 = vld [vmem:[%s11836_s9] sm:$0x3f] }
0x12e2   : > { %v3073_v51 = vadd.f32 %v3069_v25, %v3034_v20  ;;  %v3072_v18 = vadd.f32 %v3068_v59, %v3033_v2  ;;  %v12341_v2 = vld [vmem:[#allocation10_spill] sm:$0xff]  ;;  %v9849_v25 = vpop.permute.xlu1 %4790 }
0x12e4   : > { %v3112_v47 = vadd.f32 %v3108_v1, %v3073_v51  ;;  %v3111_v61 = vadd.f32 %v3107_v43, %v3072_v18  ;;  %v4873_v43 = vrot.slane %v4860_v55, %v7498_v30 }
0x12e6   : > { %v3134_v9 = vadd.f32 %v3130_v15, %v3112_v47  ;;  %v3133_v5 = vadd.f32 %v3129_v22, %v3111_v61  ;;  %v9851_v51 = vpop.permute.xlu1 %4803  ;;  %v4877_v61 = vrot.slane %v4860_v55, %v12210_v14  ;;  %v4899_v22 = vmul.f32 %v9661_v27, %v12212_v37  ;;  %v12352_v55 = vld [vmem:[#allocation14_spill] sm:$0xff] }
0x12e8   : > { %v3173_v56 = vadd.f32 %v3169_v53, %v3134_v9  ;;  %v3172_v3 = vadd.f32 %v3168_v57, %v3133_v5  ;;  %v4908_v15 = vrot.slane %v4899_v22, %v7496_v29  ;;  %v4912_v9 = vrot.slane %v4899_v22, %v7498_v30 }
0x12e9   : > { %v4916_v42 = vrot.slane %v4899_v22, %v12210_v14 }
0x12ea   : > { %v3212_v4 = vadd.f32 %v3208_v63, %v3173_v56  ;;  %v3211_v24 = vadd.f32 %v3207_v50, %v3172_v3  ;;  %v12026_v56 = vmov 50   ;;  %v9882_v3 = vpop.permute.xlu0 %3306 }
0x12ec   : > { %v3234_v35 = vadd.f32 %v3230_v10, %v3212_v4  ;;  %v3233_v46 = vadd.f32 %v3229_v58, %v3211_v24  ;;  %v12028_v10 = vmov 51  }
0x12ee   : > { %v3273_v11 = vadd.f32 %v3269_v19, %v3234_v35  ;;  %v3272_v20 = vadd.f32 %v3268_v8, %v3233_v46  ;;  %v9911_v35 = vmul.f32 %v9661_v27, %v12213_v60 }
0x12f0   : > { %v3281_v16 = vadd.f32 %v12341_v2, %v3273_v11  ;;  %v3280_v26 = vadd.f32 %v12341_v2, %v3272_v20  ;;  %v4969_v45 = vrot.slane %v9911_v35, %v7496_v29  ;;  %v4973_v8 = vrot.slane %v9911_v35, %v7498_v30 }
0x12f2   : > { %v3285_v59 = vrot.slane %v3281_v16, 7  ;;  %v3284_v28 = vrot.slane %v3280_v26, 7 }
0x12f4   : > { %3289 = vst [vmem:[%s8119_s27 + $0x18] sm:$0xe] %v3285_v59  ;;  %3288 = vst [vmem:[%s8119_s27 + $0x10] sm:$0xe] %v3284_v28 }
0x1329   : > { %v9853_v18 = vpop.permute.xlu1 %4848  ;;  %v9884_v38 = vpop.permute.xlu0 %4852 }
0x132a   : > { %12342 = vst [vmem:[#allocation40_spill] sm:$0xff] %v9853_v18  ;;  %12345 = vst [vmem:[#allocation44_spill] sm:$0xff] %v9884_v38 }
0x132d   : > { %v9857_v40 = vpop.permute.xlu1 %4850 }
0x132e   : > { %12343 = vst [vmem:[#allocation42_spill] sm:$0xff] %v9857_v40 }
0x133e   : > { %v4863_v36 = vpop.permute.xlu1 %4862 }
0x133f   : > { %v4881_v1 = vmul.f32 %v4869_v62, %v4863_v36  ;;  %v4882_v47 = vmul.f32 %v4873_v43, %v4863_v36  ;;  %v4883_v54 = vmul.f32 %v4877_v61, %v4863_v36  ;;  %v12353_v61 = vld [vmem:[#allocation12_spill] sm:$0xff] }
0x1341   : > { %4889 = vrot.lane.b32.xlu1 %v4882_v47, %s7312_s14  ;;  %4887 = vrot.lane.b32.xlu0 %v4881_v1, %s7312_s14 }
0x1345   : > { %4901 = vperm.xlu1 %7203, %v9246_v13   ;;  %4891 = vrot.lane.b32.xlu0 %v4883_v54, %s7312_s14 }
0x1349   : > { %3292 = vrot.lane.b32.xlu1 %v3281_v16, %s7289_s16  ;;  %v12351_v16 = vld [vmem:[#allocation11_spill] sm:$0xff] }
0x134a   : > { %7204 = vset.pattern.permute.xlu1 %v12027_v6 }
0x13b3   : > { %v9870_v17 = vpop.permute.xlu1 %4889  ;;  %v9886_v52 = vpop.permute.xlu0 %4887 }
0x13b4   : > { %12344 = vst [vmem:[#allocation64_spill] sm:$0xff] %v9870_v17  ;;  %12346 = vst [vmem:[#allocation45_spill] sm:$0xff] %v9886_v52 }
0x13b7   : > { %v9888_v50 = vpop.permute.xlu0 %4891 }
0x13b8   : > { %12347 = vst [vmem:[#allocation58_spill] sm:$0xff] %v9888_v50 }
0x13c4   : > { %v4902_v5 = vpop.permute.xlu1 %4901 }
0x13c5   : > { %v4920_v32 = vmul.f32 %v4908_v15, %v4902_v5  ;;  %v4921_v49 = vmul.f32 %v4912_v9, %v4902_v5  ;;  %v4922_v53 = vmul.f32 %v4916_v42, %v4902_v5  ;;  %v12354_v5 = vld [vmem:[#allocation18_spill] sm:$0xff] }
0x13c7   : > { %4926 = vrot.lane.b32.xlu0 %v4920_v32, %s7313_s17  ;;  %4928 = vrot.lane.b32.xlu1 %v4921_v49, %s7313_s17 }
0x13c8   : > { %v3293_v57 = vpop.permute.xlu1 %3292 }
0x13c9   : > { %3300 = vst.msk [vmem:[#allocation3 + $0x10] sm:$0x7] %vm464_vm2, %v3293_v57  ;;  %vm5120_vm2 = vcmask 136192  }
0x13cb   : > { %4939 = vperm.xlu1 %7204, %v9246_v13   ;;  %3290 = vrot.lane.b32.xlu0 %v3280_v26, %s7289_s16 }
0x13cf   : > { %4930 = vrot.lane.b32.xlu0 %v4922_v53, %s7313_s17  ;;  %7205 = vset.pattern.permute.xlu1 %v12026_v56 }
0x1439   : > { %v9890_v31 = vpop.permute.xlu0 %4926  ;;  %v9894_v4 = vpop.permute.xlu1 %4928 }
0x143a   : > { %12348 = vst [vmem:[#allocation13_spill] sm:$0xff] %v9890_v31  ;;  %12349 = vst [vmem:[#allocation21_spill] sm:$0xff] %v9894_v4 }
0x143d   : > { %v3291_v63 = vpop.permute.xlu0 %3290 }
0x143e   : > { %v3294_v13 = vsel %vm456_vm1, %v3291_v63, %v3293_v57  ;;  %3298 = vst.msk [vmem:[#allocation3] sm:$0x7] %vm461_vm0, %v3291_v63  ;;  %v12355_v63 = vld [vmem:[#allocation27_spill] sm:$0xff]  ;;  %vm5117_vm0 = vcmask 1045640  }
0x143f   : > { %3299 = vst [vmem:[#allocation3 + $0x8] sm:$0x7] %v3294_v13 }
0x1446   : > { %v9915_v41 = vld [vmem:[#allocation3] ss:$8 sm:$0x7]  ;;  %v9943_v47 = vld [vmem:[#allocation3 + $0x1] ss:$8 sm:$0x7] }
0x1447   : > { %v3337_v27 = vrot.slane %v9915_v41, %v7498_v30  ;;  %v3333_v2 = vrot.slane %v9915_v41, %v7496_v29  ;;  %v3341_v28 = vrot.slane %v9915_v41, %v12210_v14  ;;  %v3633_v15 = vrot.slane %v9943_v47, %v7496_v29 }
0x1448   : > { %v3641_v49 = vrot.slane %v9943_v47, %v12210_v14  ;;  %v3637_v57 = vrot.slane %v9943_v47, %v7498_v30 }
0x1449   : > { %v3346_v26 = vmul.f32 %v3337_v27, %v12351_v16  ;;  %v3345_v59 = vmul.f32 %v3333_v2, %v12351_v16  ;;  %v3445_v62 = vmul.f32 %v12352_v55, %v3333_v2  ;;  %v3347_v43 = vmul.f32 %v3341_v28, %v12351_v16 }
0x144a   : > { %v4940_v24 = vpop.permute.xlu1 %4939  ;;  %v3447_v36 = vmul.f32 %v12352_v55, %v3341_v28  ;;  %v3446_v1 = vmul.f32 %v12352_v55, %v3337_v27  ;;  %v3545_v54 = vmul.f32 %v12353_v61, %v3333_v2  ;;  %v3546_v22 = vmul.f32 %v12353_v61, %v3337_v27  ;;  %v12358_v55 = vld [vmem:[#allocation41_spill] sm:$0xff] }
0x144b   : > { %v4942_v48 = vmul.f32 %v4940_v24, %v9665_v33  ;;  %v4943_v7 = vmul.f32 %v4940_v24, %v9681_v39  ;;  %v4944_v58 = vmul.f32 %v4940_v24, %v9669_v44  ;;  %v3547_v9 = vmul.f32 %v12353_v61, %v3341_v28 }
0x144c   : > { %v3645_v32 = vmul.f32 %v3633_v15, %v12354_v5  ;;  %v3647_v42 = vmul.f32 %v3641_v49, %v12354_v5  ;;  %v3646_v53 = vmul.f32 %v3637_v57, %v12354_v5  ;;  %v3745_v13 = vmul.f32 %v12355_v63, %v3633_v15 }
0x144d   : > { %4950 = vrot.lane.b32.xlu1 %v4943_v7, %s7310_s29  ;;  %4948 = vrot.lane.b32.xlu0 %v4942_v48, %s7310_s29  ;;  %v3746_v24 = vmul.f32 %v12355_v63, %v3637_v57  ;;  %v9967_v48 = vld [vmem:[#allocation3 + $0x2] ss:$8 sm:$0x7]  ;;  %v3747_v7 = vmul.f32 %v12355_v63, %v3641_v49 }
0x144e   : > { %v3937_v2 = vrot.slane %v9967_v48, %v7498_v30 }
0x1451   : > { %4962 = vperm.xlu1 %7205, %v9904_v12   ;;  %4952 = vrot.lane.b32.xlu0 %v4944_v58, %s7310_s29  ;;  %v12356_v58 = vld [vmem:[#allocation30_spill] sm:$0xff] }
0x1452   : > { %v3847_v16 = vmul.f32 %v12356_v58, %v3641_v49 }
0x1455   : > { %7206 = vset.pattern.permute.xlu1 %v12028_v10 }
0x14bf   : > { %v9913_v46 = vpop.permute.xlu1 %4950 }
0x14c0   : > { %12350 = vst [vmem:[#allocation65_spill] sm:$0xff] %v9913_v46 }
0x14d0   : > { %v9921_v19 = vpop.permute.xlu1 %4962 }
0x14d1   : > { %v4981_v11 = vmul.f32 %v4969_v45, %v9921_v19  ;;  %v4982_v20 = vmul.f32 %v4973_v8, %v9921_v19  ;;  %v3846_v45 = vmul.f32 %v12356_v58, %v3637_v57  ;;  %v3933_v8 = vrot.slane %v9967_v48, %v7496_v29 }
0x14d3   : > { %4989 = vrot.lane.b32.xlu1 %v4982_v20, %s7314_s18  ;;  %4987 = vrot.lane.b32.xlu0 %v4981_v11, %s7314_s18  ;;  %v3845_v11 = vmul.f32 %v12356_v58, %v3633_v15  ;;  %v12357_v20 = vld [vmem:[#allocation25_spill] sm:$0xff]  ;;  %v12360_v15 = vld [vmem:[#allocation19_spill] sm:$0xff] }
0x14d4   : > { %v3945_v27 = vmul.f32 %v3933_v8, %v12357_v20 }
0x14d7   : > { %3353 = vrot.lane.b32.xlu0 %v3346_v26, %s7309_s28  ;;  %3351 = vrot.lane.b32.xlu1 %v3345_v59, %s7309_s28  ;;  %v3946_v26 = vmul.f32 %v3937_v2, %v12357_v20  ;;  %v3941_v59 = vrot.slane %v9967_v48, %v12210_v14 }
0x14d9   : > { %v3947_v28 = vmul.f32 %v3941_v59, %v12357_v20  ;;  %v12362_v20 = vld [vmem:[#allocation17_spill] sm:$0xff] }
0x14db   : > { %3451 = vrot.lane.b32.xlu0 %v3445_v62, %s7310_s29  ;;  %3355 = vrot.lane.b32.xlu1 %v3347_v43, %s7309_s28  ;;  %v4046_v62 = vmul.f32 %v12358_v55, %v3937_v2  ;;  %v3363_v43 = vmul.f32 %v9915_v41, %v12211_v23 }
0x14dd   : > { %v3376_v5 = vrot.slane %v3363_v43, %v7498_v30 }
0x14df   : > { %3455 = vrot.lane.b32.xlu0 %v3447_v36, %s7310_s29  ;;  %3453 = vrot.lane.b32.xlu1 %v3446_v1, %s7310_s29  ;;  %v4045_v36 = vmul.f32 %v12358_v55, %v3933_v8  ;;  %v12359_v1 = vld [vmem:[#allocation48_spill] sm:$0xff]  ;;  %v3385_v57 = vmul.f32 %v3376_v5, %v12360_v15 }
0x14e0   : > { %v4146_v61 = vmul.f32 %v12359_v1, %v3937_v2  ;;  %v4145_v49 = vmul.f32 %v12359_v1, %v3933_v8  ;;  %v4147_v63 = vmul.f32 %v12359_v1, %v3941_v59  ;;  %v12365_v1 = vld [vmem:[#allocation15_spill] sm:$0xff] }
0x14e3   : > { %3551 = vrot.lane.b32.xlu0 %v3545_v54, %s7311_s30  ;;  %3553 = vrot.lane.b32.xlu1 %v3546_v22, %s7311_s30  ;;  %v3372_v54 = vrot.slane %v3363_v43, %v7496_v29  ;;  %v4047_v22 = vmul.f32 %v12358_v55, %v3941_v59  ;;  %v12364_v55 = vld [vmem:[#allocation22_spill] sm:$0xff] }
0x14e7   : > { %3555 = vrot.lane.b32.xlu0 %v3547_v9, %s7311_s30  ;;  %3651 = vrot.lane.b32.xlu1 %v3645_v32, %s7309_s28  ;;  %v3384_v9 = vmul.f32 %v3372_v54, %v12360_v15  ;;  %v3402_v32 = vmul.f32 %v9915_v41, %v12212_v37 }
0x14e9   : > { %v3411_v8 = vrot.slane %v3402_v32, %v7496_v29  ;;  %v3419_v59 = vrot.slane %v3402_v32, %v12210_v14 }
0x14eb   : > { %3655 = vrot.lane.b32.xlu0 %v3647_v42, %s7309_s28  ;;  %3653 = vrot.lane.b32.xlu1 %v3646_v53, %s7309_s28  ;;  %v3415_v42 = vrot.slane %v3402_v32, %v7498_v30  ;;  %v3463_v53 = vmul.f32 %v9915_v41, %v12213_v60  ;;  %v12366_v32 = vld [vmem:[#allocation24_spill] sm:$0xff] }
0x14ed   : > { %v3476_v58 = vrot.slane %v3463_v53, %v7498_v30  ;;  %v3472_v54 = vrot.slane %v3463_v53, %v7496_v29 }
0x14ef   : > { %3751 = vrot.lane.b32.xlu0 %v3745_v13, %s7310_s29  ;;  %3753 = vrot.lane.b32.xlu1 %v3746_v24, %s7310_s29  ;;  %v12361_v13 = vld [vmem:[#allocation16_spill] sm:$0xff]  ;;  %v3484_v5 = vmul.f32 %v3472_v54, %v12362_v20  ;;  %v12370_v54 = vld [vmem:[#allocation31_spill] sm:$0xff] }
0x14f0   : > { %v3424_v24 = vmul.f32 %v3415_v42, %v12361_v13  ;;  %v10055_v42 = vmul.f32 %v9943_v47, %v12213_v60 }
0x14f3   : > { %3755 = vrot.lane.b32.xlu0 %v3747_v7, %s7310_s29  ;;  %3853 = vrot.lane.b32.xlu1 %v3846_v45, %s7311_s30  ;;  %v3380_v7 = vrot.slane %v3363_v43, %v12210_v14  ;;  %v3502_v45 = vmul.f32 %v9915_v41, %v12215_v34 }
0x14f5   : > { %v3515_v2 = vrot.slane %v3502_v45, %v7498_v30 }
0x14f7   : > { %3851 = vrot.lane.b32.xlu0 %v3845_v11, %s7311_s30  ;;  %3951 = vrot.lane.b32.xlu1 %v3945_v27, %s7309_s28  ;;  %v3386_v11 = vmul.f32 %v3380_v7, %v12360_v15  ;;  %v3485_v27 = vmul.f32 %v3476_v58, %v12362_v20  ;;  %v10044_v15 = vmul.f32 %v9943_v47, %v12212_v37 }
0x14f8   : > { %v3776_v7 = vrot.slane %v10055_v42, %v7498_v30  ;;  %v10066_v58 = vmul.f32 %v9943_v47, %v12215_v34 }
0x14fb   : > { %3855 = vrot.lane.b32.xlu0 %v3847_v16, %s7311_s30  ;;  %3953 = vrot.lane.b32.xlu1 %v3946_v26, %s7309_s28  ;;  %v12363_v16 = vld [vmem:[#allocation9_spill] sm:$0xff] }
0x14fc   : > { %v3563_v26 = vmul.f32 %v9915_v41, %v12363_v16  ;;  %v3425_v41 = vmul.f32 %v3419_v59, %v12361_v13  ;;  %v10077_v59 = vmul.f32 %v9943_v47, %v12363_v16 }
0x14fe   : > { %v3576_v43 = vrot.slane %v3563_v26, %v7498_v30 }
0x14ff   : > { %3955 = vrot.lane.b32.xlu0 %v3947_v28, %s7309_s28  ;;  %4053 = vrot.lane.b32.xlu1 %v4046_v62, %s7310_s29  ;;  %v3423_v28 = vmul.f32 %v3411_v8, %v12361_v13  ;;  %v3524_v62 = vmul.f32 %v3515_v2, %v12364_v55  ;;  %v3519_v2 = vrot.slane %v3502_v45, %v12210_v14 }
0x1503   : > { %4051 = vrot.lane.b32.xlu0 %v4045_v36, %s7310_s29  ;;  %4153 = vrot.lane.b32.xlu1 %v4146_v61, %s7311_s30  ;;  %v3663_v36 = vmul.f32 %v9943_v47, %v12211_v23  ;;  %v3585_v61 = vmul.f32 %v3576_v43, %v12365_v1  ;;  %v12369_v43 = vld [vmem:[#allocation29_spill] sm:$0xff] }
0x1507   : > { %4055 = vrot.lane.b32.xlu0 %v4047_v22, %s7310_s29  ;;  %3390 = vrot.lane.b32.xlu1 %v3384_v9, %s7312_s14  ;;  %v3676_v22 = vrot.slane %v3663_v36, %v7498_v30  ;;  %v3480_v9 = vrot.slane %v3463_v53, %v12210_v14  ;;  %v12367_v53 = vld [vmem:[#allocation26_spill] sm:$0xff] }
0x1509   : > { %v3486_v13 = vmul.f32 %v3480_v9, %v12362_v20  ;;  %v3815_v20 = vrot.slane %v10066_v58, %v7498_v30  ;;  %v3580_v9 = vrot.slane %v3563_v26, %v12210_v14 }
0x150b   : > { %4151 = vrot.lane.b32.xlu0 %v4145_v49, %s7311_s30  ;;  %3392 = vrot.lane.b32.xlu1 %v3385_v57, %s7312_s14  ;;  %v3685_v49 = vmul.f32 %v3676_v22, %v12366_v32  ;;  %v3715_v57 = vrot.slane %v10044_v15, %v7498_v30 }
0x150f   : > { %4155 = vrot.lane.b32.xlu0 %v4147_v63, %s7311_s30  ;;  %3431 = vrot.lane.b32.xlu1 %v3424_v24, %s7313_s17  ;;  %v3511_v63 = vrot.slane %v3502_v45, %v7496_v29  ;;  %v3724_v24 = vmul.f32 %v3715_v57, %v12367_v53  ;;  %v3876_v45 = vrot.slane %v10077_v59, %v7498_v30 }
0x1510   : > { %v3586_v57 = vmul.f32 %v3580_v9, %v12365_v1 }
0x1511   : > { %v3523_v8 = vmul.f32 %v3511_v63, %v12364_v55  ;;  %v3885_v22 = vmul.f32 %v3876_v45, %v12370_v54  ;;  %v12371_v63 = vld [vmem:[#allocation33_spill] sm:$0xff]  ;;  %v3711_v45 = vrot.slane %v10044_v15, %v7496_v29 }
0x1513   : > { %3394 = vrot.lane.b32.xlu0 %v3386_v11, %s7312_s14  ;;  %3492 = vrot.lane.b32.xlu1 %v3485_v27, %s7314_s18  ;;  %v12368_v11 = vld [vmem:[#allocation28_spill] sm:$0xff] }
0x1514   : > { %v3785_v27 = vmul.f32 %v3776_v7, %v12368_v11  ;;  %v3680_v7 = vrot.slane %v3663_v36, %v12210_v14 }
0x1517   : > { %3429 = vrot.lane.b32.xlu0 %v3423_v28, %s7313_s17  ;;  %3531 = vrot.lane.b32.xlu1 %v3524_v62, %s7315_s19  ;;  %v3572_v28 = vrot.slane %v3563_v26, %v7496_v29  ;;  %v3525_v62 = vmul.f32 %v3519_v2, %v12364_v55 }
0x1519   : > { %v3584_v47 = vmul.f32 %v3572_v28, %v12365_v1  ;;  %v10123_v28 = vpop.permute.xlu0 %4930 }
0x151a   : > { %12373 = vst [vmem:[#allocation47_spill] sm:$0xff] %v10123_v28 }
0x151b   : > { %3433 = vrot.lane.b32.xlu0 %v3425_v41, %s7313_s17  ;;  %3592 = vrot.lane.b32.xlu1 %v3585_v61, %s7316_s20  ;;  %v3824_v41 = vmul.f32 %v3815_v20, %v12369_v43  ;;  %v10088_v61 = vmul.f32 %v9967_v48, %v12211_v23  ;;  %v10121_v20 = vmul.f32 %v9967_v48, %v12215_v34 }
0x151d   : > { %v3976_v55 = vrot.slane %v10088_v61, %v7498_v30  ;;  %v10137_v9 = vpop.permute.xlu0 %4948 }
0x151e   : > { %12375 = vst [vmem:[#allocation49_spill] sm:$0xff] %v10137_v9 }
0x151f   : > { %3490 = vrot.lane.b32.xlu0 %v3484_v5, %s7314_s18  ;;  %3692 = vrot.lane.b32.xlu1 %v3685_v49, %s7312_s14  ;;  %v10099_v5 = vmul.f32 %v9967_v48, %v12212_v37  ;;  %v3672_v49 = vrot.slane %v3663_v36, %v7496_v29  ;;  %v12374_v36 = vld [vmem:[#allocation43_spill] sm:$0xff] }
0x1521   : > { %v4015_v26 = vrot.slane %v10099_v5, %v7498_v30 }
0x1523   : > { %3494 = vrot.lane.b32.xlu0 %v3486_v13, %s7314_s18  ;;  %3731 = vrot.lane.b32.xlu1 %v3724_v24, %s7313_s17  ;;  %v3985_v13 = vmul.f32 %v3976_v55, %v12371_v63  ;;  %v10110_v24 = vmul.f32 %v9967_v48, %v12213_v60  ;;  %v12376_v55 = vld [vmem:[#allocation46_spill] sm:$0xff] }
0x1525   : > { %v4076_v1 = vrot.slane %v10110_v24, %v7498_v30 }
0x1527   : > { %3529 = vrot.lane.b32.xlu0 %v3523_v8, %s7315_s19  ;;  %3792 = vrot.lane.b32.xlu1 %v3785_v27, %s7314_s18  ;;  %v3684_v8 = vmul.f32 %v3672_v49, %v12366_v32  ;;  %v12372_v27 = vld [vmem:[#allocation34_spill] sm:$0xff] }
0x1528   : > { %v4024_v2 = vmul.f32 %v4015_v26, %v12372_v27 }
0x152b   : > { %3533 = vrot.lane.b32.xlu0 %v3525_v62, %s7315_s19  ;;  %3831 = vrot.lane.b32.xlu1 %v3824_v41, %s7315_s19  ;;  %v3686_v62 = vmul.f32 %v3680_v7, %v12366_v32  ;;  %v4085_v41 = vmul.f32 %v4076_v1, %v12374_v36  ;;  %v3723_v32 = vmul.f32 %v3711_v45, %v12367_v53  ;;  %v12378_v7 = vld [vmem:[#allocation71_spill] sm:$0xff] }
0x152f   : > { %3590 = vrot.lane.b32.xlu0 %v3584_v47, %s7316_s20  ;;  %3892 = vrot.lane.b32.xlu1 %v3885_v22, %s7316_s20  ;;  %v4115_v47 = vrot.slane %v10121_v20, %v7498_v30  ;;  %v10135_v22 = vmul.f32 %v9967_v48, %v12363_v16  ;;  %v10149_v48 = vpop.permute.xlu0 %4952 }
0x1530   : > { %12377 = vst [vmem:[#allocation23_spill] sm:$0xff] %v10149_v48 }
0x1531   : > { %v4124_v49 = vmul.f32 %v4115_v47, %v12376_v55 }
0x1533   : > { %3594 = vrot.lane.b32.xlu0 %v3586_v57, %s7316_s20  ;;  %3992 = vrot.lane.b32.xlu1 %v3985_v13, %s7312_s14  ;;  %v3719_v57 = vrot.slane %v10044_v15, %v12210_v14  ;;  %v4176_v13 = vrot.slane %v10135_v22, %v7498_v30 }
0x1535   : > { %v3725_v26 = vmul.f32 %v3719_v57, %v12367_v53 }
0x1537   : > { %3690 = vrot.lane.b32.xlu0 %v3684_v8, %s7312_s14  ;;  %4031 = vrot.lane.b32.xlu1 %v4024_v2, %s7313_s17  ;;  %v4185_v8 = vmul.f32 %v4176_v13, %v12378_v7  ;;  %v3772_v2 = vrot.slane %v10055_v42, %v7496_v29  ;;  %v3819_v13 = vrot.slane %v10066_v58, %v12210_v14 }
0x153b   : > { %3694 = vrot.lane.b32.xlu0 %v3686_v62, %s7312_s14  ;;  %4092 = vrot.lane.b32.xlu1 %v4085_v41, %s7314_s18  ;;  %v3784_v62 = vmul.f32 %v3772_v2, %v12368_v11  ;;  %v3780_v41 = vrot.slane %v10055_v42, %v12210_v14  ;;  %v3825_v2 = vmul.f32 %v3819_v13, %v12369_v43 }
0x153c   : > { %v3972_v13 = vrot.slane %v10088_v61, %v7496_v29 }
0x153d   : > { %v3786_v47 = vmul.f32 %v3780_v41, %v12368_v11 }
0x153f   : > { %3729 = vrot.lane.b32.xlu0 %v3723_v32, %s7313_s17  ;;  %4131 = vrot.lane.b32.xlu1 %v4124_v49, %s7315_s19  ;;  %v3811_v32 = vrot.slane %v10066_v58, %v7496_v29 }
0x1541   : > { %v3823_v42 = vmul.f32 %v3811_v32, %v12369_v43  ;;  %v3880_v32 = vrot.slane %v10077_v59, %v12210_v14 }
0x1543   : > { %3733 = vrot.lane.b32.xlu0 %v3725_v26, %s7313_s17  ;;  %4192 = vrot.lane.b32.xlu1 %v4185_v8, %s7316_s20  ;;  %v12025_v26 = vmov 52   ;;  %v3886_v43 = vmul.f32 %v3880_v32, %v12370_v54  ;;  %v4011_v32 = vrot.slane %v10099_v5, %v7496_v29 }
0x1545   : > { %v10157_v15 = vpop.permute.xlu1 %4989  ;;  %v10159_v1 = vpop.permute.xlu0 %4987 }
0x1546   : > { %12379 = vst [vmem:[#allocation61_spill] sm:$0xff] %v10157_v15  ;;  %12380 = vst [vmem:[#allocation60_spill] sm:$0xff] %v10159_v1 }
0x1547   : > { %3790 = vrot.lane.b32.xlu0 %v3784_v62, %s7314_s18  ;;  %5001 = vperm.xlu1 %7206, %v9904_v12   ;;  %v3872_v62 = vrot.slane %v10077_v59, %v7496_v29  ;;  %v3980_v59 = vrot.slane %v10088_v61, %v12210_v14  ;;  %v4019_v61 = vrot.slane %v10099_v5, %v12210_v14 }
0x1548   : > { %v4080_v5 = vrot.slane %v10110_v24, %v12210_v14 }
0x1549   : > { %v10166_v53 = vpop.permute.xlu1 %3351  ;;  %v10168_v45 = vpop.permute.xlu0 %3353  ;;  %v3884_v58 = vmul.f32 %v3872_v62, %v12370_v54  ;;  %v3984_v62 = vmul.f32 %v3972_v13, %v12371_v63  ;;  %v3986_v54 = vmul.f32 %v3980_v59, %v12371_v63  ;;  %v4023_v13 = vmul.f32 %v4011_v32, %v12372_v27 }
0x154a   : > { %v4025_v63 = vmul.f32 %v4019_v61, %v12372_v27  ;;  %v4072_v59 = vrot.slane %v10110_v24, %v7496_v29  ;;  %v4086_v27 = vmul.f32 %v4080_v5, %v12374_v36  ;;  %v4111_v61 = vrot.slane %v10121_v20, %v7496_v29 }
0x154b   : > { %3794 = vrot.lane.b32.xlu0 %v3786_v47, %s7314_s18  ;;  %7207 = vset.pattern.permute.xlu1 %v12025_v26  ;;  %v4119_v24 = vrot.slane %v10121_v20, %v12210_v14  ;;  %v4172_v5 = vrot.slane %v10135_v22, %v7496_v29  ;;  %v4180_v20 = vrot.slane %v10135_v22, %v12210_v14  ;;  %v3301_v22 = vld [vmem:[#allocation3] ss:$8 sm:$0x3] }
0x154c   : > { %v4084_v32 = vmul.f32 %v4072_v59, %v12374_v36  ;;  %v4123_v59 = vmul.f32 %v4111_v61, %v12376_v55  ;;  %v10296_v15 = vmul.f32 %v9674_v21, %v3301_v22 }
0x154d   : > { %v10174_v49 = vpop.permute.xlu1 %3355  ;;  %v10176_v57 = vpop.permute.xlu0 %3451  ;;  %v4125_v36 = vmul.f32 %v4119_v24, %v12376_v55  ;;  %v4184_v61 = vmul.f32 %v4172_v5, %v12378_v7  ;;  %v4186_v55 = vmul.f32 %v4180_v20, %v12378_v7  ;;  %v4977_v24 = vrot.slane %v9911_v35, %v12210_v14 }
0x154e   : > { %v3317_v20 = vrot.slane %v10296_v15, %v7498_v30 }
0x154f   : > { %3829 = vrot.lane.b32.xlu0 %v3823_v42, %s7315_s19 }
0x1551   : > { %v10183_v11 = vpop.permute.xlu1 %3453  ;;  %v10185_v8 = vpop.permute.xlu0 %3455 }
0x1553   : > { %3833 = vrot.lane.b32.xlu0 %v3825_v2, %s7315_s19 }
0x1555   : > { %v10191_v41 = vpop.permute.xlu1 %3553  ;;  %v10193_v47 = vpop.permute.xlu0 %3551 }
0x1557   : > { %3890 = vrot.lane.b32.xlu0 %v3884_v58, %s7316_s20 }
0x1559   : > { %v10199_v42 = vpop.permute.xlu1 %3651  ;;  %v10201_v26 = vpop.permute.xlu0 %3555 }
0x155a   : > { %12381 = vst [vmem:[#allocation35_spill] sm:$0xff] %v10199_v42  ;;  %v10367_v42 = vld [vmem:[#allocation3 + $0x5] ss:$8 sm:$0x7] }
0x155b   : > { %3894 = vrot.lane.b32.xlu0 %v3886_v43, %s7316_s20  ;;  %12395 = vst [vmem:[#allocation69_spill] sm:$0xff] %v10367_v42 }
0x155d   : > { %v10207_v2 = vpop.permute.xlu1 %3653  ;;  %v10209_v56 = vpop.permute.xlu0 %3655 }
0x155f   : > { %3990 = vrot.lane.b32.xlu0 %v3984_v62, %s7312_s14 }
0x1561   : > { %v10215_v58 = vpop.permute.xlu1 %3753  ;;  %v10217_v6 = vpop.permute.xlu0 %3751 }
0x1562   : > { %12382 = vst [vmem:[#allocation66_spill] sm:$0xff] %v10217_v6 }
0x1563   : > { %3994 = vrot.lane.b32.xlu0 %v3986_v54, %s7312_s14 }
0x1565   : > { %v10223_v43 = vpop.permute.xlu1 %3853  ;;  %v10225_v10 = vpop.permute.xlu0 %3755 }
0x1567   : > { %4029 = vrot.lane.b32.xlu0 %v4023_v13, %s7313_s17 }
0x1569   : > { %v10231_v62 = vpop.permute.xlu1 %3951  ;;  %v10233_v0 = vpop.permute.xlu0 %3851 }
0x156a   : > { %12383 = vst [vmem:[#allocation50_spill] sm:$0xff] %v10231_v62  ;;  %12384 = vst [vmem:[#allocation51_spill] sm:$0xff] %v10233_v0 }
0x156b   : > { %4033 = vrot.lane.b32.xlu0 %v4025_v63, %s7313_s17 }
0x156d   : > { %v10239_v54 = vpop.permute.xlu1 %3953  ;;  %v10241_v60 = vpop.permute.xlu0 %3855 }
0x156f   : > { %4090 = vrot.lane.b32.xlu0 %v4084_v32, %s7314_s18 }
0x1571   : > { %v10247_v13 = vpop.permute.xlu1 %4053  ;;  %v10249_v37 = vpop.permute.xlu0 %3955 }
0x1573   : > { %4094 = vrot.lane.b32.xlu0 %v4086_v27, %s7314_s18 }
0x1575   : > { %v10255_v63 = vpop.permute.xlu1 %4153  ;;  %v10257_v23 = vpop.permute.xlu0 %4051 }
0x1576   : > { %12385 = vst [vmem:[#allocation67_spill] sm:$0xff] %v10255_v63  ;;  %12386 = vst [vmem:[#allocation52_spill] sm:$0xff] %v10257_v23 }
0x1577   : > { %4129 = vrot.lane.b32.xlu0 %v4123_v59, %s7315_s19 }
0x1579   : > { %v10263_v32 = vpop.permute.xlu1 %3390  ;;  %v10265_v48 = vpop.permute.xlu0 %4055 }
0x157b   : > { %4133 = vrot.lane.b32.xlu0 %v4125_v36, %s7315_s19  ;;  %v4983_v36 = vmul.f32 %v4977_v24, %v9921_v19  ;;  %v3358_v24 = vsel %vm522_vm8, %v10168_v45, %v10174_v49  ;;  %v3458_v49 = vsel %vm639_vm11, %v10183_v11, %v10185_v8 }
0x157d   : > { %v10271_v27 = vpop.permute.xlu1 %3392  ;;  %v10273_v28 = vpop.permute.xlu0 %4151 }
0x157e   : > { %12387 = vst [vmem:[#allocation53_spill] sm:$0xff] %v10273_v28 }
0x157f   : > { %4190 = vrot.lane.b32.xlu0 %v4184_v61, %s7316_s20 }
0x1581   : > { %v10279_v59 = vpop.permute.xlu1 %3431  ;;  %v10281_v50 = vpop.permute.xlu0 %4155 }
0x1583   : > { %4194 = vrot.lane.b32.xlu0 %v4186_v55, %s7316_s20 }
0x1585   : > { %v10288_v38 = vpop.permute.xlu1 %3492  ;;  %v3395_v5 = vpop.permute.xlu0 %3394 }
0x1586   : > { %v3397_v22 = vsel %vm569_vm9, %v10271_v27, %v3395_v5 }
0x1587   : > { %4991 = vrot.lane.b32.xlu0 %v4983_v36, %s7314_s18  ;;  %v3321_v36 = vmul.f32 %v3317_v20, %v9882_v3  ;;  %v3603_v20 = vld [vmem:[#allocation3 + $0x1] ss:$8 sm:$0x3] }
0x1589   : > { %v10291_v61 = vpop.permute.xlu1 %3531  ;;  %v10293_v1 = vpop.permute.xlu0 %3429  ;;  %v3362_v9 = vadd.f32 %v3358_v24, %v3321_v36 }
0x158b   : > { %v3401_v52 = vadd.f32 %v3397_v22, %v3362_v9 }
0x158d   : > { %v10298_v7 = vpop.permute.xlu1 %3592  ;;  %v3434_v35 = vpop.permute.xlu0 %3433 }
0x158e   : > { %v3436_v4 = vsel %vm616_vm10, %v10279_v59, %v3434_v35 }
0x158f   : > { %v3440_v17 = vadd.f32 %v3436_v4, %v3401_v52  ;;  %v10330_v4 = vmul.f32 %v9674_v21, %v3603_v20 }
0x1591   : > { %v10302_v19 = vpop.permute.xlu1 %3692  ;;  %v10304_v55 = vpop.permute.xlu0 %3490  ;;  %v3462_v24 = vadd.f32 %v3458_v49, %v3440_v17  ;;  %v3617_v8 = vrot.slane %v10330_v4, %v7498_v30  ;;  %v3558_v17 = vsel %vm754_vm14, %v10191_v41, %v10201_v26 }
0x1595   : > { %v10312_v46 = vpop.permute.xlu1 %3731  ;;  %v3495_v31 = vpop.permute.xlu0 %3494 }
0x1596   : > { %12388 = vst [vmem:[#allocation62_spill] sm:$0xff] %v10312_v46  ;;  %v3497_v5 = vsel %vm685_vm12, %v10288_v38, %v3495_v31 }
0x1597   : > { %v3501_v52 = vadd.f32 %v3497_v5, %v3462_v24  ;;  %v12389_v24 = vld [vmem:[#allocation20_spill] sm:$0xff] }
0x1598   : > { %v3621_v21 = vmul.f32 %v3617_v8, %v12389_v24 }
0x1599   : > { %v10316_v18 = vpop.permute.xlu1 %3792  ;;  %v10318_v40 = vpop.permute.xlu0 %3529 }
0x159d   : > { %v3534_v36 = vpop.permute.xlu0 %3533  ;;  %v10325_v28 = vpop.permute.xlu1 %3831 }
0x159e   : > { %v3536_v9 = vsel %vm731_vm13, %v10291_v61, %v3534_v36 }
0x159f   : > { %v3540_v35 = vadd.f32 %v3536_v9, %v3501_v52 }
0x15a1   : > { %v10332_v22 = vpop.permute.xlu0 %3590  ;;  %v10339_v31 = vpop.permute.xlu1 %3892  ;;  %v3562_v49 = vadd.f32 %v3558_v17, %v3540_v35 }
0x15a5   : > { %v3595_v23 = vpop.permute.xlu0 %3594  ;;  %v10346_v52 = vpop.permute.xlu1 %3992 }
0x15a6   : > { %v3597_v5 = vsel %vm800_vm15, %v10298_v7, %v3595_v23  ;;  %v3658_v23 = vsel %vm522_vm8, %v10207_v2, %v10209_v56 }
0x15a7   : > { %v3601_v20 = vadd.f32 %v3597_v5, %v3562_v49 }
0x15a9   : > { %v3623_v36 = vadd.f32 %v3621_v21, %v3601_v20  ;;  %v10344_v9 = vpop.permute.xlu0 %3690  ;;  %v10348_v0 = vpop.permute.xlu1 %4031 }
0x15aa   : > { %12390 = vst [vmem:[#allocation36_spill] sm:$0xff] %v10344_v9 }
0x15ab   : > { %v3662_v49 = vadd.f32 %v3658_v23, %v3623_v36  ;;  %v3903_v23 = vld [vmem:[#allocation3 + $0x2] ss:$8 sm:$0x3] }
0x15ad   : > { %v3695_v62 = vpop.permute.xlu0 %3694  ;;  %v10352_v6 = vpop.permute.xlu1 %4092 }
0x15ae   : > { %v3697_v8 = vsel %vm569_vm9, %v10302_v19, %v3695_v62  ;;  %v3758_v62 = vsel %vm639_vm11, %v10215_v58, %v10225_v10  ;;  %v10385_v10 = vld [vmem:[%s11828_s1] sm:$0x3] }
0x15af   : > { %v3701_v20 = vadd.f32 %v3697_v8, %v3662_v49 }
0x15b1   : > { %v10350_v16 = vpop.permute.xlu0 %3729  ;;  %v10361_v17 = vpop.permute.xlu1 %4131 }
0x15b2   : > { %12391 = vst [vmem:[#allocation37_spill] sm:$0xff] %v10350_v16  ;;  %12393 = vst [vmem:[#allocation54_spill] sm:$0xff] %v10361_v17 }
0x15b5   : > { %v3734_v26 = vpop.permute.xlu0 %3733  ;;  %v10371_v56 = vpop.permute.xlu1 %4192 }
0x15b6   : > { %v3736_v21 = vsel %vm616_vm10, %v10312_v46, %v3734_v26  ;;  %12396 = vst [vmem:[#allocation56_spill] sm:$0xff] %v10371_v56 }
0x15b7   : > { %v3740_v16 = vadd.f32 %v3736_v21, %v3701_v20 }
0x15b9   : > { %v10354_v35 = vpop.permute.xlu0 %3790  ;;  %v3762_v26 = vadd.f32 %v3758_v62, %v3740_v16 }
0x15ba   : > { %12392 = vst [vmem:[#allocation68_spill] sm:$0xff] %v10354_v35  ;;  %v4999_v35 = vmul.f32 %v10367_v42, %v12215_v34 }
0x15bc   : > { %v5008_v49 = vrot.slane %v4999_v35, %v7496_v29  ;;  %v5012_v21 = vrot.slane %v4999_v35, %v7498_v30  ;;  %v5016_v62 = vrot.slane %v4999_v35, %v12210_v14 }
0x15bd   : > { %v3795_v5 = vpop.permute.xlu0 %3794 }
0x15be   : > { %v3797_v36 = vsel %vm685_vm12, %v10316_v18, %v3795_v5  ;;  %v10388_v5 = vmul.f32 %v10385_v10, %v3903_v23 }
0x15c0   : > { %12397 = vst [vmem:[#allocation57_spill] sm:$0xff] %v10388_v5 }
0x15c1   : > { %v10365_v9 = vpop.permute.xlu0 %3829 }
0x15c2   : > { %12394 = vst [vmem:[#allocation55_spill] sm:$0xff] %v10365_v9  ;;  %v3801_v9 = vadd.f32 %v3797_v36, %v3762_v26  ;;  %v3917_v26 = vrot.slane %v10388_v5, %v7498_v30 }
0x15c5   : > { %v3834_v8 = vpop.permute.xlu0 %3833 }
0x15c6   : > { %v3836_v20 = vsel %vm731_vm13, %v10325_v28, %v3834_v8  ;;  %v5002_v34 = vpop.permute.xlu1 %5001 }
0x15c7   : > { %v5020_v42 = vmul.f32 %v5008_v49, %v5002_v34  ;;  %v5021_v46 = vmul.f32 %v5012_v21, %v5002_v34  ;;  %v3840_v16 = vadd.f32 %v3836_v20, %v3801_v9  ;;  %v5022_v36 = vmul.f32 %v5016_v62, %v5002_v34 }
0x15c8   : > { %v3858_v49 = vsel %vm754_vm14, %v10223_v43, %v10241_v60  ;;  %v12044_v62 = vmov 53  }
0x15c9   : > { %5028 = vrot.lane.b32.xlu1 %v5021_v46, %s7315_s19  ;;  %5026 = vrot.lane.b32.xlu0 %v5020_v42, %s7315_s19  ;;  %v10393_v8 = vpop.permute.xlu0 %3890  ;;  %v3862_v9 = vadd.f32 %v3858_v49, %v3840_v16  ;;  %v12399_v42 = vld [vmem:[#allocation32_spill] sm:$0xff]  ;;  %v3958_v16 = vsel %vm522_vm8, %v10239_v54, %v10249_v37 }
0x15ca   : > { %12398 = vst [vmem:[#allocation63_spill] sm:$0xff] %v10393_v8  ;;  %v3921_v23 = vmul.f32 %v3917_v26, %v12399_v42 }
0x15cd   : > { %5039 = vperm.xlu1 %7207, %v9904_v12   ;;  %5030 = vrot.lane.b32.xlu0 %v5022_v36, %s7315_s19  ;;  %v3895_v35 = vpop.permute.xlu0 %3894 }
0x15ce   : > { %v3897_v46 = vsel %vm800_vm15, %v10339_v31, %v3895_v35 }
0x15cf   : > { %v3901_v21 = vadd.f32 %v3897_v46, %v3862_v9 }
0x15d1   : > { %v3923_v34 = vadd.f32 %v3921_v23, %v3901_v21  ;;  %v10405_v20 = vpop.permute.xlu0 %3990  ;;  %7208 = vset.pattern.permute.xlu1 %v12044_v62  ;;  %v4058_v21 = vsel %vm639_vm11, %v10247_v13, %v10265_v48  ;;  %v4158_v48 = vsel %vm754_vm14, %v10255_v63, %v10281_v50 }
0x15d3   : > { %v3962_v26 = vadd.f32 %v3958_v16, %v3923_v34 }
0x15d5   : > { %v3995_v14 = vpop.permute.xlu0 %3994 }
0x15d6   : > { %v3997_v36 = vsel %vm569_vm9, %v10346_v52, %v3995_v14 }
0x15d7   : > { %v4001_v35 = vadd.f32 %v3997_v36, %v3962_v26 }
0x15d9   : > { %v10408_v60 = vpop.permute.xlu0 %4029 }
0x15da   : > { %12400 = vst [vmem:[#allocation38_spill] sm:$0xff] %v10408_v60  ;;  %v4202_v60 = vld [vmem:[#allocation3 + $0x3] ss:$8 sm:$0x3] }
0x15dd   : > { %v4034_v5 = vpop.permute.xlu0 %4033 }
0x15de   : > { %v4036_v9 = vsel %vm616_vm10, %v10348_v0, %v4034_v5  ;;  %v10429_v5 = vmul.f32 %v10385_v10, %v4202_v60 }
0x15df   : > { %v4040_v46 = vadd.f32 %v4036_v9, %v4001_v35 }
0x15e0   : > { %12403 = vst [vmem:[#allocation59_spill] sm:$0xff] %v10429_v5  ;;  %v4216_v26 = vrot.slane %v10429_v5, %v7498_v30  ;;  %v12410_v5 = vld [vmem:[#allocation85_spill] sm:$0xff] }
0x15e1   : > { %v10410_v8 = vpop.permute.xlu0 %4090  ;;  %v4062_v37 = vadd.f32 %v4058_v21, %v4040_v46  ;;  %v12406_v21 = vld [vmem:[#allocation81_spill] sm:$0xff] }
0x15e2   : > { %12401 = vst [vmem:[#allocation39_spill] sm:$0xff] %v10410_v8 }
0x15e5   : > { %v4095_v49 = vpop.permute.xlu0 %4094 }
0x15e6   : > { %v4097_v62 = vsel %vm685_vm12, %v10352_v6, %v4095_v49 }
0x15e7   : > { %v4101_v34 = vadd.f32 %v4097_v62, %v4062_v37  ;;  %v12407_v37 = vld [vmem:[#allocation74_spill] sm:$0xff] }
0x15e9   : > { %v10419_v23 = vpop.permute.xlu0 %4129 }
0x15ea   : > { %12402 = vst [vmem:[#allocation70_spill] sm:$0xff] %v10419_v23  ;;  %v12409_v23 = vld [vmem:[#allocation75_spill] sm:$0xff] }
0x15ed   : > { %v4134_v8 = vpop.permute.xlu0 %4133 }
0x15ee   : > { %v4136_v14 = vsel %vm731_vm13, %v10361_v17, %v4134_v8  ;;  %v12405_v8 = vld [vmem:[#allocation72_spill] sm:$0xff] }
0x15ef   : > { %v4140_v16 = vadd.f32 %v4136_v14, %v4101_v34  ;;  %v4220_v62 = vmul.f32 %v4216_v26, %v12405_v8  ;;  %v4257_v14 = vsel %vm522_vm8, %v12407_v37, %v12406_v21  ;;  %v12425_v37 = vld [vmem:[#allocation99_spill] sm:$0xff] }
0x15f1   : > { %v10431_v36 = vpop.permute.xlu0 %4190  ;;  %v4162_v49 = vadd.f32 %v4158_v48, %v4140_v16  ;;  %v12411_v16 = vld [vmem:[#allocation76_spill] sm:$0xff] }
0x15f2   : > { %12404 = vst [vmem:[#allocation10_spill] sm:$0xff] %v10431_v36  ;;  %v12408_v36 = vld [vmem:[#allocation83_spill] sm:$0xff]  ;;  %v4335_v48 = vsel %vm616_vm10, %v12411_v16, %v12410_v5 }
0x15f3   : > { %v4296_v50 = vsel %vm569_vm9, %v12409_v23, %v12408_v36  ;;  %v12424_v23 = vld [vmem:[#allocation106_spill] sm:$0xff] }
0x15f5   : > { %v4195_v9 = vpop.permute.xlu0 %4194 }
0x15f6   : > { %v4197_v35 = vsel %vm800_vm15, %v10371_v56, %v4195_v9  ;;  %v12412_v9 = vld [vmem:[#allocation87_spill] sm:$0xff]  ;;  %v12413_v56 = vld [vmem:[#allocation77_spill] sm:$0xff] }
0x15f7   : > { %v4201_v46 = vadd.f32 %v4197_v35, %v4162_v49  ;;  %v4357_v26 = vsel %vm639_vm11, %v12413_v56, %v12412_v9  ;;  %v4501_v49 = vld [vmem:[#allocation3 + $0x4] ss:$8 sm:$0x3]  ;;  %v12422_v56 = vld [vmem:[#allocation96_spill] sm:$0xff] }
0x15f8   : > { %v10457_v21 = vmul.f32 %v10385_v10, %v4501_v49  ;;  %v12423_v49 = vld [vmem:[#allocation97_spill] sm:$0xff] }
0x15f9   : > { %v4222_v60 = vadd.f32 %v4220_v62, %v4201_v46  ;;  %v12414_v62 = vld [vmem:[#allocation89_spill] sm:$0xff]  ;;  %v12415_v46 = vld [vmem:[#allocation78_spill] sm:$0xff] }
0x15fa   : > { %12416 = vst [vmem:[#allocation11_spill] sm:$0xff] %v10457_v21 }
0x15fb   : > { %v4261_v34 = vadd.f32 %v4257_v14, %v4222_v60  ;;  %v4396_v60 = vsel %vm685_vm12, %v12415_v46, %v12414_v62  ;;  %v12417_v14 = vld [vmem:[#allocation91_spill] sm:$0xff] }
0x15fd   : > { %v4300_v63 = vadd.f32 %v4296_v50, %v4261_v34  ;;  %v12418_v34 = vld [vmem:[#allocation79_spill] sm:$0xff] }
0x15fe   : > { %v4435_v50 = vsel %vm731_vm13, %v12418_v34, %v12417_v14  ;;  %v12427_v34 = vld [vmem:[#allocation100_spill] sm:$0xff] }
0x15ff   : > { %v4339_v17 = vadd.f32 %v4335_v48, %v4300_v63  ;;  %v12419_v63 = vld [vmem:[#allocation93_spill] sm:$0xff]  ;;  %v12420_v48 = vld [vmem:[#allocation80_spill] sm:$0xff] }
0x1600   : > { %v4457_v16 = vsel %vm754_vm14, %v12420_v48, %v12419_v63 }
0x1601   : > { %v4361_v35 = vadd.f32 %v4357_v26, %v4339_v17  ;;  %v4515_v17 = vrot.slane %v10457_v21, %v7498_v30  ;;  %v12421_v26 = vld [vmem:[#allocation95_spill] sm:$0xff]  ;;  %v12428_v21 = vld [vmem:[#allocation110_spill] sm:$0xff] }
0x1602   : > { %v4496_v62 = vsel %vm800_vm15, %v12422_v56, %v12421_v26  ;;  %v12430_v26 = vld [vmem:[#allocation112_spill] sm:$0xff]  ;;  %v12431_v56 = vld [vmem:[#allocation102_spill] sm:$0xff] }
0x1603   : > { %v4400_v36 = vadd.f32 %v4396_v60, %v4361_v35  ;;  %v4519_v46 = vmul.f32 %v4515_v17, %v12423_v49  ;;  %v4656_v17 = vsel %vm639_vm11, %v12431_v56, %v12430_v26 }
0x1605   : > { %v4439_v5 = vadd.f32 %v4435_v50, %v4400_v36  ;;  %v4556_v36 = vsel %vm522_vm8, %v12425_v37, %v12424_v23  ;;  %v12426_v50 = vld [vmem:[#allocation108_spill] sm:$0xff] }
0x1606   : > { %v4595_v63 = vsel %vm569_vm9, %v12427_v34, %v12426_v50  ;;  %v12435_v50 = vld [vmem:[#allocation104_spill] sm:$0xff] }
0x1607   : > { %v4461_v9 = vadd.f32 %v4457_v16, %v4439_v5  ;;  %v12429_v16 = vld [vmem:[#allocation101_spill] sm:$0xff] }
0x1608   : > { %v4634_v5 = vsel %vm616_vm10, %v12429_v16, %v12428_v21 }
0x1609   : > { %v4500_v35 = vadd.f32 %v4496_v62, %v4461_v9  ;;  %v12432_v62 = vld [vmem:[#allocation114_spill] sm:$0xff] }
0x160b   : > { %v4521_v60 = vadd.f32 %v4519_v46, %v4500_v35  ;;  %v4800_v46 = vld [vmem:[#allocation3 + $0x5] ss:$8 sm:$0x3]  ;;  %v12433_v35 = vld [vmem:[#allocation103_spill] sm:$0xff] }
0x160c   : > { %v4695_v23 = vsel %vm685_vm12, %v12433_v35, %v12432_v62 }
0x160d   : > { %v4560_v14 = vadd.f32 %v4556_v36, %v4521_v60  ;;  %v10487_v60 = vmul.f32 %v10385_v10, %v4800_v46 }
0x160f   : > { %v4599_v48 = vadd.f32 %v4595_v63, %v4560_v14  ;;  %v12434_v14 = vld [vmem:[#allocation116_spill] sm:$0xff] }
0x1610   : > { %v4734_v63 = vsel %vm731_vm13, %v12435_v50, %v12434_v14 }
0x1611   : > { %v4638_v8 = vadd.f32 %v4634_v5, %v4599_v48  ;;  %v12436_v48 = vld [vmem:[#allocation118_spill] sm:$0xff]  ;;  %v12437_v5 = vld [vmem:[#allocation105_spill] sm:$0xff] }
0x1612   : > { %v4756_v16 = vsel %vm754_vm14, %v12437_v5, %v12436_v48  ;;  %v3313_v48 = vrot.slane %v10296_v15, %v7496_v29  ;;  %v3457_v15 = vsel %vm639_vm11, %v10176_v57, %v10183_v11  ;;  %v3613_v11 = vrot.slane %v10330_v4, %v7496_v29  ;;  %v12444_v4 = vld [vmem:[#allocation66_spill] sm:$0xff] }
0x1613   : > { %v4660_v9 = vadd.f32 %v4656_v17, %v4638_v8  ;;  %v4814_v8 = vrot.slane %v10487_v60, %v7498_v30  ;;  %v12438_v17 = vld [vmem:[#allocation120_spill] sm:$0xff] }
0x1614   : > { %v4795_v62 = vsel %vm800_vm15, %v9849_v25, %v12438_v17 }
0x1615   : > { %v4699_v36 = vadd.f32 %v4695_v23, %v4660_v9  ;;  %v4818_v10 = vmul.f32 %v4814_v8, %v9851_v51  ;;  %v3396_v8 = vsel %vm569_vm9, %v10263_v32, %v10271_v27 }
0x1617   : > { %v4738_v21 = vadd.f32 %v4734_v63, %v4699_v36 }
0x1619   : > { %v4760_v26 = vadd.f32 %v4756_v16, %v4738_v21  ;;  %v12439_v21 = vmov 0  }
0x161b   : > { %v4799_v46 = vadd.f32 %v4795_v62, %v4760_v26 }
0x161d   : > { %v10501_v9 = vadd.f32 %v4818_v10, %v4799_v46  ;;  %v12441_v10 = vld [vmem:[#allocation36_spill] sm:$0xff]  ;;  %v12442_v46 = vld [vmem:[#allocation62_spill] sm:$0xff] }
0x163b   : > { %v10503_v23 = vpop.permute.xlu1 %5028 }
0x164c   : > { %v5040_v36 = vpop.permute.xlu1 %5039 }
0x164d   : > { %v5042_v14 = vmul.f32 %v5040_v36, %v9665_v33  ;;  %v5043_v63 = vmul.f32 %v5040_v36, %v9681_v39  ;;  %v5044_v16 = vmul.f32 %v5040_v36, %v9669_v44  ;;  %v3357_v33 = vsel %vm522_vm8, %v10166_v53, %v10168_v45  ;;  %v12443_v36 = vld [vmem:[#allocation37_spill] sm:$0xff] }
0x164e   : > { %v3320_v39 = vmul.f32 %v3313_v48, %v9882_v3  ;;  %v3496_v53 = vsel %vm685_vm12, %v10304_v55, %v10288_v38  ;;  %v3535_v45 = vsel %vm731_vm13, %v10318_v40, %v10291_v61  ;;  %v3620_v55 = vmul.f32 %v3613_v11, %v12389_v24  ;;  %v12440_v40 = vld [vmem:[#allocation35_spill] sm:$0xff]  ;;  %v12446_v48 = vld [vmem:[#allocation9_spill] sm:$0xff] }
0x164f   : > { %5050 = vrot.lane.b32.xlu1 %v5043_v63, %s7311_s30  ;;  %5048 = vrot.lane.b32.xlu0 %v5042_v14, %s7311_s30  ;;  %v3657_v61 = vsel %vm522_vm8, %v12440_v40, %v10207_v2  ;;  %v3757_v24 = vsel %vm639_vm11, %v12444_v4, %v10215_v58  ;;  %v12445_v63 = vld [vmem:[#allocation68_spill] sm:$0xff] }
0x1650   : > { %v3361_v44 = vadd.f32 %v3357_v33, %v3320_v39  ;;  %v12447_v33 = vld [vmem:[#allocation69_spill] sm:$0xff] }
0x1651   : > { %v5060_v39 = vmul.f32 %v12447_v33, %v12446_v48  ;;  %v12463_v33 = vld [vmem:[#allocation70_spill] sm:$0xff] }
0x1652   : > { %v3400_v26 = vadd.f32 %v3396_v8, %v3361_v44 }
0x1653   : > { %5062 = vperm.xlu1 %7208, %v9904_v12   ;;  %5052 = vrot.lane.b32.xlu0 %v5044_v16, %s7311_s30  ;;  %v3435_v12 = vsel %vm616_vm10, %v10293_v1, %v10279_v59  ;;  %v3557_v1 = vsel %vm754_vm14, %v10193_v47, %v10191_v41  ;;  %v3596_v59 = vsel %vm800_vm15, %v10332_v22, %v10298_v7 }
0x1654   : > { %v3439_v17 = vadd.f32 %v3435_v12, %v3400_v26  ;;  %v3696_v41 = vsel %vm569_vm9, %v12441_v10, %v10302_v19  ;;  %v3735_v7 = vsel %vm616_vm10, %v12443_v36, %v12442_v46  ;;  %v3796_v16 = vsel %vm685_vm12, %v12445_v63, %v10316_v18  ;;  %v12448_v19 = vld [vmem:[#allocation55_spill] sm:$0xff]  ;;  %v12454_v10 = vld [vmem:[#allocation50_spill] sm:$0xff] }
0x1655   : > { %v3835_v8 = vsel %vm731_vm13, %v12448_v19, %v10325_v28  ;;  %v5073_v58 = vrot.slane %v5060_v39, %v7498_v30  ;;  %v12449_v18 = vld [vmem:[#allocation51_spill] sm:$0xff]  ;;  %v12455_v46 = vld [vmem:[#allocation38_spill] sm:$0xff]  ;;  %v12460_v63 = vmov 10  }
0x1656   : > { %v3461_v3 = vadd.f32 %v3457_v15, %v3439_v17  ;;  %v5069_v17 = vrot.slane %v5060_v39, %v7496_v29  ;;  %v4035_v36 = vsel %vm616_vm10, %v12455_v46, %v10348_v0 }
0x1657   : > { %7209 = vset.pattern.permute.xlu1 %v12439_v21 }
0x1658   : > { %v3500_v32 = vadd.f32 %v3496_v53, %v3461_v3 }
0x165a   : > { %v3539_v27 = vadd.f32 %v3535_v45, %v3500_v32  ;;  %v3857_v45 = vsel %vm754_vm14, %v12449_v18, %v10223_v43  ;;  %v12450_v32 = vld [vmem:[#allocation63_spill] sm:$0xff]  ;;  %v12470_v18 = vmov 28  }
0x165c   : > { %v3561_v57 = vadd.f32 %v3557_v1, %v3539_v27  ;;  %v3896_v27 = vsel %vm800_vm15, %v12450_v32, %v10339_v31  ;;  %v12451_v1 = vld [vmem:[#allocation57_spill] sm:$0xff]  ;;  %v10586_v31 = vld [vmem:[%s11838_s11] sm:$0x3f] }
0x165e   : > { %v3600_v38 = vadd.f32 %v3596_v59, %v3561_v57  ;;  %v3913_v59 = vrot.slane %v12451_v1, %v7496_v29  ;;  %v12452_v57 = vld [vmem:[#allocation4_spill] sm:$0xff] }
0x165f   : > { %v5077_v11 = vrot.slane %v5060_v39, %v12452_v57  ;;  %v12473_v1 = vld [vmem:[#allocation72_spill] sm:$0xff] }
0x1660   : > { %v3622_v62 = vadd.f32 %v3620_v55, %v3600_v38  ;;  %v5099_v38 = vld [vmem:[%s11837_s10] sm:$0x3f] }
0x1662   : > { %v3661_v47 = vadd.f32 %v3657_v61, %v3622_v62  ;;  %v3920_v62 = vmul.f32 %v3913_v59, %v12399_v42  ;;  %v12453_v61 = vmov 1   ;;  %v3996_v42 = vsel %vm569_vm9, %v10405_v20, %v10346_v52  ;;  %v12459_v20 = vld [vmem:[#allocation39_spill] sm:$0xff] }
0x1664   : > { %v3700_v22 = vadd.f32 %v3696_v41, %v3661_v47  ;;  %v3957_v41 = vsel %vm522_vm8, %v12454_v10, %v10239_v54  ;;  %v12458_v54 = vld [vmem:[#allocation52_spill] sm:$0xff]  ;;  %v12478_v10 = vmov 38  }
0x1665   : > { %v4057_v52 = vsel %vm639_vm11, %v12458_v54, %v10247_v13  ;;  %v12464_v13 = vmov 19   ;;  %v12485_v54 = vmov 9  }
0x1666   : > { %v3739_v14 = vadd.f32 %v3735_v7, %v3700_v22  ;;  %v12456_v22 = vmov 2  }
0x1668   : > { %v3761_v2 = vadd.f32 %v3757_v24, %v3739_v14  ;;  %v12457_v14 = vmov 3   ;;  %v4096_v24 = vsel %vm685_vm12, %v12459_v20, %v10352_v6  ;;  %v12466_v6 = vld [vmem:[#allocation67_spill] sm:$0xff]  ;;  %v12486_v20 = vld [vmem:[#allocation77_spill] sm:$0xff] }
0x166a   : > { %v3800_v12 = vadd.f32 %v3796_v16, %v3761_v2  ;;  %v12461_v16 = vmov 4   ;;  %v12462_v2 = vld [vmem:[#allocation54_spill] sm:$0xff] }
0x166b   : > { %v4135_v39 = vsel %vm731_vm13, %v12463_v33, %v12462_v2  ;;  %v12489_v2 = vmov 11   ;;  %v12490_v33 = vld [vmem:[#allocation78_spill] sm:$0xff] }
0x166c   : > { %v3839_v26 = vadd.f32 %v3835_v8, %v3800_v12  ;;  %v12465_v12 = vmov 5  }
0x166e   : > { %v3861_v28 = vadd.f32 %v3857_v45, %v3839_v26  ;;  %v12467_v26 = vld [vmem:[#allocation53_spill] sm:$0xff]  ;;  %v12471_v45 = vld [vmem:[#allocation59_spill] sm:$0xff] }
0x166f   : > { %v4212_v32 = vrot.slane %v12471_v45, %v7496_v29 }
0x1670   : > { %v3900_v55 = vadd.f32 %v3896_v27, %v3861_v28  ;;  %v12472_v28 = vmov 6  }
0x1671   : > { %v4219_v59 = vmul.f32 %v4212_v32, %v12473_v1 }
0x1672   : > { %v3922_v40 = vadd.f32 %v3920_v62, %v3900_v55  ;;  %v12475_v55 = vmov 7   ;;  %v12477_v62 = vld [vmem:[#allocation73_spill] sm:$0xff] }
0x1674   : > { %v3961_v47 = vadd.f32 %v3957_v41, %v3922_v40  ;;  %v12479_v41 = vmov 8  }
0x1676   : > { %v4000_v7 = vadd.f32 %v3996_v42, %v3961_v47  ;;  %v12480_v42 = vld [vmem:[#allocation75_spill] sm:$0xff]  ;;  %v12481_v47 = vld [vmem:[#allocation82_spill] sm:$0xff] }
0x1677   : > { %v4295_v46 = vsel %vm569_vm9, %v12481_v47, %v12480_v42  ;;  %v12506_v42 = vmov 16   ;;  %v12507_v47 = vld [vmem:[#allocation107_spill] sm:$0xff] }
0x1678   : > { %v4039_v4 = vadd.f32 %v4035_v36, %v4000_v7  ;;  %v12482_v7 = vmov 41  }
0x167a   : > { %v4061_v0 = vadd.f32 %v4057_v52, %v4039_v4 }
0x167c   : > { %v4100_v19 = vadd.f32 %v4096_v24, %v4061_v0  ;;  %v12487_v24 = vld [vmem:[#allocation86_spill] sm:$0xff]  ;;  %v12488_v0 = vmov 44  }
0x167e   : > { %v4139_v8 = vadd.f32 %v4135_v39, %v4100_v19  ;;  %v12491_v39 = vld [vmem:[#allocation88_spill] sm:$0xff] }
0x167f   : > { %v4395_v19 = vsel %vm685_vm12, %v12491_v39, %v12490_v33  ;;  %v12517_v39 = vld [vmem:[#allocation117_spill] sm:$0xff] }
0x16c1   : > { %v10563_v44 = vpop.permute.xlu1 %5050 }
0x16d2   : > { %v5063_v15 = vpop.permute.xlu1 %5062 }
0x16d3   : > { %v5081_v53 = vmul.f32 %v5069_v17, %v5063_v15  ;;  %v5082_v3 = vmul.f32 %v5073_v58, %v5063_v15  ;;  %v5083_v43 = vmul.f32 %v5077_v11, %v5063_v15  ;;  %v4157_v17 = vsel %vm754_vm14, %v12467_v26, %v12466_v6  ;;  %v12468_v58 = vld [vmem:[#allocation56_spill] sm:$0xff]  ;;  %v12469_v15 = vld [vmem:[#allocation10_spill] sm:$0xff]  ;;  %v12494_v6 = vld [vmem:[#allocation79_spill] sm:$0xff] }
0x16d4   : > { %v12495_v26 = vld [vmem:[#allocation90_spill] sm:$0xff] }
0x16d5   : > { %5089 = vrot.lane.b32.xlu1 %v5082_v3, %s7316_s20  ;;  %5087 = vrot.lane.b32.xlu0 %v5081_v53, %s7316_s20  ;;  %v4196_v53 = vsel %vm800_vm15, %v12469_v15, %v12468_v58  ;;  %v4161_v3 = vadd.f32 %v4157_v17, %v4139_v8  ;;  %v4434_v17 = vsel %vm731_vm13, %v12495_v26, %v12494_v6  ;;  %v12496_v15 = vmov 51   ;;  %v10726_v6 = vpop.permute.xlu0 %4991 }
0x16d7   : > { %v4200_v27 = vadd.f32 %v4196_v53, %v4161_v3  ;;  %v12497_v53 = vmov 13   ;;  %v12498_v3 = vld [vmem:[#allocation80_spill] sm:$0xff] }
0x16d9   : > { %5102 = vperm.xlu1 %7209, %v5099_v38   ;;  %5091 = vrot.lane.b32.xlu0 %v5083_v43, %s7316_s20  ;;  %v4221_v11 = vadd.f32 %v4219_v59, %v4200_v27  ;;  %v12474_v38 = vmov 37   ;;  %v12476_v43 = vld [vmem:[#allocation74_spill] sm:$0xff]  ;;  %v12500_v27 = vld [vmem:[#allocation96_spill] sm:$0xff]  ;;  %v12502_v59 = vmov 14  }
0x16da   : > { %v4256_v40 = vsel %vm522_vm8, %v12477_v62, %v12476_v43 }
0x16dd   : > { %7210 = vset.pattern.permute.xlu1 %v12453_v61  ;;  %5127 = vperm.xlu0 %7201, %v10586_v31   ;;  %v4260_v61 = vadd.f32 %v4256_v40, %v4221_v11  ;;  %v12503_v11 = vld [vmem:[#allocation11_spill] sm:$0xff]  ;;  %v12504_v40 = vmov 15  }
0x16de   : > { %5147 = vperm.xlu1 %7210, %v10586_v31  }
0x16df   : > { %v4299_v36 = vadd.f32 %v4295_v46, %v4260_v61  ;;  %v12505_v61 = vld [vmem:[#allocation98_spill] sm:$0xff]  ;;  %v4594_v46 = vsel %vm569_vm9, %v12507_v47, %v12427_v34  ;;  %v12513_v34 = vld [vmem:[#allocation113_spill] sm:$0xff] }
0x16e0   : > { %v12532_v47 = vld [vmem:[#allocation61_spill] sm:$0xff] }
0x16e1   : > { %7211 = vset.pattern.permute.xlu0 %v12456_v22  ;;  %v12483_v22 = vld [vmem:[#allocation76_spill] sm:$0xff] }
0x16e2   : > { %7212 = vset.pattern.permute.xlu1 %v12457_v14  ;;  %5186 = vperm.xlu0 %7211, %v10586_v31   ;;  %v12484_v14 = vld [vmem:[#allocation84_spill] sm:$0xff] }
0x16e3   : > { %5225 = vperm.xlu1 %7212, %v10586_v31   ;;  %v4334_v4 = vsel %vm616_vm10, %v12484_v14, %v12483_v22  ;;  %v12510_v22 = vld [vmem:[#allocation109_spill] sm:$0xff] }
0x16e4   : > { %v4338_v52 = vadd.f32 %v4334_v4, %v4299_v36 }
0x16e6   : > { %7219 = vset.pattern.permute.xlu0 %v12460_v63  ;;  %v4356_v63 = vsel %vm639_vm11, %v12487_v24, %v12486_v20  ;;  %v4694_v24 = vsel %vm685_vm12, %v12513_v34, %v12433_v35  ;;  %v12518_v35 = vmov 22   ;;  %v12535_v34 = vmov 29  }
0x16e7   : > { %7213 = vset.pattern.permute.xlu1 %v12461_v16  ;;  %5446 = vperm.xlu0 %7219, %v10586_v31   ;;  %v4360_v16 = vadd.f32 %v4356_v63, %v4338_v52  ;;  %v12512_v52 = vmov 18  }
0x16e8   : > { %5263 = vperm.xlu1 %7213, %v10586_v31  }
0x16e9   : > { %v4399_v8 = vadd.f32 %v4395_v19, %v4360_v16  ;;  %v12515_v16 = vld [vmem:[#allocation115_spill] sm:$0xff]  ;;  %v4755_v19 = vsel %vm754_vm14, %v12517_v39, %v12437_v5  ;;  %v12538_v39 = vmov 32  }
0x16eb   : > { %7228 = vset.pattern.permute.xlu0 %v12464_v13  ;;  %v12492_v13 = vmov 48   ;;  %v4438_v58 = vadd.f32 %v4434_v17, %v4399_v8 }
0x16ec   : > { %7214 = vset.pattern.permute.xlu1 %v12465_v12  ;;  %5745 = vperm.xlu0 %7228, %v10586_v31   ;;  %v12493_v12 = vmov 12  }
0x16ed   : > { %5286 = vperm.xlu1 %7214, %v10586_v31  }
0x16f0   : > { %7237 = vset.pattern.permute.xlu0 %v12470_v18  ;;  %v12499_v18 = vld [vmem:[#allocation92_spill] sm:$0xff] }
0x16f1   : > { %7215 = vset.pattern.permute.xlu1 %v12472_v28  ;;  %6045 = vperm.xlu0 %7237, %v10586_v31   ;;  %v4456_v45 = vsel %vm754_vm14, %v12499_v18, %v12498_v3  ;;  %v12501_v28 = vld [vmem:[#allocation94_spill] sm:$0xff]  ;;  %v12522_v3 = vld [vmem:[#allocation40_spill] sm:$0xff] }
0x16f2   : > { %5325 = vperm.xlu1 %7215, %v10586_v31   ;;  %v4460_v32 = vadd.f32 %v4456_v45, %v4438_v58  ;;  %v4495_v1 = vsel %vm800_vm15, %v12501_v28, %v12500_v27  ;;  %v12520_v58 = vmov 23   ;;  %v12523_v45 = vmov 24   ;;  %v12525_v27 = vld [vmem:[#allocation45_spill] sm:$0xff] }
0x16f5   : > { %7246 = vset.pattern.permute.xlu0 %v12474_v38  ;;  %v4511_v38 = vrot.slane %v12503_v11, %v7496_v29  ;;  %v12527_v11 = vld [vmem:[#allocation21_spill] sm:$0xff] }
0x16f6   : > { %7216 = vset.pattern.permute.xlu1 %v12475_v55  ;;  %6345 = vperm.xlu0 %7246, %v10586_v31   ;;  %v4499_v55 = vadd.f32 %v4495_v1, %v4460_v32  ;;  %v12524_v32 = vld [vmem:[#allocation64_spill] sm:$0xff]  ;;  %v12526_v1 = vmov 25  }
0x16f7   : > { %5363 = vperm.xlu1 %7216, %v10586_v31   ;;  %v4518_v43 = vmul.f32 %v4511_v38, %v12423_v49  ;;  %v12508_v49 = vmov 17   ;;  %v12528_v38 = vld [vmem:[#allocation13_spill] sm:$0xff] }
0x16f9   : > { %v4520_v62 = vadd.f32 %v4518_v43, %v4499_v55  ;;  %v4932_v55 = vsel %vm616_vm10, %v12528_v38, %v12527_v11 }
0x16fa   : > { %7247 = vset.pattern.permute.xlu0 %v12478_v10  ;;  %v4555_v10 = vsel %vm522_vm8, %v12505_v61, %v12425_v37  ;;  %v12511_v37 = vld [vmem:[#allocation111_spill] sm:$0xff]  ;;  %v12531_v61 = vld [vmem:[#allocation49_spill] sm:$0xff] }
0x16fb   : > { %7217 = vset.pattern.permute.xlu1 %v12479_v41  ;;  %6384 = vperm.xlu0 %7247, %v10586_v31   ;;  %v4559_v41 = vadd.f32 %v4555_v10, %v4520_v62  ;;  %v12529_v62 = vmov 26  }
0x16fc   : > { %5386 = vperm.xlu1 %7217, %v10586_v31  }
0x16fd   : > { %v4598_v36 = vadd.f32 %v4594_v46, %v4559_v41  ;;  %v12533_v46 = vld [vmem:[#allocation60_spill] sm:$0xff] }
0x16ff   : > { %7250 = vset.pattern.permute.xlu0 %v12482_v7  ;;  %v12509_v7 = vld [vmem:[#allocation101_spill] sm:$0xff] }
0x1700   : > { %7218 = vset.pattern.permute.xlu1 %v12485_v54  ;;  %6484 = vperm.xlu0 %7250, %v10586_v31   ;;  %v4633_v14 = vsel %vm616_vm10, %v12510_v22, %v12509_v7  ;;  %v4655_v54 = vsel %vm639_vm11, %v12511_v37, %v12431_v56  ;;  %v12516_v56 = vmov 21   ;;  %v12534_v7 = vmov 27  }
0x1701   : > { %5426 = vperm.xlu1 %7218, %v10586_v31   ;;  %v4637_v4 = vadd.f32 %v4633_v14, %v4598_v36  ;;  %v4993_v36 = vsel %vm685_vm12, %v12533_v46, %v12532_v47 }
0x1703   : > { %v4659_v20 = vadd.f32 %v4655_v54, %v4637_v4 }
0x1704   : > { %7253 = vset.pattern.permute.xlu0 %v12488_v0  ;;  %v12514_v0 = vmov 20  }
0x1705   : > { %7220 = vset.pattern.permute.xlu1 %v12489_v2  ;;  %6584 = vperm.xlu0 %7253, %v10586_v31   ;;  %v4698_v63 = vadd.f32 %v4694_v24, %v4659_v20  ;;  %v4733_v2 = vsel %vm731_vm13, %v12515_v16, %v12435_v50  ;;  %v4810_v50 = vrot.slane %v10487_v60, %v7496_v29  ;;  %v12536_v16 = vmov 30  }
0x1706   : > { %5485 = vperm.xlu1 %7220, %v10586_v31  }
0x1707   : > { %v4737_v33 = vadd.f32 %v4733_v2, %v4698_v63  ;;  %v4817_v17 = vmul.f32 %v4810_v50, %v9851_v51  ;;  %v4893_v51 = vsel %vm569_vm9, %v12525_v27, %v12524_v32  ;;  %v12541_v50 = vmov 35  }
0x1709   : > { %7256 = vset.pattern.permute.xlu0 %v12492_v13  ;;  %v4759_v8 = vadd.f32 %v4755_v19, %v4737_v33  ;;  %v12519_v13 = vld [vmem:[#allocation119_spill] sm:$0xff]  ;;  %v12537_v33 = vmov 31  }
0x170a   : > { %7221 = vset.pattern.permute.xlu1 %v12493_v12  ;;  %6723 = vperm.xlu0 %7256, %v10586_v31   ;;  %v4794_v12 = vsel %vm800_vm15, %v12519_v13, %v9849_v25  ;;  %v12540_v13 = vmov 34  }
0x170b   : > { %5524 = vperm.xlu1 %7221, %v10586_v31   ;;  %v4798_v26 = vadd.f32 %v4794_v12, %v4759_v8  ;;  %v12539_v8 = vmov 33  }
0x170d   : > { %v4819_v5 = vadd.f32 %v4817_v17, %v4798_v26  ;;  %v12542_v17 = vmov 36  }
0x170e   : > { %7259 = vset.pattern.permute.xlu0 %v12496_v15  ;;  %v5027_v15 = vpop.permute.xlu0 %5026 }
0x170f   : > { %7222 = vset.pattern.permute.xlu1 %v12497_v53  ;;  %v12521_v53 = vld [vmem:[#allocation42_spill] sm:$0xff] }
0x1710   : > { %5562 = vperm.xlu1 %7222, %v10586_v31   ;;  %v4854_v25 = vsel %vm522_vm8, %v12522_v3, %v12521_v53  ;;  %v12545_v3 = vmov 40  }
0x1711   : > { %v4858_v18 = vadd.f32 %v4854_v25, %v4819_v5  ;;  %v12543_v5 = vmov 39  }
0x1712   : > { %v10736_v60 = vpop.permute.xlu0 %5030 }
0x1713   : > { %v4897_v28 = vadd.f32 %v4893_v51, %v4858_v18  ;;  %v12546_v18 = vmov 42  }
0x1714   : > { %7223 = vset.pattern.permute.xlu1 %v12502_v59 }
0x1715   : > { %5585 = vperm.xlu1 %7223, %v10586_v31   ;;  %v4936_v43 = vadd.f32 %v4932_v55, %v4897_v28 }
0x1716   : > { %v5049_v59 = vpop.permute.xlu0 %5048 }
0x1717   : > { %v5054_v37 = vsel %vm754_vm14, %v5049_v59, %v10563_v44  ;;  %v12549_v59 = vld [vmem:[#allocation58_spill] sm:$0xff] }
0x1718   : > { %v4894_v38 = vsel %vm569_vm9, %v12524_v32, %v12549_v59 }
0x1719   : > { %7224 = vset.pattern.permute.xlu1 %v12504_v40  ;;  %v12530_v40 = vld [vmem:[#allocation65_spill] sm:$0xff] }
0x171a   : > { %5624 = vperm.xlu1 %7224, %v10586_v31   ;;  %v4954_v10 = vsel %vm639_vm11, %v12531_v61, %v12530_v40  ;;  %v12550_v61 = vmov 46  }
0x171b   : > { %v4958_v41 = vadd.f32 %v4954_v10, %v4936_v43  ;;  %v12551_v10 = vld [vmem:[#allocation47_spill] sm:$0xff] }
0x171d   : > { %v4997_v22 = vadd.f32 %v4993_v36, %v4958_v41  ;;  %v12552_v36 = vld [vmem:[#allocation23_spill] sm:$0xff] }
0x171e   : > { %7225 = vset.pattern.permute.xlu1 %v12506_v42  ;;  %v10751_v42 = vpop.permute.xlu0 %5052  ;;  %v4955_v32 = vsel %vm639_vm11, %v12530_v40, %v12552_v36 }
0x171f   : > { %5662 = vperm.xlu1 %7225, %v10586_v31   ;;  %v5055_v40 = vsel %vm754_vm14, %v10563_v44, %v10751_v42  ;;  %v12556_v42 = vmov 52  }
0x1723   : > { %7226 = vset.pattern.permute.xlu1 %v12508_v49  ;;  %v5032_v49 = vsel %vm731_vm13, %v5027_v15, %v10503_v23 }
0x1724   : > { %5685 = vperm.xlu1 %7226, %v10586_v31   ;;  %v5036_v54 = vadd.f32 %v5032_v49, %v4997_v22  ;;  %v12553_v49 = vmov 47  }
0x1726   : > { %v5058_v20 = vadd.f32 %v5054_v37, %v5036_v54  ;;  %v5033_v37 = vsel %vm731_vm13, %v10503_v23, %v10736_v60 }
0x1728   : > { %7227 = vset.pattern.permute.xlu1 %v12512_v52 }
0x1729   : > { %5725 = vperm.xlu1 %7227, %v10586_v31  }
0x172d   : > { %7229 = vset.pattern.permute.xlu1 %v12514_v0 }
0x172e   : > { %5784 = vperm.xlu1 %7229, %v10586_v31  }
0x1732   : > { %7230 = vset.pattern.permute.xlu1 %v12516_v56 }
0x1733   : > { %5823 = vperm.xlu1 %7230, %v10586_v31  }
0x1737   : > { %7231 = vset.pattern.permute.xlu1 %v12518_v35 }
0x1738   : > { %5861 = vperm.xlu1 %7231, %v10586_v31  }
0x173c   : > { %7232 = vset.pattern.permute.xlu1 %v12520_v58 }
0x173d   : > { %5884 = vperm.xlu1 %7232, %v10586_v31  }
0x1741   : > { %7233 = vset.pattern.permute.xlu1 %v12523_v45  ;;  %v12547_v45 = vld [vmem:[#allocation44_spill] sm:$0xff] }
0x1742   : > { %5923 = vperm.xlu1 %7233, %v10586_v31   ;;  %v4855_v27 = vsel %vm522_vm8, %v12521_v53, %v12547_v45  ;;  %v4933_v53 = vsel %vm616_vm10, %v12527_v11, %v12551_v10  ;;  %v4994_v11 = vsel %vm685_vm12, %v12532_v47, %v10726_v6 }
0x1743   : > { %v4859_v28 = vadd.f32 %v4855_v27, %v10501_v9 }
0x1745   : > { %v4898_v55 = vadd.f32 %v4894_v38, %v4859_v28 }
0x1746   : > { %7234 = vset.pattern.permute.xlu1 %v12526_v1  ;;  %v12548_v1 = vmov 43  }
0x1747   : > { %5961 = vperm.xlu1 %7234, %v10586_v31   ;;  %v10759_v14 = vpop.permute.xlu1 %5089  ;;  %v5088_v4 = vpop.permute.xlu0 %5087  ;;  %v4937_v9 = vadd.f32 %v4933_v53, %v4898_v55 }
0x1748   : > { %v5093_v52 = vsel %vm800_vm15, %v5088_v4, %v10759_v14 }
0x1749   : > { %v5097_v24 = vadd.f32 %v5093_v52, %v5058_v20  ;;  %v12554_v52 = vmov 49  }
0x174b   : > { %7235 = vset.pattern.permute.xlu1 %v12529_v62  ;;  %v5092_v43 = vpop.permute.xlu0 %5091 }
0x174c   : > { %5984 = vperm.xlu1 %7235, %v10586_v31  }
0x1750   : > { %7236 = vset.pattern.permute.xlu1 %v12534_v7  ;;  %v4959_v7 = vadd.f32 %v4955_v32, %v4937_v9 }
0x1751   : > { %6025 = vperm.xlu1 %7236, %v10586_v31  }
0x1752   : > { %v4998_v54 = vadd.f32 %v4994_v11, %v4959_v7 }
0x1754   : > { %v5037_v20 = vadd.f32 %v5033_v37, %v4998_v54 }
0x1755   : > { %7238 = vset.pattern.permute.xlu1 %v12535_v34 }
0x1756   : > { %6084 = vperm.xlu1 %7238, %v10586_v31   ;;  %v5059_v47 = vadd.f32 %v5055_v40, %v5037_v20 }
0x1758   : > { %v10768_v63 = vpop.permute.xlu1 %5102 }
0x1759   : > { %v5105_v0 = vadd.f32 %v10768_v63, %v5097_v24  ;;  %v5094_v24 = vsel %vm800_vm15, %v10759_v14, %v5092_v43 }
0x175a   : > { %7239 = vset.pattern.permute.xlu1 %v12536_v16  ;;  %v5098_v23 = vadd.f32 %v5094_v24, %v5059_v47 }
0x175b   : > { %6123 = vperm.xlu1 %7239, %v10586_v31   ;;  %5109 = vrot.lane.b32.xlu0 %v5105_v0, %s7289_s16  ;;  %v12555_v0 = vmov 50  }
0x175c   : > { %v10828_v41 = vpop.permute.xlu0 %5127  ;;  %v5106_v60 = vadd.f32 %v10768_v63, %v5098_v23 }
0x175d   : > { %v10774_v2 = vpop.permute.xlu1 %5147 }
0x175f   : > { %7240 = vset.pattern.permute.xlu1 %v12537_v33 }
0x1760   : > { %6161 = vperm.xlu1 %7240, %v10586_v31  }
0x1761   : > { %v10837_v22 = vpop.permute.xlu0 %5186 }
0x1762   : > { %v10778_v56 = vpop.permute.xlu1 %5225 }
0x1764   : > { %7241 = vset.pattern.permute.xlu1 %v12538_v39 }
0x1765   : > { %6184 = vperm.xlu1 %7241, %v10586_v31  }
0x1766   : > { %v10852_v34 = vpop.permute.xlu0 %5446 }
0x1767   : > { %v10782_v19 = vpop.permute.xlu1 %5263 }
0x1769   : > { %7242 = vset.pattern.permute.xlu1 %v12539_v8 }
0x176a   : > { %6223 = vperm.xlu1 %7242, %v10586_v31  }
0x176b   : > { %v10863_v44 = vpop.permute.xlu0 %5745 }
0x176c   : > { %v10786_v35 = vpop.permute.xlu1 %5286 }
0x176e   : > { %7243 = vset.pattern.permute.xlu1 %v12540_v13 }
0x176f   : > { %6261 = vperm.xlu1 %7243, %v10586_v31  }
0x1770   : > { %v10869_v14 = vpop.permute.xlu0 %6045 }
0x1771   : > { %v10790_v12 = vpop.permute.xlu1 %5325 }
0x1773   : > { %7244 = vset.pattern.permute.xlu1 %v12541_v50 }
0x1774   : > { %6284 = vperm.xlu1 %7244, %v10586_v31  }
0x1775   : > { %v10873_v8 = vpop.permute.xlu0 %6345 }
0x1776   : > { %v10794_v26 = vpop.permute.xlu1 %5363  ;;  %12558 = vst [vmem:[#allocation18_spill] sm:$0xff] %v10873_v8 }
0x1778   : > { %7245 = vset.pattern.permute.xlu1 %v12542_v17 }
0x1779   : > { %6325 = vperm.xlu1 %7245, %v10586_v31  }
0x177b   : > { %v10798_v58 = vpop.permute.xlu1 %5386 }
0x177d   : > { %7248 = vset.pattern.permute.xlu1 %v12543_v5 }
0x177e   : > { %6423 = vperm.xlu1 %7248, %v10586_v31  }
0x1780   : > { %v10802_v15 = vpop.permute.xlu1 %5426 }
0x1781   : > { %12544 = vst [vmem:[#allocation14_spill] sm:$0xff] %v10802_v15 }
0x1782   : > { %7249 = vset.pattern.permute.xlu1 %v12545_v3 }
0x1783   : > { %6461 = vperm.xlu1 %7249, %v10586_v31  }
0x1785   : > { %v10806_v25 = vpop.permute.xlu1 %5485 }
0x1787   : > { %7251 = vset.pattern.permute.xlu1 %v12546_v18 }
0x1788   : > { %6523 = vperm.xlu1 %7251, %v10586_v31  }
0x178a   : > { %v10813_v51 = vpop.permute.xlu1 %5524 }
0x178c   : > { %7252 = vset.pattern.permute.xlu1 %v12548_v1 }
0x178d   : > { %6561 = vperm.xlu1 %7252, %v10586_v31  }
0x178f   : > { %v10821_v62 = vpop.permute.xlu1 %5562 }
0x1791   : > { %7254 = vset.pattern.permute.xlu1 %v12550_v61 }
0x1792   : > { %6645 = vperm.xlu1 %7254, %v10586_v31  }
0x1794   : > { %v10830_v46 = vpop.permute.xlu1 %5585 }
0x1796   : > { %7255 = vset.pattern.permute.xlu1 %v12553_v49 }
0x1797   : > { %6684 = vperm.xlu1 %7255, %v10586_v31  }
0x1799   : > { %v10839_v4 = vpop.permute.xlu1 %5624 }
0x179b   : > { %7257 = vset.pattern.permute.xlu1 %v12554_v52 }
0x179c   : > { %6761 = vperm.xlu1 %7257, %v10586_v31  }
0x179e   : > { %v10856_v6 = vpop.permute.xlu1 %5662 }
0x17a0   : > { %7258 = vset.pattern.permute.xlu1 %v12555_v0 }
0x17a1   : > { %6784 = vperm.xlu1 %7258, %v10586_v31   ;;  %v10877_v31 = vpop.permute.xlu0 %6384 }
0x17a3   : > { %v10861_v16 = vpop.permute.xlu1 %5685 }
0x17a5   : > { %5111 = vrot.lane.b32.xlu1 %v5106_v60, %s7289_s16  ;;  %v10881_v50 = vpop.permute.xlu0 %6484 }
0x17a6   : > { %7260 = vset.pattern.permute.xlu1 %v12556_v42 }
0x17a8   : > { %v10867_v33 = vpop.permute.xlu1 %5725 }
0x17a9   : > { %12557 = vst [vmem:[#allocation12_spill] sm:$0xff] %v10867_v33  ;;  %v10887_v3 = vpop.permute.xlu0 %6584 }
0x17ad   : > { %v10871_v39 = vpop.permute.xlu1 %5784  ;;  %v10891_v45 = vpop.permute.xlu0 %6723 }
0x17b2   : > { %v10875_v13 = vpop.permute.xlu1 %5823 }
0x17b7   : > { %v10879_v63 = vpop.permute.xlu1 %5861 }
0x17bc   : > { %v10883_v17 = vpop.permute.xlu1 %5884 }
0x17c1   : > { %v10885_v5 = vpop.permute.xlu1 %5923 }
0x17c6   : > { %v10889_v18 = vpop.permute.xlu1 %5961 }
0x17cb   : > { %v10893_v27 = vpop.permute.xlu1 %5984 }
0x17cd   : > { %v5110_v28 = vpop.permute.xlu0 %5109 }
0x17ce   : > { %5118 = vst.msk [vmem:[#allocation2] sm:$0x3f] %vm5117_vm0, %v5110_v28 }
0x17d0   : > { %v10895_v1 = vpop.permute.xlu1 %6025 }
0x17d1   : > { %12559 = vst [vmem:[#allocation27_spill] sm:$0xff] %v10895_v1 }
0x17d5   : > { %v10897_v59 = vpop.permute.xlu1 %6084 }
0x17da   : > { %v10899_v38 = vpop.permute.xlu1 %6123 }
0x17df   : > { %v10901_v55 = vpop.permute.xlu1 %6161 }
0x17e4   : > { %v10903_v43 = vpop.permute.xlu1 %6184 }
0x17e9   : > { %v10905_v61 = vpop.permute.xlu1 %6223 }
0x17ee   : > { %v10907_v10 = vpop.permute.xlu1 %6261 }
0x17f3   : > { %v10909_v53 = vpop.permute.xlu1 %6284 }
0x17f8   : > { %v10911_v9 = vpop.permute.xlu1 %6325 }
0x17f9   : > { %12560 = vst [vmem:[#allocation30_spill] sm:$0xff] %v10911_v9 }
0x17fd   : > { %v10913_v36 = vpop.permute.xlu1 %6423 }
0x1802   : > { %v10915_v32 = vpop.permute.xlu1 %6461 }
0x1807   : > { %v10917_v49 = vpop.permute.xlu1 %6523 }
0x180c   : > { %v10919_v7 = vpop.permute.xlu1 %6561 }
0x1811   : > { %v10921_v11 = vpop.permute.xlu1 %6645 }
0x1816   : > { %v10923_v37 = vpop.permute.xlu1 %6684 }
0x181b   : > { %v10925_v54 = vpop.permute.xlu1 %6761 }
0x181c   : > { %12561 = vst [vmem:[#allocation25_spill] sm:$0xff] %v10925_v54 }
0x1820   : > { %v10927_v52 = vpop.permute.xlu1 %6784 }
0x1821   : > { %12562 = vst [vmem:[#allocation41_spill] sm:$0xff] %v10927_v52 }
0x1824   : > { %v5112_v40 = vpop.permute.xlu1 %5111 }
0x1825   : > { %v5113_v20 = vsel %vm456_vm1, %v5110_v28, %v5112_v40  ;;  %5121 = vst.msk [vmem:[#allocation2 + $0x10] sm:$0x3f] %vm5120_vm2, %v5112_v40 }
0x1826   : > { %5119 = vst [vmem:[#allocation2 + $0x8] sm:$0x3f] %v5113_v20 }
0x182d   : > { %v10930_v24 = vld [vmem:[#allocation2] ss:$8 sm:$0x7]  ;;  %v10948_v1 = vld [vmem:[#allocation2 + $0x1] ss:$8 sm:$0x7] }
0x182e   : > { %v5158_v47 = vrot.slane %v10930_v24, %v7498_v30  ;;  %v5154_v0 = vrot.slane %v10930_v24, %v7496_v29  ;;  %v5162_v42 = vrot.slane %v10930_v24, %v12452_v57 }
0x1830   : > { %v5167_v23 = vmul.f32 %v5158_v47, %v10774_v2  ;;  %v5166_v60 = vmul.f32 %v5154_v0, %v10774_v2  ;;  %v5266_v28 = vmul.f32 %v10782_v19, %v5154_v0  ;;  %v5168_v40 = vmul.f32 %v5162_v42, %v10774_v2 }
0x1831   : > { %v5268_v20 = vmul.f32 %v10782_v19, %v5162_v42  ;;  %v5267_v9 = vmul.f32 %v10782_v19, %v5158_v47  ;;  %v5453_v2 = vrot.slane %v10948_v1, %v7496_v29 }
0x1832   : > { %5174 = vrot.lane.b32.xlu0 %v5167_v23, %s7309_s28  ;;  %5172 = vrot.lane.b32.xlu1 %v5166_v60, %s7309_s28  ;;  %v5366_v23 = vmul.f32 %v10794_v26, %v5154_v0  ;;  %v5367_v60 = vmul.f32 %v10794_v26, %v5158_v47 }
0x1833   : > { %v5465_v19 = vmul.f32 %v5453_v2, %v10852_v34 }
0x1836   : > { %5272 = vrot.lane.b32.xlu0 %v5266_v28, %s7310_s29  ;;  %5176 = vrot.lane.b32.xlu1 %v5168_v40, %s7309_s28  ;;  %v5368_v28 = vmul.f32 %v10794_v26, %v5162_v42  ;;  %v5461_v40 = vrot.slane %v10948_v1, %v12452_v57  ;;  %v5565_v26 = vmul.f32 %v10821_v62, %v5453_v2 }
0x1838   : > { %v5467_v47 = vmul.f32 %v5461_v40, %v10852_v34 }
0x183a   : > { %5276 = vrot.lane.b32.xlu0 %v5268_v20, %s7310_s29  ;;  %5274 = vrot.lane.b32.xlu1 %v5267_v9, %s7310_s29  ;;  %v5457_v9 = vrot.slane %v10948_v1, %v7498_v30  ;;  %v10972_v20 = vld [vmem:[#allocation2 + $0x2] ss:$8 sm:$0x7] }
0x183c   : > { %v5466_v0 = vmul.f32 %v5457_v9, %v10852_v34  ;;  %v5566_v42 = vmul.f32 %v10821_v62, %v5457_v9  ;;  %v5752_v34 = vrot.slane %v10972_v20, %v7496_v29 }
0x183e   : > { %5372 = vrot.lane.b32.xlu0 %v5366_v23, %s7311_s30  ;;  %5374 = vrot.lane.b32.xlu1 %v5367_v60, %s7311_s30  ;;  %v5567_v23 = vmul.f32 %v10821_v62, %v5461_v40  ;;  %v5666_v60 = vmul.f32 %v10856_v6, %v5457_v9  ;;  %v5667_v62 = vmul.f32 %v10856_v6, %v5461_v40 }
0x1842   : > { %5376 = vrot.lane.b32.xlu0 %v5368_v28, %s7311_s30  ;;  %5471 = vrot.lane.b32.xlu1 %v5465_v19, %s7309_s28  ;;  %v5665_v28 = vmul.f32 %v10856_v6, %v5453_v2  ;;  %v5764_v19 = vmul.f32 %v5752_v34, %v10863_v44  ;;  %v5864_v6 = vmul.f32 %v10879_v63, %v5752_v34 }
0x1846   : > { %5475 = vrot.lane.b32.xlu0 %v5467_v47, %s7309_s28  ;;  %5473 = vrot.lane.b32.xlu1 %v5466_v0, %s7309_s28  ;;  %v5756_v47 = vrot.slane %v10972_v20, %v7498_v30  ;;  %v5760_v0 = vrot.slane %v10972_v20, %v12452_v57 }
0x1848   : > { %v5765_v9 = vmul.f32 %v5756_v47, %v10863_v44  ;;  %v5766_v2 = vmul.f32 %v5760_v0, %v10863_v44  ;;  %v5965_v40 = vmul.f32 %v10889_v18, %v5756_v47  ;;  %v5866_v44 = vmul.f32 %v10879_v63, %v5760_v0 }
0x184a   : > { %5571 = vrot.lane.b32.xlu0 %v5565_v26, %s7310_s29  ;;  %5573 = vrot.lane.b32.xlu1 %v5566_v42, %s7310_s29  ;;  %v5865_v26 = vmul.f32 %v10879_v63, %v5756_v47  ;;  %v10996_v42 = vld [vmem:[#allocation2 + $0x3] ss:$8 sm:$0x7] }
0x184e   : > { %5575 = vrot.lane.b32.xlu0 %v5567_v23, %s7310_s29  ;;  %5673 = vrot.lane.b32.xlu1 %v5666_v60, %s7311_s30  ;;  %v6052_v23 = vrot.slane %v10996_v42, %v7496_v29 }
0x1850   : > { %v6064_v60 = vmul.f32 %v6052_v23, %v10869_v14 }
0x1852   : > { %5671 = vrot.lane.b32.xlu0 %v5665_v28, %s7311_s30  ;;  %5770 = vrot.lane.b32.xlu1 %v5764_v19, %s7309_s28  ;;  %v6056_v28 = vrot.slane %v10996_v42, %v7498_v30  ;;  %v5964_v19 = vmul.f32 %v10889_v18, %v5752_v34 }
0x1854   : > { %v6065_v47 = vmul.f32 %v6056_v28, %v10869_v14  ;;  %v6165_v63 = vmul.f32 %v10901_v55, %v6056_v28 }
0x1856   : > { %5675 = vrot.lane.b32.xlu0 %v5667_v62, %s7311_s30  ;;  %5772 = vrot.lane.b32.xlu1 %v5765_v9, %s7309_s28  ;;  %v5966_v62 = vmul.f32 %v10889_v18, %v5760_v0  ;;  %v6060_v9 = vrot.slane %v10996_v42, %v12452_v57  ;;  %v6164_v18 = vmul.f32 %v10901_v55, %v6052_v23 }
0x1858   : > { %v6066_v34 = vmul.f32 %v6060_v9, %v10869_v14  ;;  %v12564_v14 = vld [vmem:[#allocation5_spill] sm:$0xff] }
0x185a   : > { %5774 = vrot.lane.b32.xlu0 %v5766_v2, %s7309_s28  ;;  %5872 = vrot.lane.b32.xlu1 %v5865_v26, %s7310_s29  ;;  %v11020_v2 = vld [vmem:[#allocation2 + $0x4] ss:$8 sm:$0x7]  ;;  %v6265_v26 = vmul.f32 %v10907_v10, %v6056_v28 }
0x185e   : > { %5870 = vrot.lane.b32.xlu0 %v5864_v6, %s7310_s29  ;;  %5972 = vrot.lane.b32.xlu1 %v5965_v40, %s7311_s30  ;;  %v11028_v6 = vrot.slane %v11020_v2, %v7496_v29  ;;  %v11037_v40 = vrot.slane %v11020_v2, %v7498_v30 }
0x1860   : > { %v6364_v0 = vmul.f32 %v11028_v6, %v10873_v8  ;;  %12563 = vst [vmem:[#allocation48_spill] sm:$0xff] %v11037_v40  ;;  %v6365_v28 = vmul.f32 %v11037_v40, %v10873_v8  ;;  %v11196_v8 = vmul.f32 %v10972_v20, %v12446_v48 }
0x1862   : > { %5874 = vrot.lane.b32.xlu0 %v5866_v44, %s7310_s29  ;;  %6070 = vrot.lane.b32.xlu1 %v6064_v60, %s7309_s28  ;;  %v5184_v44 = vmul.f32 %v10930_v24, %v12564_v14  ;;  %v6166_v60 = vmul.f32 %v10901_v55, %v6060_v9  ;;  %v6266_v55 = vmul.f32 %v10907_v10, %v6060_v9 }
0x1863   : > { %v5995_v52 = vrot.slane %v11196_v8, %v7498_v30 }
0x1866   : > { %5970 = vrot.lane.b32.xlu0 %v5964_v19, %s7311_s30  ;;  %6072 = vrot.lane.b32.xlu1 %v6065_v47, %s7309_s28  ;;  %v5193_v19 = vrot.slane %v5184_v44, %v7496_v29  ;;  %v6264_v47 = vmul.f32 %v10907_v10, %v6052_v23  ;;  %v12566_v23 = vld [vmem:[#allocation7_spill] sm:$0xff] }
0x186a   : > { %5974 = vrot.lane.b32.xlu0 %v5966_v62, %s7311_s30  ;;  %6172 = vrot.lane.b32.xlu1 %v6165_v63, %s7310_s29  ;;  %v5205_v62 = vmul.f32 %v5193_v19, %v10837_v22  ;;  %v5197_v63 = vrot.slane %v5184_v44, %v7498_v30  ;;  %v12567_v19 = vld [vmem:[#allocation8_spill] sm:$0xff] }
0x186e   : > { %6074 = vrot.lane.b32.xlu0 %v6066_v34, %s7309_s28  ;;  %6272 = vrot.lane.b32.xlu1 %v6265_v26, %s7311_s30  ;;  %v12565_v34 = vld [vmem:[#allocation6_spill] sm:$0xff] }
0x186f   : > { %v5223_v26 = vmul.f32 %v10930_v24, %v12565_v34  ;;  %v11228_v15 = vmul.f32 %v10996_v42, %v12565_v34 }
0x1871   : > { %v5232_v9 = vrot.slane %v5223_v26, %v7496_v29  ;;  %v5240_v33 = vrot.slane %v5223_v26, %v12452_v57 }
0x1872   : > { %6170 = vrot.lane.b32.xlu0 %v6164_v18, %s7310_s29  ;;  %6370 = vrot.lane.b32.xlu1 %v6364_v0, %s7309_s28  ;;  %v5206_v18 = vmul.f32 %v5197_v63, %v10837_v22  ;;  %v5201_v0 = vrot.slane %v5184_v44, %v12452_v57  ;;  %v5384_v63 = vmul.f32 %v10930_v24, %v12446_v48 }
0x1876   : > { %6174 = vrot.lane.b32.xlu0 %v6166_v60, %s7310_s29  ;;  %6372 = vrot.lane.b32.xlu1 %v6365_v28, %s7309_s28  ;;  %v5236_v60 = vrot.slane %v5223_v26, %v7498_v30  ;;  %v5284_v28 = vmul.f32 %v10930_v24, %v12566_v23 }
0x1878   : > { %v5245_v10 = vmul.f32 %v5236_v60, %v10778_v56  ;;  %v5297_v44 = vrot.slane %v5284_v28, %v7498_v30  ;;  %v5246_v60 = vmul.f32 %v5240_v33, %v10778_v56  ;;  %v5301_v26 = vrot.slane %v5284_v28, %v12452_v57 }
0x187a   : > { %6270 = vrot.lane.b32.xlu0 %v6264_v47, %s7311_s30  ;;  %5211 = vrot.lane.b32.xlu1 %v5205_v62, %s7312_s14  ;;  %v5323_v47 = vmul.f32 %v10930_v24, %v12567_v19  ;;  %v5207_v62 = vmul.f32 %v5201_v0, %v10837_v22  ;;  %v5483_v0 = vmul.f32 %v10948_v1, %v12564_v14 }
0x187b   : > { %v5293_v24 = vrot.slane %v5284_v28, %v7496_v29 }
0x187c   : > { %v5336_v22 = vrot.slane %v5323_v47, %v7498_v30  ;;  %v5332_v33 = vrot.slane %v5323_v47, %v7496_v29 }
0x187e   : > { %6274 = vrot.lane.b32.xlu0 %v6266_v55, %s7311_s30  ;;  %5213 = vrot.lane.b32.xlu1 %v5206_v18, %s7312_s14  ;;  %v5244_v55 = vmul.f32 %v5232_v9, %v10778_v56  ;;  %v5306_v18 = vmul.f32 %v5297_v44, %v10786_v35  ;;  %v5305_v9 = vmul.f32 %v5293_v24, %v10786_v35 }
0x187f   : > { %v11094_v56 = vmul.f32 %v10948_v1, %v12565_v34 }
0x1882   : > { %5215 = vrot.lane.b32.xlu0 %v5207_v62, %s7312_s14  ;;  %5252 = vrot.lane.b32.xlu1 %v5245_v10, %s7313_s17  ;;  %v5345_v62 = vmul.f32 %v5336_v22, %v10790_v12  ;;  %v5397_v10 = vrot.slane %v5384_v63, %v7498_v30  ;;  %v5535_v22 = vrot.slane %v11094_v56, %v7498_v30 }
0x1884   : > { %v5406_v44 = vmul.f32 %v5397_v10, %v10798_v58  ;;  %v5544_v24 = vmul.f32 %v5535_v22, %v10813_v51  ;;  %v5340_v10 = vrot.slane %v5323_v47, %v12452_v57 }
0x1886   : > { %5250 = vrot.lane.b32.xlu0 %v5244_v55, %s7313_s17  ;;  %5313 = vrot.lane.b32.xlu1 %v5306_v18, %s7314_s18  ;;  %v5496_v55 = vrot.slane %v5483_v0, %v7498_v30  ;;  %v5307_v18 = vmul.f32 %v5301_v26, %v10786_v35  ;;  %v11116_v26 = vmul.f32 %v10948_v1, %v12567_v19 }
0x1888   : > { %v5505_v28 = vmul.f32 %v5496_v55, %v10806_v25  ;;  %v5635_v47 = vrot.slane %v11116_v26, %v7498_v30 }
0x188a   : > { %5254 = vrot.lane.b32.xlu0 %v5246_v60, %s7313_s17  ;;  %5352 = vrot.lane.b32.xlu1 %v5345_v62, %s7315_s19  ;;  %v11105_v60 = vmul.f32 %v10948_v1, %v12566_v23  ;;  %v5344_v62 = vmul.f32 %v5332_v33, %v10790_v12  ;;  %v11127_v33 = vmul.f32 %v10948_v1, %v12446_v48 }
0x188b   : > { %v5644_v22 = vmul.f32 %v5635_v47, %v10839_v4 }
0x188c   : > { %v5596_v35 = vrot.slane %v11105_v60, %v7498_v30 }
0x188e   : > { %5311 = vrot.lane.b32.xlu0 %v5305_v9, %s7314_s18  ;;  %5413 = vrot.lane.b32.xlu1 %v5406_v44, %s7316_s20  ;;  %v5393_v9 = vrot.slane %v5384_v63, %v7496_v29  ;;  %v5346_v44 = vmul.f32 %v5340_v10, %v10790_v12  ;;  %v5605_v55 = vmul.f32 %v5596_v35, %v10830_v46 }
0x188f   : > { %v5696_v12 = vrot.slane %v11127_v33, %v7498_v30  ;;  %v11149_v35 = vmul.f32 %v10972_v20, %v12565_v34 }
0x1892   : > { %5315 = vrot.lane.b32.xlu0 %v5307_v18, %s7314_s18  ;;  %5512 = vrot.lane.b32.xlu1 %v5505_v28, %s7312_s14  ;;  %v5401_v18 = vrot.slane %v5384_v63, %v12452_v57  ;;  %v5405_v28 = vmul.f32 %v5393_v9, %v10798_v58  ;;  %v5492_v63 = vrot.slane %v5483_v0, %v7496_v29 }
0x1893   : > { %v5500_v9 = vrot.slane %v5483_v0, %v12452_v57 }
0x1894   : > { %v5407_v1 = vmul.f32 %v5401_v18, %v10798_v58  ;;  %v5834_v18 = vrot.slane %v11149_v35, %v7498_v30 }
0x1895   : > { %v5506_v0 = vmul.f32 %v5500_v9, %v10806_v25 }
0x1896   : > { %5350 = vrot.lane.b32.xlu0 %v5344_v62, %s7315_s19  ;;  %5551 = vrot.lane.b32.xlu1 %v5544_v24, %s7313_s17  ;;  %v11138_v62 = vmul.f32 %v10972_v20, %v12564_v14  ;;  %v5705_v24 = vmul.f32 %v5696_v12, %v10861_v16 }
0x1898   : > { %v5795_v10 = vrot.slane %v11138_v62, %v7498_v30 }
0x189a   : > { %5354 = vrot.lane.b32.xlu0 %v5346_v44, %s7315_s19  ;;  %5612 = vrot.lane.b32.xlu1 %v5605_v55, %s7314_s18  ;;  %v5504_v55 = vmul.f32 %v5492_v63, %v10806_v25  ;;  %v5804_v47 = vmul.f32 %v5795_v10, %v10871_v39  ;;  %v11180_v10 = vmul.f32 %v10972_v20, %v12567_v19 }
0x189b   : > { %v5539_v25 = vrot.slane %v11094_v56, %v12452_v57 }
0x189c   : > { %v5934_v40 = vrot.slane %v11180_v10, %v7498_v30 }
0x189e   : > { %5411 = vrot.lane.b32.xlu0 %v5405_v28, %s7316_s20  ;;  %5651 = vrot.lane.b32.xlu1 %v5644_v22, %s7315_s19  ;;  %v11164_v28 = vmul.f32 %v10972_v20, %v12566_v23  ;;  %v11212_v20 = vmul.f32 %v10996_v42, %v12564_v14 }
0x18a0   : > { %v5895_v63 = vrot.slane %v11164_v28, %v7498_v30  ;;  %v6095_v54 = vrot.slane %v11212_v20, %v7498_v30 }
0x18a2   : > { %5415 = vrot.lane.b32.xlu0 %v5407_v1, %s7316_s20  ;;  %5712 = vrot.lane.b32.xlu1 %v5705_v24, %s7316_s20  ;;  %v5843_v1 = vmul.f32 %v5834_v18, %v10875_v13  ;;  %v5531_v24 = vrot.slane %v11094_v56, %v7496_v29  ;;  %v5904_v18 = vmul.f32 %v5895_v63, %v10883_v17 }
0x18a3   : > { %v5545_v56 = vmul.f32 %v5539_v25, %v10813_v51  ;;  %v5592_v63 = vrot.slane %v11105_v60, %v7496_v29 }
0x18a4   : > { %v11154_v44 = vpop.permute.xlu0 %5174  ;;  %v11156_v58 = vpop.permute.xlu1 %5172 }
0x18a6   : > { %5510 = vrot.lane.b32.xlu0 %v5504_v55, %s7312_s14  ;;  %5811 = vrot.lane.b32.xlu1 %v5804_v47, %s7312_s14  ;;  %v5543_v47 = vmul.f32 %v5531_v24, %v10813_v51  ;;  %v5943_v24 = vmul.f32 %v5934_v40, %v10885_v5  ;;  %v5600_v51 = vrot.slane %v11105_v60, %v12452_v57 }
0x18a7   : > { %v5631_v60 = vrot.slane %v11116_v26, %v7496_v29 }
0x18a8   : > { %v11169_v22 = vpop.permute.xlu0 %5272  ;;  %v11171_v12 = vpop.permute.xlu1 %5176 }
0x18aa   : > { %5514 = vrot.lane.b32.xlu0 %v5506_v0, %s7312_s14  ;;  %5850 = vrot.lane.b32.xlu1 %v5843_v1, %s7313_s17 }
0x18ac   : > { %v11186_v9 = vpop.permute.xlu0 %5276  ;;  %v11188_v55 = vpop.permute.xlu1 %5274 }
0x18ae   : > { %5549 = vrot.lane.b32.xlu0 %v5543_v47, %s7313_s17  ;;  %5911 = vrot.lane.b32.xlu1 %v5904_v18, %s7314_s18  ;;  %v5604_v47 = vmul.f32 %v5592_v63, %v10830_v46  ;;  %v6004_v18 = vmul.f32 %v5995_v52, %v10893_v27  ;;  %v5606_v52 = vmul.f32 %v5600_v51, %v10830_v46 }
0x18af   : > { %v6104_v63 = vmul.f32 %v6095_v54, %v10897_v59  ;;  %v5639_v54 = vrot.slane %v11116_v26, %v12452_v57 }
0x18b0   : > { %v11201_v0 = vpop.permute.xlu0 %5372  ;;  %v11203_v1 = vpop.permute.xlu1 %5374 }
0x18b1   : > { %v5645_v26 = vmul.f32 %v5639_v54, %v10839_v4  ;;  %v5700_v54 = vrot.slane %v11127_v33, %v12452_v57 }
0x18b2   : > { %5553 = vrot.lane.b32.xlu0 %v5545_v56, %s7313_s17  ;;  %5950 = vrot.lane.b32.xlu1 %v5943_v24, %s7315_s19 }
0x18b4   : > { %v11218_v25 = vpop.permute.xlu0 %5376  ;;  %v11220_v40 = vpop.permute.xlu1 %5471 }
0x18b5   : > { %12568 = vst [vmem:[#allocation19_spill] sm:$0xff] %v11218_v25  ;;  %12569 = vst [vmem:[#allocation16_spill] sm:$0xff] %v11220_v40  ;;  %v6134_v40 = vrot.slane %v11228_v15, %v7498_v30  ;;  %v11244_v25 = vmul.f32 %v10996_v42, %v12566_v23 }
0x18b6   : > { %5610 = vrot.lane.b32.xlu0 %v5604_v47, %s7314_s18  ;;  %6011 = vrot.lane.b32.xlu1 %v6004_v18, %s7316_s20  ;;  %v5643_v47 = vmul.f32 %v5631_v60, %v10839_v4  ;;  %v5692_v60 = vrot.slane %v11127_v33, %v7496_v29 }
0x18b7   : > { %v6143_v46 = vmul.f32 %v6134_v40, %v10899_v38  ;;  %v6195_v51 = vrot.slane %v11244_v25, %v7498_v30 }
0x18b8   : > { %v11234_v56 = vpop.permute.xlu0 %5475  ;;  %v11236_v24 = vpop.permute.xlu1 %5473 }
0x18b9   : > { %12570 = vst [vmem:[#allocation17_spill] sm:$0xff] %v11234_v56  ;;  %12571 = vst [vmem:[#allocation22_spill] sm:$0xff] %v11236_v24  ;;  %v11260_v24 = vmul.f32 %v10996_v42, %v12567_v19 }
0x18ba   : > { %5614 = vrot.lane.b32.xlu0 %v5606_v52, %s7314_s18  ;;  %6111 = vrot.lane.b32.xlu1 %v6104_v63, %s7312_s14  ;;  %v6204_v63 = vmul.f32 %v6195_v51, %v10903_v43 }
0x18bc   : > { %v11249_v18 = vpop.permute.xlu0 %5571  ;;  %v11251_v56 = vpop.permute.xlu1 %5573 }
0x18bd   : > { %12572 = vst [vmem:[#allocation15_spill] sm:$0xff] %v11249_v18  ;;  %12573 = vst [vmem:[#allocation24_spill] sm:$0xff] %v11251_v56  ;;  %v6234_v18 = vrot.slane %v11260_v24, %v7498_v30  ;;  %v11276_v56 = vmul.f32 %v10996_v42, %v12446_v48 }
0x18be   : > { %5649 = vrot.lane.b32.xlu0 %v5643_v47, %s7315_s19  ;;  %6150 = vrot.lane.b32.xlu1 %v6143_v46, %s7313_s17 }
0x18bf   : > { %v6243_v4 = vmul.f32 %v6234_v18, %v10905_v61  ;;  %v6295_v51 = vrot.slane %v11276_v56, %v7498_v30  ;;  %v5791_v18 = vrot.slane %v11138_v62, %v7496_v29 }
0x18c0   : > { %v11266_v52 = vpop.permute.xlu0 %5575  ;;  %v11268_v40 = vpop.permute.xlu1 %5673 }
0x18c1   : > { %12574 = vst [vmem:[#allocation26_spill] sm:$0xff] %v11268_v40  ;;  %v5704_v40 = vmul.f32 %v5692_v60, %v10861_v16  ;;  %v6304_v60 = vmul.f32 %v6295_v51, %v10909_v53 }
0x18c2   : > { %5653 = vrot.lane.b32.xlu0 %v5645_v26, %s7315_s19  ;;  %6211 = vrot.lane.b32.xlu1 %v6204_v63, %s7314_s18  ;;  %v5706_v63 = vmul.f32 %v5700_v54, %v10861_v16  ;;  %v11311_v16 = vmul.f32 %v11020_v2, %v12564_v14  ;;  %v11317_v54 = vld [vmem:[%s11838_s11] sm:$0x3f] }
0x18c4   : > { %v11280_v47 = vpop.permute.xlu0 %5671  ;;  %v11282_v46 = vpop.permute.xlu1 %5770 }
0x18c5   : > { %12575 = vst [vmem:[#allocation28_spill] sm:$0xff] %v11282_v46  ;;  %v5799_v46 = vrot.slane %v11138_v62, %v12452_v57  ;;  %v5830_v62 = vrot.slane %v11149_v35, %v7496_v29 }
0x18c6   : > { %5710 = vrot.lane.b32.xlu0 %v5704_v40, %s7316_s20  ;;  %6250 = vrot.lane.b32.xlu1 %v6243_v4, %s7315_s19  ;;  %v5803_v4 = vmul.f32 %v5791_v18, %v10871_v39  ;;  %v6391_v18 = vrot.slane %v11311_v16, %v7496_v29 }
0x18c8   : > { %v11292_v42 = vpop.permute.xlu0 %5675  ;;  %v11294_v26 = vpop.permute.xlu1 %5772 }
0x18c9   : > { %12576 = vst [vmem:[#allocation29_spill] sm:$0xff] %v11294_v26 }
0x18ca   : > { %5714 = vrot.lane.b32.xlu0 %v5706_v63, %s7316_s20  ;;  %6311 = vrot.lane.b32.xlu1 %v6304_v60, %s7316_s20  ;;  %v5805_v60 = vmul.f32 %v5799_v46, %v10871_v39  ;;  %v5838_v39 = vrot.slane %v11149_v35, %v12452_v57  ;;  %v6403_v46 = vmul.f32 %v6391_v18, %v10877_v31  ;;  %v12585_v18 = vmov 45  }
0x18cb   : > { %v5891_v35 = vrot.slane %v11164_v28, %v7496_v29 }
0x18cc   : > { %v11302_v33 = vpop.permute.xlu0 %5774  ;;  %v11304_v40 = vpop.permute.xlu1 %5872 }
0x18cd   : > { %12577 = vst [vmem:[#allocation31_spill] sm:$0xff] %v11302_v33  ;;  %12578 = vst [vmem:[#allocation33_spill] sm:$0xff] %v11304_v40 }
0x18ce   : > { %5809 = vrot.lane.b32.xlu0 %v5803_v4, %s7312_s14  ;;  %6861 = vperm.xlu1 %7260, %v11317_v54   ;;  %v12581_v4 = vmov 53  }
0x18d0   : > { %v11320_v51 = vpop.permute.xlu0 %5870  ;;  %v11322_v63 = vpop.permute.xlu1 %5972 }
0x18d1   : > { %12579 = vst [vmem:[#allocation34_spill] sm:$0xff] %v11320_v51  ;;  %12580 = vst [vmem:[#allocation43_spill] sm:$0xff] %v11322_v63  ;;  %v5842_v63 = vmul.f32 %v5830_v62, %v10875_v13  ;;  %v6399_v51 = vrot.slane %v11311_v16, %v12452_v57  ;;  %v5844_v62 = vmul.f32 %v5838_v39, %v10875_v13 }
0x18d2   : > { %5813 = vrot.lane.b32.xlu0 %v5805_v60, %s7312_s14  ;;  %7261 = vset.pattern.permute.xlu1 %v12581_v4  ;;  %v11344_v60 = vmul.f32 %v11020_v2, %v12565_v34  ;;  %v5903_v13 = vmul.f32 %v5891_v35, %v10883_v17  ;;  %v5899_v39 = vrot.slane %v11164_v28, %v12452_v57 }
0x18d3   : > { %6884 = vperm.xlu1 %7261, %v11317_v54   ;;  %v6464_v35 = vmul.f32 %v10915_v32, %v11028_v6  ;;  %v11382_v28 = vrot.slane %v11020_v2, %v12452_v57 }
0x18d4   : > { %v11332_v40 = vpop.permute.xlu0 %5874  ;;  %v11334_v33 = vpop.permute.xlu1 %6070  ;;  %v6434_v26 = vrot.slane %v11344_v60, %v7498_v30 }
0x18d5   : > { %12582 = vst [vmem:[#allocation46_spill] sm:$0xff] %v11332_v40  ;;  %12583 = vst [vmem:[#allocation71_spill] sm:$0xff] %v11334_v33  ;;  %v6405_v40 = vmul.f32 %v6399_v51, %v10877_v31 }
0x18d6   : > { %5848 = vrot.lane.b32.xlu0 %v5842_v63, %s7313_s17 }
0x18d7   : > { %6409 = vrot.lane.b32.xlu1 %v6403_v46, %s7312_s14 }
0x18d8   : > { %v11348_v4 = vpop.permute.xlu0 %5970  ;;  %v11350_v33 = vpop.permute.xlu1 %6072  ;;  %7262 = vset.pattern.permute.xlu1 %v12585_v18  ;;  %v6443_v18 = vmul.f32 %v6434_v26, %v10913_v36  ;;  %v11386_v26 = vmul.f32 %v11020_v2, %v12566_v23 }
0x18d9   : > { %12584 = vst [vmem:[#allocation20_spill] sm:$0xff] %v11350_v33  ;;  %v11413_v33 = vmul.f32 %v11020_v2, %v12567_v19  ;;  %v5999_v19 = vrot.slane %v11196_v8, %v12452_v57 }
0x18da   : > { %5852 = vrot.lane.b32.xlu0 %v5844_v62, %s7313_s17 }
0x18db   : > { %6413 = vrot.lane.b32.xlu1 %v6405_v40, %s7312_s14  ;;  %v5905_v40 = vmul.f32 %v5899_v39, %v10883_v17 }
0x18dc   : > { %v11361_v63 = vpop.permute.xlu0 %5974  ;;  %v11363_v46 = vpop.permute.xlu1 %6172 }
0x18dd   : > { %12586 = vst [vmem:[#allocation32_spill] sm:$0xff] %v11361_v63  ;;  %12587 = vst [vmem:[#allocation81_spill] sm:$0xff] %v11363_v46  ;;  %v5930_v46 = vrot.slane %v11180_v10, %v7496_v29 }
0x18de   : > { %5909 = vrot.lane.b32.xlu0 %v5903_v13, %s7314_s18 }
0x18df   : > { %6450 = vrot.lane.b32.xlu1 %v6443_v18, %s7313_s17  ;;  %v5942_v39 = vmul.f32 %v5930_v46, %v10885_v5  ;;  %v5938_v18 = vrot.slane %v11180_v10, %v12452_v57  ;;  %v5991_v46 = vrot.slane %v11196_v8, %v7496_v29  ;;  %v5122_v10 = vld [vmem:[#allocation2] ss:$8 sm:$0x3] }
0x18e0   : > { %v11371_v51 = vpop.permute.xlu0 %6074  ;;  %v11373_v62 = vpop.permute.xlu1 %6272 }
0x18e1   : > { %12588 = vst [vmem:[#allocation83_spill] sm:$0xff] %v11371_v51  ;;  %12589 = vst [vmem:[#allocation85_spill] sm:$0xff] %v11373_v62  ;;  %v6466_v62 = vmul.f32 %v10915_v32, %v11382_v28  ;;  %v6495_v51 = vrot.slane %v11386_v26, %v7498_v30 }
0x18e2   : > { %5913 = vrot.lane.b32.xlu0 %v5905_v40, %s7314_s18 }
0x18e3   : > { %6470 = vrot.lane.b32.xlu1 %v6464_v35, %s7310_s29 }
0x18e4   : > { %v11390_v13 = vpop.permute.xlu0 %6170  ;;  %v11392_v17 = vpop.permute.xlu1 %6370 }
0x18e5   : > { %12590 = vst [vmem:[#allocation87_spill] sm:$0xff] %v11390_v13  ;;  %12591 = vst [vmem:[#allocation89_spill] sm:$0xff] %v11392_v17  ;;  %v5944_v17 = vmul.f32 %v5938_v18, %v10885_v5  ;;  %v6504_v13 = vmul.f32 %v6495_v51, %v10881_v50  ;;  %v6003_v51 = vmul.f32 %v5991_v46, %v10893_v27 }
0x18e6   : > { %5948 = vrot.lane.b32.xlu0 %v5942_v39, %s7315_s19  ;;  %v6091_v46 = vrot.slane %v11212_v20, %v7496_v29 }
0x18e7   : > { %6474 = vrot.lane.b32.xlu1 %v6466_v62, %s7310_s29  ;;  %v11420_v62 = vld [vmem:[%s11828_s1] sm:$0x3] }
0x18e8   : > { %v11403_v40 = vpop.permute.xlu0 %6174  ;;  %v11405_v35 = vpop.permute.xlu1 %6372  ;;  %v5123_v5 = vmul.f32 %v11420_v62, %v5122_v10 }
0x18e9   : > { %12592 = vst [vmem:[#allocation91_spill] sm:$0xff] %v11403_v40  ;;  %12593 = vst [vmem:[#allocation93_spill] sm:$0xff] %v11405_v35 }
0x18ea   : > { %5952 = vrot.lane.b32.xlu0 %v5944_v17, %s7315_s19  ;;  %v6534_v17 = vrot.slane %v11413_v33, %v7498_v30  ;;  %v5138_v63 = vrot.slane %v5123_v5, %v7498_v30 }
0x18eb   : > { %6511 = vrot.lane.b32.xlu1 %v6504_v13, %s7314_s18  ;;  %v5134_v13 = vrot.slane %v5123_v5, %v7496_v29  ;;  %v5179_v5 = vsel %vm522_vm8, %v11154_v44, %v11171_v12 }
0x18ec   : > { %v11423_v39 = vpop.permute.xlu0 %6270  ;;  %v5212_v18 = vpop.permute.xlu1 %5211  ;;  %v6543_v8 = vmul.f32 %v6534_v17, %v10917_v49 }
0x18ed   : > { %12594 = vst [vmem:[#allocation95_spill] sm:$0xff] %v11423_v39  ;;  %v6005_v39 = vmul.f32 %v5999_v19, %v10893_v27  ;;  %v6103_v19 = vmul.f32 %v6091_v46, %v10897_v59 }
0x18ee   : > { %6009 = vrot.lane.b32.xlu0 %v6003_v51, %s7316_s20  ;;  %v5178_v51 = vsel %vm522_vm8, %v11156_v58, %v11154_v44  ;;  %v11455_v58 = vmul.f32 %v11020_v2, %v12446_v48  ;;  %v6130_v2 = vrot.slane %v11228_v15, %v7496_v29 }
0x18ef   : > { %6625 = vperm.xlu1 %7262, %v11317_v54  }
0x18f0   : > { %v11433_v35 = vpop.permute.xlu0 %6274  ;;  %v5214_v10 = vpop.permute.xlu1 %5213  ;;  %v6595_v44 = vrot.slane %v11455_v58, %v7498_v30 }
0x18f1   : > { %12595 = vst [vmem:[#allocation97_spill] sm:$0xff] %v11433_v35  ;;  %v5217_v40 = vsel %vm569_vm9, %v5212_v18, %v5214_v10  ;;  %v5141_v35 = vmul.f32 %v5134_v13, %v10828_v41  ;;  %v6099_v18 = vrot.slane %v11212_v20, %v12452_v57  ;;  %v5142_v20 = vmul.f32 %v5138_v63, %v10828_v41  ;;  %v11473_v63 = vld [vmem:[#allocation2 + $0x5] ss:$8 sm:$0x7] }
0x18f2   : > { %6013 = vrot.lane.b32.xlu0 %v6005_v39, %s7316_s20  ;;  %v6564_v39 = vmul.f32 %v10919_v7, %v11028_v6 }
0x18f3   : > { %6550 = vrot.lane.b32.xlu1 %v6543_v8, %s7315_s19  ;;  %v5182_v17 = vadd.f32 %v5178_v51, %v5141_v35  ;;  %v6105_v6 = vmul.f32 %v6099_v18, %v10897_v59  ;;  %v5183_v12 = vadd.f32 %v5179_v5, %v5142_v20  ;;  %v5278_v20 = vsel %vm639_vm11, %v11169_v22, %v11188_v55 }
0x18f4   : > { %v5216_v27 = vpop.permute.xlu0 %5215  ;;  %7263 = vset.pattern.permute.xlu1 %v12439_v21  ;;  %v5253_v46 = vpop.permute.xlu1 %5252  ;;  %v11502_v22 = vmul.f32 %v11473_v63, %v12564_v14 }
0x18f5   : > { %v5221_v13 = vadd.f32 %v5217_v40, %v5182_v17  ;;  %v5218_v35 = vsel %vm569_vm9, %v5214_v10, %v5216_v27  ;;  %v6142_v10 = vmul.f32 %v6130_v2, %v10899_v38  ;;  %v6138_v27 = vrot.slane %v11228_v15, %v12452_v57 }
0x18f6   : > { %6109 = vrot.lane.b32.xlu0 %v6103_v19, %s7312_s14  ;;  %v6566_v19 = vmul.f32 %v10919_v7, %v11382_v28  ;;  %v5222_v59 = vadd.f32 %v5218_v35, %v5183_v12  ;;  %v11483_v17 = vrot.slane %v11473_v63, %v7496_v29 }
0x18f7   : > { %6570 = vrot.lane.b32.xlu1 %v6564_v39, %s7311_s30  ;;  %v6604_v39 = vmul.f32 %v6595_v44, %v10887_v3 }
0x18f8   : > { %v5251_v8 = vpop.permute.xlu0 %5250  ;;  %v6664_v35 = vmul.f32 %v11483_v17, %v10921_v11 }
0x18f9   : > { %v5256_v51 = vsel %vm616_vm10, %v5251_v8, %v5253_v46  ;;  %v5314_v8 = vpop.permute.xlu1 %5313 }
0x18fa   : > { %v5260_v41 = vadd.f32 %v5256_v51, %v5221_v13  ;;  %6113 = vrot.lane.b32.xlu0 %v6105_v6, %s7312_s14  ;;  %v6191_v6 = vrot.slane %v11244_v25, %v7496_v29  ;;  %v11498_v51 = vrot.slane %v11473_v63, %v12452_v57 }
0x18fb   : > { %6574 = vrot.lane.b32.xlu1 %v6566_v19, %s7311_s30 }
0x18fc   : > { %v5255_v40 = vpop.permute.xlu0 %5254  ;;  %v5282_v13 = vadd.f32 %v5278_v20, %v5260_v41  ;;  %v6203_v41 = vmul.f32 %v6191_v6, %v10903_v43  ;;  %v6666_v14 = vmul.f32 %v11498_v51, %v10921_v11  ;;  %v6238_v6 = vrot.slane %v11260_v24, %v12452_v57 }
0x18fd   : > { %v5257_v18 = vsel %vm616_vm10, %v5253_v46, %v5255_v40  ;;  %v6144_v46 = vmul.f32 %v6138_v27, %v10899_v38  ;;  %v5279_v38 = vsel %vm639_vm11, %v11188_v55, %v11186_v9  ;;  %v11519_v9 = vmul.f32 %v11473_v63, %v12565_v34  ;;  %v5423_v27 = vld [vmem:[#allocation2 + $0x1] ss:$8 sm:$0x3] }
0x18fe   : > { %v5261_v5 = vadd.f32 %v5257_v18, %v5222_v59  ;;  %6148 = vrot.lane.b32.xlu0 %v6142_v10, %s7313_s17  ;;  %v6199_v59 = vrot.slane %v11244_v25, %v12452_v57  ;;  %v6695_v10 = vrot.slane %v11502_v22, %v7498_v30  ;;  %v5353_v18 = vpop.permute.xlu1 %5352 }
0x18ff   : > { %6611 = vrot.lane.b32.xlu1 %v6604_v39, %s7316_s20  ;;  %v6730_v34 = vrot.slane %v11519_v9, %v7496_v29 }
0x1900   : > { %v5312_v15 = vpop.permute.xlu0 %5311  ;;  %v5283_v44 = vadd.f32 %v5279_v38, %v5261_v5  ;;  %v6205_v39 = vmul.f32 %v6199_v59, %v10903_v43  ;;  %v6230_v5 = vrot.slane %v11260_v24, %v7496_v29  ;;  %v6738_v38 = vrot.slane %v11519_v9, %v12452_v57 }
0x1901   : > { %v5317_v2 = vsel %vm685_vm12, %v5312_v15, %v5314_v8  ;;  %v5424_v15 = vmul.f32 %v11420_v62, %v5423_v27  ;;  %v11553_v27 = vrot.slane %v11473_v63, %v7498_v30 }
0x1902   : > { %v5321_v19 = vadd.f32 %v5317_v2, %v5282_v13  ;;  %6152 = vrot.lane.b32.xlu0 %v6144_v46, %s7313_s17  ;;  %v6704_v13 = vmul.f32 %v6695_v10, %v10923_v37  ;;  %v6242_v43 = vmul.f32 %v6230_v5, %v10905_v61  ;;  %v12597_v5 = vld [vmem:[#allocation19_spill] sm:$0xff] }
0x1903   : > { %6670 = vrot.lane.b32.xlu1 %v6664_v35, %s7309_s28  ;;  %v6742_v35 = vmul.f32 %v6730_v34, %v10891_v45 }
0x1904   : > { %v5316_v12 = vpop.permute.xlu0 %5315 }
0x1905   : > { %v5318_v40 = vsel %vm685_vm12, %v5314_v8, %v5316_v12  ;;  %v5378_v12 = vsel %vm754_vm14, %v11201_v0, %v11203_v1  ;;  %v11557_v0 = vmul.f32 %v11473_v63, %v12566_v23  ;;  %v6299_v23 = vrot.slane %v11276_v56, %v12452_v57 }
0x1906   : > { %v5322_v55 = vadd.f32 %v5318_v40, %v5283_v44  ;;  %6209 = vrot.lane.b32.xlu0 %v6203_v41, %s7314_s18  ;;  %v5433_v44 = vrot.slane %v5424_v15, %v7496_v29  ;;  %v5414_v41 = vpop.permute.xlu1 %5413  ;;  %v6244_v40 = vmul.f32 %v6238_v6, %v10905_v61  ;;  %v5437_v61 = vrot.slane %v5424_v15, %v7498_v30  ;;  %v12598_v6 = vld [vmem:[#allocation25_spill] sm:$0xff] }
0x1907   : > { %6674 = vrot.lane.b32.xlu1 %v6666_v14, %s7309_s28  ;;  %v6291_v14 = vrot.slane %v11276_v56, %v7496_v29  ;;  %v6791_v15 = vrot.slane %v11557_v0, %v7496_v29 }
0x1908   : > { %v5351_v25 = vpop.permute.xlu0 %5350 }
0x1909   : > { %v5356_v20 = vsel %vm731_vm13, %v5351_v25, %v5353_v18 }
0x190a   : > { %v5360_v8 = vadd.f32 %v5356_v20, %v5321_v19  ;;  %6213 = vrot.lane.b32.xlu0 %v6205_v39, %s7314_s18  ;;  %v5379_v20 = vsel %vm754_vm14, %v11203_v1, %v12597_v5  ;;  %v5513_v56 = vpop.permute.xlu1 %5512 }
0x190b   : > { %6711 = vrot.lane.b32.xlu1 %v6704_v13, %s7312_s14 }
0x190c   : > { %v5355_v46 = vpop.permute.xlu0 %5354  ;;  %v5382_v24 = vadd.f32 %v5378_v12, %v5360_v8 }
0x190d   : > { %v5357_v2 = vsel %vm731_vm13, %v5353_v18, %v5355_v46  ;;  %v12596_v18 = vld [vmem:[#allocation14_spill] sm:$0xff]  ;;  %v6303_v46 = vmul.f32 %v6291_v14, %v10909_v53  ;;  %v12601_v14 = vld [vmem:[#allocation41_spill] sm:$0xff] }
0x190e   : > { %v5361_v19 = vadd.f32 %v5357_v2, %v5322_v55  ;;  %6248 = vrot.lane.b32.xlu0 %v6242_v43, %s7315_s19  ;;  %v6744_v55 = vmul.f32 %v6738_v38, %v10891_v45  ;;  %v5440_v25 = vmul.f32 %v5433_v44, %v12596_v18  ;;  %v6765_v2 = vmul.f32 %v12598_v6, %v11553_v27  ;;  %v12599_v38 = vld [vmem:[#allocation22_spill] sm:$0xff] }
0x190f   : > { %6748 = vrot.lane.b32.xlu1 %v6742_v35, %s7313_s17  ;;  %v5441_v1 = vmul.f32 %v5437_v61, %v12596_v18 }
0x1910   : > { %v5412_v59 = vpop.permute.xlu0 %5411  ;;  %v5383_v13 = vadd.f32 %v5379_v20, %v5361_v19  ;;  %v12600_v19 = vld [vmem:[#allocation16_spill] sm:$0xff] }
0x1911   : > { %v5417_v10 = vsel %vm800_vm15, %v5412_v59, %v5414_v41  ;;  %v5477_v44 = vsel %vm522_vm8, %v12600_v19, %v12599_v38  ;;  %v6305_v59 = vmul.f32 %v6299_v23, %v10909_v53 }
0x1912   : > { %v5421_v39 = vadd.f32 %v5417_v10, %v5382_v24  ;;  %6252 = vrot.lane.b32.xlu0 %v6244_v40, %s7315_s19  ;;  %v6803_v10 = vmul.f32 %v6791_v15, %v12601_v14 }
0x1913   : > { %6752 = vrot.lane.b32.xlu1 %v6744_v55, %s7313_s17  ;;  %v6799_v55 = vrot.slane %v11557_v0, %v12452_v57 }
0x1914   : > { %v5442_v34 = vadd.f32 %v5440_v25, %v5421_v39  ;;  %v5416_v8 = vpop.permute.xlu0 %5415  ;;  %v12602_v25 = vld [vmem:[#allocation17_spill] sm:$0xff] }
0x1915   : > { %v5418_v43 = vsel %vm800_vm15, %v5414_v41, %v5416_v8  ;;  %v5478_v39 = vsel %vm522_vm8, %v12599_v38, %v12602_v25  ;;  %v6805_v20 = vmul.f32 %v6799_v55, %v12601_v14 }
0x1916   : > { %v5422_v35 = vadd.f32 %v5418_v43, %v5383_v13  ;;  %6309 = vrot.lane.b32.xlu0 %v6303_v46, %s7316_s20  ;;  %v5481_v24 = vadd.f32 %v5477_v44, %v5442_v34  ;;  %v5552_v34 = vpop.permute.xlu1 %5551  ;;  %v12603_v46 = vld [vmem:[#allocation18_spill] sm:$0xff]  ;;  %v6395_v43 = vrot.slane %v11311_v16, %v7498_v30  ;;  %v12605_v16 = vld [vmem:[#allocation15_spill] sm:$0xff] }
0x1917   : > { %6772 = vrot.lane.b32.xlu1 %v6765_v2, %s7310_s29  ;;  %v6366_v23 = vmul.f32 %v11382_v28, %v12603_v46  ;;  %v12604_v28 = vld [vmem:[#allocation24_spill] sm:$0xff] }
0x1918   : > { %v5443_v12 = vadd.f32 %v5441_v1, %v5422_v35  ;;  %v5511_v41 = vpop.permute.xlu0 %5510  ;;  %v6430_v35 = vrot.slane %v11344_v60, %v7496_v29  ;;  %v5577_v44 = vsel %vm639_vm11, %v12605_v16, %v12604_v28  ;;  %v12608_v16 = vld [vmem:[#allocation12_spill] sm:$0xff] }
0x1919   : > { %v5516_v40 = vsel %vm569_vm9, %v5511_v41, %v5513_v56 }
0x191a   : > { %v5520_v18 = vadd.f32 %v5516_v40, %v5481_v24  ;;  %6313 = vrot.lane.b32.xlu0 %v6305_v59, %s7316_s20  ;;  %v5482_v5 = vadd.f32 %v5478_v39, %v5443_v12  ;;  %v5578_v40 = vsel %vm639_vm11, %v12604_v28, %v11266_v52  ;;  %v6530_v28 = vrot.slane %v11413_v33, %v7496_v29 }
0x191b   : > { %6809 = vrot.lane.b32.xlu1 %v6803_v10, %s7314_s18 }
0x191c   : > { %v5515_v61 = vpop.permute.xlu0 %5514 }
0x191d   : > { %v5517_v53 = vsel %vm569_vm9, %v5513_v56, %v5515_v61  ;;  %v5613_v56 = vpop.permute.xlu1 %5612  ;;  %v5722_v61 = vld [vmem:[#allocation2 + $0x2] ss:$8 sm:$0x3] }
0x191e   : > { %v5521_v13 = vadd.f32 %v5517_v53, %v5482_v5  ;;  %6823 = vperm.xlu0 %7259, %v11317_v54   ;;  %v6404_v54 = vmul.f32 %v6395_v43, %v10877_v31  ;;  %v6438_v31 = vrot.slane %v11344_v60, %v12452_v57  ;;  %v12606_v53 = vld [vmem:[#allocation48_spill] sm:$0xff] }
0x191f   : > { %6813 = vrot.lane.b32.xlu1 %v6805_v20, %s7314_s18  ;;  %v6465_v20 = vmul.f32 %v10915_v32, %v12606_v53 }
0x1920   : > { %v5550_v8 = vpop.permute.xlu0 %5549 }
0x1921   : > { %v5555_v2 = vsel %vm616_vm10, %v5550_v8, %v5552_v34  ;;  %v5652_v60 = vpop.permute.xlu1 %5651 }
0x1922   : > { %v5559_v15 = vadd.f32 %v5555_v2, %v5520_v18  ;;  %6374 = vrot.lane.b32.xlu0 %v6366_v23, %s7309_s28  ;;  %v6444_v18 = vmul.f32 %v6438_v31, %v10913_v36  ;;  %v6499_v23 = vrot.slane %v11386_v26, %v12452_v57 }
0x1923   : > { %7264 = vset.pattern.permute.xlu0 %v12439_v21  ;;  %v6442_v21 = vmul.f32 %v6430_v35, %v10913_v36  ;;  %v5723_v36 = vmul.f32 %v11420_v62, %v5722_v61 }
0x1924   : > { %v5554_v1 = vpop.permute.xlu0 %5553  ;;  %v5581_v41 = vadd.f32 %v5577_v44, %v5559_v15  ;;  %v12607_v15 = vld [vmem:[#allocation26_spill] sm:$0xff] }
0x1925   : > { %v5556_v38 = vsel %vm616_vm10, %v5552_v34, %v5554_v1  ;;  %v5732_v32 = vrot.slane %v5723_v36, %v7496_v29  ;;  %v5677_v1 = vsel %vm754_vm14, %v11280_v47, %v12607_v15  ;;  %v5678_v47 = vsel %vm754_vm14, %v12607_v15, %v11292_v42 }
0x1926   : > { %v5560_v19 = vadd.f32 %v5556_v38, %v5521_v13  ;;  %6411 = vrot.lane.b32.xlu0 %v6404_v54, %s7312_s14  ;;  %v6491_v13 = vrot.slane %v11386_v26, %v7496_v29  ;;  %v5713_v54 = vpop.permute.xlu1 %5712  ;;  %v6599_v15 = vrot.slane %v11455_v58, %v12452_v57 }
0x1927   : > { %v5739_v44 = vmul.f32 %v5732_v32, %v12608_v16 }
0x1928   : > { %v5611_v12 = vpop.permute.xlu0 %5610  ;;  %v5582_v55 = vadd.f32 %v5578_v40, %v5560_v19  ;;  %v6503_v46 = vmul.f32 %v6491_v13, %v10881_v50  ;;  %v6505_v19 = vmul.f32 %v6499_v23, %v10881_v50  ;;  %v6542_v50 = vmul.f32 %v6530_v28, %v10917_v49  ;;  %v12611_v13 = vld [vmem:[#allocation31_spill] sm:$0xff]  ;;  %v12613_v28 = vld [vmem:[#allocation34_spill] sm:$0xff] }
0x1929   : > { %v5616_v24 = vsel %vm685_vm12, %v5611_v12, %v5613_v56  ;;  %v5736_v12 = vrot.slane %v5723_v36, %v7498_v30 }
0x192a   : > { %v5620_v59 = vadd.f32 %v5616_v24, %v5581_v41  ;;  %6448 = vrot.lane.b32.xlu0 %v6442_v21, %s7313_s17  ;;  %v6538_v24 = vrot.slane %v11413_v33, %v12452_v57  ;;  %v5812_v42 = vpop.permute.xlu1 %5811 }
0x192b   : > { %v5740_v40 = vmul.f32 %v5736_v12, %v12608_v16  ;;  %v6691_v12 = vrot.slane %v11502_v22, %v7496_v29 }
0x192c   : > { %v5615_v10 = vpop.permute.xlu0 %5614 }
0x192d   : > { %v5617_v25 = vsel %vm685_vm12, %v5613_v56, %v5615_v10 }
0x192e   : > { %v5621_v39 = vadd.f32 %v5617_v25, %v5582_v55  ;;  %6452 = vrot.lane.b32.xlu0 %v6444_v18, %s7313_s17  ;;  %v12609_v55 = vld [vmem:[#allocation29_spill] sm:$0xff]  ;;  %v12610_v18 = vld [vmem:[#allocation28_spill] sm:$0xff] }
0x192f   : > { %v5776_v25 = vsel %vm522_vm8, %v12610_v18, %v12609_v55 }
0x1930   : > { %v5650_v5 = vpop.permute.xlu0 %5649 }
0x1931   : > { %v5655_v52 = vsel %vm731_vm13, %v5650_v5, %v5652_v60  ;;  %v6544_v5 = vmul.f32 %v6538_v24, %v10917_v49  ;;  %v6703_v24 = vmul.f32 %v6691_v12, %v10923_v37 }
0x1932   : > { %v5659_v34 = vadd.f32 %v5655_v52, %v5620_v59  ;;  %6472 = vrot.lane.b32.xlu0 %v6465_v20, %s7310_s29  ;;  %v5777_v52 = vsel %vm522_vm8, %v12609_v55, %v12611_v13  ;;  %v12615_v13 = vld [vmem:[#allocation43_spill] sm:$0xff] }
0x1934   : > { %v5654_v8 = vpop.permute.xlu0 %5653  ;;  %v5681_v38 = vadd.f32 %v5677_v1, %v5659_v34 }
0x1935   : > { %v5656_v43 = vsel %vm731_vm13, %v5652_v60, %v5654_v8  ;;  %v6565_v8 = vmul.f32 %v10919_v7, %v12606_v53  ;;  %v6605_v53 = vmul.f32 %v6599_v15, %v10887_v3 }
0x1936   : > { %v5660_v2 = vadd.f32 %v5656_v43, %v5621_v39  ;;  %6509 = vrot.lane.b32.xlu0 %v6503_v46, %s7314_s18  ;;  %v6591_v46 = vrot.slane %v11455_v58, %v7496_v29  ;;  %v5851_v43 = vpop.permute.xlu1 %5850 }
0x1938   : > { %v5711_v35 = vpop.permute.xlu0 %5710  ;;  %v5682_v31 = vadd.f32 %v5678_v47, %v5660_v2  ;;  %v6603_v32 = vmul.f32 %v6591_v46, %v10887_v3 }
0x1939   : > { %v5716_v26 = vsel %vm800_vm15, %v5711_v35, %v5713_v54 }
0x193a   : > { %v5720_v56 = vadd.f32 %v5716_v26, %v5681_v38  ;;  %6513 = vrot.lane.b32.xlu0 %v6505_v19, %s7314_s18  ;;  %v12612_v19 = vld [vmem:[#allocation33_spill] sm:$0xff]  ;;  %v5912_v16 = vpop.permute.xlu1 %5911 }
0x193b   : > { %v5876_v26 = vsel %vm639_vm11, %v12613_v28, %v12612_v19  ;;  %v12619_v28 = vld [vmem:[#allocation71_spill] sm:$0xff] }
0x193c   : > { %v5741_v41 = vadd.f32 %v5739_v44, %v5720_v56  ;;  %v5715_v21 = vpop.permute.xlu0 %5714  ;;  %v6665_v56 = vmul.f32 %v11553_v27, %v10921_v11 }
0x193d   : > { %v5717_v59 = vsel %vm800_vm15, %v5713_v54, %v5715_v21 }
0x193e   : > { %v5721_v10 = vadd.f32 %v5717_v59, %v5682_v31  ;;  %6548 = vrot.lane.b32.xlu0 %v6542_v50, %s7315_s19  ;;  %v5780_v60 = vadd.f32 %v5776_v25, %v5741_v41  ;;  %v12614_v41 = vld [vmem:[#allocation46_spill] sm:$0xff]  ;;  %v6699_v59 = vrot.slane %v11502_v22, %v12452_v57  ;;  %v5951_v55 = vpop.permute.xlu1 %5950 }
0x193f   : > { %v5877_v21 = vsel %vm639_vm11, %v12612_v19, %v12614_v41  ;;  %v12618_v19 = vld [vmem:[#allocation20_spill] sm:$0xff] }
0x1940   : > { %v5742_v39 = vadd.f32 %v5740_v40, %v5721_v10  ;;  %v5810_v61 = vpop.permute.xlu0 %5809  ;;  %v6022_v10 = vld [vmem:[#allocation2 + $0x3] ss:$8 sm:$0x3]  ;;  %v6705_v25 = vmul.f32 %v6699_v59, %v10923_v37 }
0x1941   : > { %v5815_v20 = vsel %vm569_vm9, %v5810_v61, %v5812_v42  ;;  %v6023_v22 = vmul.f32 %v11420_v62, %v6022_v10 }
0x1942   : > { %v5819_v33 = vadd.f32 %v5815_v20, %v5780_v60  ;;  %6552 = vrot.lane.b32.xlu0 %v6544_v5, %s7315_s19  ;;  %v5781_v36 = vadd.f32 %v5777_v52, %v5742_v39  ;;  %v6012_v52 = vpop.permute.xlu1 %6011 }
0x1943   : > { %v6032_v37 = vrot.slane %v6023_v22, %v7496_v29 }
0x1944   : > { %v5814_v34 = vpop.permute.xlu0 %5813 }
0x1945   : > { %v5816_v23 = vsel %vm569_vm9, %v5812_v42, %v5814_v34  ;;  %v6734_v42 = vrot.slane %v11519_v9, %v7498_v30  ;;  %v5976_v9 = vsel %vm754_vm14, %v11348_v4, %v12615_v13 }
0x1946   : > { %v5820_v49 = vadd.f32 %v5816_v23, %v5781_v36  ;;  %6572 = vrot.lane.b32.xlu0 %v6565_v8, %s7311_s30  ;;  %v6764_v8 = vmul.f32 %v12598_v6, %v11483_v17 }
0x1947   : > { %v6743_v5 = vmul.f32 %v6734_v42, %v10891_v45  ;;  %v12616_v45 = vld [vmem:[#allocation27_spill] sm:$0xff] }
0x1948   : > { %v5849_v2 = vpop.permute.xlu0 %5848  ;;  %v6039_v23 = vmul.f32 %v6032_v37, %v12616_v45 }
0x1949   : > { %v5854_v1 = vsel %vm616_vm10, %v5849_v2, %v5851_v43  ;;  %v12617_v2 = vld [vmem:[#allocation32_spill] sm:$0xff] }
0x194a   : > { %v5858_v54 = vadd.f32 %v5854_v1, %v5819_v33  ;;  %6609 = vrot.lane.b32.xlu0 %v6603_v32, %s7316_s20  ;;  %v5977_v32 = vsel %vm754_vm14, %v12615_v13, %v12617_v2 }
0x194c   : > { %v5853_v7 = vpop.permute.xlu0 %5852  ;;  %v5880_v58 = vadd.f32 %v5876_v26, %v5858_v54  ;;  %v6766_v54 = vmul.f32 %v12598_v6, %v11498_v51  ;;  %v6076_v26 = vsel %vm522_vm8, %v12619_v28, %v12618_v19 }
0x194d   : > { %v5855_v35 = vsel %vm616_vm10, %v5851_v43, %v5853_v7  ;;  %v6036_v43 = vrot.slane %v6023_v22, %v7498_v30  ;;  %v6795_v7 = vrot.slane %v11557_v0, %v7498_v30 }
0x194e   : > { %v5859_v38 = vadd.f32 %v5855_v35, %v5820_v49  ;;  %6613 = vrot.lane.b32.xlu0 %v6605_v53, %s7316_s20 }
0x194f   : > { %v6040_v35 = vmul.f32 %v6036_v43, %v12616_v45  ;;  %v6804_v6 = vmul.f32 %v6795_v7, %v12601_v14 }
0x1950   : > { %v5910_v44 = vpop.permute.xlu0 %5909  ;;  %v5881_v50 = vadd.f32 %v5877_v21, %v5859_v38 }
0x1951   : > { %v5915_v3 = vsel %vm685_vm12, %v5910_v44, %v5912_v16 }
0x1952   : > { %v5919_v47 = vadd.f32 %v5915_v3, %v5880_v58  ;;  %6672 = vrot.lane.b32.xlu0 %v6665_v56, %s7309_s28  ;;  %v12620_v3 = vld [vmem:[#allocation83_spill] sm:$0xff] }
0x1954   : > { %v5914_v31 = vpop.permute.xlu0 %5913 }
0x1955   : > { %v5916_v11 = vsel %vm685_vm12, %v5912_v16, %v5914_v31  ;;  %v6112_v16 = vpop.permute.xlu1 %6111 }
0x1956   : > { %v5920_v40 = vadd.f32 %v5916_v11, %v5881_v50  ;;  %6709 = vrot.lane.b32.xlu0 %v6703_v24, %s7312_s14 }
0x1958   : > { %v5949_v18 = vpop.permute.xlu0 %5948 }
0x1959   : > { %v5954_v39 = vsel %vm731_vm13, %v5949_v18, %v5951_v55  ;;  %v6151_v24 = vpop.permute.xlu1 %6150  ;;  %v12621_v18 = vld [vmem:[#allocation81_spill] sm:$0xff] }
0x195a   : > { %v5958_v61 = vadd.f32 %v5954_v39, %v5919_v47  ;;  %6713 = vrot.lane.b32.xlu0 %v6705_v25, %s7312_s14  ;;  %v6077_v47 = vsel %vm522_vm8, %v12618_v19, %v12620_v3  ;;  %v12622_v25 = vld [vmem:[#allocation87_spill] sm:$0xff] }
0x195b   : > { %v6176_v42 = vsel %vm639_vm11, %v12622_v25, %v12621_v18 }
0x195c   : > { %v5953_v60 = vpop.permute.xlu0 %5952  ;;  %v5980_v36 = vadd.f32 %v5976_v9, %v5958_v61 }
0x195d   : > { %v5955_v20 = vsel %vm731_vm13, %v5951_v55, %v5953_v60  ;;  %v6212_v39 = vpop.permute.xlu1 %6211 }
0x195e   : > { %v5959_v33 = vadd.f32 %v5955_v20, %v5920_v40  ;;  %6750 = vrot.lane.b32.xlu0 %v6743_v5, %s7313_s17  ;;  %v12623_v20 = vld [vmem:[#allocation91_spill] sm:$0xff] }
0x1960   : > { %v6010_v34 = vpop.permute.xlu0 %6009  ;;  %v5981_v1 = vadd.f32 %v5977_v32, %v5959_v33  ;;  %v6177_v33 = vsel %vm639_vm11, %v12621_v18, %v12623_v20 }
0x1961   : > { %v6015_v46 = vsel %vm800_vm15, %v6010_v34, %v6012_v52  ;;  %v6322_v34 = vld [vmem:[#allocation2 + $0x4] ss:$8 sm:$0x3] }
0x1962   : > { %v6019_v49 = vadd.f32 %v6015_v46, %v5980_v36  ;;  %6770 = vrot.lane.b32.xlu0 %v6764_v8, %s7310_s29  ;;  %v6251_v36 = vpop.permute.xlu1 %6250 }
0x1964   : > { %v6041_v4 = vadd.f32 %v6039_v23, %v6019_v49  ;;  %v6014_v15 = vpop.permute.xlu0 %6013  ;;  %v6323_v23 = vmul.f32 %v11420_v62, %v6322_v34 }
0x1965   : > { %v6016_v53 = vsel %vm800_vm15, %v6012_v52, %v6014_v15  ;;  %v12625_v15 = vld [vmem:[#allocation95_spill] sm:$0xff] }
0x1966   : > { %v6020_v38 = vadd.f32 %v6016_v53, %v5981_v1  ;;  %6774 = vrot.lane.b32.xlu0 %v6766_v54, %s7310_s29  ;;  %v6080_v56 = vadd.f32 %v6076_v26, %v6041_v4  ;;  %v6332_v32 = vrot.slane %v6323_v23, %v7496_v29  ;;  %v12624_v4 = vld [vmem:[#allocation85_spill] sm:$0xff]  ;;  %v6312_v54 = vpop.permute.xlu1 %6311 }
0x1967   : > { %v6276_v1 = vsel %vm754_vm14, %v12625_v15, %v12624_v4  ;;  %v12627_v26 = vld [vmem:[#allocation97_spill] sm:$0xff] }
0x1968   : > { %v6042_v44 = vadd.f32 %v6040_v35, %v6020_v38  ;;  %v6110_v58 = vpop.permute.xlu0 %6109  ;;  %v12626_v38 = vld [vmem:[#allocation30_spill] sm:$0xff] }
0x1969   : > { %v6115_v12 = vsel %vm569_vm9, %v6110_v58, %v6112_v16  ;;  %v6339_v19 = vmul.f32 %v6332_v32, %v12626_v38 }
0x196a   : > { %v6119_v0 = vadd.f32 %v6115_v12, %v6080_v56  ;;  %6811 = vrot.lane.b32.xlu0 %v6804_v6, %s7314_s18  ;;  %v6081_v21 = vadd.f32 %v6077_v47, %v6042_v44  ;;  %v12628_v6 = vld [vmem:[#allocation93_spill] sm:$0xff]  ;;  %v6862_v18 = vpop.permute.xlu1 %6861 }
0x196b   : > { %v12629_v12 = vld [vmem:[#allocation89_spill] sm:$0xff]  ;;  %v6864_v20 = vmul.f32 %v6862_v18, %v11483_v17 }
0x196c   : > { %v6114_v41 = vpop.permute.xlu0 %6113 }
0x196d   : > { %v6116_v31 = vsel %vm569_vm9, %v6112_v16, %v6114_v41  ;;  %v6277_v16 = vsel %vm754_vm14, %v12624_v4, %v12627_v26 }
0x196e   : > { %v6120_v50 = vadd.f32 %v6116_v31, %v6081_v21  ;;  %v12630_v21 = vld [vmem:[#allocation8_spill] sm:$0xff] }
0x196f   : > { %v6821_v31 = vmul.f32 %v11473_v63, %v12630_v21 }
0x1970   : > { %v6149_v59 = vpop.permute.xlu0 %6148 }
0x1971   : > { %v6154_v11 = vsel %vm616_vm10, %v6149_v59, %v6151_v24  ;;  %v6834_v59 = vrot.slane %v6821_v31, %v7498_v30 }
0x1972   : > { %v6158_v40 = vadd.f32 %v6154_v11, %v6119_v0  ;;  %v6376_v0 = vsel %vm522_vm8, %v12629_v12, %v12628_v6 }
0x1974   : > { %v6153_v14 = vpop.permute.xlu0 %6152  ;;  %v6180_v22 = vadd.f32 %v6176_v42, %v6158_v40 }
0x1975   : > { %v6155_v10 = vsel %vm616_vm10, %v6151_v24, %v6153_v14  ;;  %v6830_v24 = vrot.slane %v6821_v31, %v7496_v29 }
0x1976   : > { %v6159_v55 = vadd.f32 %v6155_v10, %v6120_v50  ;;  %v6336_v50 = vrot.slane %v6323_v23, %v7498_v30 }
0x1978   : > { %v6210_v61 = vpop.permute.xlu0 %6209  ;;  %v6181_v13 = vadd.f32 %v6177_v33, %v6159_v55  ;;  %v6340_v10 = vmul.f32 %v6336_v50, %v12626_v38  ;;  %v6838_v55 = vrot.slane %v6821_v31, %v12452_v57  ;;  %v6865_v33 = vmul.f32 %v6862_v18, %v11553_v27 }
0x1979   : > { %v6215_v60 = vsel %vm685_vm12, %v6210_v61, %v6212_v39 }
0x197a   : > { %v6219_v5 = vadd.f32 %v6215_v60, %v6180_v22 }
0x197c   : > { %v6214_v37 = vpop.permute.xlu0 %6213 }
0x197d   : > { %v6216_v9 = vsel %vm685_vm12, %v6212_v39, %v6214_v37  ;;  %v6921_v39 = vld [vmem:[%s11839_s12] sm:$0x3f]  ;;  %v6885_v37 = vpop.permute.xlu1 %6884 }
0x197e   : > { %v6220_v52 = vadd.f32 %v6216_v9, %v6181_v13 }
0x1980   : > { %v6249_v8 = vpop.permute.xlu0 %6248 }
0x1981   : > { %v6254_v46 = vsel %vm731_vm13, %v6249_v8, %v6251_v36 }
0x1982   : > { %v6258_v45 = vadd.f32 %v6254_v46, %v6219_v5  ;;  %v6882_v5 = vmul.f32 %v11473_v63, %v12446_v48 }
0x1984   : > { %v6253_v49 = vpop.permute.xlu0 %6252  ;;  %v6280_v53 = vadd.f32 %v6276_v1, %v6258_v45  ;;  %v6891_v13 = vrot.slane %v6882_v5, %v7496_v29  ;;  %v6895_v48 = vrot.slane %v6882_v5, %v7498_v30  ;;  %v6899_v63 = vrot.slane %v6882_v5, %v12452_v57 }
0x1985   : > { %v6255_v43 = vsel %vm731_vm13, %v6251_v36, %v6253_v49  ;;  %v6410_v36 = vpop.permute.xlu1 %6409 }
0x1986   : > { %v6259_v2 = vadd.f32 %v6255_v43, %v6220_v52  ;;  %v6866_v52 = vmul.f32 %v6862_v18, %v11498_v51  ;;  %v6903_v34 = vmul.f32 %v6891_v13, %v6885_v37  ;;  %v6904_v17 = vmul.f32 %v6895_v48, %v6885_v37 }
0x1987   : > { %v6905_v27 = vmul.f32 %v6899_v63, %v6885_v37 }
0x1988   : > { %v6310_v7 = vpop.permute.xlu0 %6309  ;;  %v6281_v56 = vadd.f32 %v6277_v16, %v6259_v2 }
0x1989   : > { %v6315_v35 = vsel %vm800_vm15, %v6310_v7, %v6312_v54  ;;  %v6414_v46 = vpop.permute.xlu1 %6413 }
0x198a   : > { %v6319_v28 = vadd.f32 %v6315_v35, %v6280_v53 }
0x198c   : > { %v6341_v44 = vadd.f32 %v6339_v19, %v6319_v28  ;;  %v6314_v58 = vpop.permute.xlu0 %6313 }
0x198d   : > { %v6316_v3 = vsel %vm800_vm15, %v6312_v54, %v6314_v58  ;;  %v6451_v51 = vpop.permute.xlu1 %6450 }
0x198e   : > { %v6320_v47 = vadd.f32 %v6316_v3, %v6281_v56  ;;  %v11757_v41 = vadd.f32 %v6376_v0, %v6341_v44 }
0x1990   : > { %v6342_v42 = vadd.f32 %v6340_v10, %v6320_v47 }
0x1991   : > { %v6471_v49 = vpop.permute.xlu1 %6470 }
0x1995   : > { %v6475_v2 = vpop.permute.xlu1 %6474 }
0x1999   : > { %v6512_v32 = vpop.permute.xlu1 %6511 }
0x199d   : > { %v6824_v11 = vpop.permute.xlu0 %6823  ;;  %v6626_v15 = vpop.permute.xlu1 %6625 }
0x199e   : > { %v6842_v40 = vmul.f32 %v6830_v24, %v6824_v11  ;;  %v6843_v14 = vmul.f32 %v6834_v59, %v6824_v11  ;;  %v6844_v61 = vmul.f32 %v6838_v55, %v6824_v11 }
0x19a0   : > { %6848 = vrot.lane.b32.xlu0 %v6842_v40, %s7315_s19  ;;  %6850 = vrot.lane.b32.xlu1 %v6843_v14, %s7315_s19 }
0x19a1   : > { %v6375_v25 = vpop.permute.xlu0 %6374  ;;  %v6551_v54 = vpop.permute.xlu1 %6550 }
0x19a2   : > { %v6377_v22 = vsel %vm522_vm8, %v12628_v6, %v6375_v25 }
0x19a3   : > { %v6381_v60 = vadd.f32 %v6377_v22, %v6342_v42  ;;  %v6622_v22 = vld [vmem:[#allocation2 + $0x5] ss:$8 sm:$0x3] }
0x19a4   : > { %6852 = vrot.lane.b32.xlu0 %v6844_v61, %s7315_s19  ;;  %6924 = vperm.xlu1 %7263, %v6921_v39  }
0x19a5   : > { %v6412_v9 = vpop.permute.xlu0 %6411  ;;  %v6571_v53 = vpop.permute.xlu1 %6570 }
0x19a6   : > { %v6415_v31 = vsel %vm569_vm9, %v6410_v36, %v6412_v9  ;;  %v6416_v50 = vsel %vm569_vm9, %v6412_v9, %v6414_v46  ;;  %v6623_v9 = vmul.f32 %v11420_v62, %v6622_v22 }
0x19a7   : > { %v6419_v59 = vadd.f32 %v6415_v31, %v11757_v41  ;;  %v6420_v10 = vadd.f32 %v6416_v50, %v6381_v60 }
0x19a8   : > { %6872 = vrot.lane.b32.xlu1 %v6865_v33, %s7311_s30  ;;  %6870 = vrot.lane.b32.xlu0 %v6864_v20, %s7311_s30  ;;  %v6632_v46 = vrot.slane %v6623_v9, %v7496_v29 }
0x19a9   : > { %v6449_v8 = vpop.permute.xlu0 %6448  ;;  %v6575_v38 = vpop.permute.xlu1 %6574 }
0x19aa   : > { %v6454_v24 = vsel %vm616_vm10, %v6449_v8, %v6451_v51 }
0x19ab   : > { %v6458_v55 = vadd.f32 %v6454_v24, %v6419_v59 }
0x19ac   : > { %6874 = vrot.lane.b32.xlu0 %v6866_v52, %s7311_s30  ;;  %6909 = vrot.lane.b32.xlu1 %v6903_v34, %s7316_s20 }
0x19ad   : > { %v6453_v45 = vpop.permute.xlu0 %6452  ;;  %v6612_v28 = vpop.permute.xlu1 %6611 }
0x19ae   : > { %v6455_v11 = vsel %vm616_vm10, %v6451_v51, %v6453_v45 }
0x19af   : > { %v6459_v39 = vadd.f32 %v6455_v11, %v6420_v10 }
0x19b0   : > { %6911 = vrot.lane.b32.xlu0 %v6904_v17, %s7316_s20  ;;  %6913 = vrot.lane.b32.xlu1 %v6905_v27, %s7316_s20 }
0x19b1   : > { %v6473_v23 = vpop.permute.xlu0 %6472  ;;  %v6671_v16 = vpop.permute.xlu1 %6670 }
0x19b2   : > { %v6476_v40 = vsel %vm639_vm11, %v6471_v49, %v6473_v23  ;;  %v6477_v25 = vsel %vm639_vm11, %v6473_v23, %v6475_v2  ;;  %v6636_v49 = vrot.slane %v6623_v9, %v7498_v30 }
0x19b3   : > { %v6480_v61 = vadd.f32 %v6476_v40, %v6458_v55  ;;  %v6481_v41 = vadd.f32 %v6477_v25, %v6459_v39 }
0x19b5   : > { %v6510_v43 = vpop.permute.xlu0 %6509  ;;  %v6675_v58 = vpop.permute.xlu1 %6674 }
0x19b6   : > { %v6515_v42 = vsel %vm685_vm12, %v6510_v43, %v6512_v32  ;;  %v6639_v43 = vmul.f32 %v6632_v46, %v6626_v15 }
0x19b7   : > { %v6519_v33 = vadd.f32 %v6515_v42, %v6480_v61 }
0x19b9   : > { %v6514_v57 = vpop.permute.xlu0 %6513  ;;  %v6712_v6 = vpop.permute.xlu1 %6711 }
0x19ba   : > { %v6516_v5 = vsel %vm685_vm12, %v6512_v32, %v6514_v57  ;;  %v6640_v32 = vmul.f32 %v6636_v49, %v6626_v15 }
0x19bb   : > { %v6520_v34 = vadd.f32 %v6516_v5, %v6481_v41 }
0x19bd   : > { %v6549_v4 = vpop.permute.xlu0 %6548  ;;  %v6749_v0 = vpop.permute.xlu1 %6748 }
0x19be   : > { %v6554_v20 = vsel %vm731_vm13, %v6549_v4, %v6551_v54 }
0x19bf   : > { %v6558_v48 = vadd.f32 %v6554_v20, %v6519_v33 }
0x19c1   : > { %v6553_v1 = vpop.permute.xlu0 %6552  ;;  %v6753_v47 = vpop.permute.xlu1 %6752 }
0x19c2   : > { %v6555_v13 = vsel %vm731_vm13, %v6551_v54, %v6553_v1 }
0x19c3   : > { %v6559_v27 = vadd.f32 %v6555_v13, %v6520_v34 }
0x19c5   : > { %v6573_v7 = vpop.permute.xlu0 %6572  ;;  %v6773_v14 = vpop.permute.xlu1 %6772 }
0x19c6   : > { %v6576_v60 = vsel %vm754_vm14, %v6571_v53, %v6573_v7  ;;  %v6577_v63 = vsel %vm754_vm14, %v6573_v7, %v6575_v38 }
0x19c7   : > { %v6580_v36 = vadd.f32 %v6576_v60, %v6558_v48  ;;  %v6581_v45 = vadd.f32 %v6577_v63, %v6559_v27 }
0x19c9   : > { %v6610_v35 = vpop.permute.xlu0 %6609  ;;  %v6810_v52 = vpop.permute.xlu1 %6809 }
0x19ca   : > { %v6615_v17 = vsel %vm800_vm15, %v6610_v35, %v6612_v28 }
0x19cb   : > { %v6619_v51 = vadd.f32 %v6615_v17, %v6580_v36 }
0x19cd   : > { %v6614_v19 = vpop.permute.xlu0 %6613  ;;  %v6814_v62 = vpop.permute.xlu1 %6813  ;;  %v6641_v4 = vadd.f32 %v6639_v43, %v6619_v51 }
0x19ce   : > { %v6616_v8 = vsel %vm800_vm15, %v6612_v28, %v6614_v19 }
0x19cf   : > { %v6620_v2 = vadd.f32 %v6616_v8, %v6581_v45 }
0x19d1   : > { %v6673_v26 = vpop.permute.xlu0 %6672  ;;  %v6642_v54 = vadd.f32 %v6640_v32, %v6620_v2 }
0x19d2   : > { %v6676_v57 = vsel %vm522_vm8, %v6671_v16, %v6673_v26  ;;  %v6677_v29 = vsel %vm522_vm8, %v6673_v26, %v6675_v58 }
0x19d3   : > { %v6680_v7 = vadd.f32 %v6676_v57, %v6641_v4  ;;  %v6681_v31 = vadd.f32 %v6677_v29, %v6642_v54 }
0x19d5   : > { %v6710_v44 = vpop.permute.xlu0 %6709 }
0x19d6   : > { %v6715_v1 = vsel %vm569_vm9, %v6710_v44, %v6712_v6 }
0x19d7   : > { %v6719_v19 = vadd.f32 %v6715_v1, %v6680_v7 }
0x19d9   : > { %v6714_v56 = vpop.permute.xlu0 %6713 }
0x19da   : > { %v6716_v30 = vsel %vm569_vm9, %v6712_v6, %v6714_v56 }
0x19db   : > { %v6720_v24 = vadd.f32 %v6716_v30, %v6681_v31 }
0x19dd   : > { %v6751_v12 = vpop.permute.xlu0 %6750 }
0x19de   : > { %v6754_v38 = vsel %vm616_vm10, %v6749_v0, %v6751_v12  ;;  %v6755_v15 = vsel %vm616_vm10, %v6751_v12, %v6753_v47 }
0x19df   : > { %v6758_v50 = vadd.f32 %v6754_v38, %v6719_v19  ;;  %v6759_v58 = vadd.f32 %v6755_v15, %v6720_v24 }
0x19e1   : > { %v6771_v3 = vpop.permute.xlu0 %6770 }
0x19e2   : > { %v6776_v28 = vsel %vm639_vm11, %v6771_v3, %v6773_v14 }
0x19e3   : > { %v6780_v59 = vadd.f32 %v6776_v28, %v6758_v50 }
0x19e5   : > { %v6775_v21 = vpop.permute.xlu0 %6774 }
0x19e6   : > { %v6777_v40 = vsel %vm639_vm11, %v6773_v14, %v6775_v21 }
0x19e7   : > { %v6781_v3 = vadd.f32 %v6777_v40, %v6759_v58 }
0x19e9   : > { %v6812_v18 = vpop.permute.xlu0 %6811 }
0x19ea   : > { %v6815_v44 = vsel %vm685_vm12, %v6810_v52, %v6812_v18  ;;  %v6816_v56 = vsel %vm685_vm12, %v6812_v18, %v6814_v62 }
0x19eb   : > { %v6819_v0 = vadd.f32 %v6815_v44, %v6780_v59  ;;  %v6820_v47 = vadd.f32 %v6816_v56, %v6781_v3 }
0x1a12   : > { %v6849_v37 = vpop.permute.xlu0 %6848  ;;  %v6851_v53 = vpop.permute.xlu1 %6850 }
0x1a13   : > { %v6854_v26 = vsel %vm731_vm13, %v6849_v37, %v6851_v53 }
0x1a14   : > { %v6858_v55 = vadd.f32 %v6854_v26, %v6819_v0 }
0x1a16   : > { %v6853_v23 = vpop.permute.xlu0 %6852 }
0x1a17   : > { %v6855_v12 = vsel %vm731_vm13, %v6851_v53, %v6853_v23 }
0x1a18   : > { %v6859_v61 = vadd.f32 %v6855_v12, %v6820_v47 }
0x1a1a   : > { %v6871_v35 = vpop.permute.xlu0 %6870 }
0x1a1e   : > { %v6875_v11 = vpop.permute.xlu0 %6874 }
0x1a22   : > { %v6912_v25 = vpop.permute.xlu0 %6911 }
0x1a23   : > { %v6925_v16 = vpop.permute.xlu1 %6924 }
0x1a27   : > { %v6873_v10 = vpop.permute.xlu1 %6872 }
0x1a28   : > { %v6876_v6 = vsel %vm754_vm14, %v6871_v35, %v6873_v10  ;;  %v6877_v21 = vsel %vm754_vm14, %v6873_v10, %v6875_v11 }
0x1a29   : > { %v6880_v42 = vadd.f32 %v6876_v6, %v6858_v55  ;;  %v6881_v5 = vadd.f32 %v6877_v21, %v6859_v61 }
0x1a2b   : > { %v6910_v39 = vpop.permute.xlu1 %6909 }
0x1a2c   : > { %v6915_v14 = vsel %vm800_vm15, %v6910_v39, %v6912_v25 }
0x1a2d   : > { %v6919_v22 = vadd.f32 %v6915_v14, %v6880_v42 }
0x1a2f   : > { %v6927_v18 = vadd.f32 %v6925_v16, %v6919_v22  ;;  %v6914_v20 = vpop.permute.xlu1 %6913 }
0x1a30   : > { %v6916_v41 = vsel %vm800_vm15, %v6912_v25, %v6914_v20 }
0x1a31   : > { %6929 = vst [vmem:[%s8119_s27] sm:$0x3f] %v6927_v18  ;;  %v6920_v33 = vadd.f32 %v6916_v41, %v6881_v5 }
0x1a33   : > { %v6928_v37 = vadd.f32 %v6925_v16, %v6920_v33 }
0x1a35   : > { %6930 = vst [vmem:[%s8119_s27 + $0x8] sm:$0x3f] %v6928_v37 }
0x1a36 PF: > { %s23_s25 = sadd.s32 1, %s7283_s25  }
0x1a37   : > { %p20_p4 = scmp.ge.s32.totalorder %s23_s25, 4  }
0x1a39   :  { %22 = sbr.rel (!%p20_p4) target bundleno = 1 (0x1), region = 112 }

</bundles_post_ra>
